<compile_context>
chip_gen: v5e
topology: v5e:2x2
jax: 0.10.0
libtpu: 0.0.40
codegen_flags: <defaults>
</compile_context>

<pallas_src>
import jax
import jax.numpy as jnp
from jax import lax
from jax.experimental import pallas as pl
from jax.experimental.pallas import tpu as pltpu
from jax.scipy.linalg import block_diag


# ----------------------------------------------------------------------------
# Fused LiteMSA kernel (one grid step per batch element).
#
# Channel layout convention (prepared at param-prep time):
#   branch-0 qkv conv columns    : [q0 | k0 | v0]   (head-major inside each block)
#   branch-1 grouped-conv output : [q1 | k1 | v1]
# so q / k / v for all heads of a branch are contiguous lane slices.
# ----------------------------------------------------------------------------
def _lite_msa_kernel(x_ref, wqkv_ref, wdw_ref, wg_ref, wpT_ref,
                     scale_ref, bias_ref, mask_ref, o_ref, pad_ref):
    _, H, W, Cin = x_ref.shape
    C3 = wqkv_ref.shape[1]            # 3 * total_dim
    td = C3 // 3
    g2 = 2 * td                       # q/k/v width across both multi-scale branches
    N = H * W
    mac_dt = pad_ref.dtype            # bf16 on v6e/v7x, f32 on v5e/older

    # ---- 1. qkv 1x1 conv (branch 0): bf16 MXU operands, f32 accumulation ----
    x = x_ref[0].reshape(N, Cin)
    qkv = jnp.dot(x, wqkv_ref[...], preferred_element_type=jnp.float32)     # (N, C3)
    x1 = qkv.astype(jnp.bfloat16)

    # ---- 2. depthwise 3x3, padding=1: zero halo in VMEM scratch, 9-tap MAC ----
    pad_ref[...] = jnp.zeros(pad_ref.shape, mac_dt)
    pad_ref[1:H + 1, 1:W + 1, :] = qkv.astype(mac_dt).reshape(H, W, C3)
    acc = jnp.zeros((H, W, C3), mac_dt)
    for kh in range(3):
        for kw in range(3):
            tap = wdw_ref[3 * kh + kw:3 * kh + kw + 1, :]                    # (1, C3)
            acc = acc + pad_ref[kh:kh + H, kw:kw + W, :] * tap
    dw = acc.reshape(N, C3).astype(jnp.bfloat16)

    # ---- 3. grouped 1x1 conv (block-diagonal matmul) -> branch 1 ----
    x2 = jnp.dot(dw, wg_ref[...], preferred_element_type=jnp.float32).astype(jnp.bfloat16)

    # ---- 4. multi-head linear attention over both multi-scale branches ----
    q = jnp.maximum(jnp.concatenate([x1[:, 0:td], x2[:, 0:td]], axis=1), 0)            # (N, 2td)
    k = jnp.maximum(jnp.concatenate([x1[:, td:2 * td], x2[:, td:2 * td]], axis=1), 0)   # (N, 2td)
    v = jnp.concatenate([x1[:, 2 * td:], x2[:, 2 * td:],
                         jnp.ones((N, 1), jnp.bfloat16)], axis=1)                        # (N, 2td+1)

    # one bf16 MXU pass gives [k^T v | k^T 1], f32-accumulated over N
    kvx = lax.dot_general(k, v, (((0,), (0,)), ((), ())),
                          preferred_element_type=jnp.float32)                            # (2td, 2td+1)
    mask = mask_ref[...]                                          # resident block-diag per-head mask
    kv_aug = jnp.concatenate([kvx[:, :g2] * mask, mask * kvx[:, g2:g2 + 1]],
                             axis=1).astype(jnp.bfloat16)                                # (2td, 4td)

    out = jnp.dot(q, kv_aug, preferred_element_type=jnp.float32)                         # (N, 4td)
    attn = out[:, :g2] * pl.reciprocal(out[:, g2:] + 1e-15, approx=True)                 # (N, 2td)

    # ---- 5. proj 1x1 + BN affine, produced directly lane-dense as (cout, N) ----
    yt = lax.dot_general(wpT_ref[...], attn.astype(jnp.bfloat16),
                         (((1,), (1,)), ((), ())),
                         preferred_element_type=jnp.float32)                             # (cout, N)
    o_ref[0] = (yt * scale_ref[...] + bias_ref[...]).astype(o_ref.dtype)


# ----------------------------------------------------------------------------
# Wrapper: NCHW in, NCHW out.  Single pallas_call, grid over the batch.
# ----------------------------------------------------------------------------
def lite_msa_forward(x_nchw, kp):
    B, Cin, H, W = x_nchw.shape
    N = H * W
    C3 = kp["w_qkv"].shape[1]
    td = C3 // 3
    cout = kp["w_projT"].shape[0]
    mac_dt = kp["w_dw"].dtype

    # bf16 cast fused with the NCHW -> NHWC boundary transpose (halves input DMA bytes)
    x_nhwc = jnp.transpose(x_nchw, (0, 2, 3, 1)).astype(jnp.bfloat16)

    out = pl.pallas_call(
        _lite_msa_kernel,
        out_shape=jax.ShapeDtypeStruct((B, cout, N), jnp.float32),
        grid=(B,),
        in_specs=[
            pl.BlockSpec((1, H, W, Cin), lambda b: (b, 0, 0, 0)),
            pl.BlockSpec((Cin, C3), lambda b: (0, 0)),          # resident weights below
            pl.BlockSpec((9, C3), lambda b: (0, 0)),
            pl.BlockSpec((C3, C3), lambda b: (0, 0)),
            pl.BlockSpec((cout, 2 * td), lambda b: (0, 0)),
            pl.BlockSpec((cout, 1), lambda b: (0, 0)),
            pl.BlockSpec((cout, 1), lambda b: (0, 0)),
            pl.BlockSpec((2 * td, 2 * td), lambda b: (0, 0)),
        ],
        out_specs=pl.BlockSpec((1, cout, N), lambda b: (b, 0, 0)),
        scratch_shapes=[pltpu.VMEM((H + 2, W + 2, C3), mac_dt)],   # depthwise halo buffer
        compiler_params=pltpu.CompilerParams(
            dimension_semantics=("parallel",),
            vmem_limit_bytes=32 * 1024 * 1024),
    )(x_nhwc, kp["w_qkv"], kp["w_dw"], kp["w_group"], kp["w_projT"],
      kp["bn_scale"], kp["bn_bias"], kp["head_mask"])

    # lane-dense (B, cout, N) -> NCHW is a pure reshape (no transpose pass over HBM)
    return out.reshape(B, cout, H, W)


# ----------------------------------------------------------------------------
# Parameters: canonical (PyTorch-ordered) init + kernel-layout preparation.
# ----------------------------------------------------------------------------
def init_params(key, in_channels, out_channels, dim, heads):
    """Canonical (PyTorch-ordered) parameters for the LiteMSA module."""
    total_dim = heads * dim
    c3 = 3 * total_dim
    k = jax.random.split(key, 4)
    w_qkv = 0.1 * jax.random.normal(k[0], (in_channels, c3), jnp.float32)     # Conv2d(in,3td,1).weight.T
    w_dw = 0.1 * jax.random.normal(k[1], (3, 3, c3), jnp.float32)             # depthwise 3x3, per channel
    w_g = 0.1 * jax.random.normal(k[2], (3 * heads, dim, dim), jnp.float32)   # grouped 1x1, (group,out,in)
    w_proj = 0.1 * jax.random.normal(k[3], (2 * total_dim, out_channels), jnp.float32)

    # BatchNorm2d(out_channels), inference mode (running_mean=0, running_var=1)
    eps = 1e-5
    gamma = jnp.linspace(0.5, 1.5, out_channels, dtype=jnp.float32)
    beta = jnp.linspace(-0.1, 0.1, out_channels, dtype=jnp.float32)
    return dict(w_qkv=w_qkv, w_dw=w_dw, w_g=w_g, w_proj=w_proj,
                bn_scale=gamma / jnp.sqrt(1.0 + eps), bn_bias=beta)


def prepare_params(canon, mac_dtype):
    """Permute / fold / cast the canonical params into the kernel's lane-dense layout."""
    heads = canon["w_g"].shape[0] // 3
    dim = canon["w_g"].shape[1]
    td = heads * dim
    c3 = 3 * td
    cout = canon["w_proj"].shape[1]

    # interleaved [q_h k_h v_h]*heads  ->  lane-dense [q | k | v] (head-major inside each)
    perm = jnp.array([h * 3 * dim + t * dim + d
                      for t in range(3) for h in range(heads) for d in range(dim)],
                     dtype=jnp.int32)

    w_qkv = canon["w_qkv"][:, perm].astype(jnp.bfloat16)
    w_dw = canon["w_dw"][:, :, perm].reshape(9, c3).astype(mac_dtype)
    # grouped 1x1 as a block-diagonal (c3, c3) matrix, permuted on both sides
    w_bd = block_diag(*[canon["w_g"][g].T for g in range(3 * heads)])
    w_group = w_bd[perm][:, perm].astype(jnp.bfloat16)
    w_projT = canon["w_proj"].T.astype(jnp.bfloat16)               # (cout, 2td)

    # block-diagonal per-head mask over the 2*td attention channels
    hid = jnp.arange(2 * td, dtype=jnp.int32) // dim
    head_mask = (hid[:, None] == hid[None, :]).astype(jnp.float32)

    return dict(
        w_qkv=w_qkv, w_dw=w_dw, w_group=w_group, w_projT=w_projT,
        bn_scale=canon["bn_scale"].reshape(cout, 1),
        bn_bias=canon["bn_bias"].reshape(cout, 1),
        head_mask=head_mask,
    )


def _dw_mac_dtype():
    """bf16 depthwise MACs on bf16-VALU chips (v6e / v7x+); f32 on v5e and older."""
    try:
        kind = jax.devices()[0].device_kind.lower()
    except Exception:
        return jnp.float32
    for old in ("v2", "v3", "v4", "v5"):
        if old in kind:
            return jnp.float32
    return jnp.bfloat16


# ----------------------------------------------------------------------------
# Pure-JAX f32 reference (straight port of the PyTorch forward, canonical layout)
# ----------------------------------------------------------------------------
def lite_msa_reference(x_nchw, canon):
    B, _, H, W = x_nchw.shape
    heads = canon["w_g"].shape[0] // 3
    dim = canon["w_g"].shape[1]
    td = heads * dim

    qkv = jnp.einsum("bchw,co->bohw", x_nchw, canon["w_qkv"])
    xp = jnp.pad(qkv, ((0, 0), (0, 0), (1, 1), (1, 1)))
    dwc = jnp.zeros_like(qkv)
    for kh in range(3):
        for kw in range(3):
            dwc = dwc + xp[:, :, kh:kh + H, kw:kw + W] * canon["w_dw"][kh, kw][None, :, None, None]
    dwg = dwc.reshape(B, 3 * heads, dim, H, W)
    x2 = jnp.einsum("bgihw,goi->bgohw", dwg, canon["w_g"]).reshape(B, 3 * td, H, W)

    ms = jnp.concatenate([qkv, x2], axis=1)                       # (B, 6td, H, W)
    ms = ms.reshape(B, 2 * heads, 3 * dim, H * W).transpose(0, 1, 3, 2)
    q = jax.nn.relu(ms[..., 0:dim])
    k = jax.nn.relu(ms[..., dim:2 * dim])
    v = ms[..., 2 * dim:]
    v = jnp.concatenate([v, jnp.ones(v.shape[:-1] + (1,), v.dtype)], axis=-1)
    kv = jnp.einsum("bhnd,bhne->bhde", k, v)
    out = jnp.einsum("bhnd,bhde->bhne", q, kv)
    out = out[..., :-1] / (out[..., -1:] + 1e-15)
    out = out.transpose(0, 1, 3, 2).reshape(B, 2 * td, H, W)
    y = jnp.einsum("bchw,co->bohw", out, canon["w_proj"])
    return y * canon["bn_scale"][None, :, None, None] + canon["bn_bias"][None, :, None, None]


if __name__ == "__main__":
    # Module config: heads = in_channels // dim * 1.0 = 2, total_dim = 16
    in_channels, out_channels, dim = 16, 16, 8
    heads = int(in_channels // dim * 1.0)
    B, H, W = 2, 16, 16

    key = jax.random.PRNGKey(0)
    kx, kp = jax.random.split(key)
    x = jax.random.normal(kx, (B, in_channels, H, W), jnp.float32)   # NCHW input

    canon = init_params(kp, in_channels, out_channels, dim, heads)
    kparams = prepare_params(canon, _dw_mac_dtype())

    fwd = jax.jit(lite_msa_forward)
    out = jax.block_until_ready(fwd(x, kparams))

    assert out.shape == (B, out_channels, H, W), out.shape
    assert bool(jnp.all(jnp.isfinite(out)))

    # loose parity check vs the pure-JAX f32 reference (kernel uses bf16 internals)
    ref = lite_msa_reference(x, canon)
    err = float(jnp.max(jnp.abs(out - ref)) / (jnp.max(jnp.abs(ref)) + 1e-6))
    assert err < 0.1, f"normalized max error vs reference: {err}"
    print("KERNEL_OK")
</pallas_src>

<mosaic_0001>
module attributes {stable_mosaic.version = 11 : i64} {
  func.func @_lite_msa_kernel(%arg0: i32, %arg1: memref<1x16x16x16xbf16, #tpu.memory_space<vmem>>, %arg2: memref<16x48xbf16, #tpu.memory_space<vmem>>, %arg3: memref<9x48xbf16, #tpu.memory_space<vmem>>, %arg4: memref<48x48xbf16, #tpu.memory_space<vmem>>, %arg5: memref<16x32xbf16, #tpu.memory_space<vmem>>, %arg6: memref<16x1xf32, #tpu.memory_space<vmem>>, %arg7: memref<16x1xf32, #tpu.memory_space<vmem>>, %arg8: memref<32x32xf32, #tpu.memory_space<vmem>>, %arg9: memref<1x16x256xf32, #tpu.memory_space<vmem>>, %arg10: memref<18x18x48xbf16, #tpu.memory_space<vmem>>) attributes {dimension_semantics = [#tpu.dimension_semantics<parallel>], iteration_bounds = array<i64: 2>, scalar_prefetch = 0 : i64, scratch_operands = 1 : i64, tpu.core_type = #tpu.core_type<tc>, window_params = [{transform_indices = @transform_0, window_bounds = array<i64: 1, 16, 16, 16>}, {pipeline_mode = #tpu.pipeline_mode<synchronous>, transform_indices = @transform_1, window_bounds = array<i64: 16, 48>}, {pipeline_mode = #tpu.pipeline_mode<synchronous>, transform_indices = @transform_2, window_bounds = array<i64: 9, 48>}, {pipeline_mode = #tpu.pipeline_mode<synchronous>, transform_indices = @transform_3, window_bounds = array<i64: 48, 48>}, {pipeline_mode = #tpu.pipeline_mode<synchronous>, transform_indices = @transform_4, window_bounds = array<i64: 16, 32>}, {pipeline_mode = #tpu.pipeline_mode<synchronous>, transform_indices = @transform_5, window_bounds = array<i64: 16, 1>}, {pipeline_mode = #tpu.pipeline_mode<synchronous>, transform_indices = @transform_6, window_bounds = array<i64: 16, 1>}, {pipeline_mode = #tpu.pipeline_mode<synchronous>, transform_indices = @transform_7, window_bounds = array<i64: 32, 32>}, {transform_indices = @transform_8, window_bounds = array<i64: 1, 16, 256>}]} {
    %c0 = arith.constant 0 : index
    %c0_0 = arith.constant 0 : index
    %c0_1 = arith.constant 0 : index
    %c0_2 = arith.constant 0 : index
    %0 = vector.load %arg1[%c0, %c0_0, %c0_1, %c0_2] : memref<1x16x16x16xbf16, #tpu.memory_space<vmem>>, vector<1x16x16x16xbf16>
    %1 = vector.shape_cast %0 : vector<1x16x16x16xbf16> to vector<16x16x16xbf16>
    %2 = vector.shape_cast %1 : vector<16x16x16xbf16> to vector<256x16xbf16>
    %c0_3 = arith.constant 0 : index
    %c0_4 = arith.constant 0 : index
    %3 = vector.load %arg2[%c0_3, %c0_4] : memref<16x48xbf16, #tpu.memory_space<vmem>>, vector<16x48xbf16>
    %cst = arith.constant dense<0.000000e+00> : vector<256x48xf32>
    %4 = tpu.matmul %2, %3, %cst {dimension_numbers = #tpu.dot_dimension_numbers<[1], [0], [0], [1], [0, 0, 1, 1], [], []>} : vector<256x16xbf16>, vector<16x48xbf16>, vector<256x48xf32> -> vector<256x48xf32>
    %5 = arith.truncf %4 : vector<256x48xf32> to vector<256x48xbf16>
    %cst_5 = arith.constant 0.000000e+00 : bf16
    %6 = vector.broadcast %cst_5 : bf16 to vector<18x18x48xbf16>
    %c0_6 = arith.constant 0 : index
    %c0_7 = arith.constant 0 : index
    %c0_8 = arith.constant 0 : index
    %7 = vector.load %arg10[%c0_6, %c0_7, %c0_8] : memref<18x18x48xbf16, #tpu.memory_space<vmem>>, vector<18x18x48xbf16>
    tpu.vector_store %arg10[%c0_6, %c0_7, %c0_8], %6 {strides = array<i32>} : memref<18x18x48xbf16, #tpu.memory_space<vmem>>, vector<18x18x48xbf16>,
    %8 = arith.truncf %4 : vector<256x48xf32> to vector<256x48xbf16>
    %9 = vector.shape_cast %8 : vector<256x48xbf16> to vector<16x16x48xbf16>
    %c1 = arith.constant 1 : index
    %c1_9 = arith.constant 1 : index
    %c0_10 = arith.constant 0 : index
    %10 = vector.load %arg10[%c1, %c1_9, %c0_10] : memref<18x18x48xbf16, #tpu.memory_space<vmem>>, vector<16x16x48xbf16>
    tpu.vector_store %arg10[%c1, %c1_9, %c0_10], %9 {strides = array<i32>} : memref<18x18x48xbf16, #tpu.memory_space<vmem>>, vector<16x16x48xbf16>,
    %cst_11 = arith.constant 0.000000e+00 : bf16
    %11 = vector.broadcast %cst_11 : bf16 to vector<16x16x48xbf16>
    %c0_12 = arith.constant 0 : index
    %c0_13 = arith.constant 0 : index
    %12 = vector.load %arg3[%c0_12, %c0_13] : memref<9x48xbf16, #tpu.memory_space<vmem>>, vector<1x48xbf16>
    %c0_14 = arith.constant 0 : index
    %c0_15 = arith.constant 0 : index
    %c0_16 = arith.constant 0 : index
    %13 = vector.load %arg10[%c0_14, %c0_15, %c0_16] : memref<18x18x48xbf16, #tpu.memory_space<vmem>>, vector<16x16x48xbf16>
    %14 = vector.shape_cast %12 : vector<1x48xbf16> to vector<1x1x48xbf16>
    %15 = vector.broadcast %14 : vector<1x1x48xbf16> to vector<16x16x48xbf16>
    %16 = arith.mulf %13, %15 : vector<16x16x48xbf16>
    %17 = arith.addf %11, %16 : vector<16x16x48xbf16>
    %c1_17 = arith.constant 1 : index
    %c0_18 = arith.constant 0 : index
    %18 = vector.load %arg3[%c1_17, %c0_18] : memref<9x48xbf16, #tpu.memory_space<vmem>>, vector<1x48xbf16>
    %c0_19 = arith.constant 0 : index
    %c1_20 = arith.constant 1 : index
    %c0_21 = arith.constant 0 : index
    %19 = vector.load %arg10[%c0_19, %c1_20, %c0_21] : memref<18x18x48xbf16, #tpu.memory_space<vmem>>, vector<16x16x48xbf16>
    %20 = vector.shape_cast %18 : vector<1x48xbf16> to vector<1x1x48xbf16>
    %21 = vector.broadcast %20 : vector<1x1x48xbf16> to vector<16x16x48xbf16>
    %22 = arith.mulf %19, %21 : vector<16x16x48xbf16>
    %23 = arith.addf %17, %22 : vector<16x16x48xbf16>
    %c2 = arith.constant 2 : index
    %c0_22 = arith.constant 0 : index
    %24 = vector.load %arg3[%c2, %c0_22] : memref<9x48xbf16, #tpu.memory_space<vmem>>, vector<1x48xbf16>
    %c0_23 = arith.constant 0 : index
    %c2_24 = arith.constant 2 : index
    %c0_25 = arith.constant 0 : index
    %25 = vector.load %arg10[%c0_23, %c2_24, %c0_25] : memref<18x18x48xbf16, #tpu.memory_space<vmem>>, vector<16x16x48xbf16>
    %26 = vector.shape_cast %24 : vector<1x48xbf16> to vector<1x1x48xbf16>
    %27 = vector.broadcast %26 : vector<1x1x48xbf16> to vector<16x16x48xbf16>
    %28 = arith.mulf %25, %27 : vector<16x16x48xbf16>
    %29 = arith.addf %23, %28 : vector<16x16x48xbf16>
    %c3 = arith.constant 3 : index
    %c0_26 = arith.constant 0 : index
    %30 = vector.load %arg3[%c3, %c0_26] : memref<9x48xbf16, #tpu.memory_space<vmem>>, vector<1x48xbf16>
    %c1_27 = arith.constant 1 : index
    %c0_28 = arith.constant 0 : index
    %c0_29 = arith.constant 0 : index
    %31 = vector.load %arg10[%c1_27, %c0_28, %c0_29] : memref<18x18x48xbf16, #tpu.memory_space<vmem>>, vector<16x16x48xbf16>
    %32 = vector.shape_cast %30 : vector<1x48xbf16> to vector<1x1x48xbf16>
    %33 = vector.broadcast %32 : vector<1x1x48xbf16> to vector<16x16x48xbf16>
    %34 = arith.mulf %31, %33 : vector<16x16x48xbf16>
    %35 = arith.addf %29, %34 : vector<16x16x48xbf16>
    %c4 = arith.constant 4 : index
    %c0_30 = arith.constant 0 : index
    %36 = vector.load %arg3[%c4, %c0_30] : memref<9x48xbf16, #tpu.memory_space<vmem>>, vector<1x48xbf16>
    %c1_31 = arith.constant 1 : index
    %c1_32 = arith.constant 1 : index
    %c0_33 = arith.constant 0 : index
    %37 = vector.load %arg10[%c1_31, %c1_32, %c0_33] : memref<18x18x48xbf16, #tpu.memory_space<vmem>>, vector<16x16x48xbf16>
    %38 = vector.shape_cast %36 : vector<1x48xbf16> to vector<1x1x48xbf16>
    %39 = vector.broadcast %38 : vector<1x1x48xbf16> to vector<16x16x48xbf16>
    %40 = arith.mulf %37, %39 : vector<16x16x48xbf16>
    %41 = arith.addf %35, %40 : vector<16x16x48xbf16>
    %c5 = arith.constant 5 : index
    %c0_34 = arith.constant 0 : index
    %42 = vector.load %arg3[%c5, %c0_34] : memref<9x48xbf16, #tpu.memory_space<vmem>>, vector<1x48xbf16>
    %c1_35 = arith.constant 1 : index
    %c2_36 = arith.constant 2 : index
    %c0_37 = arith.constant 0 : index
    %43 = vector.load %arg10[%c1_35, %c2_36, %c0_37] : memref<18x18x48xbf16, #tpu.memory_space<vmem>>, vector<16x16x48xbf16>
    %44 = vector.shape_cast %42 : vector<1x48xbf16> to vector<1x1x48xbf16>
    %45 = vector.broadcast %44 : vector<1x1x48xbf16> to vector<16x16x48xbf16>
    %46 = arith.mulf %43, %45 : vector<16x16x48xbf16>
    %47 = arith.addf %41, %46 : vector<16x16x48xbf16>
    %c6 = arith.constant 6 : index
    %c0_38 = arith.constant 0 : index
    %48 = vector.load %arg3[%c6, %c0_38] : memref<9x48xbf16, #tpu.memory_space<vmem>>, vector<1x48xbf16>
    %c2_39 = arith.constant 2 : index
    %c0_40 = arith.constant 0 : index
    %c0_41 = arith.constant 0 : index
    %49 = vector.load %arg10[%c2_39, %c0_40, %c0_41] : memref<18x18x48xbf16, #tpu.memory_space<vmem>>, vector<16x16x48xbf16>
    %50 = vector.shape_cast %48 : vector<1x48xbf16> to vector<1x1x48xbf16>
    %51 = vector.broadcast %50 : vector<1x1x48xbf16> to vector<16x16x48xbf16>
    %52 = arith.mulf %49, %51 : vector<16x16x48xbf16>
    %53 = arith.addf %47, %52 : vector<16x16x48xbf16>
    %c7 = arith.constant 7 : index
    %c0_42 = arith.constant 0 : index
    %54 = vector.load %arg3[%c7, %c0_42] : memref<9x48xbf16, #tpu.memory_space<vmem>>, vector<1x48xbf16>
    %c2_43 = arith.constant 2 : index
    %c1_44 = arith.constant 1 : index
    %c0_45 = arith.constant 0 : index
    %55 = vector.load %arg10[%c2_43, %c1_44, %c0_45] : memref<18x18x48xbf16, #tpu.memory_space<vmem>>, vector<16x16x48xbf16>
    %56 = vector.shape_cast %54 : vector<1x48xbf16> to vector<1x1x48xbf16>
    %57 = vector.broadcast %56 : vector<1x1x48xbf16> to vector<16x16x48xbf16>
    %58 = arith.mulf %55, %57 : vector<16x16x48xbf16>
    %59 = arith.addf %53, %58 : vector<16x16x48xbf16>
    %c8 = arith.constant 8 : index
    %c0_46 = arith.constant 0 : index
    %60 = vector.load %arg3[%c8, %c0_46] : memref<9x48xbf16, #tpu.memory_space<vmem>>, vector<1x48xbf16>
    %c2_47 = arith.constant 2 : index
    %c2_48 = arith.constant 2 : index
    %c0_49 = arith.constant 0 : index
    %61 = vector.load %arg10[%c2_47, %c2_48, %c0_49] : memref<18x18x48xbf16, #tpu.memory_space<vmem>>, vector<16x16x48xbf16>
    %62 = vector.shape_cast %60 : vector<1x48xbf16> to vector<1x1x48xbf16>
    %63 = vector.broadcast %62 : vector<1x1x48xbf16> to vector<16x16x48xbf16>
    %64 = arith.mulf %61, %63 : vector<16x16x48xbf16>
    %65 = arith.addf %59, %64 : vector<16x16x48xbf16>
    %66 = vector.shape_cast %65 : vector<16x16x48xbf16> to vector<256x48xbf16>
    %c0_50 = arith.constant 0 : index
    %c0_51 = arith.constant 0 : index
    %67 = vector.load %arg4[%c0_50, %c0_51] : memref<48x48xbf16, #tpu.memory_space<vmem>>, vector<48x48xbf16>
    %cst_52 = arith.constant dense<0.000000e+00> : vector<256x48xf32>
    %68 = tpu.matmul %66, %67, %cst_52 {dimension_numbers = #tpu.dot_dimension_numbers<[1], [0], [0], [1], [0, 0, 1, 1], [], []>} : vector<256x48xbf16>, vector<48x48xbf16>, vector<256x48xf32> -> vector<256x48xf32>
    %69 = arith.truncf %68 : vector<256x48xf32> to vector<256x48xbf16>
    %70 = vector.extract_strided_slice %5 {offsets = [0, 0], sizes = [256, 16], strides = [1, 1]} : vector<256x48xbf16> to vector<256x16xbf16>
    %71 = vector.extract_strided_slice %69 {offsets = [0, 0], sizes = [256, 16], strides = [1, 1]} : vector<256x48xbf16> to vector<256x16xbf16>
    %72 = tpu.concatenate %70, %71 in 1 : vector<256x16xbf16>, vector<256x16xbf16> -> vector<256x32xbf16>
    %cst_53 = arith.constant 0.000000e+00 : bf16
    %73 = vector.broadcast %cst_53 : bf16 to vector<256x32xbf16>
    %74 = arith.maximumf %72, %73 : vector<256x32xbf16>
    %75 = vector.extract_strided_slice %5 {offsets = [0, 16], sizes = [256, 16], strides = [1, 1]} : vector<256x48xbf16> to vector<256x16xbf16>
    %76 = vector.extract_strided_slice %69 {offsets = [0, 16], sizes = [256, 16], strides = [1, 1]} : vector<256x48xbf16> to vector<256x16xbf16>
    %77 = tpu.concatenate %75, %76 in 1 : vector<256x16xbf16>, vector<256x16xbf16> -> vector<256x32xbf16>
    %cst_54 = arith.constant 0.000000e+00 : bf16
    %78 = vector.broadcast %cst_54 : bf16 to vector<256x32xbf16>
    %79 = arith.maximumf %77, %78 : vector<256x32xbf16>
    %80 = vector.extract_strided_slice %5 {offsets = [0, 32], sizes = [256, 16], strides = [1, 1]} : vector<256x48xbf16> to vector<256x16xbf16>
    %81 = vector.extract_strided_slice %69 {offsets = [0, 32], sizes = [256, 16], strides = [1, 1]} : vector<256x48xbf16> to vector<256x16xbf16>
    %cst_55 = arith.constant 1.000000e+00 : bf16
    %82 = vector.broadcast %cst_55 : bf16 to vector<256x1xbf16>
    %83 = tpu.concatenate %80, %81, %82 in 1 : vector<256x16xbf16>, vector<256x16xbf16>, vector<256x1xbf16> -> vector<256x33xbf16>
    %cst_56 = arith.constant dense<0.000000e+00> : vector<32x33xf32>
    %84 = tpu.matmul %79, %83, %cst_56 {dimension_numbers = #tpu.dot_dimension_numbers<[0], [0], [1], [1], [0, 1, 1, 1], [], []>} : vector<256x32xbf16>, vector<256x33xbf16>, vector<32x33xf32> -> vector<32x33xf32>
    %c0_57 = arith.constant 0 : index
    %c0_58 = arith.constant 0 : index
    %85 = vector.load %arg8[%c0_57, %c0_58] : memref<32x32xf32, #tpu.memory_space<vmem>>, vector<32x32xf32>
    %86 = vector.extract_strided_slice %84 {offsets = [0, 0], sizes = [32, 32], strides = [1, 1]} : vector<32x33xf32> to vector<32x32xf32>
    %87 = arith.mulf %86, %85 : vector<32x32xf32>
    %88 = vector.extract_strided_slice %84 {offsets = [0, 32], sizes = [32, 1], strides = [1, 1]} : vector<32x33xf32> to vector<32x1xf32>
    %89 = vector.broadcast %88 : vector<32x1xf32> to vector<32x32xf32>
    %90 = arith.mulf %85, %89 : vector<32x32xf32>
    %91 = tpu.concatenate %87, %90 in 1 : vector<32x32xf32>, vector<32x32xf32> -> vector<32x64xf32>
    %92 = arith.truncf %91 : vector<32x64xf32> to vector<32x64xbf16>
    %cst_59 = arith.constant dense<0.000000e+00> : vector<256x64xf32>
    %93 = tpu.matmul %74, %92, %cst_59 {dimension_numbers = #tpu.dot_dimension_numbers<[1], [0], [0], [1], [0, 0, 1, 1], [], []>} : vector<256x32xbf16>, vector<32x64xbf16>, vector<256x64xf32> -> vector<256x64xf32>
    %94 = vector.extract_strided_slice %93 {offsets = [0, 0], sizes = [256, 32], strides = [1, 1]} : vector<256x64xf32> to vector<256x32xf32>
    %95 = vector.extract_strided_slice %93 {offsets = [0, 32], sizes = [256, 32], strides = [1, 1]} : vector<256x64xf32> to vector<256x32xf32>
    %cst_60 = arith.constant 1.000000e-15 : f32
    %96 = vector.broadcast %cst_60 : f32 to vector<256x32xf32>
    %97 = arith.addf %95, %96 : vector<256x32xf32>
    %98 = tpu.reciprocal %97 {approx = true} : vector<256x32xf32> -> vector<256x32xf32>
    %99 = arith.mulf %94, %98 : vector<256x32xf32>
    %c0_61 = arith.constant 0 : index
    %c0_62 = arith.constant 0 : index
    %100 = vector.load %arg5[%c0_61, %c0_62] : memref<16x32xbf16, #tpu.memory_space<vmem>>, vector<16x32xbf16>
    %101 = arith.truncf %99 : vector<256x32xf32> to vector<256x32xbf16>
    %cst_63 = arith.constant dense<0.000000e+00> : vector<16x256xf32>
    %102 = tpu.matmul %100, %101, %cst_63 {dimension_numbers = #tpu.dot_dimension_numbers<[1], [1], [0], [0], [0, 0, 1, 0], [], []>} : vector<16x32xbf16>, vector<256x32xbf16>, vector<16x256xf32> -> vector<16x256xf32>
    %c0_64 = arith.constant 0 : index
    %c0_65 = arith.constant 0 : index
    %103 = vector.load %arg6[%c0_64, %c0_65] : memref<16x1xf32, #tpu.memory_space<vmem>>, vector<16x1xf32>
    %104 = vector.broadcast %103 : vector<16x1xf32> to vector<16x256xf32>
    %105 = arith.mulf %102, %104 : vector<16x256xf32>
    %c0_66 = arith.constant 0 : index
    %c0_67 = arith.constant 0 : index
    %106 = vector.load %arg7[%c0_66, %c0_67] : memref<16x1xf32, #tpu.memory_space<vmem>>, vector<16x1xf32>
    %107 = vector.broadcast %106 : vector<16x1xf32> to vector<16x256xf32>
    %108 = arith.addf %105, %107 : vector<16x256xf32>
    %c0_68 = arith.constant 0 : index
    %c0_69 = arith.constant 0 : index
    %c0_70 = arith.constant 0 : index
    %109 = vector.load %arg9[%c0_68, %c0_69, %c0_70] : memref<1x16x256xf32, #tpu.memory_space<vmem>>, vector<1x16x256xf32>
    %110 = vector.shape_cast %109 : vector<1x16x256xf32> to vector<16x256xf32>
    %111 = vector.shape_cast %108 : vector<16x256xf32> to vector<1x16x256xf32>
    tpu.vector_store %arg9[%c0_68, %c0_69, %c0_70], %111 {strides = array<i32>} : memref<1x16x256xf32, #tpu.memory_space<vmem>>, vector<1x16x256xf32>,
    return
  }
  func.func @transform_0(%arg0: i32) -> (i32, i32, i32, i32) {
    %c0_i32 = arith.constant 0 : i32
    %c0_i32_0 = arith.constant 0 : i32
    %c0_i32_1 = arith.constant 0 : i32
    %c0_i32_2 = arith.constant 0 : i32
    return %arg0, %c0_i32, %c0_i32_0, %c0_i32_1 : i32, i32, i32, i32
  }
  func.func @transform_1(%arg0: i32) -> (i32, i32) {
    %c0_i32 = arith.constant 0 : i32
    %c0_i32_0 = arith.constant 0 : i32
    %c0_i32_1 = arith.constant 0 : i32
    return %c0_i32, %c0_i32_0 : i32, i32
  }
  func.func @transform_2(%arg0: i32) -> (i32, i32) {
    %c0_i32 = arith.constant 0 : i32
    %c0_i32_0 = arith.constant 0 : i32
    %c0_i32_1 = arith.constant 0 : i32
    return %c0_i32, %c0_i32_0 : i32, i32
  }
  func.func @transform_3(%arg0: i32) -> (i32, i32) {
    %c0_i32 = arith.constant 0 : i32
    %c0_i32_0 = arith.constant 0 : i32
    %c0_i32_1 = arith.constant 0 : i32
    return %c0_i32, %c0_i32_0 : i32, i32
  }
  func.func @transform_4(%arg0: i32) -> (i32, i32) {
    %c0_i32 = arith.constant 0 : i32
    %c0_i32_0 = arith.constant 0 : i32
    %c0_i32_1 = arith.constant 0 : i32
    return %c0_i32, %c0_i32_0 : i32, i32
  }
  func.func @transform_5(%arg0: i32) -> (i32, i32) {
    %c0_i32 = arith.constant 0 : i32
    %c0_i32_0 = arith.constant 0 : i32
    %c0_i32_1 = arith.constant 0 : i32
    return %c0_i32, %c0_i32_0 : i32, i32
  }
  func.func @transform_6(%arg0: i32) -> (i32, i32) {
    %c0_i32 = arith.constant 0 : i32
    %c0_i32_0 = arith.constant 0 : i32
    %c0_i32_1 = arith.constant 0 : i32
    return %c0_i32, %c0_i32_0 : i32, i32
  }
  func.func @transform_7(%arg0: i32) -> (i32, i32) {
    %c0_i32 = arith.constant 0 : i32
    %c0_i32_0 = arith.constant 0 : i32
    %c0_i32_1 = arith.constant 0 : i32
    return %c0_i32, %c0_i32_0 : i32, i32
  }
  func.func @transform_8(%arg0: i32) -> (i32, i32, i32) {
    %c0_i32 = arith.constant 0 : i32
    %c0_i32_0 = arith.constant 0 : i32
    %c0_i32_1 = arith.constant 0 : i32
    return %arg0, %c0_i32, %c0_i32_0 : i32, i32, i32
  }
}

</mosaic_0001>

<bundles_post_ra>
// kernel: lite_msa_forward.1
= control target key start
LH: loop header
LB: loop body
LE: loop exit
PB: predicated region body
PF: predicated region fallthrough
CT: control target
= control target key end

     0   :  { %s6544_s27 = smov 0   ;;  %s8444_s0 = inlined_call_operand.vmem [shape: bf16[2,16,16,16], index: 0, kind: input, shape index: {}]   ;;  %s8445_s1 = inlined_call_operand.vmem [shape: bf16[16,48], index: 1, kind: input, shape index: {}]   ;;  %s8446_s2 = inlined_call_operand.vmem [shape: bf16[9,48], index: 2, kind: input, shape index: {}]   ;;  %s8447_s3 = inlined_call_operand.vmem [shape: bf16[48,48], index: 3, kind: input, shape index: {}]   ;;  %s8448_s4 = inlined_call_operand.vmem [shape: bf16[16,32], index: 4, kind: input, shape index: {}]   ;;  %s8449_s5 = inlined_call_operand.vmem [shape: f32[16,1], index: 5, kind: input, shape index: {}]   ;;  %s8450_s6 = inlined_call_operand.vmem [shape: f32[16,1], index: 6, kind: input, shape index: {}]   ;;  %s8451_s7 = inlined_call_operand.vmem [shape: f32[32,32], index: 7, kind: input, shape index: {}]   ;;  %s8452_s8 = inlined_call_operand.vmem [shape: f32[2,16,256], index: 8, kind: output, shape index: {}]  }
   0x1 LB: > { %s6086_s28 = sadd.s32 4294967295, %s6491_s27   ;;  %p6090_p0 = scmp.ge.s32.totalorder %s6491_s27, 1  ;;  %s6491_s27 = sphi %s6544_s27, %s18_s27  }
   0x2   : > { %p262_p1 = scmp.lt.s32.totalorder %s6491_s27, 3 }
   0x4   : > { %p263_p2 = pnand %p6090_p0, %p262_p1 }
   0x6   : > { %266 = sbr.rel (%p263_p2) target bundleno = 2270 (0x8de), region = 52 }
   0xb   : > { %v6249_v0 = vld [vmem:[%s8445_s1] sm:$0xff]  ;;  %p296_p3 = scmp.lt.s32.totalorder %s6086_s28, 1  ;;  %vm428_vm0 = vcmask 130048   ;;  %vm598_vm1 = vcmask 388096   ;;  %v8453_v8 = vmov 0   ;;  %vm1586_vm2 = vcmask 1046528  }
   0xc   : > { %484 = vmatpush.bf16.msra.mxu0 %v6249_v0  ;;  %603 = vst.msk [vmem:[#allocation2 + $0xc] sm:$0xf] %vm598_vm1, %v8453_v8  ;;  %v1095_v9 = vld [vmem:[%s8446_s2] sm:$0x1]  ;;  %v6618_v20 = vld [vmem:[%s8446_s2] sm:$0x2] }
   0xd   : > { %s8484_s28 = smov (!%p296_p3, %s6086_s28), 1  ;;  %599 = vst.msk [vmem:[#allocation2] sm:$0xf] %vm598_vm1, %v8453_v8  ;;  %v1341_v10 = vshrl.u32 %v1095_v9, 16  ;;  %v1129_v14 = vpack.i.b16 %v1095_v9, %v1095_v9  ;;  %v1781_v23 = vpack.i.b16 %v6618_v20, %v6618_v20  ;;  %v6676_v44 = vld [vmem:[%s8446_s2] sm:$0x4] }
   0xe   : > { %s6231_s9 = sshll.u32 %s8484_s28, 7  ;;  %600 = vst.msk [vmem:[#allocation2 + $0x4] sm:$0xf] %vm598_vm1, %v8453_v8  ;;  %vm601_vm3 = vcmask 385024   ;;  %v2917_v48 = vshrl.u32 %v6676_v44, 16  ;;  %vm2025_vm6 = vcmask 1045504  }
   0xf   : > { %s6561_s12 = scalar_lea.vmem %s8444_s0, %s6231_s9  ;;  %604 = vst.msk [vmem:[#allocation2 + $0x10] sm:$0xf] %vm598_vm1, %v8453_v8  ;;  %v1342_v11 = vpack.i.b16 %v1341_v10, %v1341_v10  ;;  %v1131_v19 = vperm.slane %v1129_v14, 0  ;;  %v1783_v27 = vperm.slane %v1781_v23, 1  ;;  %vm979_vm4 = vsmask.f32 7938 }
  0x10   : > { %v6233_v1 = vld [vmem:[%s6561_s12] sm:$0xff]  ;;  %v6234_v2 = vld [vmem:[%s6561_s12 + $0x8] sm:$0xff]  ;;  %v6235_v3 = vld [vmem:[%s6561_s12 + $0x10] sm:$0xff]  ;;  %606 = vst.msk [vmem:[#allocation2 + $0x18] sm:$0xf] %vm598_vm1, %v8453_v8  ;;  %v2918_v57 = vpack.i.b16 %v2917_v48, %v2917_v48  ;;  %v2234_v62 = vshrl.u32 %v6618_v20, 16  ;;  %v2481_v23 = vpack.i.b16 %v6676_v44, %v6676_v44 }
  0x11   : > { %6163 = vmatmul.msk.bf16.vlgmr.msra.gmra.mxu0 %vm428_vm0, %v6233_v1  ;;  %v6236_v4 = vld [vmem:[%s6561_s12 + $0x18] sm:$0xff]  ;;  %v6237_v5 = vld [vmem:[%s6561_s12 + $0x20] sm:$0xff]  ;;  %v6238_v6 = vld [vmem:[%s6561_s12 + $0x28] sm:$0xff]  ;;  %607 = vst.msk [vmem:[#allocation2 + $0x1c] sm:$0xf] %vm598_vm1, %v8453_v8  ;;  %v1344_v12 = vperm.slane %v1342_v11, 0  ;;  %v6631_v24 = vunpack.c.l.bf16 %v1131_v19  ;;  %v6647_v33 = vunpack.c.l.bf16 %v1783_v27 }
  0x12   : > { %v6239_v7 = vld [vmem:[%s6561_s12 + $0x30] sm:$0xff]  ;;  %609 = vst.msk [vmem:[#allocation2 + $0x24] sm:$0xf] %vm598_vm1, %v8453_v8  ;;  %v6240_v18 = vld [vmem:[%s6561_s12 + $0x38] sm:$0xff]  ;;  %v6241_v40 = vld [vmem:[%s6561_s12 + $0x40] sm:$0xff]  ;;  %v2235_v10 = vpack.i.b16 %v2234_v62, %v2234_v62  ;;  %s6494_s23 = smov 112  }
  0x13   : > { %610 = vst.msk [vmem:[#allocation2 + $0x28] sm:$0xf] %vm598_vm1, %v8453_v8  ;;  %v6610_v17 = vunpack.c.l.bf16 %v1344_v12  ;;  %vm6697_vm5 = vmand %vm598_vm1, %vm979_vm4  ;;  %v981_v55 = vld [vmem:[#allocation2 + $0xc] sm:$0xf]  ;;  %vm654_vm7 = vsmask.f32 256 }
  0x14   : > { %612 = vst.msk [vmem:[#allocation2 + $0x30] sm:$0xf] %vm598_vm1, %v8453_v8  ;;  %v1764_v28 = vld [vmem:[#allocation2] sm:$0xe]  ;;  %vm655_vm8 = vsmask.f32 4368  ;;  %vm6742_vm10 = vmand %vm601_vm3, %vm654_vm7 }
  0x15   : > { %613 = vst.msk [vmem:[#allocation2 + $0x34] sm:$0xf] %vm598_vm1, %v8453_v8  ;;  %v6255_v13 = vld [vmem:[#allocation2] sm:$0xff]   ;;  %v1784_v32 = vunpack.c.l.bf16 %v1764_v28  ;;  %vm6730_vm9 = vmor %vm654_vm7, %vm655_vm8  ;;  %s6495_s10 = smov 96   ;;  %vm4580_vm11 = vcmask 392192   ;;  %vm5374_vm12 = vcmask 261120  }
  0x16   : > { %615 = vst.msk [vmem:[#allocation2 + $0x3c] sm:$0xf] %vm598_vm1, %v8453_v8  ;;  %v6256_v15 = vunpack.c.l.bf16 %v6255_v13  ;;  %v6608_v16 = vunpack.c.h.bf16 %v6255_v13  ;;  %v4038_v11 = vld [vmem:[%s8446_s2 + $0x4] sm:$0x1]  ;;  %s6497_s11 = smov 16   ;;  %s6498_s20 = smov 32  }
  0x17   : > { %616 = vst.msk [vmem:[#allocation2 + $0x40] sm:$0xf] %vm598_vm1, %v8453_v8  ;;  %v1801_v37 = vmul.f32 %v6647_v33, %v1784_v32  ;;  %v4056_v32 = vpack.i.b16 %v4038_v11, %v4038_v11 }
  0x18   : > { %618 = vst.msk [vmem:[#allocation2 + $0x48] sm:$0xf] %vm598_vm1, %v8453_v8  ;;  %v1362_v21 = vmul.f32 %v6256_v15, %v6610_v17  ;;  %v1363_v22 = vmul.f32 %v6608_v16, %v6610_v17  ;;  %v1165_v29 = vmul.f32 %v6256_v15, %v6631_v24  ;;  %v1802_v38 = vmul.f32 %v6608_v16, %v6647_v33 }
  0x19   : > { %619 = vst.msk [vmem:[#allocation2 + $0x4c] sm:$0xf] %vm598_vm1, %v8453_v8  ;;  %v1849_v42 = vpack.c.bf16 %v1801_v37, %v1801_v37  ;;  %v6716_v1 = vmul.f32 %v6608_v16, %v6631_v24 }
  0x1a   : > { %621 = vst.msk [vmem:[#allocation2 + $0x54] sm:$0xf] %vm598_vm1, %v8453_v8  ;;  %v1410_v25 = vpack.c.bf16 %v1362_v21, %v1362_v21  ;;  %v1411_v26 = vpack.c.bf16 %v1363_v22, %v1363_v22  ;;  %v1293_v34 = vpack.c.bf16 %v1165_v29, %v1165_v29  ;;  %v1850_v43 = vpack.c.bf16 %v1802_v38, %v1802_v38  ;;  %v6242_v29 = vld [vmem:[%s6561_s12 + $0x48] sm:$0xff] }
  0x1b   : > { %622 = vst.msk [vmem:[#allocation2 + $0x58] sm:$0xf] %vm598_vm1, %v8453_v8  ;;  %v1929_v50 = vunpack.c.l.bf16 %v1849_v42  ;;  %v1294_v16 = vpack.c.bf16 %v6716_v1, %v6716_v1  ;;  %v2237_v38 = vperm.slane %v2235_v10, 1 }
  0x1c   : > { %624 = vst.msk [vmem:[#allocation2 + $0x60] sm:$0xf] %vm598_vm1, %v8453_v8  ;;  %v1490_v30 = vunpack.c.l.bf16 %v1410_v25  ;;  %v6645_v31 = vunpack.c.l.bf16 %v1411_v26  ;;  %v1458_v39 = vunpack.c.l.bf16 %v1293_v34  ;;  %v6688_v51 = vunpack.c.l.bf16 %v1850_v43  ;;  %v3338_v26 = vld [vmem:[%s8446_s2] sm:$0x8] }
  0x1d   : > { %625 = vst.msk [vmem:[#allocation2 + $0x64] sm:$0xf] %vm598_vm1, %v8453_v8  ;;  %v2026_v59 = vrot.slane %v1929_v50, 2  ;;  %v1459_v62 = vunpack.c.l.bf16 %v1294_v16 }
  0x1e   : > { %627 = vst.msk [vmem:[#allocation2 + $0x6c] sm:$0xf] %vm598_vm1, %v8453_v8  ;;  %v1587_v35 = vrot.slane %v1490_v30, 1  ;;  %v1588_v36 = vrot.slane %v6645_v31, 1  ;;  %v2027_v60 = vrot.slane %v6688_v51, 2  ;;  %v3617_v30 = vshrl.u32 %v3338_v26, 16 }
  0x1f   : > { %628 = vst.msk [vmem:[#allocation2 + $0x70] sm:$0xf] %vm598_vm1, %v8453_v8 }
  0x20   : > { %630 = vst.msk [vmem:[#allocation2 + $0x78] sm:$0xf] %vm598_vm1, %v8453_v8  ;;  %v1589_v41 = vsel %vm1586_vm2, %v1587_v35, %v1588_v36  ;;  %v3618_v44 = vpack.i.b16 %v3617_v30, %v3617_v30 }
  0x21   : > { %6164 = vmatmul.msk.bf16.gmra.mxu0 %vm428_vm0, %v6234_v2  ;;  %631 = vst.msk [vmem:[#allocation2 + $0x7c] sm:$0xf] %vm598_vm1, %v8453_v8  ;;  %v1699_v47 = vadd.f32 %v1589_v41, %v1458_v39  ;;  %v3373_v39 = vpack.i.b16 %v3338_v26, %v3338_v26 }
  0x22   : > { %633 = vst.msk [vmem:[#allocation2 + $0x84] sm:$0xf] %vm598_vm1, %v8453_v8 }
  0x23   : > { %634 = vst.msk [vmem:[#allocation2 + $0x88] sm:$0xf] %vm598_vm1, %v8453_v8  ;;  %v1731_v56 = vpack.c.bf16 %v1699_v47, %v1699_v47  ;;  %v2483_v47 = vperm.slane %v2481_v23, 2 }
  0x24   : > { %636 = vst.msk [vmem:[#allocation2 + $0x90] sm:$0xf] %vm598_vm1, %v8453_v8 }
  0x25   : > { %637 = vst.msk [vmem:[#allocation2 + $0x94] sm:$0xf] %vm598_vm1, %v8453_v8  ;;  %v1897_v2 = vunpack.c.l.bf16 %v1731_v56 }
  0x26   : > { %639 = vst.msk [vmem:[#allocation2 + $0x9c] sm:$0xf] %vm598_vm1, %v8453_v8 }
  0x27   : > { %640 = vst.msk [vmem:[#allocation2 + $0xa0] sm:$0xf] %vm598_vm1, %v8453_v8 }
  0x28   : > { %642 = vst.msk [vmem:[#allocation2 + $0xa8] sm:$0xf] %vm598_vm1, %v8453_v8 }
  0x29   : > { %643 = vst.msk [vmem:[#allocation2 + $0xac] sm:$0xf] %vm598_vm1, %v8453_v8 }
  0x2a   : > { %645 = vst.msk [vmem:[#allocation2 + $0xb4] sm:$0xf] %vm598_vm1, %v8453_v8 }
  0x2b   : > { %646 = vst.msk [vmem:[#allocation2 + $0xb8] sm:$0xf] %vm598_vm1, %v8453_v8 }
  0x2c   : > { %648 = vst.msk [vmem:[#allocation2 + $0xc0] sm:$0xf] %vm598_vm1, %v8453_v8 }
  0x2d   : > { %649 = vst.msk [vmem:[#allocation2 + $0xc4] sm:$0xf] %vm598_vm1, %v8453_v8 }
  0x2e   : > { %651 = vst.msk [vmem:[#allocation2 + $0xcc] sm:$0xf] %vm598_vm1, %v8453_v8 }
  0x2f   : > { %652 = vst.msk [vmem:[#allocation2 + $0xd0] sm:$0xf] %vm598_vm1, %v8453_v8 }
  0x30   : > { %605 = vst.msk [vmem:[#allocation2 + $0x14] sm:$0x1] %vm601_vm3, %v8453_v8 }
  0x31   : > { %6165 = vmatmul.msk.bf16.gmra.mxu0 %vm428_vm0, %v6235_v3  ;;  %602 = vst.msk [vmem:[#allocation2 + $0x8] sm:$0x1] %vm601_vm3, %v8453_v8  ;;  %v2920_v3 = vperm.slane %v2918_v57, 2 }
  0x32   : > { %608 = vst.msk [vmem:[#allocation2 + $0x20] sm:$0x1] %vm601_vm3, %v8453_v8 }
  0x33   : > { %611 = vst.msk [vmem:[#allocation2 + $0x2c] sm:$0x1] %vm601_vm3, %v8453_v8  ;;  %v6750_v25 = vunpack.c.l.bf16 %v2920_v3  ;;  %v6787_v3 = vunpack.c.l.bf16 %v2483_v47 }
  0x34   : > { %614 = vst.msk [vmem:[#allocation2 + $0x38] sm:$0x1] %vm601_vm3, %v8453_v8 }
  0x35   : > { %617 = vst.msk [vmem:[#allocation2 + $0x44] sm:$0x1] %vm601_vm3, %v8453_v8 }
  0x36   : > { %620 = vst.msk [vmem:[#allocation2 + $0x50] sm:$0x1] %vm601_vm3, %v8453_v8 }
  0x37   : > { %623 = vst.msk [vmem:[#allocation2 + $0x5c] sm:$0x1] %vm601_vm3, %v8453_v8  ;;  %v987_v20 = vld [vmem:[#allocation2 + $0x14] sm:$0x1] }
  0x38   : > { %626 = vst.msk [vmem:[#allocation2 + $0x68] sm:$0x1] %vm601_vm3, %v8453_v8 }
  0x39   : > { %629 = vst.msk [vmem:[#allocation2 + $0x74] sm:$0x1] %vm601_vm3, %v8453_v8 }
  0x3a   : > { %632 = vst.msk [vmem:[#allocation2 + $0x80] sm:$0x1] %vm601_vm3, %v8453_v8 }
  0x3b   : > { %635 = vst.msk [vmem:[#allocation2 + $0x8c] sm:$0x1] %vm601_vm3, %v8453_v8 }
  0x3c   : > { %638 = vst.msk [vmem:[#allocation2 + $0x98] sm:$0x1] %vm601_vm3, %v8453_v8 }
  0x3d   : > { %641 = vst.msk [vmem:[#allocation2 + $0xa4] sm:$0x1] %vm601_vm3, %v8453_v8 }
  0x3e   : > { %644 = vst.msk [vmem:[#allocation2 + $0xb0] sm:$0x1] %vm601_vm3, %v8453_v8 }
  0x3f   : > { %647 = vst.msk [vmem:[#allocation2 + $0xbc] sm:$0x1] %vm601_vm3, %v8453_v8 }
  0x40   : > { %650 = vst.msk [vmem:[#allocation2 + $0xc8] sm:$0x1] %vm601_vm3, %v8453_v8 }
  0x41   : > { %6166 = vmatmul.msk.bf16.gmra.mxu0 %vm428_vm0, %v6236_v4  ;;  %653 = vst.msk [vmem:[#allocation2 + $0xd4] sm:$0x1] %vm601_vm3, %v8453_v8 }
  0x51   : > { %6167 = vmatmul.msk.bf16.gmra.mxu0 %vm428_vm0, %v6237_v5 }
  0x61   : > { %6168 = vmatmul.msk.bf16.gmra.mxu0 %vm428_vm0, %v6238_v6 }
  0x71   : > { %6169 = vmatmul.msk.bf16.gmra.mxu0 %vm428_vm0, %v6239_v7  ;;  %v2028_v7 = vsel %vm2025_vm6, %v2026_v59, %v2027_v60 }
  0x72   : > { %v2138_v22 = vadd.f32 %v2028_v7, %v1897_v2 }
  0x74   : > { %v2170_v50 = vpack.c.bf16 %v2138_v22, %v2138_v22 }
  0x76   : > { %v2335_v7 = vunpack.c.l.bf16 %v2170_v50  ;;  %v6243_v50 = vld [vmem:[%s6561_s12 + $0x50] sm:$0xff] }
  0x81   : > { %6170 = vmatmul.msk.bf16.gmra.mxu0 %vm428_vm0, %v6240_v18  ;;  %v1325_v18 = vld [vmem:[#allocation2 + $0x8] sm:$0x1] }
  0x82   : > { %v1345_v21 = vunpack.c.l.bf16 %v1325_v18 }
  0x84   : > { %v1364_v35 = vmul.f32 %v6610_v17, %v1345_v21  ;;  %v1803_v37 = vmul.f32 %v6647_v33, %v1345_v21 }
  0x8e   : > { %v486_v45 = vpop.f32.mrf.mxu0 }
  0x8f   : > { %v566_v46 = vpack.c.bf16 %v486_v45, %v486_v45  ;;  %v1412_v45 = vpack.c.bf16 %v1364_v35, %v1364_v35 }
  0x91   : > { %v658_v49 = vshrl.u32 %v566_v46, 16  ;;  %6171 = vmatmul.msk.bf16.gmra.mxu0 %vm428_vm0, %v6241_v40  ;;  %v661_v53 = vshll.u32 %v566_v46, 16  ;;  %v4782_v4 = vunpack.c.l.b16 %v566_v46  ;;  %v1851_v46 = vpack.c.bf16 %v1803_v37, %v1803_v37 }
  0x93   : > { %v6692_v52 = vrot.slane %v658_v49, 7  ;;  %v1931_v56 = vunpack.c.l.bf16 %v1851_v46 }
  0x95   : > { %v663_v58 = vor.u32 %v661_v53, %v6692_v52  ;;  %v664_v9 = vrot.slane %v6692_v52, 4  ;;  %v3375_v52 = vperm.slane %v3373_v39, 3  ;;  %v4058_v53 = vperm.slane %v4056_v32, 0 }
  0x96   : > { %v488_v61 = vpop.f32.mrf.mxu0  ;;  %v2029_v2 = vrot.slane %v1931_v56, 2 }
  0x97   : > { %v982_v63 = vsel %vm6697_vm5, %v663_v58, %v981_v55  ;;  %v567_v0 = vpack.c.bf16 %v488_v61, %v488_v61  ;;  %v1492_v55 = vunpack.c.l.bf16 %v1412_v45  ;;  %v3620_v58 = vperm.slane %v3618_v44, 3 }
  0x98   : > { %983 = vst [vmem:[#allocation2 + $0xc] sm:$0xf] %v982_v63  ;;  %v6783_v63 = vunpack.c.l.bf16 %v2237_v38  ;;  %v2030_v31 = vsel %vm2025_vm6, %v2027_v60, %v2029_v2 }
  0x99   : > { %v666_v5 = vshrl.u32 %v567_v0, 16  ;;  %v4783_v6 = vunpack.c.l.b16 %v567_v0  ;;  %v669_v14 = vshll.u32 %v567_v0, 16  ;;  %v990_v0 = vld [vmem:[#allocation2 + $0x18] sm:$0xf]  ;;  %v1590_v1 = vrot.slane %v1492_v55, 1 }
  0x9a   : > { %v6804_v16 = vunpack.c.l.bf16 %v3620_v58 }
  0x9b   : > { %v668_v13 = vrot.slane %v666_v5, 7  ;;  %v6736_v15 = vpack.c.b16 %v4783_v6, %v4782_v4  ;;  %v1591_v11 = vsel %vm1586_vm2, %v1588_v36, %v1590_v1 }
  0x9c   : > { %v1700_v22 = vadd.f32 %v1591_v11, %v1459_v62 }
  0x9d   : > { %v671_v27 = vor.u32 %v669_v14, %v668_v13  ;;  %v673_v28 = vrot.slane %v668_v13, 4  ;;  %5086 = vrot.lane.b32.xlu0 %v6736_v15, %s6494_s23  ;;  %v6802_v14 = vunpack.c.l.bf16 %v3375_v52 }
  0x9e   : > { %v491_v34 = vpop.f32.mrf.mxu0 }
  0x9f   : > { %v672_v40 = vsel %vm6730_vm9, %v664_v9, %v671_v27  ;;  %v988_v41 = vsel %vm6742_vm10, %v673_v28, %v987_v20  ;;  %v6770_v42 = vpack.c.bf16 %v491_v34, %v491_v34  ;;  %v2901_v43 = vld [vmem:[#allocation2 + $0xc] sm:$0xe]  ;;  %v6793_v9 = vunpack.c.l.bf16 %v4058_v53 }
  0xa0   : > { %984 = vst.msk [vmem:[#allocation2 + $0x10] sm:$0xf] %vm598_vm1, %v672_v40  ;;  %v2921_v48 = vunpack.c.l.bf16 %v2901_v43  ;;  %v1732_v34 = vpack.c.bf16 %v1700_v22, %v1700_v22  ;;  %v6252_v43 = vld [vmem:[%s8447_s3 + $0x10] sm:$0xff] }
  0xa1   : > { %989 = vst [vmem:[#allocation2 + $0x14] sm:$0x1] %v988_v41  ;;  %v675_v49 = vshrl.u32 %v6770_v42, 16  ;;  %6172 = vmatmul.msk.bf16.gmra.mxu0 %vm428_vm0, %v6242_v29  ;;  %v678_v61 = vshll.u32 %v6770_v42, 16  ;;  %v4784_v6 = vunpack.c.l.b16 %v6770_v42  ;;  %v994_v42 = vld [vmem:[#allocation2 + $0x20] sm:$0x1]  ;;  %4634 = vmatpush.bf16.msra.mxu1 %v6252_v43 }
  0xa2   : > { %v2938_v57 = vmul.f32 %v6750_v25, %v2921_v48  ;;  %v1898_v60 = vunpack.c.l.bf16 %v1732_v34 }
  0xa3   : > { %v6780_v59 = vrot.slane %v675_v49, 7 }
  0xa4   : > { %v2986_v4 = vpack.c.bf16 %v2938_v57, %v2938_v57  ;;  %v2139_v52 = vadd.f32 %v2030_v31, %v1898_v60 }
  0xa5   : > { %v680_v5 = vor.u32 %v678_v61, %v6780_v59  ;;  %v681_v18 = vrot.slane %v6780_v59, 4 }
  0xa6   : > { %v493_v10 = vpop.f32.mrf.mxu0  ;;  %v6800_v13 = vunpack.c.l.bf16 %v2986_v4  ;;  %v2171_v2 = vpack.c.bf16 %v2139_v52, %v2139_v52  ;;  %v6251_v4 = vld [vmem:[%s8447_s3 + $0x8] sm:$0xff] }
  0xa7   : > { %v991_v20 = vsel %vm6697_vm5, %v680_v5, %v990_v0  ;;  %v569_v21 = vpack.c.bf16 %v493_v10, %v493_v10  ;;  %v2202_v23 = vld [vmem:[#allocation2 + $0xc] sm:$0xff]   ;;  %4635 = vmatpush.bf16.msra.mxu1 %v6251_v4 }
  0xa8   : > { %992 = vst [vmem:[#allocation2 + $0x18] sm:$0xf] %v991_v20  ;;  %v2238_v36 = vunpack.c.l.bf16 %v2202_v23  ;;  %v2239_v26 = vunpack.c.h.bf16 %v2202_v23  ;;  %v2464_v27 = vld [vmem:[#allocation2 + $0x14] sm:$0x1]  ;;  %v3162_v28 = vrot.slane %v6800_v13, 2  ;;  %v6828_v61 = vld [vmem:[#allocation2 + $0xc] sm:$0xff]  }
  0xa9   : > { %v683_v29 = vshrl.u32 %v569_v21, 16  ;;  %v686_v30 = vshll.u32 %v569_v21, 16  ;;  %v4785_v32 = vunpack.c.l.b16 %v569_v21  ;;  %v2484_v38 = vunpack.c.l.bf16 %v2464_v27 }
  0xaa   : > { %v2271_v35 = vmul.f32 %v6783_v63, %v2238_v36  ;;  %v2272_v37 = vmul.f32 %v6783_v63, %v2239_v26  ;;  %v2501_v39 = vmul.f32 %v6787_v3, %v2238_v36  ;;  %v2502_v41 = vmul.f32 %v6787_v3, %v2239_v26 }
  0xab   : > { %v685_v51 = vrot.slane %v683_v29, 7  ;;  %v6818_v40 = vpack.c.b16 %v4785_v32, %v4784_v6  ;;  %v2503_v46 = vmul.f32 %v6787_v3, %v2484_v38  ;;  %v1134_v23 = vunpack.c.l.bf16 %v6828_v61 }
  0xac   : > { %v2303_v44 = vpack.c.bf16 %v2271_v35, %v2271_v35  ;;  %v2304_v45 = vpack.c.bf16 %v2272_v37, %v2272_v37  ;;  %v2549_v47 = vpack.c.bf16 %v2501_v39, %v2501_v39  ;;  %v2550_v53 = vpack.c.bf16 %v2502_v41, %v2502_v41  ;;  %v997_v35 = vld [vmem:[#allocation2 + $0x24] sm:$0xf] }
  0xad   : > { %v688_v48 = vor.u32 %v686_v30, %v685_v51  ;;  %v690_v49 = vrot.slane %v685_v51, 4  ;;  %5088 = vrot.lane.b32.xlu1 %v6818_v40, %s6494_s23  ;;  %v2551_v58 = vpack.c.bf16 %v2503_v46, %v2503_v46  ;;  %v2939_v29 = vmul.f32 %v6750_v25, %v2239_v26  ;;  %v6250_v39 = vld [vmem:[%s8447_s3] sm:$0xff] }
  0xae   : > { %v496_v55 = vpop.f32.mrf.mxu0  ;;  %v2367_v56 = vunpack.c.l.bf16 %v2303_v44  ;;  %v2368_v57 = vunpack.c.l.bf16 %v2304_v45  ;;  %v2629_v59 = vunpack.c.l.bf16 %v2549_v47  ;;  %v2630_v6 = vunpack.c.l.bf16 %v2550_v53  ;;  %4636 = vmatpush.bf16.msra.mxu1 %v6250_v39 }
  0xaf   : > { %v689_v62 = vsel %vm6730_vm9, %v681_v18, %v688_v48  ;;  %v995_v0 = vsel %vm6742_vm10, %v690_v49, %v994_v42  ;;  %v570_v1 = vpack.c.bf16 %v496_v55, %v496_v55  ;;  %v2631_v10 = vunpack.c.l.bf16 %v2551_v58  ;;  %v4039_v20 = vld [vmem:[#allocation2 + $0x18] sm:$0xe] }
  0xb0   : > { %993 = vst.msk [vmem:[#allocation2 + $0x1c] sm:$0xf] %vm598_vm1, %v689_v62  ;;  %v2399_v5 = vadd.f32 %v2367_v56, %v2335_v7  ;;  %v2725_v11 = vrot.slane %v2629_v59, 1  ;;  %v2336_v18 = vunpack.c.l.bf16 %v2171_v2  ;;  %v2726_v36 = vrot.slane %v2630_v6, 1 }
  0xb1   : > { %996 = vst [vmem:[#allocation2 + $0x20] sm:$0x1] %v995_v0  ;;  %v692_v21 = vshrl.u32 %v570_v1, 16  ;;  %v695_v22 = vshll.u32 %v570_v1, 16  ;;  %6173 = vmatmul.msk.bf16.gmra.mxu0 %vm428_vm0, %v6243_v50  ;;  %v2728_v27 = vrot.slane %v2631_v10, 1  ;;  %v2940_v32 = vmul.f32 %v6750_v25, %v2484_v38 }
  0xb2   : > { %v2431_v31 = vpack.c.bf16 %v2399_v5, %v2399_v5  ;;  %v2400_v7 = vadd.f32 %v2368_v57, %v2336_v18  ;;  %v4059_v34 = vunpack.c.l.bf16 %v4039_v20  ;;  %v4786_v37 = vunpack.c.l.b16 %v570_v1 }
  0xb3   : > { %v6841_v30 = vrot.slane %v692_v21, 7  ;;  %v2727_v60 = vsel %vm1586_vm2, %v2725_v11, %v2726_v36  ;;  %v2987_v41 = vpack.c.bf16 %v2939_v29, %v2939_v29  ;;  %v2729_v26 = vsel %vm1586_vm2, %v2726_v36, %v2728_v27 }
  0xb4   : > { %v2597_v51 = vunpack.c.l.bf16 %v2431_v31  ;;  %v2432_v43 = vpack.c.bf16 %v2400_v7, %v2400_v7  ;;  %v2988_v44 = vpack.c.bf16 %v2940_v32, %v2940_v32  ;;  %v6852_v48 = vmul.f32 %v6793_v9, %v4059_v34  ;;  %v1001_v31 = vld [vmem:[#allocation2 + $0x2c] sm:$0x1]  ;;  %v6244_v7 = vld [vmem:[%s6561_s12 + $0x58] sm:$0xff] }
  0xb5   : > { %v697_v42 = vor.u32 %v695_v22, %v6841_v30  ;;  %v698_v45 = vrot.slane %v6841_v30, 4  ;;  %v3067_v47 = vunpack.c.l.bf16 %v2987_v41  ;;  %v6870_v13 = vunpack.c.h.bf16 %v6828_v61 }
  0xb6   : > { %v498_v38 = vpop.f32.mrf.mxu0  ;;  %v2837_v46 = vadd.f32 %v2727_v60, %v2597_v51  ;;  %v2598_v52 = vunpack.c.l.bf16 %v2432_v43  ;;  %v3068_v53 = vunpack.c.l.bf16 %v2988_v44 }
  0xb7   : > { %v998_v49 = vsel %vm6697_vm5, %v697_v42, %v997_v35  ;;  %v571_v50 = vpack.c.bf16 %v498_v38, %v498_v38  ;;  %v6319_v55 = vld [vmem:[#allocation2 + $0x18] sm:$0xff]   ;;  %v3163_v57 = vrot.slane %v3067_v47, 2 }
  0xb8   : > { %999 = vst [vmem:[#allocation2 + $0x24] sm:$0xf] %v998_v49  ;;  %v2869_v56 = vpack.c.bf16 %v2837_v46, %v2837_v46  ;;  %v6856_v58 = vunpack.c.l.bf16 %v6319_v55  ;;  %v6858_v59 = vunpack.c.h.bf16 %v6319_v55  ;;  %v2838_v2 = vadd.f32 %v2729_v26, %v2598_v52  ;;  %v3601_v4 = vld [vmem:[#allocation2 + $0x20] sm:$0x1] }
  0xb9   : > { %v700_v62 = vshrl.u32 %v571_v50, 16  ;;  %v703_v0 = vshll.u32 %v571_v50, 16  ;;  %v4787_v1 = vunpack.c.l.b16 %v571_v50  ;;  %v3164_v6 = vsel %vm2025_vm6, %v3162_v28, %v3163_v57 }
  0xba   : > { %v3034_v5 = vunpack.c.l.bf16 %v2869_v56  ;;  %v3165_v10 = vrot.slane %v3068_v53, 2  ;;  %v3409_v11 = vmul.f32 %v6856_v58, %v6802_v14  ;;  %v2870_v22 = vpack.c.bf16 %v2838_v2, %v2838_v2 }
  0xbb   : > { %v702_v20 = vrot.slane %v700_v62, 7  ;;  %v6865_v21 = vpack.c.b16 %v4787_v1, %v4786_v37  ;;  %v3410_v18 = vmul.f32 %v6858_v59, %v6802_v14  ;;  %v3621_v29 = vunpack.c.l.bf16 %v3601_v4  ;;  %v1004_v4 = vld [vmem:[#allocation2 + $0x30] sm:$0xf] }
  0xbc   : > { %v3274_v36 = vadd.f32 %v3164_v6, %v3034_v5  ;;  %v3441_v27 = vpack.c.bf16 %v3409_v11, %v3409_v11  ;;  %v3035_v32 = vunpack.c.l.bf16 %v2870_v22  ;;  %v3166_v37 = vsel %vm2025_vm6, %v3163_v57, %v3165_v10 }
  0xbd   : > { %v705_v28 = vor.u32 %v703_v0, %v702_v20  ;;  %v707_v30 = vrot.slane %v702_v20, 4  ;;  %5266 = vrot.lane.b32.xlu0 %v6865_v21, %s6495_s10  ;;  %5090 = vrot.lane.b32.xlu2 %v6865_v21, %s6494_s23  ;;  %v3442_v34 = vpack.c.bf16 %v3410_v18, %v3410_v18  ;;  %v3638_v51 = vmul.f32 %v6856_v58, %v6804_v16 }
  0xbe   : > { %v501_v35 = vpop.f32.mrf.mxu0  ;;  %v3306_v39 = vpack.c.bf16 %v3274_v36, %v3274_v36  ;;  %v3639_v60 = vmul.f32 %v6858_v59, %v6804_v16  ;;  %v3275_v26 = vadd.f32 %v3166_v37, %v3035_v32  ;;  %v3505_v38 = vunpack.c.l.bf16 %v3441_v27 }
  0xbf   : > { %v706_v41 = vsel %vm6730_vm9, %v698_v45, %v705_v28  ;;  %v1002_v42 = vsel %vm6742_vm10, %v707_v30, %v1001_v31  ;;  %v572_v43 = vpack.c.bf16 %v501_v35, %v501_v35  ;;  %v3640_v46 = vmul.f32 %v6804_v16, %v3621_v29 }
  0xc0   : > { %1000 = vst.msk [vmem:[#allocation2 + $0x28] sm:$0xf] %vm598_vm1, %v706_v41  ;;  %v3473_v44 = vunpack.c.l.bf16 %v3306_v39  ;;  %v3686_v47 = vpack.c.bf16 %v3638_v51, %v3638_v51  ;;  %v3307_v52 = vpack.c.bf16 %v3275_v26, %v3275_v26  ;;  %v3506_v53 = vunpack.c.l.bf16 %v3442_v34 }
  0xc1   : > { %1003 = vst [vmem:[#allocation2 + $0x2c] sm:$0x1] %v1002_v42  ;;  %v709_v49 = vshrl.u32 %v572_v43, 16  ;;  %v712_v50 = vshll.u32 %v572_v43, 16  ;;  %6174 = vmatmul.msk.bf16.gmra.mxu0 %vm428_vm0, %v6244_v7  ;;  %v3687_v55 = vpack.c.bf16 %v3639_v60, %v3639_v60  ;;  %v3688_v56 = vpack.c.bf16 %v3640_v46, %v3640_v46 }
  0xc2   : > { %v3537_v45 = vadd.f32 %v3505_v38, %v3473_v44  ;;  %v3766_v57 = vunpack.c.l.bf16 %v3686_v47  ;;  %v3474_v0 = vunpack.c.l.bf16 %v3307_v52  ;;  %v4077_v1 = vmul.f32 %v6858_v59, %v6793_v9 }
  0xc3   : > { %v711_v62 = vrot.slane %v709_v49, 7  ;;  %v4078_v2 = vmul.f32 %v6793_v9, %v3621_v29  ;;  %v3767_v6 = vunpack.c.l.bf16 %v3687_v55  ;;  %v3768_v10 = vunpack.c.l.bf16 %v3688_v56 }
  0xc4   : > { %v3569_v5 = vpack.c.bf16 %v3537_v45, %v3537_v45  ;;  %v3862_v11 = vrot.slane %v3766_v57, 1  ;;  %v4788_v22 = vunpack.c.l.b16 %v572_v43  ;;  %v3538_v18 = vadd.f32 %v3506_v53, %v3474_v0  ;;  %v6900_v53 = vld [vmem:[#allocation2 + $0x14] sm:$0x1]  ;;  %v1008_v45 = vld [vmem:[#allocation2 + $0x38] sm:$0x1] }
  0xc5   : > { %v714_v20 = vor.u32 %v712_v50, %v711_v62  ;;  %v4124_v31 = vpack.c.bf16 %v6852_v48, %v6852_v48  ;;  %v3863_v28 = vrot.slane %v3767_v6, 1  ;;  %v3865_v30 = vrot.slane %v3768_v10, 1 }
  0xc6   : > { %v503_v36 = vpop.f32.mrf.mxu0  ;;  %v3734_v27 = vunpack.c.l.bf16 %v3569_v5  ;;  %v4125_v7 = vpack.c.bf16 %v4077_v1, %v4077_v1  ;;  %v3570_v34 = vpack.c.bf16 %v3538_v18, %v3538_v18  ;;  %v4126_v35 = vpack.c.bf16 %v4078_v2, %v4078_v2  ;;  %v6245_v2 = vld [vmem:[%s6561_s12 + $0x60] sm:$0xff] }
  0xc7   : > { %v1005_v32 = vsel %vm6697_vm5, %v714_v20, %v1004_v4  ;;  %v573_v29 = vpack.c.bf16 %v503_v36, %v503_v36  ;;  %v715_v37 = vrot.slane %v711_v62, 4  ;;  %v3864_v39 = vsel %vm1586_vm2, %v3862_v11, %v3863_v28 }
  0xc8   : > { %1006 = vst [vmem:[#allocation2 + $0x30] sm:$0xf] %v1005_v32  ;;  %v4204_v51 = vunpack.c.l.bf16 %v4124_v31  ;;  %v4205_v60 = vunpack.c.l.bf16 %v4125_v7  ;;  %v3735_v48 = vunpack.c.l.bf16 %v3570_v34  ;;  %v3866_v43 = vsel %vm1586_vm2, %v3863_v28, %v3865_v30 }
  0xc9   : > { %v717_v41 = vshrl.u32 %v573_v29, 16  ;;  %v4789_v42 = vunpack.c.l.b16 %v573_v29  ;;  %v3974_v26 = vadd.f32 %v3864_v39, %v3734_v27  ;;  %v4206_v44 = vunpack.c.l.bf16 %v4126_v35 }
  0xca   : > { %v4300_v38 = vrot.slane %v4204_v51, 2  ;;  %v4301_v46 = vrot.slane %v4205_v60, 2  ;;  %v720_v49 = vshll.u32 %v573_v29, 16  ;;  %v3975_v52 = vadd.f32 %v3866_v43, %v3735_v48 }
  0xcb   : > { %v719_v47 = vrot.slane %v717_v41, 7  ;;  %v6898_v50 = vpack.c.b16 %v4789_v42, %v4788_v22  ;;  %v4006_v55 = vpack.c.bf16 %v3974_v26, %v3974_v26  ;;  %v4303_v57 = vrot.slane %v4206_v44, 2  ;;  %v1765_v42 = vld [vmem:[#allocation2 + $0xc] sm:$0xe]  ;;  %v1011_v26 = vld [vmem:[#allocation2 + $0x3c] sm:$0xf] }
  0xcc   : > { %v4302_v56 = vsel %vm2025_vm6, %v4300_v38, %v4301_v46  ;;  %v1167_v62 = vmul.f32 %v6631_v24, %v1134_v23  ;;  %v4007_v4 = vpack.c.bf16 %v3975_v52, %v3975_v52  ;;  %v1168_v5 = vmul.f32 %v6631_v24, %v6870_v13 }
  0xcd   : > { %v722_v0 = vor.u32 %v720_v49, %v719_v47  ;;  %v724_v1 = vrot.slane %v719_v47, 4  ;;  %5268 = vrot.lane.b32.xlu2 %v6898_v50, %s6495_s10  ;;  %5092 = vrot.lane.b32.xlu0 %v6898_v50, %s6494_s23  ;;  %v4172_v10 = vunpack.c.l.bf16 %v4006_v55  ;;  %v4304_v11 = vsel %vm2025_vm6, %v4301_v46, %v4303_v57 }
  0xce   : > { %v506_v6 = vpop.f32.mrf.mxu0  ;;  %v1295_v20 = vpack.c.bf16 %v1167_v62, %v1167_v62  ;;  %v1346_v22 = vunpack.c.l.bf16 %v6900_v53  ;;  %v4173_v27 = vunpack.c.l.bf16 %v4007_v4  ;;  %v1296_v30 = vpack.c.bf16 %v1168_v5, %v1168_v5 }
  0xcf   : > { %v723_v18 = vsel %vm6730_vm9, %v715_v37, %v722_v0  ;;  %v1009_v31 = vsel %vm6742_vm10, %v724_v1, %v1008_v45  ;;  %v574_v36 = vpack.c.bf16 %v506_v6, %v506_v6  ;;  %v4412_v28 = vadd.f32 %v4302_v56, %v4172_v10 }
  0xd0   : > { %1007 = vst.msk [vmem:[#allocation2 + $0x34] sm:$0xf] %vm598_vm1, %v723_v18  ;;  %v1365_v7 = vmul.f32 %v6610_v17, %v1134_v23  ;;  %v1366_v32 = vmul.f32 %v6610_v17, %v6870_v13  ;;  %v4413_v37 = vadd.f32 %v4304_v11, %v4173_v27  ;;  %v1367_v51 = vmul.f32 %v6610_v17, %v1346_v22 }
  0xd1   : > { %1010 = vst [vmem:[#allocation2 + $0x38] sm:$0x1] %v1009_v31  ;;  %v726_v29 = vshrl.u32 %v574_v36, 16  ;;  %v729_v34 = vshll.u32 %v574_v36, 16  ;;  %v4790_v35 = vunpack.c.l.b16 %v574_v36  ;;  %6175 = vmatmul.msk.bf16.gmra.mxu0 %vm428_vm0, %v6245_v2  ;;  %v4444_v39 = vpack.c.bf16 %v4412_v28, %v4412_v28 }
  0xd2   : > { %v1413_v60 = vpack.c.bf16 %v1365_v7, %v1365_v7  ;;  %v1414_v41 = vpack.c.bf16 %v1366_v32, %v1366_v32  ;;  %v4445_v61 = vpack.c.bf16 %v4413_v37, %v4413_v37  ;;  %v1460_v43 = vunpack.c.l.bf16 %v1295_v20 }
  0xd3   : > { %v728_v48 = vrot.slane %v726_v29, 7  ;;  %v1461_v23 = vunpack.c.l.bf16 %v1296_v30  ;;  %v4514_v44 = vunpack.c.l.b16 %v4444_v39  ;;  %v1415_v38 = vpack.c.bf16 %v1367_v51, %v1367_v51  ;;  %v1015_v39 = vld [vmem:[#allocation2 + $0x44] sm:$0x1] }
  0xd4   : > { %v1493_v46 = vunpack.c.l.bf16 %v1413_v60  ;;  %v1494_v47 = vunpack.c.l.bf16 %v1414_v41  ;;  %v4515_v53 = vunpack.c.l.b16 %v4445_v61  ;;  %v1785_v45 = vunpack.c.l.bf16 %v1765_v42  ;;  %v6246_v61 = vld [vmem:[%s6561_s12 + $0x68] sm:$0xff] }
  0xd5   : > { %v731_v49 = vor.u32 %v729_v34, %v728_v48  ;;  %v732_v52 = vrot.slane %v728_v48, 4  ;;  %v1495_v56 = vunpack.c.l.bf16 %v1415_v38  ;;  %v1805_v0 = vmul.f32 %v6647_v33, %v6870_v13 }
  0xd6   : > { %v508_v55 = vpop.f32.mrf.mxu0  ;;  %v1592_v57 = vrot.slane %v1493_v46, 1  ;;  %v1593_v62 = vrot.slane %v1494_v47, 1  ;;  %v4546_v4 = vpack.c.b16 %v4515_v53, %v4514_v44  ;;  %v1804_v5 = vmul.f32 %v6647_v33, %v1785_v45 }
  0xd7   : > { %v1012_v1 = vsel %vm6697_vm5, %v731_v49, %v1011_v26  ;;  %v575_v2 = vpack.c.bf16 %v508_v55, %v508_v55  ;;  %v1595_v10 = vrot.slane %v1495_v56, 1  ;;  %v1806_v11 = vmul.f32 %v6647_v33, %v1346_v22  ;;  %v2465_v55 = vld [vmem:[#allocation2 + $0x20] sm:$0x1] }
  0xd8   : > { %1013 = vst [vmem:[#allocation2 + $0x3c] sm:$0xf] %v1012_v1  ;;  %v1594_v6 = vsel %vm1586_vm2, %v1592_v57, %v1593_v62  ;;  %v1853_v20 = vpack.c.bf16 %v1805_v0, %v1805_v0  ;;  %6191 = vmatmul.msk.bf16.vlgmr.msra.gmra.mxu1 %vm4580_vm11, %v4546_v4  ;;  %v1852_v28 = vpack.c.bf16 %v1804_v5, %v1804_v5  ;;  %v2902_v1 = vld [vmem:[#allocation2 + $0x18] sm:$0xe] }
  0xd9   : > { %v734_v18 = vshrl.u32 %v575_v2, 16  ;;  %v737_v31 = vshll.u32 %v575_v2, 16  ;;  %v4791_v36 = vunpack.c.l.b16 %v575_v2  ;;  %v1701_v13 = vadd.f32 %v1594_v6, %v1460_v43 }
  0xda   : > { %v1596_v27 = vsel %vm1586_vm2, %v1593_v62, %v1595_v10  ;;  %v1854_v30 = vpack.c.bf16 %v1806_v11, %v1806_v11  ;;  %v1933_v7 = vunpack.c.l.bf16 %v1853_v20  ;;  %v1932_v22 = vunpack.c.l.bf16 %v1852_v28 }
  0xdb   : > { %v736_v32 = vrot.slane %v734_v18, 7  ;;  %v6936_v29 = vpack.c.b16 %v4791_v36, %v4790_v35  ;;  %v1702_v34 = vadd.f32 %v1596_v27, %v1461_v23  ;;  %v1733_v37 = vpack.c.bf16 %v1701_v13, %v1701_v13  ;;  %v1018_v27 = vld [vmem:[#allocation2 + $0x48] sm:$0xf] }
  0xdc   : > { %v1934_v51 = vunpack.c.l.bf16 %v1854_v30  ;;  %v2032_v60 = vrot.slane %v1933_v7, 2  ;;  %v2273_v41 = vmul.f32 %v6856_v58, %v6783_v63  ;;  %v2031_v26 = vrot.slane %v1932_v22, 2 }
  0xdd   : > { %8468 = vst [vmem:[#allocation3_spill] sm:$0xff] %v6936_v29  ;;  %v739_v42 = vor.u32 %v737_v31, %v736_v32  ;;  %v741_v48 = vrot.slane %v736_v32, 4  ;;  %5270 = vrot.lane.b32.xlu1 %v6936_v29, %s6495_s10  ;;  %5094 = vrot.lane.b32.xlu2 %v6936_v29, %s6494_s23  ;;  %v1734_v35 = vpack.c.bf16 %v1702_v34, %v1702_v34  ;;  %v1899_v43 = vunpack.c.l.bf16 %v1733_v37 }
  0xde   : > { %v511_v23 = vpop.f32.mrf.mxu0  ;;  %v2034_v44 = vrot.slane %v1934_v51, 2  ;;  %v2274_v38 = vmul.f32 %v6858_v59, %v6783_v63  ;;  %v2305_v46 = vpack.c.bf16 %v2273_v41, %v2273_v41  ;;  %v2033_v56 = vsel %vm2025_vm6, %v2031_v26, %v2032_v60 }
  0xdf   : > { %v740_v47 = vsel %vm6730_vm9, %v732_v52, %v739_v42  ;;  %v1016_v49 = vsel %vm6742_vm10, %v741_v48, %v1015_v39  ;;  %v6951_v53 = vpack.c.bf16 %v511_v23, %v511_v23  ;;  %v1900_v45 = vunpack.c.l.bf16 %v1734_v35 }
  0xe0   : > { %1014 = vst.msk [vmem:[#allocation2 + $0x40] sm:$0xf] %vm598_vm1, %v740_v47  ;;  %v2035_v57 = vsel %vm2025_vm6, %v2032_v60, %v2034_v44  ;;  %v2306_v62 = vpack.c.bf16 %v2274_v38, %v2274_v38  ;;  %v2369_v0 = vunpack.c.l.bf16 %v2305_v46  ;;  %v2140_v5 = vadd.f32 %v2033_v56, %v1899_v43 }
  0xe1   : > { %1017 = vst [vmem:[#allocation2 + $0x44] sm:$0x1] %v1016_v49  ;;  %v743_v2 = vshrl.u32 %v6951_v53, 16  ;;  %v746_v52 = vshll.u32 %v6951_v53, 16  ;;  %v4792_v4 = vunpack.c.l.b16 %v6951_v53  ;;  %6176 = vmatmul.msk.bf16.gmra.mxu0 %vm428_vm0, %v6246_v61  ;;  %v2141_v6 = vadd.f32 %v2035_v57, %v1900_v45 }
  0xe2   : > { %v2370_v10 = vunpack.c.l.bf16 %v2306_v62  ;;  %v2485_v11 = vunpack.c.l.bf16 %v2465_v55  ;;  %v2504_v20 = vmul.f32 %v6856_v58, %v6787_v3  ;;  %v2172_v31 = vpack.c.bf16 %v2140_v5, %v2140_v5 }
  0xe3   : > { %v745_v18 = vrot.slane %v743_v2, 7  ;;  %v2505_v36 = vmul.f32 %v6858_v59, %v6787_v3  ;;  %v2922_v13 = vunpack.c.l.bf16 %v2902_v1  ;;  %v2173_v28 = vpack.c.bf16 %v2141_v6, %v2141_v6  ;;  %v3342_v6 = vld [vmem:[#allocation2 + $0x24] sm:$0xff]  }
  0xe4   : > { %v2506_v30 = vmul.f32 %v6787_v3, %v2485_v11  ;;  %v2552_v7 = vpack.c.bf16 %v2504_v20, %v2504_v20  ;;  %v2942_v32 = vmul.f32 %v6858_v59, %v6750_v25  ;;  %v2337_v39 = vunpack.c.l.bf16 %v2172_v31 }
  0xe5   : > { %v748_v34 = vor.u32 %v746_v52, %v745_v18  ;;  %v749_v37 = vrot.slane %v745_v18, 4  ;;  %v2553_v22 = vpack.c.bf16 %v2505_v36, %v2505_v36  ;;  %v2338_v60 = vunpack.c.l.bf16 %v2173_v28 }
  0xe6   : > { %v513_v51 = vpop.f32.mrf.mxu0  ;;  %v2554_v41 = vpack.c.bf16 %v2506_v30, %v2506_v30  ;;  %v2632_v42 = vunpack.c.l.bf16 %v2552_v7  ;;  %v2941_v48 = vmul.f32 %v6750_v25, %v2922_v13  ;;  %v2401_v43 = vadd.f32 %v2369_v0, %v2337_v39 }
  0xe7   : > { %v1019_v61 = vsel %vm6697_vm5, %v748_v34, %v1018_v27  ;;  %v6970_v35 = vpack.c.bf16 %v513_v51, %v513_v51  ;;  %v2633_v23 = vunpack.c.l.bf16 %v2553_v22  ;;  %v2402_v26 = vadd.f32 %v2370_v10, %v2338_v60  ;;  %v1022_v10 = vld [vmem:[#allocation2 + $0x50] sm:$0x1]  ;;  %v3602_v22 = vld [vmem:[#allocation2 + $0x2c] sm:$0x1] }
  0xe8   : > { %1020 = vst [vmem:[#allocation2 + $0x48] sm:$0xf] %v1019_v61  ;;  %v2634_v44 = vunpack.c.l.bf16 %v2554_v41  ;;  %v2730_v38 = vrot.slane %v2632_v42, 1  ;;  %v2943_v46 = vmul.f32 %v6750_v25, %v2485_v11  ;;  %v2433_v55 = vpack.c.bf16 %v2401_v43, %v2401_v43 }
  0xe9   : > { %v751_v47 = vshrl.u32 %v6970_v35, 16  ;;  %v754_v49 = vshll.u32 %v6970_v35, 16  ;;  %v4793_v45 = vunpack.c.l.b16 %v6970_v35  ;;  %v2434_v56 = vpack.c.bf16 %v2402_v26, %v2402_v26 }
  0xea   : > { %v2731_v57 = vrot.slane %v2633_v23, 1  ;;  %v2733_v62 = vrot.slane %v2634_v44, 1  ;;  %v2989_v1 = vpack.c.bf16 %v2941_v48, %v2941_v48  ;;  %v2599_v0 = vunpack.c.l.bf16 %v2433_v55 }
  0xeb   : > { %v753_v2 = vrot.slane %v751_v47, 7  ;;  %v2990_v52 = vpack.c.bf16 %v2942_v32, %v2942_v32  ;;  %v2991_v5 = vpack.c.bf16 %v2943_v46, %v2943_v46  ;;  %v2600_v20 = vunpack.c.l.bf16 %v2434_v56  ;;  %v6247_v32 = vld [vmem:[%s6561_s12 + $0x70] sm:$0xff]  ;;  %v4040_v47 = vld [vmem:[#allocation2 + $0x24] sm:$0xe] }
  0xec   : > { %v2732_v11 = vsel %vm1586_vm2, %v2730_v38, %v2731_v57  ;;  %v2734_v18 = vsel %vm1586_vm2, %v2731_v57, %v2733_v62  ;;  %v3069_v31 = vunpack.c.l.bf16 %v2989_v1  ;;  %v3378_v39 = vunpack.c.l.bf16 %v3342_v6 }
  0xed   : > { %v756_v36 = vor.u32 %v754_v49, %v753_v2  ;;  %v758_v13 = vrot.slane %v753_v2, 4  ;;  %v2839_v27 = vadd.f32 %v2732_v11, %v2599_v0  ;;  %v3070_v28 = vunpack.c.l.bf16 %v2990_v52 }
  0xee   : > { %v2840_v30 = vadd.f32 %v2734_v18, %v2600_v20  ;;  %v3071_v7 = vunpack.c.l.bf16 %v2991_v5  ;;  %v3167_v34 = vrot.slane %v3069_v31, 2  ;;  %v3379_v43 = vunpack.c.h.bf16 %v3342_v6  ;;  %v516_v26 = vpop.f32.mrf.mxu0 }
  0xef   : > { %v757_v51 = vsel %vm6730_vm9, %v749_v37, %v756_v36  ;;  %v1023_v60 = vsel %vm6742_vm10, %v758_v13, %v1022_v10  ;;  %v2871_v41 = vpack.c.bf16 %v2839_v27, %v2839_v27  ;;  %v3168_v42 = vrot.slane %v3070_v28, 2 }
  0xf0   : > { %1021 = vst.msk [vmem:[#allocation2 + $0x4c] sm:$0xf] %vm598_vm1, %v757_v51  ;;  %v2872_v48 = vpack.c.bf16 %v2840_v30, %v2840_v30  ;;  %v3170_v61 = vrot.slane %v3071_v7, 2  ;;  %v3411_v23 = vmul.f32 %v6802_v14, %v3378_v39  ;;  %v3622_v46 = vunpack.c.l.bf16 %v3602_v22 }
  0xf1   : > { %1024 = vst [vmem:[#allocation2 + $0x50] sm:$0x1] %v1023_v60  ;;  %v3036_v44 = vunpack.c.l.bf16 %v2871_v41  ;;  %v3169_v38 = vsel %vm2025_vm6, %v3167_v34, %v3168_v42  ;;  %v3641_v37 = vmul.f32 %v6804_v16, %v3378_v39  ;;  %6177 = vmatmul.msk.bf16.gmra.mxu0 %vm428_vm0, %v6247_v32  ;;  %v3412_v56 = vmul.f32 %v6802_v14, %v3379_v43 }
  0xf2   : > { %v3037_v49 = vunpack.c.l.bf16 %v2872_v48  ;;  %v3171_v55 = vsel %vm2025_vm6, %v3168_v42, %v3170_v61  ;;  %v3443_v57 = vpack.c.bf16 %v3411_v23, %v3411_v23  ;;  %v3642_v1 = vmul.f32 %v6804_v16, %v3379_v43 }
  0xf3   : > { %v3276_v62 = vadd.f32 %v3169_v38, %v3036_v44  ;;  %v3643_v2 = vmul.f32 %v6804_v16, %v3622_v46  ;;  %v3689_v0 = vpack.c.bf16 %v3641_v37, %v3641_v37  ;;  %v3444_v5 = vpack.c.bf16 %v3412_v56, %v3412_v56 }
  0xf4   : > { %v3277_v52 = vadd.f32 %v3171_v55, %v3037_v49  ;;  %v3507_v6 = vunpack.c.l.bf16 %v3443_v57  ;;  %v4060_v10 = vunpack.c.l.bf16 %v4040_v47  ;;  %v3690_v11 = vpack.c.bf16 %v3642_v1, %v3642_v1 }
  0xf5   : > { %v3308_v20 = vpack.c.bf16 %v3276_v62, %v3276_v62  ;;  %v3691_v18 = vpack.c.bf16 %v3643_v2, %v3643_v2  ;;  %v3769_v31 = vunpack.c.l.bf16 %v3689_v0  ;;  %v3508_v13 = vunpack.c.l.bf16 %v3444_v5 }
  0xf6   : > { %v3309_v36 = vpack.c.bf16 %v3277_v52, %v3277_v52  ;;  %v4079_v27 = vmul.f32 %v6793_v9, %v4060_v10  ;;  %v4080_v28 = vmul.f32 %v6793_v9, %v3379_v43  ;;  %v3770_v7 = vunpack.c.l.bf16 %v3690_v11  ;;  %v518_v37 = vpop.f32.mrf.mxu0 }
  0xf7   : > { %v3475_v30 = vunpack.c.l.bf16 %v3308_v20  ;;  %v3771_v34 = vunpack.c.l.bf16 %v3691_v18  ;;  %v3867_v39 = vrot.slane %v3769_v31, 1  ;;  %v4081_v32 = vmul.f32 %v6793_v9, %v3622_v46 }
  0xf8   : > { %v3476_v22 = vunpack.c.l.bf16 %v3309_v36  ;;  %v4127_v51 = vpack.c.bf16 %v4079_v27, %v4079_v27  ;;  %v4128_v60 = vpack.c.bf16 %v4080_v28, %v4080_v28  ;;  %v3868_v42 = vrot.slane %v3770_v7, 1  ;;  %v1025_v7 = vld [vmem:[#allocation2 + $0x54] sm:$0xf] }
  0xf9   : > { %v3539_v41 = vadd.f32 %v3507_v6, %v3475_v30  ;;  %v3870_v48 = vrot.slane %v3771_v34, 1  ;;  %v6999_v61 = vpack.c.b16 %v4793_v45, %v4792_v4  ;;  %v4129_v43 = vpack.c.bf16 %v4081_v32, %v4081_v32  ;;  %v1327_v4 = vld [vmem:[#allocation2 + $0x20] sm:$0x1] }
  0xfa   : > { %v3540_v23 = vadd.f32 %v3508_v13, %v3476_v22  ;;  %v4207_v44 = vunpack.c.l.bf16 %v4127_v51  ;;  %v4208_v38 = vunpack.c.l.bf16 %v4128_v60  ;;  %v3869_v49 = vsel %vm1586_vm2, %v3867_v39, %v3868_v42 }
  0xfb   : > { %8469 = vst [vmem:[#allocation4_spill] sm:$0xff] %v6999_v61  ;;  %v3571_v47 = vpack.c.bf16 %v3539_v41, %v3539_v41  ;;  %5272 = vrot.lane.b32.xlu0 %v6999_v61, %s6495_s10  ;;  %5096 = vrot.lane.b32.xlu1 %v6999_v61, %s6494_s23  ;;  %v4209_v53 = vunpack.c.l.bf16 %v4129_v43  ;;  %v7006_v56 = vpack.c.bf16 %v516_v26, %v516_v26  ;;  %v1347_v20 = vunpack.c.l.bf16 %v1327_v4  ;;  %v1029_v41 = vld [vmem:[#allocation2 + $0x5c] sm:$0x1] }
  0xfc   : > { %v3572_v46 = vpack.c.bf16 %v3540_v23, %v3540_v23  ;;  %v4305_v55 = vrot.slane %v4207_v44, 2  ;;  %v4306_v35 = vrot.slane %v4208_v38, 2  ;;  %v7008_v57 = vpack.c.bf16 %v518_v37, %v518_v37 }
  0xfd   : > { %v3736_v45 = vunpack.c.l.bf16 %v3571_v47  ;;  %v1169_v62 = vmul.f32 %v6856_v58, %v6631_v24  ;;  %v3871_v2 = vsel %vm1586_vm2, %v3868_v42, %v3870_v48  ;;  %v4308_v0 = vrot.slane %v4209_v53, 2 }
  0xfe   : > { %v3737_v1 = vunpack.c.l.bf16 %v3572_v46  ;;  %v1170_v52 = vmul.f32 %v6858_v59, %v6631_v24  ;;  %v4307_v6 = vsel %vm2025_vm6, %v4305_v55, %v4306_v35  ;;  %v760_v10 = vshrl.u32 %v7006_v56, 16  ;;  %v1766_v46 = vld [vmem:[#allocation2 + $0x18] sm:$0xe] }
  0xff   : > { %v3976_v5 = vadd.f32 %v3869_v49, %v3736_v45  ;;  %v4309_v11 = vsel %vm2025_vm6, %v4306_v35, %v4308_v0  ;;  %v763_v18 = vshll.u32 %v7006_v56, 16  ;;  %v768_v31 = vshrl.u32 %v7008_v57, 16 }
 0x100   : > { %v3977_v26 = vadd.f32 %v3871_v2, %v3737_v1  ;;  %v762_v13 = vrot.slane %v760_v10, 7  ;;  %v771_v27 = vshll.u32 %v7008_v57, 16  ;;  %v1297_v28 = vpack.c.bf16 %v1169_v62, %v1169_v62 }
 0x101   : > { %v4008_v36 = vpack.c.bf16 %v3976_v5, %v3976_v5  ;;  %v770_v34 = vrot.slane %v768_v31, 7  ;;  %v1298_v39 = vpack.c.bf16 %v1170_v52, %v1170_v52  ;;  %v1368_v22 = vmul.f32 %v6856_v58, %v6610_v17 }
 0x102   : > { %v4009_v30 = vpack.c.bf16 %v3977_v26, %v3977_v26  ;;  %v765_v51 = vor.u32 %v763_v18, %v762_v13  ;;  %v766_v60 = vrot.slane %v762_v13, 4  ;;  %v1369_v42 = vmul.f32 %v6858_v59, %v6610_v17 }
 0x103   : > { %v4174_v32 = vunpack.c.l.bf16 %v4008_v36  ;;  %v773_v23 = vor.u32 %v771_v27, %v770_v34  ;;  %v775_v43 = vrot.slane %v770_v34, 4  ;;  %v1370_v44 = vmul.f32 %v6610_v17, %v1347_v20 }
 0x104   : > { %v4175_v48 = vunpack.c.l.bf16 %v4009_v30  ;;  %v1026_v37 = vsel %vm6697_vm5, %v765_v51, %v1025_v7  ;;  %v1416_v47 = vpack.c.bf16 %v1368_v22, %v1368_v22  ;;  %v1417_v49 = vpack.c.bf16 %v1369_v42, %v1369_v42 }
 0x105   : > { %v4414_v38 = vadd.f32 %v4307_v6, %v4174_v32  ;;  %1027 = vst [vmem:[#allocation2 + $0x54] sm:$0xf] %v1026_v37  ;;  %v774_v53 = vsel %vm6730_vm9, %v766_v60, %v773_v23  ;;  %v1030_v55 = vsel %vm6742_vm10, %v775_v43, %v1029_v41  ;;  %v1418_v35 = vpack.c.bf16 %v1370_v44, %v1370_v44  ;;  %v2206_v6 = vld [vmem:[#allocation2 + $0x24] sm:$0xff]  }
 0x106   : > { %v4415_v58 = vadd.f32 %v4309_v11, %v4175_v48  ;;  %1028 = vst.msk [vmem:[#allocation2 + $0x58] sm:$0xf] %vm598_vm1, %v774_v53  ;;  %v1462_v45 = vunpack.c.l.bf16 %v1297_v28  ;;  %v1463_v62 = vunpack.c.l.bf16 %v1298_v39  ;;  %v1496_v1 = vunpack.c.l.bf16 %v1416_v47  ;;  %v2466_v39 = vld [vmem:[#allocation2 + $0x2c] sm:$0x1] }
 0x107   : > { %v4446_v4 = vpack.c.bf16 %v4414_v38, %v4414_v38  ;;  %1031 = vst [vmem:[#allocation2 + $0x5c] sm:$0x1] %v1030_v55  ;;  %v1497_v0 = vunpack.c.l.bf16 %v1417_v49  ;;  %v1498_v52 = vunpack.c.l.bf16 %v1418_v35  ;;  %v1786_v5 = vunpack.c.l.bf16 %v1766_v46 }
 0x108   : > { %v4447_v2 = vpack.c.bf16 %v4415_v58, %v4415_v58  ;;  %v1597_v26 = vrot.slane %v1496_v1, 1  ;;  %v1808_v11 = vmul.f32 %v6858_v59, %v6647_v33  ;;  %v1809_v18 = vmul.f32 %v6647_v33, %v1347_v20  ;;  %v2903_v1 = vld [vmem:[#allocation2 + $0x24] sm:$0xe] }
 0x109   : > { %v4516_v10 = vunpack.c.l.b16 %v4446_v4  ;;  %v1598_v36 = vrot.slane %v1497_v0, 1  ;;  %v1600_v13 = vrot.slane %v1498_v52, 1  ;;  %v1807_v27 = vmul.f32 %v6647_v33, %v1786_v5 }
 0x10a   : > { %v4517_v31 = vunpack.c.l.b16 %v4447_v2  ;;  %v1856_v28 = vpack.c.bf16 %v1808_v11, %v1808_v11  ;;  %v1857_v30 = vpack.c.bf16 %v1809_v18, %v1809_v18  ;;  %v2242_v7 = vunpack.c.l.bf16 %v2206_v6 }
 0x10b   : > { %v2243_v34 = vunpack.c.h.bf16 %v2206_v6  ;;  %v1599_v32 = vsel %vm1586_vm2, %v1597_v26, %v1598_v36  ;;  %v1601_v51 = vsel %vm1586_vm2, %v1598_v36, %v1600_v13  ;;  %v1855_v60 = vpack.c.bf16 %v1807_v27, %v1807_v27 }
 0x10c   : > { %v4547_v22 = vpack.c.b16 %v4517_v31, %v4516_v10  ;;  %v1703_v41 = vadd.f32 %v1599_v32, %v1462_v45  ;;  %v1704_v59 = vadd.f32 %v1601_v51, %v1463_v62  ;;  %v1936_v42 = vunpack.c.l.bf16 %v1856_v28 }
 0x10d   : > { %v1937_v20 = vunpack.c.l.bf16 %v1857_v30  ;;  %v1935_v48 = vunpack.c.l.bf16 %v1855_v60  ;;  %v2275_v23 = vmul.f32 %v6783_v63, %v2242_v7  ;;  %v2276_v43 = vmul.f32 %v6783_v63, %v2243_v34  ;;  %v6365_v60 = vld [vmem:[#allocation2 + $0x30] sm:$0xff]  }
 0x10e   : > { %6192 = vmatmul.msk.bf16.gmra.mxu1 %vm4580_vm11, %v4547_v22  ;;  %v2486_v44 = vunpack.c.l.bf16 %v2466_v39  ;;  %v1735_v38 = vpack.c.bf16 %v1703_v41, %v1703_v41  ;;  %v1736_v37 = vpack.c.bf16 %v1704_v59, %v1704_v59  ;;  %v2037_v47 = vrot.slane %v1936_v42, 2 }
 0x10f   : > { %v2039_v49 = vrot.slane %v1937_v20, 2  ;;  %v2036_v46 = vrot.slane %v1935_v48, 2  ;;  %v2307_v58 = vpack.c.bf16 %v2275_v23, %v2275_v23  ;;  %v2308_v53 = vpack.c.bf16 %v2276_v43, %v2276_v43 }
 0x110   : > { %v2507_v55 = vmul.f32 %v6787_v3, %v2242_v7  ;;  %v1901_v35 = vunpack.c.l.bf16 %v1735_v38  ;;  %v1902_v4 = vunpack.c.l.bf16 %v1736_v37  ;;  %v2508_v62 = vmul.f32 %v6787_v3, %v2243_v34 }
 0x111   : > { %v2040_v45 = vsel %vm2025_vm6, %v2037_v47, %v2039_v49  ;;  %v2038_v2 = vsel %vm2025_vm6, %v2036_v46, %v2037_v47  ;;  %v2371_v0 = vunpack.c.l.bf16 %v2307_v58  ;;  %v2372_v52 = vunpack.c.l.bf16 %v2308_v53  ;;  %v3603_v49 = vld [vmem:[#allocation2 + $0x38] sm:$0x1] }
 0x112   : > { %v2509_v5 = vmul.f32 %v6787_v3, %v2486_v44  ;;  %v2142_v6 = vadd.f32 %v2038_v2, %v1901_v35  ;;  %v2143_v10 = vadd.f32 %v2040_v45, %v1902_v4  ;;  %v2555_v26 = vpack.c.bf16 %v2507_v55, %v2507_v55 }
 0x113   : > { %v2556_v11 = vpack.c.bf16 %v2508_v62, %v2508_v62  ;;  %v2923_v31 = vunpack.c.l.bf16 %v2903_v1  ;;  %v2945_v36 = vmul.f32 %v6750_v25, %v2243_v34  ;;  %v2946_v13 = vmul.f32 %v6750_v25, %v2486_v44 }
 0x114   : > { %v2557_v18 = vpack.c.bf16 %v2509_v5, %v2509_v5  ;;  %v2174_v27 = vpack.c.bf16 %v2142_v6, %v2142_v6  ;;  %v2175_v28 = vpack.c.bf16 %v2143_v10, %v2143_v10  ;;  %v2635_v30 = vunpack.c.l.bf16 %v2555_v26  ;;  %v4041_v10 = vld [vmem:[#allocation2 + $0x30] sm:$0xe] }
 0x115   : > { %v2636_v7 = vunpack.c.l.bf16 %v2556_v11  ;;  %v2944_v22 = vmul.f32 %v6750_v25, %v2923_v31  ;;  %v2993_v32 = vpack.c.bf16 %v2945_v36, %v2945_v36  ;;  %v2994_v51 = vpack.c.bf16 %v2946_v13, %v2946_v13 }
 0x116   : > { %v2637_v39 = vunpack.c.l.bf16 %v2557_v18  ;;  %v2339_v41 = vunpack.c.l.bf16 %v2174_v27  ;;  %v2340_v59 = vunpack.c.l.bf16 %v2175_v28  ;;  %v2735_v42 = vrot.slane %v2635_v30, 1  ;;  %v521_v30 = vpop.f32.mrf.mxu0 }
 0x117   : > { %v2736_v20 = vrot.slane %v2636_v7, 1  ;;  %v2992_v23 = vpack.c.bf16 %v2944_v22, %v2944_v22  ;;  %v3073_v43 = vunpack.c.l.bf16 %v2993_v32  ;;  %v3074_v34 = vunpack.c.l.bf16 %v2994_v51  ;;  %v6248_v7 = vld [vmem:[%s6561_s12 + $0x78] sm:$0xff] }
 0x118   : > { %v2738_v48 = vrot.slane %v2637_v39, 1  ;;  %v4794_v44 = vunpack.c.l.b16 %v7006_v56  ;;  %v2403_v38 = vadd.f32 %v2371_v0, %v2339_v41  ;;  %v2404_v37 = vadd.f32 %v2372_v52, %v2340_v59  ;;  %6178 = vmatmul.msk.bf16.gmra.mxu0 %vm428_vm0, %v6248_v7 }
 0x119   : > { %v7051_v47 = vunpack.c.l.bf16 %v6365_v60  ;;  %v4795_v46 = vunpack.c.l.b16 %v7008_v57  ;;  %v3072_v58 = vunpack.c.l.bf16 %v2992_v23  ;;  %v3173_v53 = vrot.slane %v3073_v43, 2 }
 0x11a   : > { %v3175_v55 = vrot.slane %v3074_v34, 2  ;;  %v2435_v35 = vpack.c.bf16 %v2403_v38, %v2403_v38  ;;  %v2436_v4 = vpack.c.bf16 %v2404_v37, %v2404_v37  ;;  %v7054_v45 = vunpack.c.h.bf16 %v6365_v60 }
 0x11b   : > { %v3413_v62 = vmul.f32 %v7051_v47, %v6802_v14  ;;  %v2737_v1 = vsel %vm1586_vm2, %v2735_v42, %v2736_v20  ;;  %v2739_v56 = vsel %vm1586_vm2, %v2736_v20, %v2738_v48  ;;  %v3623_v2 = vunpack.c.l.bf16 %v3603_v49 }
 0x11c   : > { %v3644_v0 = vmul.f32 %v7051_v47, %v6804_v16  ;;  %v2601_v57 = vunpack.c.l.bf16 %v2435_v35  ;;  %v2602_v52 = vunpack.c.l.bf16 %v2436_v4  ;;  %v3172_v5 = vrot.slane %v3072_v58, 2 }
 0x11d   : > { %v3414_v6 = vmul.f32 %v7054_v45, %v6802_v14  ;;  %v3176_v26 = vsel %vm2025_vm6, %v3173_v53, %v3175_v55  ;;  %v3645_v11 = vmul.f32 %v7054_v45, %v6804_v16  ;;  %v3646_v18 = vmul.f32 %v6804_v16, %v3623_v2 }
 0x11e   : > { %v3692_v31 = vpack.c.bf16 %v3644_v0, %v3644_v0  ;;  %v2841_v36 = vadd.f32 %v2737_v1, %v2601_v57  ;;  %v2842_v13 = vadd.f32 %v2739_v56, %v2602_v52  ;;  %v3174_v27 = vsel %vm2025_vm6, %v3172_v5, %v3173_v53 }
 0x11f   : > { %v3445_v28 = vpack.c.bf16 %v3413_v62, %v3413_v62  ;;  %v3693_v39 = vpack.c.bf16 %v3645_v11, %v3645_v11  ;;  %v3694_v22 = vpack.c.bf16 %v3646_v18, %v3646_v18  ;;  %v4061_v51 = vunpack.c.l.bf16 %v4041_v10  ;;  %v523_v18 = vpop.f32.mrf.mxu0 }
 0x120   : > { %v3772_v32 = vunpack.c.l.bf16 %v3692_v31  ;;  %v2873_v60 = vpack.c.bf16 %v2841_v36, %v2841_v36  ;;  %v2874_v41 = vpack.c.bf16 %v2842_v13, %v2842_v13  ;;  %v3446_v59 = vpack.c.bf16 %v3414_v6, %v3414_v6  ;;  %v1102_v31 = vld [vmem:[#allocation2 + $0x24] sm:$0xff]  }
 0x121   : > { %v4083_v42 = vmul.f32 %v7054_v45, %v6793_v9  ;;  %v3773_v20 = vunpack.c.l.bf16 %v3693_v39  ;;  %v3774_v48 = vunpack.c.l.bf16 %v3694_v22  ;;  %v4082_v43 = vmul.f32 %v6793_v9, %v4061_v51 }
 0x122   : > { %v3872_v23 = vrot.slane %v3772_v32, 1  ;;  %v3038_v34 = vunpack.c.l.bf16 %v2873_v60  ;;  %v3039_v38 = vunpack.c.l.bf16 %v2874_v41  ;;  %v4084_v37 = vmul.f32 %v6793_v9, %v3623_v2 }
 0x123   : > { %v4131_v49 = vpack.c.bf16 %v4083_v42, %v4083_v42  ;;  %v3873_v58 = vrot.slane %v3773_v20, 1  ;;  %v3875_v53 = vrot.slane %v3774_v48, 1  ;;  %v4130_v55 = vpack.c.bf16 %v4082_v43, %v4082_v43  ;;  %v1328_v20 = vld [vmem:[#allocation2 + $0x2c] sm:$0x1] }
 0x124   : > { %v7075_v35 = vpack.c.b16 %v4795_v46, %v4794_v44  ;;  %v3278_v4 = vadd.f32 %v3174_v27, %v3038_v34  ;;  %v3279_v62 = vadd.f32 %v3176_v26, %v3039_v38  ;;  %v4132_v1 = vpack.c.bf16 %v4084_v37, %v4084_v37 }
 0x125   : > { %v4211_v56 = vunpack.c.l.bf16 %v4131_v49  ;;  %v3509_v0 = vunpack.c.l.bf16 %v3445_v28  ;;  %v3510_v57 = vunpack.c.l.bf16 %v3446_v59  ;;  %v4210_v52 = vunpack.c.l.bf16 %v4130_v55  ;;  %v1032_v59 = vld [vmem:[#allocation2 + $0x60] sm:$0xf]  ;;  %v1036_v55 = vld [vmem:[#allocation2 + $0x68] sm:$0x1] }
 0x126   : > { %8470 = vst [vmem:[#allocation5_spill] sm:$0xff] %v7075_v35  ;;  %5098 = vrot.lane.b32.xlu0 %v7075_v35, %s6494_s23  ;;  %v7079_v5 = vpack.c.bf16 %v521_v30, %v521_v30  ;;  %v3310_v6 = vpack.c.bf16 %v3278_v4, %v3278_v4  ;;  %v3311_v2 = vpack.c.bf16 %v3279_v62, %v3279_v62  ;;  %v4212_v10 = vunpack.c.l.bf16 %v4132_v1 }
 0x127   : > { %v4311_v11 = vrot.slane %v4211_v56, 2  ;;  %v3874_v44 = vsel %vm1586_vm2, %v3872_v23, %v3873_v58  ;;  %v3876_v46 = vsel %vm1586_vm2, %v3873_v58, %v3875_v53  ;;  %v4310_v26 = vrot.slane %v4210_v52, 2 }
 0x128   : > { %v777_v36 = vshrl.u32 %v7079_v5, 16  ;;  %v3477_v13 = vunpack.c.l.bf16 %v3310_v6  ;;  %v3478_v27 = vunpack.c.l.bf16 %v3311_v2  ;;  %v4313_v28 = vrot.slane %v4212_v10, 2 }
 0x129   : > { %v7084_v7 = vpack.c.bf16 %v523_v18, %v523_v18  ;;  %v780_v39 = vshll.u32 %v7079_v5, 16  ;;  %v1138_v22 = vunpack.c.l.bf16 %v1102_v31  ;;  %v1139_v32 = vunpack.c.h.bf16 %v1102_v31  ;;  %v1767_v18 = vld [vmem:[#allocation2 + $0x24] sm:$0xe] }
 0x12a   : > { %v779_v30 = vrot.slane %v777_v36, 7  ;;  %v3541_v51 = vadd.f32 %v3509_v0, %v3477_v13  ;;  %v3542_v60 = vadd.f32 %v3510_v57, %v3478_v27  ;;  %v4312_v41 = vsel %vm2025_vm6, %v4310_v26, %v4311_v11 }
 0x12b   : > { %v785_v42 = vshrl.u32 %v7084_v7, 16  ;;  %v4314_v48 = vsel %vm2025_vm6, %v4311_v11, %v4313_v28  ;;  %v788_v34 = vshll.u32 %v7084_v7, 16  ;;  %v1171_v58 = vmul.f32 %v6631_v24, %v1138_v22 }
 0x12c   : > { %v782_v23 = vor.u32 %v780_v39, %v779_v30  ;;  %v783_v43 = vrot.slane %v779_v30, 4  ;;  %v3573_v38 = vpack.c.bf16 %v3541_v51, %v3541_v51  ;;  %v3574_v37 = vpack.c.bf16 %v3542_v60, %v3542_v60 }
 0x12d   : > { %v787_v49 = vrot.slane %v785_v42, 7  ;;  %v1172_v4 = vmul.f32 %v6631_v24, %v1139_v32  ;;  %v1348_v62 = vunpack.c.l.bf16 %v1328_v20  ;;  %v1371_v1 = vmul.f32 %v6610_v17, %v1138_v22 }
 0x12e   : > { %v1033_v53 = vsel %vm6697_vm5, %v782_v23, %v1032_v59  ;;  %5274 = vrot.lane.b32.xlu0 %v7075_v35, %s6495_s10  ;;  %v3738_v56 = vunpack.c.l.bf16 %v3573_v38  ;;  %v3739_v0 = vunpack.c.l.bf16 %v3574_v37  ;;  %v1299_v6 = vpack.c.bf16 %v1171_v58, %v1171_v58 }
 0x12f   : > { %1034 = vst [vmem:[#allocation2 + $0x60] sm:$0xf] %v1033_v53  ;;  %v790_v57 = vor.u32 %v788_v34, %v787_v49  ;;  %v792_v52 = vrot.slane %v787_v49, 4  ;;  %v1300_v2 = vpack.c.bf16 %v1172_v4, %v1172_v4  ;;  %v1372_v10 = vmul.f32 %v6610_v17, %v1139_v32 }
 0x130   : > { %v1373_v11 = vmul.f32 %v6610_v17, %v1348_v62  ;;  %v3978_v31 = vadd.f32 %v3874_v44, %v3738_v56  ;;  %v3979_v26 = vadd.f32 %v3876_v46, %v3739_v0  ;;  %v1419_v27 = vpack.c.bf16 %v1371_v1, %v1371_v1 }
 0x131   : > { %v791_v36 = vsel %vm6730_vm9, %v783_v43, %v790_v57  ;;  %v1037_v13 = vsel %vm6742_vm10, %v792_v52, %v1036_v55  ;;  %v1420_v28 = vpack.c.bf16 %v1372_v10, %v1372_v10  ;;  %v1464_v39 = vunpack.c.l.bf16 %v1299_v6 }
 0x132   : > { %1035 = vst.msk [vmem:[#allocation2 + $0x64] sm:$0xf] %vm598_vm1, %v791_v36  ;;  %v1421_v30 = vpack.c.bf16 %v1373_v11, %v1373_v11  ;;  %v4010_v22 = vpack.c.bf16 %v3978_v31, %v3978_v31  ;;  %v4011_v51 = vpack.c.bf16 %v3979_v26, %v3979_v26  ;;  %v1465_v60 = vunpack.c.l.bf16 %v1300_v2 }
 0x133   : > { %1038 = vst [vmem:[#allocation2 + $0x68] sm:$0x1] %v1037_v13  ;;  %v1787_v59 = vunpack.c.l.bf16 %v1767_v18  ;;  %v1499_v42 = vunpack.c.l.bf16 %v1419_v27  ;;  %v1500_v44 = vunpack.c.l.bf16 %v1420_v28  ;;  %v1811_v20 = vmul.f32 %v6647_v33, %v1139_v32 }
 0x134   : > { %v1501_v46 = vunpack.c.l.bf16 %v1421_v30  ;;  %v4176_v23 = vunpack.c.l.bf16 %v4010_v22  ;;  %v4177_v43 = vunpack.c.l.bf16 %v4011_v51  ;;  %v1812_v38 = vmul.f32 %v6647_v33, %v1348_v62 }
 0x135   : > { %v1810_v34 = vmul.f32 %v6647_v33, %v1787_v59  ;;  %v1602_v37 = vrot.slane %v1499_v42, 1  ;;  %v1603_v49 = vrot.slane %v1500_v44, 1  ;;  %v1859_v53 = vpack.c.bf16 %v1811_v20, %v1811_v20 }
 0x136   : > { %v1605_v58 = vrot.slane %v1501_v46, 1  ;;  %v4416_v55 = vadd.f32 %v4312_v41, %v4176_v23  ;;  %v4417_v4 = vadd.f32 %v4314_v48, %v4177_v43  ;;  %v1860_v56 = vpack.c.bf16 %v1812_v38, %v1812_v38  ;;  %v2467_v48 = vld [vmem:[#allocation2 + $0x38] sm:$0x1] }
 0x137   : > { %v1858_v1 = vpack.c.bf16 %v1810_v34, %v1810_v34  ;;  %v1604_v0 = vsel %vm1586_vm2, %v1602_v37, %v1603_v49  ;;  %v1939_v52 = vunpack.c.l.bf16 %v1859_v53  ;;  %v2277_v32 = vmul.f32 %v7051_v47, %v6783_v63 }
 0x138   : > { %v1606_v57 = vsel %vm1586_vm2, %v1603_v49, %v1605_v58  ;;  %v4448_v6 = vpack.c.bf16 %v4416_v55, %v4416_v55  ;;  %v4449_v2 = vpack.c.bf16 %v4417_v4, %v4417_v4  ;;  %v1705_v10 = vadd.f32 %v1604_v0, %v1464_v39 }
 0x139   : > { %v1706_v62 = vadd.f32 %v1606_v57, %v1465_v60  ;;  %v1938_v11 = vunpack.c.l.bf16 %v1858_v1  ;;  %v1940_v18 = vunpack.c.l.bf16 %v1860_v56  ;;  %v2042_v31 = vrot.slane %v1939_v52, 2  ;;  %v2904_v60 = vld [vmem:[#allocation2 + $0x30] sm:$0xe] }
 0x13a   : > { %v2278_v41 = vmul.f32 %v7054_v45, %v6783_v63  ;;  %v4518_v26 = vunpack.c.l.b16 %v4448_v6  ;;  %v4519_v36 = vunpack.c.l.b16 %v4449_v2  ;;  %v1737_v13 = vpack.c.bf16 %v1705_v10, %v1705_v10 }
 0x13b   : > { %v1738_v27 = vpack.c.bf16 %v1706_v62, %v1706_v62  ;;  %v2041_v28 = vrot.slane %v1938_v11, 2  ;;  %v2044_v30 = vrot.slane %v1940_v18, 2  ;;  %v2309_v22 = vpack.c.bf16 %v2277_v32, %v2277_v32 }
 0x13c   : > { %v2310_v51 = vpack.c.bf16 %v2278_v41, %v2278_v41  ;;  %v4548_v59 = vpack.c.b16 %v4519_v36, %v4518_v26  ;;  %v1903_v42 = vunpack.c.l.bf16 %v1737_v13  ;;  %v2487_v39 = vunpack.c.l.bf16 %v2467_v48  ;;  %v3346_v36 = vld [vmem:[#allocation2 + $0x3c] sm:$0xff]  }
 0x13d   : > { %v1904_v44 = vunpack.c.l.bf16 %v1738_v27  ;;  %v2043_v46 = vsel %vm2025_vm6, %v2041_v28, %v2042_v31  ;;  %v2045_v20 = vsel %vm2025_vm6, %v2042_v31, %v2044_v30  ;;  %v2373_v23 = vunpack.c.l.bf16 %v2309_v22 }
 0x13e   : > { %v2374_v43 = vunpack.c.l.bf16 %v2310_v51  ;;  %6193 = vmatmul.msk.bf16.gmra.mxu1 %vm4580_vm11, %v4548_v59  ;;  %v2144_v34 = vadd.f32 %v2043_v46, %v1903_v42  ;;  %v2510_v37 = vmul.f32 %v7051_v47, %v6787_v3  ;;  %v2511_v49 = vmul.f32 %v7054_v45, %v6787_v3 }
 0x13f   : > { %v2145_v38 = vadd.f32 %v2045_v20, %v1904_v44  ;;  %v2512_v58 = vmul.f32 %v6787_v3, %v2487_v39  ;;  %v2924_v53 = vunpack.c.l.bf16 %v2904_v60  ;;  %v2948_v55 = vmul.f32 %v7054_v45, %v6750_v25  ;;  %v3604_v44 = vld [vmem:[#allocation2 + $0x44] sm:$0x1] }
 0x140   : > { %v2949_v4 = vmul.f32 %v6750_v25, %v2487_v39  ;;  %v2176_v1 = vpack.c.bf16 %v2144_v34, %v2144_v34  ;;  %v2558_v0 = vpack.c.bf16 %v2510_v37, %v2510_v37  ;;  %v2559_v57 = vpack.c.bf16 %v2511_v49, %v2511_v49 }
 0x141   : > { %v2177_v56 = vpack.c.bf16 %v2145_v38, %v2145_v38  ;;  %v2560_v52 = vpack.c.bf16 %v2512_v58, %v2512_v58  ;;  %v2947_v32 = vmul.f32 %v6750_v25, %v2924_v53  ;;  %v2996_v6 = vpack.c.bf16 %v2948_v55, %v2948_v55  ;;  %v4042_v53 = vld [vmem:[#allocation2 + $0x3c] sm:$0xe] }
 0x142   : > { %v2997_v2 = vpack.c.bf16 %v2949_v4, %v2949_v4  ;;  %v2341_v10 = vunpack.c.l.bf16 %v2176_v1  ;;  %v2638_v11 = vunpack.c.l.bf16 %v2558_v0  ;;  %v2639_v18 = vunpack.c.l.bf16 %v2559_v57 }
 0x143   : > { %v2342_v62 = vunpack.c.l.bf16 %v2177_v56  ;;  %v2640_v31 = vunpack.c.l.bf16 %v2560_v52  ;;  %v2995_v41 = vpack.c.bf16 %v2947_v32, %v2947_v32  ;;  %v3076_v48 = vunpack.c.l.bf16 %v2996_v6  ;;  %v526_v32 = vpop.f32.mrf.mxu0 }
 0x144   : > { %v3077_v26 = vunpack.c.l.bf16 %v2997_v2  ;;  %v2405_v13 = vadd.f32 %v2373_v23, %v2341_v10  ;;  %v2740_v28 = vrot.slane %v2638_v11, 1  ;;  %v2741_v30 = vrot.slane %v2639_v18, 1 }
 0x145   : > { %v2406_v27 = vadd.f32 %v2374_v43, %v2342_v62  ;;  %v4796_v22 = vunpack.c.l.b16 %v7079_v5  ;;  %v2743_v51 = vrot.slane %v2640_v31, 1  ;;  %v3075_v59 = vunpack.c.l.bf16 %v2995_v41 }
 0x146   : > { %v3178_v42 = vrot.slane %v3076_v48, 2  ;;  %v2437_v39 = vpack.c.bf16 %v2405_v13, %v2405_v13  ;;  %v3180_v46 = vrot.slane %v3077_v26, 2  ;;  %v3382_v20 = vunpack.c.l.bf16 %v3346_v36 }
 0x147   : > { %v2438_v60 = vpack.c.bf16 %v2406_v27, %v2406_v27  ;;  %v4797_v34 = vunpack.c.l.b16 %v7084_v7  ;;  %v2742_v38 = vsel %vm1586_vm2, %v2740_v28, %v2741_v30  ;;  %v2744_v37 = vsel %vm1586_vm2, %v2741_v30, %v2743_v51 }
 0x148   : > { %v3383_v23 = vunpack.c.h.bf16 %v3346_v36  ;;  %v2603_v43 = vunpack.c.l.bf16 %v2437_v39  ;;  %v3415_v58 = vmul.f32 %v6802_v14, %v3382_v20  ;;  %v3624_v5 = vunpack.c.l.bf16 %v3604_v44 }
 0x149   : > { %v2604_v49 = vunpack.c.l.bf16 %v2438_v60  ;;  %v3177_v55 = vrot.slane %v3075_v59, 2  ;;  %v3647_v1 = vmul.f32 %v6804_v16, %v3382_v20  ;;  %v3181_v57 = vsel %vm2025_vm6, %v3178_v42, %v3180_v46 }
 0x14a   : > { %v3416_v4 = vmul.f32 %v6802_v14, %v3383_v23  ;;  %v3648_v56 = vmul.f32 %v6804_v16, %v3383_v23  ;;  %v2843_v0 = vadd.f32 %v2742_v38, %v2603_v43  ;;  %v3649_v52 = vmul.f32 %v6804_v16, %v3624_v5 }
 0x14b   : > { %v2844_v7 = vadd.f32 %v2744_v37, %v2604_v49  ;;  %v3179_v6 = vsel %vm2025_vm6, %v3177_v55, %v3178_v42  ;;  %v3695_v2 = vpack.c.bf16 %v3647_v1, %v3647_v1  ;;  %v4062_v62 = vunpack.c.l.bf16 %v4042_v53 }
 0x14c   : > { %v3696_v10 = vpack.c.bf16 %v3648_v56, %v3648_v56  ;;  %v2875_v11 = vpack.c.bf16 %v2843_v0, %v2843_v0  ;;  %v3447_v31 = vpack.c.bf16 %v3415_v58, %v3415_v58  ;;  %v3697_v41 = vpack.c.bf16 %v3649_v52, %v3649_v52  ;;  %v528_v56 = vpop.f32.mrf.mxu0 }
 0x14d   : > { %v2876_v18 = vpack.c.bf16 %v2844_v7, %v2844_v7  ;;  %v3448_v48 = vpack.c.bf16 %v3416_v4, %v3416_v4  ;;  %v3775_v26 = vunpack.c.l.bf16 %v3695_v2  ;;  %v4085_v13 = vmul.f32 %v6793_v9, %v4062_v62 }
 0x14e   : > { %v3776_v36 = vunpack.c.l.bf16 %v3696_v10  ;;  %v3040_v27 = vunpack.c.l.bf16 %v2875_v11  ;;  %v3777_v30 = vunpack.c.l.bf16 %v3697_v41  ;;  %v4086_v51 = vmul.f32 %v6793_v9, %v3383_v23  ;;  %v1329_v41 = vld [vmem:[#allocation2 + $0x38] sm:$0x1] }
 0x14f   : > { %v3041_v28 = vunpack.c.l.bf16 %v2876_v18  ;;  %v3877_v59 = vrot.slane %v3775_v26, 1  ;;  %v4087_v42 = vmul.f32 %v6793_v9, %v3624_v5  ;;  %v4133_v39 = vpack.c.bf16 %v4085_v13, %v4085_v13 }
 0x150   : > { %v3878_v44 = vrot.slane %v3776_v36, 1  ;;  %v3280_v60 = vadd.f32 %v3179_v6, %v3040_v27  ;;  %v3880_v20 = vrot.slane %v3777_v30, 1  ;;  %v4134_v38 = vpack.c.bf16 %v4086_v51, %v4086_v51  ;;  %v1039_v30 = vld [vmem:[#allocation2 + $0x6c] sm:$0xf] }
 0x151   : > { %v3281_v46 = vadd.f32 %v3181_v57, %v3041_v28  ;;  %v3511_v37 = vunpack.c.l.bf16 %v3447_v31  ;;  %v4135_v43 = vpack.c.bf16 %v4087_v42, %v4087_v42  ;;  %v4213_v49 = vunpack.c.l.bf16 %v4133_v39  ;;  %v1043_v39 = vld [vmem:[#allocation2 + $0x74] sm:$0x1] }
 0x152   : > { %v7140_v58 = vpack.c.b16 %v4797_v34, %v4796_v22  ;;  %v3312_v53 = vpack.c.bf16 %v3280_v60, %v3280_v60  ;;  %v3512_v4 = vunpack.c.l.bf16 %v3448_v48  ;;  %v4214_v1 = vunpack.c.l.bf16 %v4134_v38 }
 0x153   : > { %v3313_v55 = vpack.c.bf16 %v3281_v46, %v3281_v46  ;;  %v3879_v23 = vsel %vm1586_vm2, %v3877_v59, %v3878_v44  ;;  %v4215_v0 = vunpack.c.l.bf16 %v4135_v43  ;;  %v7147_v5 = vpack.c.bf16 %v526_v32, %v526_v32 }
 0x154   : > { %8471 = vst [vmem:[#allocation6_spill] sm:$0xff] %v7140_v58  ;;  %5100 = vrot.lane.b32.xlu1 %v7140_v58, %s6494_s23  ;;  %5276 = vrot.lane.b32.xlu2 %v7140_v58, %s6495_s10  ;;  %v7149_v7 = vpack.c.bf16 %v528_v56, %v528_v56  ;;  %v3479_v22 = vunpack.c.l.bf16 %v3312_v53  ;;  %v3881_v57 = vsel %vm1586_vm2, %v3878_v44, %v3880_v20  ;;  %v4316_v52 = vrot.slane %v4214_v1, 2  ;;  %v1768_v1 = vld [vmem:[#allocation2 + $0x30] sm:$0xe] }
 0x155   : > { %v3480_v34 = vunpack.c.l.bf16 %v3313_v55  ;;  %v4315_v6 = vrot.slane %v4213_v49, 2  ;;  %v4318_v2 = vrot.slane %v4215_v0, 2  ;;  %v794_v10 = vshrl.u32 %v7147_v5, 16 }
 0x156   : > { %v1173_v62 = vmul.f32 %v7051_v47, %v6631_v24  ;;  %v3543_v11 = vadd.f32 %v3511_v37, %v3479_v22  ;;  %v797_v31 = vshll.u32 %v7147_v5, 16  ;;  %v802_v32 = vshrl.u32 %v7149_v7, 16 }
 0x157   : > { %v3544_v18 = vadd.f32 %v3512_v4, %v3480_v34  ;;  %v4317_v48 = vsel %vm2025_vm6, %v4315_v6, %v4316_v52  ;;  %v4319_v26 = vsel %vm2025_vm6, %v4316_v52, %v4318_v2  ;;  %v796_v36 = vrot.slane %v794_v10, 7 }
 0x158   : > { %v805_v13 = vshll.u32 %v7149_v7, 16  ;;  %v3575_v27 = vpack.c.bf16 %v3543_v11, %v3543_v11  ;;  %v804_v51 = vrot.slane %v802_v32, 7  ;;  %v1174_v59 = vmul.f32 %v7054_v45, %v6631_v24 }
 0x159   : > { %v3576_v28 = vpack.c.bf16 %v3544_v18, %v3544_v18  ;;  %v799_v44 = vor.u32 %v797_v31, %v796_v36  ;;  %v800_v42 = vrot.slane %v796_v36, 4  ;;  %v1301_v60 = vpack.c.bf16 %v1173_v62, %v1173_v62 }
 0x15a   : > { %v1349_v46 = vunpack.c.l.bf16 %v1329_v41  ;;  %v3740_v20 = vunpack.c.l.bf16 %v3575_v27  ;;  %v807_v37 = vor.u32 %v805_v13, %v804_v51  ;;  %v809_v43 = vrot.slane %v804_v51, 4 }
 0x15b   : > { %v3741_v38 = vunpack.c.l.bf16 %v3576_v28  ;;  %v1040_v49 = vsel %vm6697_vm5, %v799_v44, %v1039_v30  ;;  %v1302_v53 = vpack.c.bf16 %v1174_v59, %v1174_v59  ;;  %v1374_v55 = vmul.f32 %v7051_v47, %v6610_v17  ;;  %v2210_v28 = vld [vmem:[#allocation2 + $0x3c] sm:$0xff]  }
 0x15c   : > { %v1375_v4 = vmul.f32 %v7054_v45, %v6610_v17  ;;  %v3980_v56 = vadd.f32 %v3879_v23, %v3740_v20  ;;  %1041 = vst [vmem:[#allocation2 + $0x6c] sm:$0xf] %v1040_v49  ;;  %v808_v22 = vsel %vm6730_vm9, %v800_v42, %v807_v37  ;;  %v1044_v34 = vsel %vm6742_vm10, %v809_v43, %v1043_v39 }
 0x15d   : > { %v3981_v0 = vadd.f32 %v3881_v57, %v3741_v38  ;;  %1042 = vst.msk [vmem:[#allocation2 + $0x70] sm:$0xf] %vm598_vm1, %v808_v22  ;;  %v1376_v52 = vmul.f32 %v6610_v17, %v1349_v46  ;;  %v1422_v6 = vpack.c.bf16 %v1374_v55, %v1374_v55  ;;  %v1466_v47 = vunpack.c.l.bf16 %v1301_v60  ;;  %v2468_v22 = vld [vmem:[#allocation2 + $0x44] sm:$0x1] }
 0x15e   : > { %v1423_v2 = vpack.c.bf16 %v1375_v4, %v1375_v4  ;;  %v4012_v10 = vpack.c.bf16 %v3980_v56, %v3980_v56  ;;  %1045 = vst [vmem:[#allocation2 + $0x74] sm:$0x1] %v1044_v34  ;;  %v1467_v11 = vunpack.c.l.bf16 %v1302_v53  ;;  %v1788_v23 = vunpack.c.l.bf16 %v1768_v1 }
 0x15f   : > { %v4013_v62 = vpack.c.bf16 %v3981_v0, %v3981_v0  ;;  %v1424_v57 = vpack.c.bf16 %v1376_v52, %v1376_v52  ;;  %v1502_v18 = vunpack.c.l.bf16 %v1422_v6  ;;  %v1814_v32 = vmul.f32 %v7054_v45, %v6647_v33 }
 0x160   : > { %v1503_v31 = vunpack.c.l.bf16 %v1423_v2  ;;  %v4178_v41 = vunpack.c.l.bf16 %v4012_v10  ;;  %v1813_v13 = vmul.f32 %v6647_v33, %v1788_v23  ;;  %v1815_v27 = vmul.f32 %v6647_v33, %v1349_v46 }
 0x161   : > { %v4179_v36 = vunpack.c.l.bf16 %v4013_v62  ;;  %v1504_v30 = vunpack.c.l.bf16 %v1424_v57  ;;  %v1607_v51 = vrot.slane %v1502_v18, 1  ;;  %v1862_v44 = vpack.c.bf16 %v1814_v32, %v1814_v32 }
 0x162   : > { %v1608_v59 = vrot.slane %v1503_v31, 1  ;;  %v4418_v42 = vadd.f32 %v4317_v48, %v4178_v41  ;;  %v1861_v60 = vpack.c.bf16 %v1813_v13, %v1813_v13  ;;  %v1863_v20 = vpack.c.bf16 %v1815_v27, %v1815_v27  ;;  %v2905_v31 = vld [vmem:[#allocation2 + $0x3c] sm:$0xe] }
 0x163   : > { %v4419_v39 = vadd.f32 %v4319_v26, %v4179_v36  ;;  %v1610_v37 = vrot.slane %v1504_v30, 1  ;;  %v1942_v43 = vunpack.c.l.bf16 %v1862_v44  ;;  %v2246_v45 = vunpack.c.l.bf16 %v2210_v28 }
 0x164   : > { %v1609_v38 = vsel %vm1586_vm2, %v1607_v51, %v1608_v59  ;;  %v4450_v49 = vpack.c.bf16 %v4418_v42, %v4418_v42  ;;  %v1941_v4 = vunpack.c.l.bf16 %v1861_v60  ;;  %v1943_v1 = vunpack.c.l.bf16 %v1863_v20 }
 0x165   : > { %v4451_v53 = vpack.c.bf16 %v4419_v39, %v4419_v39  ;;  %v1707_v55 = vadd.f32 %v1609_v38, %v1466_v47  ;;  %v1611_v46 = vsel %vm1586_vm2, %v1608_v59, %v1610_v37  ;;  %v2047_v56 = vrot.slane %v1942_v43, 2 }
 0x166   : > { %v2247_v0 = vunpack.c.h.bf16 %v2210_v28  ;;  %v4520_v34 = vunpack.c.l.b16 %v4450_v49  ;;  %v1708_v26 = vadd.f32 %v1611_v46, %v1467_v11  ;;  %v2046_v6 = vrot.slane %v1941_v4, 2 }
 0x167   : > { %v4521_v48 = vunpack.c.l.b16 %v4451_v53  ;;  %v1739_v52 = vpack.c.bf16 %v1707_v55, %v1707_v55  ;;  %v2049_v2 = vrot.slane %v1943_v1, 2  ;;  %v2279_v10 = vmul.f32 %v6783_v63, %v2246_v45 }
 0x168   : > { %v2280_v62 = vmul.f32 %v6783_v63, %v2247_v0  ;;  %v1740_v57 = vpack.c.bf16 %v1708_v26, %v1708_v26  ;;  %v2488_v18 = vunpack.c.l.bf16 %v2468_v22  ;;  %v2048_v32 = vsel %vm2025_vm6, %v2046_v6, %v2047_v56 }
 0x169   : > { %v4549_v23 = vpack.c.b16 %v4521_v48, %v4520_v34  ;;  %v1905_v47 = vunpack.c.l.bf16 %v1739_v52  ;;  %v2050_v41 = vsel %vm2025_vm6, %v2047_v56, %v2049_v2  ;;  %v2311_v36 = vpack.c.bf16 %v2279_v10, %v2279_v10  ;;  %v6366_v48 = vld [vmem:[#allocation2 + $0x48] sm:$0xff]  }
 0x16a   : > { %v2312_v13 = vpack.c.bf16 %v2280_v62, %v2280_v62  ;;  %v1906_v11 = vunpack.c.l.bf16 %v1740_v57  ;;  %v2513_v28 = vmul.f32 %v6787_v3, %v2246_v45  ;;  %v2514_v30 = vmul.f32 %v6787_v3, %v2247_v0 }
 0x16b   : > { %6194 = vmatmul.msk.bf16.gmra.mxu1 %vm4580_vm11, %v4549_v23  ;;  %v2146_v27 = vadd.f32 %v2048_v32, %v1905_v47  ;;  %v2375_v51 = vunpack.c.l.bf16 %v2311_v36  ;;  %v2515_v44 = vmul.f32 %v6787_v3, %v2488_v18  ;;  %v2925_v42 = vunpack.c.l.bf16 %v2905_v31  ;;  %v3605_v32 = vld [vmem:[#allocation2 + $0x50] sm:$0x1] }
 0x16c   : > { %v2376_v59 = vunpack.c.l.bf16 %v2312_v13  ;;  %v2147_v39 = vadd.f32 %v2050_v41, %v1906_v11  ;;  %v2561_v20 = vpack.c.bf16 %v2513_v28, %v2513_v28  ;;  %v2562_v38 = vpack.c.bf16 %v2514_v30, %v2514_v30 }
 0x16d   : > { %v2178_v60 = vpack.c.bf16 %v2146_v27, %v2146_v27  ;;  %v2563_v37 = vpack.c.bf16 %v2515_v44, %v2515_v44  ;;  %v2950_v43 = vmul.f32 %v6750_v25, %v2925_v42  ;;  %v2951_v49 = vmul.f32 %v6750_v25, %v2247_v0  ;;  %v4043_v44 = vld [vmem:[#allocation2 + $0x48] sm:$0xe] }
 0x16e   : > { %v2952_v53 = vmul.f32 %v6750_v25, %v2488_v18  ;;  %v2179_v55 = vpack.c.bf16 %v2147_v39, %v2147_v39  ;;  %v2641_v4 = vunpack.c.l.bf16 %v2561_v20  ;;  %v2642_v46 = vunpack.c.l.bf16 %v2562_v38 }
 0x16f   : > { %v2343_v45 = vunpack.c.l.bf16 %v2178_v60  ;;  %v2643_v1 = vunpack.c.l.bf16 %v2563_v37  ;;  %v2998_v56 = vpack.c.bf16 %v2950_v43, %v2950_v43  ;;  %v2999_v22 = vpack.c.bf16 %v2951_v49, %v2951_v49 }
 0x170   : > { %v3000_v34 = vpack.c.bf16 %v2952_v53, %v2952_v53  ;;  %v2344_v26 = vunpack.c.l.bf16 %v2179_v55  ;;  %v2745_v6 = vrot.slane %v2641_v4, 1  ;;  %v2746_v2 = vrot.slane %v2642_v46, 1 }
 0x171   : > { %v2407_v52 = vadd.f32 %v2375_v51, %v2343_v45  ;;  %v2748_v10 = vrot.slane %v2643_v1, 1  ;;  %v3078_v62 = vunpack.c.l.bf16 %v2998_v56  ;;  %v3079_v23 = vunpack.c.l.bf16 %v2999_v22  ;;  %v531_v1 = vpop.f32.mrf.mxu0 }
 0x172   : > { %v3080_v57 = vunpack.c.l.bf16 %v3000_v34  ;;  %v4798_v0 = vunpack.c.l.b16 %v7147_v5  ;;  %v2408_v47 = vadd.f32 %v2376_v59, %v2344_v26  ;;  %v7192_v31 = vunpack.c.l.bf16 %v6366_v48 }
 0x173   : > { %v2439_v18 = vpack.c.bf16 %v2407_v52, %v2407_v52  ;;  %v4799_v41 = vunpack.c.l.b16 %v7149_v7  ;;  %v3182_v36 = vrot.slane %v3078_v62, 2  ;;  %v3183_v13 = vrot.slane %v3079_v23, 2 }
 0x174   : > { %v3185_v11 = vrot.slane %v3080_v57, 2  ;;  %v2440_v27 = vpack.c.bf16 %v2408_v47, %v2408_v47  ;;  %v7195_v30 = vunpack.c.h.bf16 %v6366_v48  ;;  %v3417_v51 = vmul.f32 %v7192_v31, %v6802_v14 }
 0x175   : > { %v2605_v28 = vunpack.c.l.bf16 %v2439_v18  ;;  %v2747_v5 = vsel %vm1586_vm2, %v2745_v6, %v2746_v2  ;;  %v2749_v59 = vsel %vm1586_vm2, %v2746_v2, %v2748_v10  ;;  %v3625_v42 = vunpack.c.l.bf16 %v3605_v32 }
 0x176   : > { %v3650_v39 = vmul.f32 %v7192_v31, %v6804_v16  ;;  %v2606_v7 = vunpack.c.l.bf16 %v2440_v27  ;;  %v3184_v20 = vsel %vm2025_vm6, %v3182_v36, %v3183_v13  ;;  %v3418_v38 = vmul.f32 %v7195_v30, %v6802_v14 }
 0x177   : > { %v2845_v60 = vadd.f32 %v2747_v5, %v2605_v28  ;;  %v3651_v37 = vmul.f32 %v7195_v30, %v6804_v16  ;;  %v3652_v43 = vmul.f32 %v6804_v16, %v3625_v42  ;;  %v4063_v53 = vunpack.c.l.bf16 %v4043_v44 }
 0x178   : > { %v3698_v49 = vpack.c.bf16 %v3650_v39, %v3650_v39  ;;  %v2846_v55 = vadd.f32 %v2749_v59, %v2606_v7  ;;  %v3186_v4 = vsel %vm2025_vm6, %v3183_v13, %v3185_v11  ;;  %v3449_v46 = vpack.c.bf16 %v3417_v51, %v3417_v51 }
 0x179   : > { %v2877_v45 = vpack.c.bf16 %v2845_v60, %v2845_v60  ;;  %v3699_v56 = vpack.c.bf16 %v3651_v37, %v3651_v37  ;;  %v3700_v22 = vpack.c.bf16 %v3652_v43, %v3652_v43  ;;  %v4088_v48 = vmul.f32 %v6793_v9, %v4063_v53 }
 0x17a   : > { %v3778_v34 = vunpack.c.l.bf16 %v3698_v49  ;;  %v2878_v26 = vpack.c.bf16 %v2846_v55, %v2846_v55  ;;  %v3450_v6 = vpack.c.bf16 %v3418_v38, %v3418_v38  ;;  %v4089_v2 = vmul.f32 %v7195_v30, %v6793_v9  ;;  %v533_v49 = vpop.f32.mrf.mxu0 }
 0x17b   : > { %v3042_v52 = vunpack.c.l.bf16 %v2877_v45  ;;  %v3779_v10 = vunpack.c.l.bf16 %v3699_v56  ;;  %v3780_v62 = vunpack.c.l.bf16 %v3700_v22  ;;  %v4090_v57 = vmul.f32 %v6793_v9, %v3625_v42 }
 0x17c   : > { %v3882_v23 = vrot.slane %v3778_v34, 1  ;;  %v3043_v47 = vunpack.c.l.bf16 %v2878_v26  ;;  %v4136_v32 = vpack.c.bf16 %v4088_v48, %v4088_v48  ;;  %v4137_v36 = vpack.c.bf16 %v4089_v2, %v4089_v2 }
 0x17d   : > { %v3282_v18 = vadd.f32 %v3184_v20, %v3042_v52  ;;  %v3883_v13 = vrot.slane %v3779_v10, 1  ;;  %v3885_v11 = vrot.slane %v3780_v62, 1  ;;  %v4138_v27 = vpack.c.bf16 %v4090_v57, %v4090_v57  ;;  %v1046_v10 = vld [vmem:[#allocation2 + $0x78] sm:$0xf] }
 0x17e   : > { %v7214_v28 = vpack.c.b16 %v4799_v41, %v4798_v0  ;;  %v3283_v51 = vadd.f32 %v3186_v4, %v3043_v47  ;;  %v4216_v5 = vunpack.c.l.bf16 %v4136_v32  ;;  %v4217_v59 = vunpack.c.l.bf16 %v4137_v36  ;;  %v1106_v0 = vld [vmem:[#allocation2 + $0x3c] sm:$0xff]  }
 0x17f   : > { %v3314_v44 = vpack.c.bf16 %v3282_v18, %v3282_v18  ;;  %v3513_v39 = vunpack.c.l.bf16 %v3449_v46  ;;  %v3514_v7 = vunpack.c.l.bf16 %v3450_v6  ;;  %v4218_v60 = vunpack.c.l.bf16 %v4138_v27 }
 0x180   : > { %5102 = vrot.lane.b32.xlu0 %v7214_v28, %s6494_s23  ;;  %v7218_v42 = vpack.c.bf16 %v531_v1, %v531_v1  ;;  %v3315_v20 = vpack.c.bf16 %v3283_v51, %v3283_v51  ;;  %v3884_v37 = vsel %vm1586_vm2, %v3882_v23, %v3883_v13  ;;  %v4321_v43 = vrot.slane %v4217_v59, 2  ;;  %v1330_v23 = vld [vmem:[#allocation2 + $0x44] sm:$0x1] }
 0x181   : > { %v3481_v38 = vunpack.c.l.bf16 %v3314_v44  ;;  %v3886_v41 = vsel %vm1586_vm2, %v3883_v13, %v3885_v11  ;;  %v4320_v53 = vrot.slane %v4216_v5, 2  ;;  %v4323_v55 = vrot.slane %v4218_v60, 2  ;;  %v1050_v44 = vld [vmem:[#allocation2 + $0x80] sm:$0x1] }
 0x182   : > { %v811_v45 = vshrl.u32 %v7218_v42, 16  ;;  %v3482_v4 = vunpack.c.l.bf16 %v3315_v20  ;;  %v814_v56 = vshll.u32 %v7218_v42, 16  ;;  %v7224_v22 = vpack.c.bf16 %v533_v49, %v533_v49 }
 0x183   : > { %v3545_v46 = vadd.f32 %v3513_v39, %v3481_v38  ;;  %v4322_v1 = vsel %vm2025_vm6, %v4320_v53, %v4321_v43  ;;  %v1142_v48 = vunpack.c.l.bf16 %v1106_v0  ;;  %v1143_v26 = vunpack.c.h.bf16 %v1106_v0 }
 0x184   : > { %v813_v34 = vrot.slane %v811_v45, 7  ;;  %v3546_v52 = vadd.f32 %v3514_v7, %v3482_v4  ;;  %v4324_v2 = vsel %vm2025_vm6, %v4321_v43, %v4323_v55  ;;  %v819_v62 = vshrl.u32 %v7224_v22, 16  ;;  %v1769_v55 = vld [vmem:[#allocation2 + $0x3c] sm:$0xe] }
 0x185   : > { %v3577_v6 = vpack.c.bf16 %v3545_v46, %v3545_v46  ;;  %v822_v18 = vshll.u32 %v7224_v22, 16  ;;  %v1175_v32 = vmul.f32 %v6631_v24, %v1142_v48  ;;  %v1176_v27 = vmul.f32 %v6631_v24, %v1143_v26 }
 0x186   : > { %v816_v57 = vor.u32 %v814_v56, %v813_v34  ;;  %v817_v47 = vrot.slane %v813_v34, 4  ;;  %v3578_v36 = vpack.c.bf16 %v3546_v52, %v3546_v52  ;;  %v821_v11 = vrot.slane %v819_v62, 7 }
 0x187   : > { %v3742_v13 = vunpack.c.l.bf16 %v3577_v6  ;;  %v1303_v5 = vpack.c.bf16 %v1175_v32, %v1175_v32  ;;  %v1350_v59 = vunpack.c.l.bf16 %v1330_v23  ;;  %v1377_v39 = vmul.f32 %v6610_v17, %v1142_v48 }
 0x188   : > { %v1047_v51 = vsel %vm6697_vm5, %v816_v57, %v1046_v10  ;;  %v3743_v7 = vunpack.c.l.bf16 %v3578_v36  ;;  %v824_v20 = vor.u32 %v822_v18, %v821_v11  ;;  %v826_v38 = vrot.slane %v821_v11, 4 }
 0x189   : > { %v3982_v60 = vadd.f32 %v3884_v37, %v3742_v13  ;;  %1048 = vst [vmem:[#allocation2 + $0x78] sm:$0xf] %v1047_v51  ;;  %v1304_v43 = vpack.c.bf16 %v1176_v27, %v1176_v27  ;;  %v1378_v49 = vmul.f32 %v6610_v17, %v1143_v26  ;;  %v1379_v0 = vmul.f32 %v6610_v17, %v1350_v59 }
 0x18a   : > { %v1425_v53 = vpack.c.bf16 %v1377_v39, %v1377_v39  ;;  %v3983_v45 = vadd.f32 %v3886_v41, %v3743_v7  ;;  %v825_v46 = vsel %vm6730_vm9, %v817_v47, %v824_v20  ;;  %v1051_v56 = vsel %vm6742_vm10, %v826_v38, %v1050_v44 }
 0x18b   : > { %v4014_v4 = vpack.c.bf16 %v3982_v60, %v3982_v60  ;;  %1049 = vst.msk [vmem:[#allocation2 + $0x7c] sm:$0xf] %vm598_vm1, %v825_v46  ;;  %v1426_v37 = vpack.c.bf16 %v1378_v49, %v1378_v49  ;;  %v1427_v34 = vpack.c.bf16 %v1379_v0, %v1379_v0  ;;  %v1468_v48 = vunpack.c.l.bf16 %v1303_v5 }
 0x18c   : > { %v1469_v52 = vunpack.c.l.bf16 %v1304_v43  ;;  %v4015_v6 = vpack.c.bf16 %v3983_v45, %v3983_v45  ;;  %1052 = vst [vmem:[#allocation2 + $0x80] sm:$0x1] %v1051_v56  ;;  %v1505_v62 = vunpack.c.l.bf16 %v1425_v53  ;;  %v1789_v23 = vunpack.c.l.bf16 %v1769_v55  ;;  %v2469_v55 = vld [vmem:[#allocation2 + $0x50] sm:$0x1] }
 0x18d   : > { %v4180_v10 = vunpack.c.l.bf16 %v4014_v4  ;;  %v1506_v57 = vunpack.c.l.bf16 %v1426_v37  ;;  %v1507_v41 = vunpack.c.l.bf16 %v1427_v34  ;;  %v1817_v18 = vmul.f32 %v6647_v33, %v1143_v26 }
 0x18e   : > { %v1818_v47 = vmul.f32 %v6647_v33, %v1350_v59  ;;  %v4181_v32 = vunpack.c.l.bf16 %v4015_v6  ;;  %v1612_v13 = vrot.slane %v1505_v62, 1  ;;  %v1816_v11 = vmul.f32 %v6647_v33, %v1789_v23 }
 0x18f   : > { %v4420_v36 = vadd.f32 %v4322_v1, %v4180_v10  ;;  %v1613_v27 = vrot.slane %v1506_v57, 1  ;;  %v1615_v51 = vrot.slane %v1507_v41, 1  ;;  %v1865_v44 = vpack.c.bf16 %v1817_v18, %v1817_v18  ;;  %v2906_v41 = vld [vmem:[#allocation2 + $0x48] sm:$0xe] }
 0x190   : > { %v1866_v5 = vpack.c.bf16 %v1818_v47, %v1818_v47  ;;  %v4421_v39 = vadd.f32 %v4324_v2, %v4181_v32  ;;  %v1864_v60 = vpack.c.bf16 %v1816_v11, %v1816_v11  ;;  %v2281_v20 = vmul.f32 %v7192_v31, %v6783_v63 }
 0x191   : > { %v4452_v7 = vpack.c.bf16 %v4420_v36, %v4420_v36  ;;  %v1614_v38 = vsel %vm1586_vm2, %v1612_v13, %v1613_v27  ;;  %v1616_v26 = vsel %vm1586_vm2, %v1613_v27, %v1615_v51  ;;  %v1945_v59 = vunpack.c.l.bf16 %v1865_v44 }
 0x192   : > { %v1946_v43 = vunpack.c.l.bf16 %v1866_v5  ;;  %v4453_v1 = vpack.c.bf16 %v4421_v39, %v4421_v39  ;;  %v1709_v0 = vadd.f32 %v1614_v38, %v1468_v48  ;;  %v1710_v53 = vadd.f32 %v1616_v26, %v1469_v52 }
 0x193   : > { %v4522_v49 = vunpack.c.l.b16 %v4452_v7  ;;  %v1944_v45 = vunpack.c.l.bf16 %v1864_v60  ;;  %v2052_v4 = vrot.slane %v1945_v59, 2  ;;  %v2282_v2 = vmul.f32 %v7195_v30, %v6783_v63 }
 0x194   : > { %v2054_v46 = vrot.slane %v1946_v43, 2  ;;  %v4523_v56 = vunpack.c.l.b16 %v4453_v1  ;;  %v1741_v37 = vpack.c.bf16 %v1709_v0, %v1709_v0  ;;  %v1742_v34 = vpack.c.bf16 %v1710_v53, %v1710_v53 }
 0x195   : > { %v2313_v6 = vpack.c.bf16 %v2281_v20, %v2281_v20  ;;  %v2051_v10 = vrot.slane %v1944_v45, 2  ;;  %v2314_v23 = vpack.c.bf16 %v2282_v2, %v2282_v2  ;;  %v2489_v57 = vunpack.c.l.bf16 %v2469_v55  ;;  %v3350_v2 = vld [vmem:[#allocation2 + $0x54] sm:$0xff]  }
 0x196   : > { %v2055_v62 = vsel %vm2025_vm6, %v2052_v4, %v2054_v46  ;;  %v4550_v18 = vpack.c.b16 %v4523_v56, %v4522_v49  ;;  %v1907_v48 = vunpack.c.l.bf16 %v1741_v37  ;;  %v1908_v52 = vunpack.c.l.bf16 %v1742_v34 }
 0x197   : > { %v2377_v47 = vunpack.c.l.bf16 %v2313_v6  ;;  %v2053_v32 = vsel %vm2025_vm6, %v2051_v10, %v2052_v4  ;;  %v2378_v36 = vunpack.c.l.bf16 %v2314_v23  ;;  %v2516_v13 = vmul.f32 %v7192_v31, %v6787_v3 }
 0x198   : > { %v2517_v11 = vmul.f32 %v7195_v30, %v6787_v3  ;;  %6195 = vmatmul.msk.bf16.gmra.mxu1 %vm4580_vm11, %v4550_v18  ;;  %v2148_v27 = vadd.f32 %v2053_v32, %v1907_v48  ;;  %v2149_v51 = vadd.f32 %v2055_v62, %v1908_v52  ;;  %v2518_v44 = vmul.f32 %v6787_v3, %v2489_v57 }
 0x199   : > { %v2926_v5 = vunpack.c.l.bf16 %v2906_v41  ;;  %v2564_v39 = vpack.c.bf16 %v2516_v13, %v2516_v13  ;;  %v2954_v60 = vmul.f32 %v7195_v30, %v6750_v25  ;;  %v2955_v20 = vmul.f32 %v6750_v25, %v2489_v57  ;;  %v3606_v41 = vld [vmem:[#allocation2 + $0x5c] sm:$0x1] }
 0x19a   : > { %v2565_v7 = vpack.c.bf16 %v2517_v11, %v2517_v11  ;;  %v2180_v38 = vpack.c.bf16 %v2148_v27, %v2148_v27  ;;  %v2181_v26 = vpack.c.bf16 %v2149_v51, %v2149_v51  ;;  %v2566_v59 = vpack.c.bf16 %v2518_v44, %v2518_v44 }
 0x19b   : > { %v2953_v43 = vmul.f32 %v6750_v25, %v2926_v5  ;;  %v2644_v1 = vunpack.c.l.bf16 %v2564_v39  ;;  %v3002_v0 = vpack.c.bf16 %v2954_v60, %v2954_v60  ;;  %v3003_v53 = vpack.c.bf16 %v2955_v20, %v2955_v20  ;;  %v4044_v39 = vld [vmem:[#allocation2 + $0x54] sm:$0xe] }
 0x19c   : > { %v2645_v49 = vunpack.c.l.bf16 %v2565_v7  ;;  %v2345_v55 = vunpack.c.l.bf16 %v2180_v38  ;;  %v2346_v45 = vunpack.c.l.bf16 %v2181_v26  ;;  %v2646_v4 = vunpack.c.l.bf16 %v2566_v59 }
 0x19d   : > { %v3001_v46 = vpack.c.bf16 %v2953_v43, %v2953_v43  ;;  %v2750_v56 = vrot.slane %v2644_v1, 1  ;;  %v3082_v34 = vunpack.c.l.bf16 %v3002_v0  ;;  %v3083_v6 = vunpack.c.l.bf16 %v3003_v53  ;;  %v536_v53 = vpop.f32.mrf.mxu0 }
 0x19e   : > { %v2751_v37 = vrot.slane %v2645_v49, 1  ;;  %v2409_v10 = vadd.f32 %v2377_v47, %v2345_v55  ;;  %v2410_v62 = vadd.f32 %v2378_v36, %v2346_v45  ;;  %v2753_v23 = vrot.slane %v2646_v4, 1 }
 0x19f   : > { %v3081_v57 = vunpack.c.l.bf16 %v3001_v46  ;;  %v4800_v18 = vunpack.c.l.b16 %v7218_v42  ;;  %v4801_v48 = vunpack.c.l.b16 %v7224_v22  ;;  %v3386_v32 = vunpack.c.l.bf16 %v3350_v2 }
 0x1a0   : > { %v2752_v52 = vsel %vm1586_vm2, %v2750_v56, %v2751_v37  ;;  %v2441_v13 = vpack.c.bf16 %v2409_v10, %v2409_v10  ;;  %v2442_v11 = vpack.c.bf16 %v2410_v62, %v2410_v62  ;;  %v3188_v27 = vrot.slane %v3082_v34, 2 }
 0x1a1   : > { %v3190_v51 = vrot.slane %v3083_v6, 2  ;;  %v2754_v44 = vsel %vm1586_vm2, %v2751_v37, %v2753_v23  ;;  %v3387_v5 = vunpack.c.h.bf16 %v3350_v2  ;;  %v3419_v47 = vmul.f32 %v6802_v14, %v3386_v32 }
 0x1a2   : > { %v3626_v36 = vunpack.c.l.bf16 %v3606_v41  ;;  %v2607_v7 = vunpack.c.l.bf16 %v2441_v13  ;;  %v2608_v60 = vunpack.c.l.bf16 %v2442_v11  ;;  %v3187_v20 = vrot.slane %v3081_v57, 2 }
 0x1a3   : > { %v3653_v42 = vmul.f32 %v6804_v16, %v3386_v32  ;;  %v3420_v22 = vmul.f32 %v6802_v14, %v3387_v5  ;;  %v3451_v38 = vpack.c.bf16 %v3419_v47, %v3419_v47  ;;  %v3654_v26 = vmul.f32 %v6804_v16, %v3387_v5 }
 0x1a4   : > { %v3655_v59 = vmul.f32 %v6804_v16, %v3626_v36  ;;  %v2847_v43 = vadd.f32 %v2752_v52, %v2607_v7  ;;  %v2848_v1 = vadd.f32 %v2754_v44, %v2608_v60  ;;  %v4064_v0 = vunpack.c.l.bf16 %v4044_v39 }
 0x1a5   : > { %v3701_v49 = vpack.c.bf16 %v3653_v42, %v3653_v42  ;;  %v3189_v55 = vsel %vm2025_vm6, %v3187_v20, %v3188_v27  ;;  %v3191_v45 = vsel %vm2025_vm6, %v3188_v27, %v3190_v51  ;;  %v3702_v4 = vpack.c.bf16 %v3654_v26, %v3654_v26 }
 0x1a6   : > { %v3703_v46 = vpack.c.bf16 %v3655_v59, %v3655_v59  ;;  %v2879_v2 = vpack.c.bf16 %v2847_v43, %v2847_v43  ;;  %v2880_v56 = vpack.c.bf16 %v2848_v1, %v2848_v1  ;;  %v4091_v34 = vmul.f32 %v6793_v9, %v4064_v0 }
 0x1a7   : > { %v3781_v37 = vunpack.c.l.bf16 %v3701_v49  ;;  %v3452_v6 = vpack.c.bf16 %v3420_v22, %v3420_v22  ;;  %v3782_v10 = vunpack.c.l.bf16 %v3702_v4  ;;  %v4092_v23 = vmul.f32 %v6793_v9, %v3387_v5 }
 0x1a8   : > { %v3783_v62 = vunpack.c.l.bf16 %v3703_v46  ;;  %v3044_v57 = vunpack.c.l.bf16 %v2879_v2  ;;  %v3045_v41 = vunpack.c.l.bf16 %v2880_v56  ;;  %v3515_v52 = vunpack.c.l.bf16 %v3451_v38  ;;  %v538_v38 = vpop.f32.mrf.mxu0 }
 0x1a9   : > { %v4093_v32 = vmul.f32 %v6793_v9, %v3626_v36  ;;  %v3887_v13 = vrot.slane %v3781_v37, 1  ;;  %v3888_v11 = vrot.slane %v3782_v10, 1  ;;  %v4139_v27 = vpack.c.bf16 %v4091_v34, %v4091_v34 }
 0x1aa   : > { %v4140_v51 = vpack.c.bf16 %v4092_v23, %v4092_v23  ;;  %v3284_v44 = vadd.f32 %v3189_v55, %v3044_v57  ;;  %v3285_v47 = vadd.f32 %v3191_v45, %v3045_v41  ;;  %v7277_v7 = vpack.c.b16 %v4801_v48, %v4800_v18 }
 0x1ab   : > { %v4141_v39 = vpack.c.bf16 %v4093_v32, %v4093_v32  ;;  %v3516_v60 = vunpack.c.l.bf16 %v3452_v6  ;;  %v3890_v20 = vrot.slane %v3783_v62, 1  ;;  %v4219_v42 = vunpack.c.l.bf16 %v4139_v27  ;;  %v1053_v62 = vld [vmem:[#allocation2 + $0x84] sm:$0xf]  ;;  %v1331_v32 = vld [vmem:[#allocation2 + $0x50] sm:$0x1] }
 0x1ac   : > { %v4220_v22 = vunpack.c.l.bf16 %v4140_v51  ;;  %v3316_v26 = vpack.c.bf16 %v3284_v44, %v3284_v44  ;;  %v3317_v5 = vpack.c.bf16 %v3285_v47, %v3285_v47  ;;  %5104 = vrot.lane.b32.xlu1 %v7277_v7, %s6494_s23  ;;  %v7281_v36 = vpack.c.bf16 %v536_v53, %v536_v53  ;;  %v1057_v44 = vld [vmem:[#allocation2 + $0x8c] sm:$0x1] }
 0x1ad   : > { %v4221_v59 = vunpack.c.l.bf16 %v4141_v39  ;;  %v3889_v43 = vsel %vm1586_vm2, %v3887_v13, %v3888_v11  ;;  %v4325_v1 = vrot.slane %v4219_v42, 2  ;;  %v7284_v0 = vpack.c.bf16 %v538_v38, %v538_v38 }
 0x1ae   : > { %v4326_v49 = vrot.slane %v4220_v22, 2  ;;  %v3483_v18 = vunpack.c.l.bf16 %v3316_v26  ;;  %v3484_v48 = vunpack.c.l.bf16 %v3317_v5  ;;  %v828_v45 = vshrl.u32 %v7281_v36, 16  ;;  %v1770_v5 = vld [vmem:[#allocation2 + $0x48] sm:$0xe] }
 0x1af   : > { %v4328_v55 = vrot.slane %v4221_v59, 2  ;;  %v3891_v4 = vsel %vm1586_vm2, %v3888_v11, %v3890_v20  ;;  %v836_v2 = vshrl.u32 %v7284_v0, 16  ;;  %v1177_v53 = vmul.f32 %v7192_v31, %v6631_v24 }
 0x1b0   : > { %v4327_v46 = vsel %vm2025_vm6, %v4325_v1, %v4326_v49  ;;  %v3547_v56 = vadd.f32 %v3515_v52, %v3483_v18  ;;  %v3548_v37 = vadd.f32 %v3516_v60, %v3484_v48  ;;  %v830_v34 = vrot.slane %v828_v45, 7 }
 0x1b1   : > { %v831_v6 = vshll.u32 %v7281_v36, 16  ;;  %v4329_v10 = vsel %vm2025_vm6, %v4326_v49, %v4328_v55  ;;  %v838_v23 = vrot.slane %v836_v2, 7  ;;  %v839_v57 = vshll.u32 %v7284_v0, 16 }
 0x1b2   : > { %v1178_v41 = vmul.f32 %v7195_v30, %v6631_v24  ;;  %v3579_v13 = vpack.c.bf16 %v3547_v56, %v3547_v56  ;;  %v3580_v11 = vpack.c.bf16 %v3548_v37, %v3548_v37  ;;  %v834_v51 = vrot.slane %v830_v34, 4 }
 0x1b3   : > { %v833_v27 = vor.u32 %v831_v6, %v830_v34  ;;  %v841_v52 = vor.u32 %v839_v57, %v838_v23  ;;  %v843_v47 = vrot.slane %v838_v23, 4  ;;  %v1305_v39 = vpack.c.bf16 %v1177_v53, %v1177_v53 }
 0x1b4   : > { %v1306_v60 = vpack.c.bf16 %v1178_v41, %v1178_v41  ;;  %v3744_v20 = vunpack.c.l.bf16 %v3579_v13  ;;  %v3745_v42 = vunpack.c.l.bf16 %v3580_v11  ;;  %v1351_v26 = vunpack.c.l.bf16 %v1331_v32 }
 0x1b5   : > { %v1054_v22 = vsel %vm6697_vm5, %v833_v27, %v1053_v62  ;;  %v842_v59 = vsel %vm6730_vm9, %v834_v51, %v841_v52  ;;  %v1058_v38 = vsel %vm6742_vm10, %v843_v47, %v1057_v44  ;;  %v1380_v1 = vmul.f32 %v7192_v31, %v6610_v17  ;;  %v2214_v27 = vld [vmem:[#allocation2 + $0x54] sm:$0xff]  }
 0x1b6   : > { %1055 = vst [vmem:[#allocation2 + $0x84] sm:$0xf] %v1054_v22  ;;  %v1381_v49 = vmul.f32 %v7195_v30, %v6610_v17  ;;  %v3984_v18 = vadd.f32 %v3889_v43, %v3744_v20  ;;  %v3985_v48 = vadd.f32 %v3891_v4, %v3745_v42  ;;  %v1382_v55 = vmul.f32 %v6610_v17, %v1351_v26 }
 0x1b7   : > { %1056 = vst.msk [vmem:[#allocation2 + $0x88] sm:$0xf] %vm598_vm1, %v842_v59  ;;  %v1470_v45 = vunpack.c.l.bf16 %v1305_v39  ;;  %v1428_v2 = vpack.c.bf16 %v1380_v1, %v1380_v1  ;;  %v1471_v56 = vunpack.c.l.bf16 %v1306_v60  ;;  %v1790_v37 = vunpack.c.l.bf16 %v1770_v5 }
 0x1b8   : > { %1059 = vst [vmem:[#allocation2 + $0x8c] sm:$0x1] %v1058_v38  ;;  %v1429_v53 = vpack.c.bf16 %v1381_v49, %v1381_v49  ;;  %v4016_v34 = vpack.c.bf16 %v3984_v18, %v3984_v18  ;;  %v4017_v6 = vpack.c.bf16 %v3985_v48, %v3985_v48  ;;  %v1430_v62 = vpack.c.bf16 %v1382_v55, %v1382_v55 }
 0x1b9   : > { %v1820_v31 = vmul.f32 %v7195_v30, %v6647_v33  ;;  %v1508_v23 = vunpack.c.l.bf16 %v1428_v2  ;;  %v1819_v43 = vmul.f32 %v6647_v33, %v1790_v37  ;;  %v1821_v4 = vmul.f32 %v6647_v33, %v1351_v26 }
 0x1ba   : > { %v1509_v57 = vunpack.c.l.bf16 %v1429_v53  ;;  %v4182_v41 = vunpack.c.l.bf16 %v4016_v34  ;;  %v4183_v32 = vunpack.c.l.bf16 %v4017_v6  ;;  %v1510_v13 = vunpack.c.l.bf16 %v1430_v62  ;;  %v2470_v53 = vld [vmem:[#allocation2 + $0x5c] sm:$0x1] }
 0x1bb   : > { %v1868_v11 = vpack.c.bf16 %v1820_v31, %v1820_v31  ;;  %v1617_v51 = vrot.slane %v1508_v23, 1  ;;  %v1867_v52 = vpack.c.bf16 %v1819_v43, %v1819_v43  ;;  %v1869_v47 = vpack.c.bf16 %v1821_v4, %v1821_v4 }
 0x1bc   : > { %v1618_v44 = vrot.slane %v1509_v57, 1  ;;  %v4422_v39 = vadd.f32 %v4327_v46, %v4182_v41  ;;  %v4423_v60 = vadd.f32 %v4329_v10, %v4183_v32  ;;  %v1620_v20 = vrot.slane %v1510_v13, 1  ;;  %v2907_v57 = vld [vmem:[#allocation2 + $0x54] sm:$0xe] }
 0x1bd   : > { %v1948_v42 = vunpack.c.l.bf16 %v1868_v11  ;;  %v1947_v22 = vunpack.c.l.bf16 %v1867_v52  ;;  %v1949_v5 = vunpack.c.l.bf16 %v1869_v47  ;;  %v2250_v59 = vunpack.c.l.bf16 %v2214_v27 }
 0x1be   : > { %v1619_v30 = vsel %vm1586_vm2, %v1617_v51, %v1618_v44  ;;  %v4454_v38 = vpack.c.bf16 %v4422_v39, %v4422_v39  ;;  %v4455_v26 = vpack.c.bf16 %v4423_v60, %v4423_v60  ;;  %v1621_v1 = vsel %vm1586_vm2, %v1618_v44, %v1620_v20 }
 0x1bf   : > { %v1711_v49 = vadd.f32 %v1619_v30, %v1470_v45  ;;  %v1712_v18 = vadd.f32 %v1621_v1, %v1471_v56  ;;  %v2056_v48 = vrot.slane %v1947_v22, 2  ;;  %v2057_v55 = vrot.slane %v1948_v42, 2 }
 0x1c0   : > { %v2059_v2 = vrot.slane %v1949_v5, 2  ;;  %v4524_v37 = vunpack.c.l.b16 %v4454_v38  ;;  %v4525_v46 = vunpack.c.l.b16 %v4455_v26  ;;  %v2251_v34 = vunpack.c.h.bf16 %v2214_v27 }
 0x1c1   : > { %v1743_v10 = vpack.c.bf16 %v1711_v49, %v1711_v49  ;;  %v1744_v6 = vpack.c.bf16 %v1712_v18, %v1712_v18  ;;  %v2058_v62 = vsel %vm2025_vm6, %v2056_v48, %v2057_v55  ;;  %v2283_v23 = vmul.f32 %v6783_v63, %v2250_v59 }
 0x1c2   : > { %v2060_v31 = vsel %vm2025_vm6, %v2057_v55, %v2059_v2  ;;  %v4551_v43 = vpack.c.b16 %v4525_v46, %v4524_v37  ;;  %v2284_v45 = vmul.f32 %v6783_v63, %v2251_v34  ;;  %v2490_v56 = vunpack.c.l.bf16 %v2470_v53  ;;  %v6367_v2 = vld [vmem:[#allocation2 + $0x60] sm:$0xff]  }
 0x1c3   : > { %v1909_v4 = vunpack.c.l.bf16 %v1743_v10  ;;  %v1910_v41 = vunpack.c.l.bf16 %v1744_v6  ;;  %v2315_v32 = vpack.c.bf16 %v2283_v23, %v2283_v23  ;;  %v2519_v13 = vmul.f32 %v6787_v3, %v2250_v59 }
 0x1c4   : > { %v2520_v11 = vmul.f32 %v6787_v3, %v2251_v34  ;;  %6196 = vmatmul.msk.bf16.gmra.mxu1 %vm4580_vm11, %v4551_v43  ;;  %v2316_v51 = vpack.c.bf16 %v2284_v45, %v2284_v45  ;;  %v2521_v44 = vmul.f32 %v6787_v3, %v2490_v56  ;;  %v2927_v52 = vunpack.c.l.bf16 %v2907_v57 }
 0x1c5   : > { %v2150_v27 = vadd.f32 %v2058_v62, %v1909_v4  ;;  %v2151_v47 = vadd.f32 %v2060_v31, %v1910_v41  ;;  %v2379_v39 = vunpack.c.l.bf16 %v2315_v32  ;;  %v2567_v60 = vpack.c.bf16 %v2519_v13, %v2519_v13 }
 0x1c6   : > { %v2568_v20 = vpack.c.bf16 %v2520_v11, %v2520_v11  ;;  %v2380_v30 = vunpack.c.l.bf16 %v2316_v51  ;;  %v2569_v22 = vpack.c.bf16 %v2521_v44, %v2521_v44  ;;  %v2956_v5 = vmul.f32 %v6750_v25, %v2927_v52 }
 0x1c7   : > { %v2182_v42 = vpack.c.bf16 %v2150_v27, %v2150_v27  ;;  %v2183_v38 = vpack.c.bf16 %v2151_v47, %v2151_v47  ;;  %v2647_v59 = vunpack.c.l.bf16 %v2567_v60  ;;  %v2957_v1 = vmul.f32 %v6750_v25, %v2251_v34  ;;  %v3607_v34 = vld [vmem:[#allocation2 + $0x68] sm:$0x1] }
 0x1c8   : > { %v2648_v26 = vunpack.c.l.bf16 %v2568_v20  ;;  %v2649_v18 = vunpack.c.l.bf16 %v2569_v22  ;;  %v2958_v48 = vmul.f32 %v6750_v25, %v2490_v56  ;;  %v3004_v55 = vpack.c.bf16 %v2956_v5, %v2956_v5 }
 0x1c9   : > { %v2347_v49 = vunpack.c.l.bf16 %v2182_v42  ;;  %v4802_v53 = vunpack.c.l.b16 %v7281_v36  ;;  %v2348_v37 = vunpack.c.l.bf16 %v2183_v38  ;;  %v2755_v46 = vrot.slane %v2647_v59, 1 }
 0x1ca   : > { %v3005_v10 = vpack.c.bf16 %v2957_v1, %v2957_v1  ;;  %v2756_v62 = vrot.slane %v2648_v26, 1  ;;  %v3006_v31 = vpack.c.bf16 %v2958_v48, %v2958_v48  ;;  %v3084_v23 = vunpack.c.l.bf16 %v3004_v55  ;;  %v541_v48 = vpop.f32.mrf.mxu0 }
 0x1cb   : > { %v2411_v6 = vadd.f32 %v2379_v39, %v2347_v49  ;;  %v2412_v57 = vadd.f32 %v2380_v30, %v2348_v37  ;;  %v2758_v43 = vrot.slane %v2649_v18, 1  ;;  %v7327_v45 = vunpack.c.l.bf16 %v6367_v2  ;;  %v4045_v30 = vld [vmem:[#allocation2 + $0x60] sm:$0xe] }
 0x1cc   : > { %v3085_v4 = vunpack.c.l.bf16 %v3005_v10  ;;  %v4803_v41 = vunpack.c.l.b16 %v7284_v0  ;;  %v3086_v32 = vunpack.c.l.bf16 %v3006_v31  ;;  %v3192_v13 = vrot.slane %v3084_v23, 2 }
 0x1cd   : > { %v2443_v56 = vpack.c.bf16 %v2411_v6, %v2411_v6  ;;  %v2444_v11 = vpack.c.bf16 %v2412_v57, %v2412_v57  ;;  %v7330_v27 = vunpack.c.h.bf16 %v6367_v2  ;;  %v3421_v51 = vmul.f32 %v7327_v45, %v6802_v14 }
 0x1ce   : > { %v3193_v36 = vrot.slane %v3085_v4, 2  ;;  %v3195_v52 = vrot.slane %v3086_v32, 2  ;;  %v3627_v47 = vunpack.c.l.bf16 %v3607_v34  ;;  %v3656_v39 = vmul.f32 %v7327_v45, %v6804_v16 }
 0x1cf   : > { %v2609_v44 = vunpack.c.l.bf16 %v2443_v56  ;;  %v2610_v60 = vunpack.c.l.bf16 %v2444_v11  ;;  %v2757_v20 = vsel %vm1586_vm2, %v2755_v46, %v2756_v62  ;;  %v2759_v0 = vsel %vm1586_vm2, %v2756_v62, %v2758_v43 }
 0x1d0   : > { %v3422_v42 = vmul.f32 %v7330_v27, %v6802_v14  ;;  %v3194_v5 = vsel %vm2025_vm6, %v3192_v13, %v3193_v36  ;;  %v3657_v38 = vmul.f32 %v7330_v27, %v6804_v16  ;;  %v3658_v59 = vmul.f32 %v6804_v16, %v3627_v47 }
 0x1d1   : > { %v2849_v22 = vadd.f32 %v2757_v20, %v2609_v44  ;;  %v2850_v26 = vadd.f32 %v2759_v0, %v2610_v60  ;;  %v3196_v1 = vsel %vm2025_vm6, %v3193_v36, %v3195_v52  ;;  %v3453_v49 = vpack.c.bf16 %v3421_v51, %v3421_v51 }
 0x1d2   : > { %v3704_v18 = vpack.c.bf16 %v3656_v39, %v3656_v39  ;;  %v3705_v2 = vpack.c.bf16 %v3657_v38, %v3657_v38  ;;  %v3706_v37 = vpack.c.bf16 %v3658_v59, %v3658_v59  ;;  %v4065_v46 = vunpack.c.l.bf16 %v4045_v30  ;;  %v1110_v38 = vld [vmem:[#allocation2 + $0x54] sm:$0xff]  }
 0x1d3   : > { %v2881_v55 = vpack.c.bf16 %v2849_v22, %v2849_v22  ;;  %v2882_v10 = vpack.c.bf16 %v2850_v26, %v2850_v26  ;;  %v3454_v6 = vpack.c.bf16 %v3422_v42, %v3422_v42  ;;  %v4095_v31 = vmul.f32 %v7330_v27, %v6793_v9 }
 0x1d4   : > { %v3784_v62 = vunpack.c.l.bf16 %v3704_v18  ;;  %v3785_v57 = vunpack.c.l.bf16 %v3705_v2  ;;  %v3786_v43 = vunpack.c.l.bf16 %v3706_v37  ;;  %v4094_v4 = vmul.f32 %v6793_v9, %v4065_v46 }
 0x1d5   : > { %v3046_v23 = vunpack.c.l.bf16 %v2881_v55  ;;  %v3047_v34 = vunpack.c.l.bf16 %v2882_v10  ;;  %v3517_v56 = vunpack.c.l.bf16 %v3453_v49  ;;  %v4096_v32 = vmul.f32 %v6793_v9, %v3627_v47 }
 0x1d6   : > { %v4143_v13 = vpack.c.bf16 %v4095_v31, %v4095_v31  ;;  %v3892_v36 = vrot.slane %v3784_v62, 1  ;;  %v3893_v51 = vrot.slane %v3785_v57, 1  ;;  %v4142_v44 = vpack.c.bf16 %v4094_v4, %v4094_v4 }
 0x1d7   : > { %v3286_v11 = vadd.f32 %v3194_v5, %v3046_v23  ;;  %v3287_v52 = vadd.f32 %v3196_v1, %v3047_v34  ;;  %v4144_v39 = vpack.c.bf16 %v4096_v32, %v4096_v32  ;;  %v7349_v20 = vpack.c.b16 %v4803_v41, %v4802_v53  ;;  %v543_v5 = vpop.f32.mrf.mxu0  ;;  %v1060_v34 = vld [vmem:[#allocation2 + $0x90] sm:$0xf] }
 0x1d8   : > { %v4223_v60 = vunpack.c.l.bf16 %v4143_v13  ;;  %v3518_v42 = vunpack.c.l.bf16 %v3454_v6  ;;  %v3895_v30 = vrot.slane %v3786_v43, 1  ;;  %v4222_v22 = vunpack.c.l.bf16 %v4142_v44 }
 0x1d9   : > { %8472 = vst [vmem:[#allocation7_spill] sm:$0xff] %v7349_v20  ;;  %v3318_v0 = vpack.c.bf16 %v3286_v11, %v3286_v11  ;;  %v3319_v59 = vpack.c.bf16 %v3287_v52, %v3287_v52  ;;  %v4224_v26 = vunpack.c.l.bf16 %v4144_v39  ;;  %5282 = vrot.lane.b32.xlu1 %v7349_v20, %s6495_s10  ;;  %5106 = vrot.lane.b32.xlu2 %v7349_v20, %s6494_s23  ;;  %v1146_v46 = vunpack.c.l.bf16 %v1110_v38  ;;  %v1064_v52 = vld [vmem:[#allocation2 + $0x98] sm:$0x1]  ;;  %v1775_v20 = vld [vmem:[#allocation2 + $0x84] sm:$0xe] }
 0x1da   : > { %v4331_v49 = vrot.slane %v4223_v60, 2  ;;  %v7355_v47 = vpack.c.bf16 %v541_v48, %v541_v48  ;;  %v3894_v53 = vsel %vm1586_vm2, %v3892_v36, %v3893_v51  ;;  %v4330_v41 = vrot.slane %v4222_v22, 2  ;;  %v1332_v36 = vld [vmem:[#allocation2 + $0x5c] sm:$0x1] }
 0x1db   : > { %v3485_v1 = vunpack.c.l.bf16 %v3318_v0  ;;  %v7358_v18 = vpack.c.bf16 %v543_v5, %v543_v5  ;;  %v3486_v55 = vunpack.c.l.bf16 %v3319_v59  ;;  %v4333_v2 = vrot.slane %v4224_v26, 2  ;;  %v1771_v5 = vld [vmem:[#allocation2 + $0x54] sm:$0xe] }
 0x1dc   : > { %v845_v37 = vshrl.u32 %v7355_v47, 16  ;;  %v3896_v6 = vsel %vm1586_vm2, %v3893_v51, %v3895_v30  ;;  %v848_v62 = vshll.u32 %v7355_v47, 16  ;;  %v4332_v23 = vsel %vm2025_vm6, %v4330_v41, %v4331_v49 }
 0x1dd   : > { %v3549_v10 = vadd.f32 %v3517_v56, %v3485_v1  ;;  %v853_v48 = vshrl.u32 %v7358_v18, 16  ;;  %v3550_v31 = vadd.f32 %v3518_v42, %v3486_v55  ;;  %v4334_v57 = vsel %vm2025_vm6, %v4331_v49, %v4333_v2 }
 0x1de   : > { %v847_v43 = vrot.slane %v845_v37, 7  ;;  %v856_v13 = vshll.u32 %v7358_v18, 16  ;;  %v1147_v11 = vunpack.c.h.bf16 %v1110_v38  ;;  %v1179_v39 = vmul.f32 %v6631_v24, %v1146_v46 }
 0x1df   : > { %v3581_v4 = vpack.c.bf16 %v3549_v10, %v3549_v10  ;;  %v855_v32 = vrot.slane %v853_v48, 7  ;;  %v3582_v56 = vpack.c.bf16 %v3550_v31, %v3550_v31  ;;  %v1352_v49 = vunpack.c.l.bf16 %v1332_v36 }
 0x1e0   : > { %v850_v44 = vor.u32 %v848_v62, %v847_v43  ;;  %v851_v51 = vrot.slane %v847_v43, 4  ;;  %v1180_v30 = vmul.f32 %v6631_v24, %v1147_v11  ;;  %v1307_v26 = vpack.c.bf16 %v1179_v39, %v1179_v39 }
 0x1e1   : > { %v3746_v60 = vunpack.c.l.bf16 %v3581_v4  ;;  %v858_v0 = vor.u32 %v856_v13, %v855_v32  ;;  %v860_v42 = vrot.slane %v855_v32, 4  ;;  %v3747_v22 = vunpack.c.l.bf16 %v3582_v56 }
 0x1e2   : > { %v1061_v59 = vsel %vm6697_vm5, %v850_v44, %v1060_v34  ;;  %v1308_v55 = vpack.c.bf16 %v1180_v30, %v1180_v30  ;;  %v1383_v37 = vmul.f32 %v6610_v17, %v1146_v46  ;;  %v1384_v10 = vmul.f32 %v6610_v17, %v1147_v11 }
 0x1e3   : > { %v3986_v38 = vadd.f32 %v3894_v53, %v3746_v60  ;;  %1062 = vst [vmem:[#allocation2 + $0x90] sm:$0xf] %v1061_v59  ;;  %v859_v1 = vsel %vm6730_vm9, %v851_v51, %v858_v0  ;;  %v1065_v41 = vsel %vm6742_vm10, %v860_v42, %v1064_v52  ;;  %v3987_v2 = vadd.f32 %v3896_v6, %v3747_v22 }
 0x1e4   : > { %1063 = vst.msk [vmem:[#allocation2 + $0x94] sm:$0xf] %vm598_vm1, %v859_v1  ;;  %v1385_v62 = vmul.f32 %v6610_v17, %v1352_v49  ;;  %v1472_v53 = vunpack.c.l.bf16 %v1307_v26  ;;  %v1473_v31 = vunpack.c.l.bf16 %v1308_v55  ;;  %v1791_v43 = vunpack.c.l.bf16 %v1771_v5 }
 0x1e5   : > { %v4018_v48 = vpack.c.bf16 %v3986_v38, %v3986_v38  ;;  %1066 = vst [vmem:[#allocation2 + $0x98] sm:$0x1] %v1065_v41  ;;  %v4019_v4 = vpack.c.bf16 %v3987_v2, %v3987_v2  ;;  %v1431_v34 = vpack.c.bf16 %v1383_v37, %v1383_v37  ;;  %v1432_v32 = vpack.c.bf16 %v1384_v10, %v1384_v10 }
 0x1e6   : > { %v1433_v13 = vpack.c.bf16 %v1385_v62, %v1385_v62  ;;  %v1822_v6 = vmul.f32 %v6647_v33, %v1791_v43  ;;  %v1823_v56 = vmul.f32 %v6647_v33, %v1147_v11  ;;  %v1824_v46 = vmul.f32 %v6647_v33, %v1352_v49 }
 0x1e7   : > { %v4184_v36 = vunpack.c.l.bf16 %v4018_v48  ;;  %v4185_v44 = vunpack.c.l.bf16 %v4019_v4  ;;  %v1511_v51 = vunpack.c.l.bf16 %v1431_v34  ;;  %v1512_v52 = vunpack.c.l.bf16 %v1432_v32 }
 0x1e8   : > { %v1513_v39 = vunpack.c.l.bf16 %v1433_v13  ;;  %v1870_v0 = vpack.c.bf16 %v1822_v6, %v1822_v6  ;;  %v1871_v42 = vpack.c.bf16 %v1823_v56, %v1823_v56  ;;  %v1872_v30 = vpack.c.bf16 %v1824_v46, %v1824_v46  ;;  %v2908_v46 = vld [vmem:[#allocation2 + $0x60] sm:$0xe] }
 0x1e9   : > { %v4424_v60 = vadd.f32 %v4332_v23, %v4184_v36  ;;  %v4425_v22 = vadd.f32 %v4334_v57, %v4185_v44  ;;  %v1622_v59 = vrot.slane %v1511_v51, 1  ;;  %v1623_v26 = vrot.slane %v1512_v52, 1  ;;  %v2471_v23 = vld [vmem:[#allocation2 + $0x68] sm:$0x1] }
 0x1ea   : > { %v1625_v5 = vrot.slane %v1513_v39, 1  ;;  %v1950_v1 = vunpack.c.l.bf16 %v1870_v0  ;;  %v1951_v41 = vunpack.c.l.bf16 %v1871_v42  ;;  %v1952_v55 = vunpack.c.l.bf16 %v1872_v30 }
 0x1eb   : > { %v4456_v38 = vpack.c.bf16 %v4424_v60, %v4424_v60  ;;  %v4457_v2 = vpack.c.bf16 %v4425_v22, %v4425_v22  ;;  %v1624_v11 = vsel %vm1586_vm2, %v1622_v59, %v1623_v26  ;;  %v2285_v37 = vmul.f32 %v7327_v45, %v6783_v63 }
 0x1ec   : > { %v1626_v49 = vsel %vm1586_vm2, %v1623_v26, %v1625_v5  ;;  %v1713_v62 = vadd.f32 %v1624_v11, %v1472_v53  ;;  %v2061_v57 = vrot.slane %v1950_v1, 2  ;;  %v2062_v4 = vrot.slane %v1951_v41, 2 }
 0x1ed   : > { %v4526_v10 = vunpack.c.l.b16 %v4456_v38  ;;  %v1714_v48 = vadd.f32 %v1626_v49, %v1473_v31  ;;  %v4527_v43 = vunpack.c.l.b16 %v4457_v2  ;;  %v2064_v34 = vrot.slane %v1952_v55, 2 }
 0x1ee   : > { %v2286_v32 = vmul.f32 %v7330_v27, %v6783_v63  ;;  %v1745_v13 = vpack.c.bf16 %v1713_v62, %v1713_v62  ;;  %v2317_v6 = vpack.c.bf16 %v2285_v37, %v2285_v37  ;;  %v2491_v56 = vunpack.c.l.bf16 %v2471_v23 }
 0x1ef   : > { %v1746_v36 = vpack.c.bf16 %v1714_v48, %v1714_v48  ;;  %v4552_v44 = vpack.c.b16 %v4527_v43, %v4526_v10  ;;  %v2063_v51 = vsel %vm2025_vm6, %v2061_v57, %v2062_v4  ;;  %v2065_v52 = vsel %vm2025_vm6, %v2062_v4, %v2064_v34  ;;  %v3354_v4 = vld [vmem:[#allocation2 + $0x6c] sm:$0xff]  }
 0x1f0   : > { %v2318_v39 = vpack.c.bf16 %v2286_v32, %v2286_v32  ;;  %v1911_v53 = vunpack.c.l.bf16 %v1745_v13  ;;  %v2381_v60 = vunpack.c.l.bf16 %v2317_v6  ;;  %v2522_v0 = vmul.f32 %v7327_v45, %v6787_v3 }
 0x1f1   : > { %v1912_v31 = vunpack.c.l.bf16 %v1746_v36  ;;  %6197 = vmatmul.msk.bf16.gmra.mxu1 %vm4580_vm11, %v4552_v44  ;;  %v2523_v30 = vmul.f32 %v7330_v27, %v6787_v3  ;;  %v2524_v22 = vmul.f32 %v6787_v3, %v2491_v56  ;;  %v2928_v59 = vunpack.c.l.bf16 %v2908_v46 }
 0x1f2   : > { %v2382_v42 = vunpack.c.l.bf16 %v2318_v39  ;;  %v2152_v26 = vadd.f32 %v2063_v51, %v1911_v53  ;;  %v2570_v38 = vpack.c.bf16 %v2522_v0, %v2522_v0  ;;  %v2960_v1 = vmul.f32 %v7330_v27, %v6750_v25 }
 0x1f3   : > { %v2153_v5 = vadd.f32 %v2065_v52, %v1912_v31  ;;  %v2571_v41 = vpack.c.bf16 %v2523_v30, %v2523_v30  ;;  %v2572_v55 = vpack.c.bf16 %v2524_v22, %v2524_v22  ;;  %v2959_v2 = vmul.f32 %v6750_v25, %v2928_v59  ;;  %v3608_v31 = vld [vmem:[#allocation2 + $0x74] sm:$0x1] }
 0x1f4   : > { %v2961_v11 = vmul.f32 %v6750_v25, %v2491_v56  ;;  %v2184_v49 = vpack.c.bf16 %v2152_v26, %v2152_v26  ;;  %v2650_v23 = vunpack.c.l.bf16 %v2570_v38  ;;  %v3008_v10 = vpack.c.bf16 %v2960_v1, %v2960_v1 }
 0x1f5   : > { %v2185_v37 = vpack.c.bf16 %v2153_v5, %v2153_v5  ;;  %v2651_v62 = vunpack.c.l.bf16 %v2571_v41  ;;  %v2652_v48 = vunpack.c.l.bf16 %v2572_v55  ;;  %v3007_v57 = vpack.c.bf16 %v2959_v2, %v2959_v2  ;;  %v4046_v41 = vld [vmem:[#allocation2 + $0x6c] sm:$0xe] }
 0x1f6   : > { %v3009_v43 = vpack.c.bf16 %v2961_v11, %v2961_v11  ;;  %v2349_v34 = vunpack.c.l.bf16 %v2184_v49  ;;  %v2760_v13 = vrot.slane %v2650_v23, 1  ;;  %v3088_v36 = vunpack.c.l.bf16 %v3008_v10 }
 0x1f7   : > { %v2350_v32 = vunpack.c.l.bf16 %v2185_v37  ;;  %v2761_v6 = vrot.slane %v2651_v62, 1  ;;  %v2763_v46 = vrot.slane %v2652_v48, 1  ;;  %v3087_v44 = vunpack.c.l.bf16 %v3007_v57 }
 0x1f8   : > { %v3089_v51 = vunpack.c.l.bf16 %v3009_v43  ;;  %v2413_v52 = vadd.f32 %v2381_v60, %v2349_v34  ;;  %v3198_v56 = vrot.slane %v3088_v36, 2  ;;  %v3390_v53 = vunpack.c.l.bf16 %v3354_v4  ;;  %v546_v34 = vpop.f32.mrf.mxu0 }
 0x1f9   : > { %v2414_v39 = vadd.f32 %v2382_v42, %v2350_v32  ;;  %v4804_v0 = vunpack.c.l.b16 %v7355_v47  ;;  %v4805_v30 = vunpack.c.l.b16 %v7358_v18  ;;  %v3197_v22 = vrot.slane %v3087_v44, 2 }
 0x1fa   : > { %v3200_v59 = vrot.slane %v3089_v51, 2  ;;  %v2445_v26 = vpack.c.bf16 %v2413_v52, %v2413_v52  ;;  %v3391_v38 = vunpack.c.h.bf16 %v3354_v4  ;;  %v3423_v1 = vmul.f32 %v6802_v14, %v3390_v53 }
 0x1fb   : > { %v2446_v5 = vpack.c.bf16 %v2414_v39, %v2414_v39  ;;  %v2762_v55 = vsel %vm1586_vm2, %v2760_v13, %v2761_v6  ;;  %v2764_v60 = vsel %vm1586_vm2, %v2761_v6, %v2763_v46  ;;  %v3628_v42 = vunpack.c.l.bf16 %v3608_v31 }
 0x1fc   : > { %v3659_v2 = vmul.f32 %v6804_v16, %v3390_v53  ;;  %v2611_v11 = vunpack.c.l.bf16 %v2445_v26  ;;  %v3199_v47 = vsel %vm2025_vm6, %v3197_v22, %v3198_v56  ;;  %v3424_v18 = vmul.f32 %v6802_v14, %v3391_v38 }
 0x1fd   : > { %v2612_v49 = vunpack.c.l.bf16 %v2446_v5  ;;  %v3660_v37 = vmul.f32 %v6804_v16, %v3391_v38  ;;  %v3661_v23 = vmul.f32 %v6804_v16, %v3628_v42  ;;  %v4066_v62 = vunpack.c.l.bf16 %v4046_v41 }
 0x1fe   : > { %v3707_v10 = vpack.c.bf16 %v3659_v2, %v3659_v2  ;;  %v2851_v48 = vadd.f32 %v2762_v55, %v2611_v11  ;;  %v3201_v43 = vsel %vm2025_vm6, %v3198_v56, %v3200_v59  ;;  %v3455_v4 = vpack.c.bf16 %v3423_v1, %v3423_v1 }
 0x1ff   : > { %v2852_v57 = vadd.f32 %v2764_v60, %v2612_v49  ;;  %v3708_v32 = vpack.c.bf16 %v3660_v37, %v3660_v37  ;;  %v3709_v13 = vpack.c.bf16 %v3661_v23, %v3661_v23  ;;  %v4097_v6 = vmul.f32 %v6793_v9, %v4066_v62 }
 0x200   : > { %v3787_v36 = vunpack.c.l.bf16 %v3707_v10  ;;  %v2883_v46 = vpack.c.bf16 %v2851_v48, %v2851_v48  ;;  %v3456_v51 = vpack.c.bf16 %v3424_v18, %v3424_v18  ;;  %v4098_v52 = vmul.f32 %v6793_v9, %v3391_v38  ;;  %v548_v48 = vpop.f32.mrf.mxu0 }
 0x201   : > { %v2884_v44 = vpack.c.bf16 %v2852_v57, %v2852_v57  ;;  %v3788_v39 = vunpack.c.l.bf16 %v3708_v32  ;;  %v3789_v53 = vunpack.c.l.bf16 %v3709_v13  ;;  %v4099_v22 = vmul.f32 %v6793_v9, %v3628_v42 }
 0x202   : > { %v3897_v31 = vrot.slane %v3787_v36, 1  ;;  %v3048_v26 = vunpack.c.l.bf16 %v2883_v46  ;;  %v4145_v56 = vpack.c.bf16 %v4097_v6, %v4097_v6  ;;  %v4146_v59 = vpack.c.bf16 %v4098_v52, %v4098_v52 }
 0x203   : > { %v3049_v5 = vunpack.c.l.bf16 %v2884_v44  ;;  %v3898_v1 = vrot.slane %v3788_v39, 1  ;;  %v3900_v41 = vrot.slane %v3789_v53, 1  ;;  %v4147_v55 = vpack.c.bf16 %v4099_v22, %v4099_v22  ;;  %v1067_v39 = vld [vmem:[#allocation2 + $0x9c] sm:$0xf] }
 0x204   : > { %v7414_v60 = vpack.c.b16 %v4805_v30, %v4804_v0  ;;  %v3288_v2 = vadd.f32 %v3199_v47, %v3048_v26  ;;  %v4225_v49 = vunpack.c.l.bf16 %v4145_v56  ;;  %v4226_v18 = vunpack.c.l.bf16 %v4146_v59 }
 0x205   : > { %v3289_v11 = vadd.f32 %v3201_v43, %v3049_v5  ;;  %v4227_v37 = vunpack.c.l.bf16 %v4147_v55  ;;  %v7420_v38 = vpack.c.bf16 %v546_v34, %v546_v34  ;;  %v3519_v10 = vunpack.c.l.bf16 %v3455_v4 }
 0x206   : > { %8473 = vst [vmem:[#allocation8_spill] sm:$0xff] %v7414_v60  ;;  %5284 = vrot.lane.b32.xlu0 %v7414_v60, %s6495_s10  ;;  %5108 = vrot.lane.b32.xlu1 %v7414_v60, %s6494_s23  ;;  %v3320_v42 = vpack.c.bf16 %v3288_v2, %v3288_v2  ;;  %v4336_v62 = vrot.slane %v4226_v18, 2  ;;  %v3520_v0 = vunpack.c.l.bf16 %v3456_v51  ;;  %v3899_v30 = vsel %vm1586_vm2, %v3897_v31, %v3898_v1  ;;  %v1333_v31 = vld [vmem:[#allocation2 + $0x68] sm:$0x1] }
 0x207   : > { %v3321_v23 = vpack.c.bf16 %v3289_v11, %v3289_v11  ;;  %v4338_v47 = vrot.slane %v4227_v37, 2  ;;  %v862_v57 = vshrl.u32 %v7420_v38, 16  ;;  %v3901_v13 = vsel %vm1586_vm2, %v3898_v1, %v3900_v41 }
 0x208   : > { %v3487_v43 = vunpack.c.l.bf16 %v3320_v42  ;;  %v4335_v36 = vrot.slane %v4225_v49, 2  ;;  %v865_v34 = vshll.u32 %v7420_v38, 16  ;;  %v7426_v46 = vpack.c.bf16 %v548_v48, %v548_v48 }
 0x209   : > { %v3488_v32 = vunpack.c.l.bf16 %v3321_v23  ;;  %v864_v6 = vrot.slane %v862_v57, 7  ;;  %v1181_v4 = vmul.f32 %v7327_v45, %v6631_v24  ;;  %v1182_v53 = vmul.f32 %v7330_v27, %v6631_v24  ;;  %v1071_v23 = vld [vmem:[#allocation2 + $0xa4] sm:$0x1] }
 0x20a   : > { %v3551_v44 = vadd.f32 %v3519_v10, %v3487_v43  ;;  %v4337_v52 = vsel %vm2025_vm6, %v4335_v36, %v4336_v62  ;;  %v4339_v22 = vsel %vm2025_vm6, %v4336_v62, %v4338_v47  ;;  %v870_v56 = vshrl.u32 %v7426_v46, 16 }
 0x20b   : > { %v3552_v51 = vadd.f32 %v3520_v0, %v3488_v32  ;;  %v867_v26 = vor.u32 %v865_v34, %v864_v6  ;;  %v868_v5 = vrot.slane %v864_v6, 4  ;;  %v873_v41 = vshll.u32 %v7426_v46, 16  ;;  %v1772_v34 = vld [vmem:[#allocation2 + $0x60] sm:$0xe] }
 0x20c   : > { %v3583_v59 = vpack.c.bf16 %v3551_v44, %v3551_v44  ;;  %v1309_v55 = vpack.c.bf16 %v1181_v4, %v1181_v4  ;;  %v872_v11 = vrot.slane %v870_v56, 7  ;;  %v1310_v49 = vpack.c.bf16 %v1182_v53, %v1182_v53 }
 0x20d   : > { %v3584_v1 = vpack.c.bf16 %v3552_v51, %v3552_v51  ;;  %v1068_v2 = vsel %vm6697_vm5, %v867_v26, %v1067_v39  ;;  %v1353_v18 = vunpack.c.l.bf16 %v1333_v31  ;;  %v1386_v10 = vmul.f32 %v7327_v45, %v6610_v17 }
 0x20e   : > { %v3748_v37 = vunpack.c.l.bf16 %v3583_v59  ;;  %1069 = vst [vmem:[#allocation2 + $0x9c] sm:$0xf] %v1068_v2  ;;  %v1387_v62 = vmul.f32 %v7330_v27, %v6610_v17  ;;  %v875_v48 = vor.u32 %v873_v41, %v872_v11  ;;  %v877_v0 = vrot.slane %v872_v11, 4 }
 0x20f   : > { %v3749_v42 = vunpack.c.l.bf16 %v3584_v1  ;;  %v1388_v47 = vmul.f32 %v6610_v17, %v1353_v18  ;;  %v1474_v57 = vunpack.c.l.bf16 %v1309_v55  ;;  %v1434_v36 = vpack.c.bf16 %v1386_v10, %v1386_v10 }
 0x210   : > { %v3988_v43 = vadd.f32 %v3899_v30, %v3748_v37  ;;  %v1435_v6 = vpack.c.bf16 %v1387_v62, %v1387_v62  ;;  %v876_v4 = vsel %vm6730_vm9, %v868_v5, %v875_v48  ;;  %v1072_v44 = vsel %vm6742_vm10, %v877_v0, %v1071_v23  ;;  %v2218_v5 = vld [vmem:[#allocation2 + $0x6c] sm:$0xff]  }
 0x211   : > { %v3989_v32 = vadd.f32 %v3901_v13, %v3749_v42  ;;  %v1436_v45 = vpack.c.bf16 %v1388_v47, %v1388_v47  ;;  %v1475_v51 = vunpack.c.l.bf16 %v1310_v49  ;;  %1070 = vst.msk [vmem:[#allocation2 + $0xa0] sm:$0xf] %vm598_vm1, %v876_v4  ;;  %v1514_v31 = vunpack.c.l.bf16 %v1434_v36 }
 0x212   : > { %v4020_v39 = vpack.c.bf16 %v3988_v43, %v3988_v43  ;;  %v1515_v26 = vunpack.c.l.bf16 %v1435_v6  ;;  %1073 = vst [vmem:[#allocation2 + $0xa4] sm:$0x1] %v1072_v44  ;;  %v1792_v13 = vunpack.c.l.bf16 %v1772_v34  ;;  %v1826_v56 = vmul.f32 %v7330_v27, %v6647_v33 }
 0x213   : > { %v4021_v53 = vpack.c.bf16 %v3989_v32, %v3989_v32  ;;  %v1516_v30 = vunpack.c.l.bf16 %v1436_v45  ;;  %v1827_v59 = vmul.f32 %v6647_v33, %v1353_v18  ;;  %v1627_v55 = vrot.slane %v1514_v31, 1 }
 0x214   : > { %v4186_v1 = vunpack.c.l.bf16 %v4020_v39  ;;  %v1628_v2 = vrot.slane %v1515_v26, 1  ;;  %v1825_v49 = vmul.f32 %v6647_v33, %v1792_v13  ;;  %v1874_v37 = vpack.c.bf16 %v1826_v56, %v1826_v56  ;;  %v2472_v39 = vld [vmem:[#allocation2 + $0x74] sm:$0x1] }
 0x215   : > { %v4187_v41 = vunpack.c.l.bf16 %v4021_v53  ;;  %v1630_v11 = vrot.slane %v1516_v30, 1  ;;  %v1875_v42 = vpack.c.bf16 %v1827_v59, %v1827_v59  ;;  %v2254_v48 = vunpack.c.l.bf16 %v2218_v5 }
 0x216   : > { %v4426_v23 = vadd.f32 %v4337_v52, %v4186_v1  ;;  %v1629_v62 = vsel %vm1586_vm2, %v1627_v55, %v1628_v2  ;;  %v1873_v47 = vpack.c.bf16 %v1825_v49, %v1825_v49  ;;  %v1954_v18 = vunpack.c.l.bf16 %v1874_v37 }
 0x217   : > { %v4427_v10 = vadd.f32 %v4339_v22, %v4187_v41  ;;  %v1631_v0 = vsel %vm1586_vm2, %v1628_v2, %v1630_v11  ;;  %v1715_v27 = vadd.f32 %v1629_v62, %v1474_v57  ;;  %v1955_v6 = vunpack.c.l.bf16 %v1875_v42  ;;  %v2909_v41 = vld [vmem:[#allocation2 + $0x6c] sm:$0xe] }
 0x218   : > { %v4458_v43 = vpack.c.bf16 %v4426_v23, %v4426_v23  ;;  %v1716_v36 = vadd.f32 %v1631_v0, %v1475_v51  ;;  %v1953_v4 = vunpack.c.l.bf16 %v1873_v47  ;;  %v2067_v44 = vrot.slane %v1954_v18, 2 }
 0x219   : > { %v4459_v32 = vpack.c.bf16 %v4427_v10, %v4427_v10  ;;  %v1747_v34 = vpack.c.bf16 %v1715_v27, %v1715_v27  ;;  %v2255_v45 = vunpack.c.h.bf16 %v2218_v5  ;;  %v2069_v31 = vrot.slane %v1955_v6, 2 }
 0x21a   : > { %v4528_v53 = vunpack.c.l.b16 %v4458_v43  ;;  %v1748_v22 = vpack.c.bf16 %v1716_v36, %v1716_v36  ;;  %v2066_v30 = vrot.slane %v1953_v4, 2  ;;  %v2287_v13 = vmul.f32 %v6783_v63, %v2254_v48 }
 0x21b   : > { %v4529_v52 = vunpack.c.l.b16 %v4459_v32  ;;  %v1913_v26 = vunpack.c.l.bf16 %v1747_v34  ;;  %v2288_v57 = vmul.f32 %v6783_v63, %v2255_v45  ;;  %v2070_v51 = vsel %vm2025_vm6, %v2067_v44, %v2069_v31 }
 0x21c   : > { %v1914_v59 = vunpack.c.l.bf16 %v1748_v22  ;;  %v2492_v1 = vunpack.c.l.bf16 %v2472_v39  ;;  %v2068_v55 = vsel %vm2025_vm6, %v2066_v30, %v2067_v44  ;;  %v2319_v5 = vpack.c.bf16 %v2287_v13, %v2287_v13 }
 0x21d   : > { %v4553_v56 = vpack.c.b16 %v4529_v52, %v4528_v53  ;;  %v2320_v2 = vpack.c.bf16 %v2288_v57, %v2288_v57  ;;  %v2525_v11 = vmul.f32 %v6787_v3, %v2254_v48  ;;  %v2154_v49 = vadd.f32 %v2068_v55, %v1913_v26  ;;  %v6368_v52 = vld [vmem:[#allocation2 + $0x78] sm:$0xff]  }
 0x21e   : > { %v2155_v37 = vadd.f32 %v2070_v51, %v1914_v59  ;;  %v2526_v42 = vmul.f32 %v6787_v3, %v2255_v45  ;;  %v2527_v23 = vmul.f32 %v6787_v3, %v2492_v1  ;;  %v2383_v10 = vunpack.c.l.bf16 %v2319_v5 }
 0x21f   : > { %6198 = vmatmul.msk.bf16.gmra.mxu1 %vm4580_vm11, %v4553_v56  ;;  %v2384_v62 = vunpack.c.l.bf16 %v2320_v2  ;;  %v2573_v0 = vpack.c.bf16 %v2525_v11, %v2525_v11  ;;  %v2929_v27 = vunpack.c.l.bf16 %v2909_v41  ;;  %v2186_v47 = vpack.c.bf16 %v2154_v49, %v2154_v49 }
 0x220   : > { %v2187_v18 = vpack.c.bf16 %v2155_v37, %v2155_v37  ;;  %v2574_v43 = vpack.c.bf16 %v2526_v42, %v2526_v42  ;;  %v2575_v32 = vpack.c.bf16 %v2527_v23, %v2527_v23  ;;  %v2963_v48 = vmul.f32 %v6750_v25, %v2255_v45  ;;  %v3609_v45 = vld [vmem:[#allocation2 + $0x80] sm:$0x1] }
 0x221   : > { %v2653_v36 = vunpack.c.l.bf16 %v2573_v0  ;;  %v2962_v6 = vmul.f32 %v6750_v25, %v2929_v27  ;;  %v2964_v34 = vmul.f32 %v6750_v25, %v2492_v1  ;;  %v2351_v4 = vunpack.c.l.bf16 %v2186_v47  ;;  %v4047_v27 = vld [vmem:[#allocation2 + $0x78] sm:$0xe] }
 0x222   : > { %v2352_v44 = vunpack.c.l.bf16 %v2187_v18  ;;  %v2654_v39 = vunpack.c.l.bf16 %v2574_v43  ;;  %v2655_v53 = vunpack.c.l.bf16 %v2575_v32  ;;  %v3011_v26 = vpack.c.bf16 %v2963_v48, %v2963_v48 }
 0x223   : > { %v2765_v22 = vrot.slane %v2653_v36, 1  ;;  %v3010_v31 = vpack.c.bf16 %v2962_v6, %v2962_v6  ;;  %v3012_v30 = vpack.c.bf16 %v2964_v34, %v2964_v34  ;;  %v2415_v13 = vadd.f32 %v2383_v10, %v2351_v4  ;;  %v551_v34 = vpop.f32.mrf.mxu0 }
 0x224   : > { %v2416_v57 = vadd.f32 %v2384_v62, %v2352_v44  ;;  %v2766_v56 = vrot.slane %v2654_v39, 1  ;;  %v2768_v59 = vrot.slane %v2655_v53, 1  ;;  %v3091_v41 = vunpack.c.l.bf16 %v3011_v26 }
 0x225   : > { %v3090_v51 = vunpack.c.l.bf16 %v3010_v31  ;;  %v3092_v55 = vunpack.c.l.bf16 %v3012_v30  ;;  %v7465_v5 = vunpack.c.l.bf16 %v6368_v52  ;;  %v2447_v1 = vpack.c.bf16 %v2415_v13, %v2415_v13 }
 0x226   : > { %v2448_v2 = vpack.c.bf16 %v2416_v57, %v2416_v57  ;;  %v2767_v11 = vsel %vm1586_vm2, %v2765_v22, %v2766_v56  ;;  %v2769_v49 = vsel %vm1586_vm2, %v2766_v56, %v2768_v59  ;;  %v3203_v37 = vrot.slane %v3091_v41, 2 }
 0x227   : > { %v7469_v42 = vunpack.c.h.bf16 %v6368_v52  ;;  %v2613_v23 = vunpack.c.l.bf16 %v2447_v1  ;;  %v3205_v62 = vrot.slane %v3092_v55, 2  ;;  %v3629_v0 = vunpack.c.l.bf16 %v3609_v45 }
 0x228   : > { %v2614_v10 = vunpack.c.l.bf16 %v2448_v2  ;;  %v3202_v47 = vrot.slane %v3090_v51, 2  ;;  %v3425_v18 = vmul.f32 %v7465_v5, %v6802_v14  ;;  %v3662_v32 = vmul.f32 %v7465_v5, %v6804_v16 }
 0x229   : > { %v3426_v43 = vmul.f32 %v7469_v42, %v6802_v14  ;;  %v2853_v36 = vadd.f32 %v2767_v11, %v2613_v23  ;;  %v3663_v48 = vmul.f32 %v7469_v42, %v6804_v16  ;;  %v3664_v44 = vmul.f32 %v6804_v16, %v3629_v0 }
 0x22a   : > { %v2854_v6 = vadd.f32 %v2769_v49, %v2614_v10  ;;  %v3204_v4 = vsel %vm2025_vm6, %v3202_v47, %v3203_v37  ;;  %v3710_v39 = vpack.c.bf16 %v3662_v32, %v3662_v32  ;;  %v4067_v53 = vunpack.c.l.bf16 %v4047_v27 }
 0x22b   : > { %v2885_v52 = vpack.c.bf16 %v2853_v36, %v2853_v36  ;;  %v3206_v31 = vsel %vm2025_vm6, %v3203_v37, %v3205_v62  ;;  %v3711_v26 = vpack.c.bf16 %v3663_v48, %v3663_v48  ;;  %v3457_v30 = vpack.c.bf16 %v3425_v18, %v3425_v18  ;;  %v553_v48 = vpop.f32.mrf.mxu0 }
 0x22c   : > { %v2886_v22 = vpack.c.bf16 %v2854_v6, %v2854_v6  ;;  %v3458_v13 = vpack.c.bf16 %v3426_v43, %v3426_v43  ;;  %v3712_v57 = vpack.c.bf16 %v3664_v44, %v3664_v44  ;;  %v4100_v56 = vmul.f32 %v6793_v9, %v4067_v53 }
 0x22d   : > { %v3050_v59 = vunpack.c.l.bf16 %v2885_v52  ;;  %v3790_v41 = vunpack.c.l.bf16 %v3710_v39  ;;  %v4101_v55 = vmul.f32 %v7469_v42, %v6793_v9  ;;  %v3791_v45 = vunpack.c.l.bf16 %v3711_v26  ;;  %v1114_v52 = vld [vmem:[#allocation2 + $0x6c] sm:$0xff]  }
 0x22e   : > { %v3051_v51 = vunpack.c.l.bf16 %v2886_v22  ;;  %v3792_v1 = vunpack.c.l.bf16 %v3712_v57  ;;  %v4102_v2 = vmul.f32 %v6793_v9, %v3629_v0  ;;  %v4148_v11 = vpack.c.bf16 %v4100_v56, %v4100_v56 }
 0x22f   : > { %v4807_v49 = vunpack.c.l.b16 %v7426_v46  ;;  %v3290_v37 = vadd.f32 %v3204_v4, %v3050_v59  ;;  %v4149_v10 = vpack.c.bf16 %v4101_v55, %v4101_v55  ;;  %v4806_v62 = vunpack.c.l.b16 %v7420_v38 }
 0x230   : > { %v3291_v23 = vadd.f32 %v3206_v31, %v3051_v51  ;;  %v3521_v27 = vunpack.c.l.bf16 %v3457_v30  ;;  %v4150_v47 = vpack.c.bf16 %v4102_v2, %v4102_v2  ;;  %v4228_v18 = vunpack.c.l.bf16 %v4148_v11 }
 0x231   : > { %v3322_v43 = vpack.c.bf16 %v3290_v37, %v3290_v37  ;;  %v3522_v36 = vunpack.c.l.bf16 %v3458_v13  ;;  %v4229_v6 = vunpack.c.l.bf16 %v4149_v10  ;;  %v3902_v44 = vrot.slane %v3790_v41, 1 }
 0x232   : > { %v3323_v32 = vpack.c.bf16 %v3291_v23, %v3291_v23  ;;  %v3903_v39 = vrot.slane %v3791_v45, 1  ;;  %v3905_v53 = vrot.slane %v3792_v1, 1  ;;  %v4230_v0 = vunpack.c.l.bf16 %v4150_v47 }
 0x233   : > { %v3489_v22 = vunpack.c.l.bf16 %v3322_v43  ;;  %v4341_v4 = vrot.slane %v4229_v6, 2  ;;  %v7488_v31 = vpack.c.b16 %v4807_v49, %v4806_v62  ;;  %v4340_v26 = vrot.slane %v4228_v18, 2  ;;  %v1334_v49 = vld [vmem:[#allocation2 + $0x74] sm:$0x1]  ;;  %v1074_v18 = vld [vmem:[#allocation2 + $0xa8] sm:$0xf] }
 0x234   : > { %v3490_v46 = vunpack.c.l.bf16 %v3323_v32  ;;  %v4343_v38 = vrot.slane %v4230_v0, 2  ;;  %v7490_v30 = vpack.c.bf16 %v551_v34, %v551_v34  ;;  %v7492_v57 = vpack.c.bf16 %v553_v48, %v553_v48  ;;  %v1078_v48 = vld [vmem:[#allocation2 + $0xb0] sm:$0x1] }
 0x235   : > { %v3553_v56 = vadd.f32 %v3521_v27, %v3489_v22  ;;  %5286 = vrot.lane.b32.xlu2 %v7488_v31, %s6495_s10  ;;  %5110 = vrot.lane.b32.xlu0 %v7488_v31, %s6494_s23  ;;  %v1150_v59 = vunpack.c.l.bf16 %v1114_v52  ;;  %v3904_v51 = vsel %vm1586_vm2, %v3902_v44, %v3903_v39  ;;  %v3906_v41 = vsel %vm1586_vm2, %v3903_v39, %v3905_v53 }
 0x236   : > { %v3554_v13 = vadd.f32 %v3522_v36, %v3490_v46  ;;  %v4342_v55 = vsel %vm2025_vm6, %v4340_v26, %v4341_v4  ;;  %v879_v34 = vshrl.u32 %v7490_v30, 16  ;;  %v4344_v2 = vsel %vm2025_vm6, %v4341_v4, %v4343_v38 }
 0x237   : > { %v3585_v45 = vpack.c.bf16 %v3553_v56, %v3553_v56  ;;  %v887_v11 = vshrl.u32 %v7492_v57, 16  ;;  %v882_v23 = vshll.u32 %v7490_v30, 16  ;;  %v890_v10 = vshll.u32 %v7492_v57, 16  ;;  %v1773_v56 = vld [vmem:[#allocation2 + $0x6c] sm:$0xe] }
 0x238   : > { %v3586_v1 = vpack.c.bf16 %v3554_v13, %v3554_v13  ;;  %v881_v37 = vrot.slane %v879_v34, 7  ;;  %v1151_v62 = vunpack.c.h.bf16 %v1114_v52  ;;  %v1183_v32 = vmul.f32 %v6631_v24, %v1150_v59 }
 0x239   : > { %v3750_v27 = vunpack.c.l.bf16 %v3585_v45  ;;  %v889_v43 = vrot.slane %v887_v11, 7  ;;  %v1354_v39 = vunpack.c.l.bf16 %v1334_v49  ;;  %v1389_v38 = vmul.f32 %v6610_v17, %v1150_v59 }
 0x23a   : > { %v3751_v47 = vunpack.c.l.bf16 %v3586_v1  ;;  %v884_v36 = vor.u32 %v882_v23, %v881_v37  ;;  %v885_v6 = vrot.slane %v881_v37, 4  ;;  %v1184_v44 = vmul.f32 %v6631_v24, %v1151_v62 }
 0x23b   : > { %v3990_v53 = vadd.f32 %v3904_v51, %v3750_v27  ;;  %v892_v22 = vor.u32 %v890_v10, %v889_v43  ;;  %v894_v46 = vrot.slane %v889_v43, 4  ;;  %v1311_v52 = vpack.c.bf16 %v1183_v32, %v1183_v32 }
 0x23c   : > { %v3991_v0 = vadd.f32 %v3906_v41, %v3751_v47  ;;  %v1075_v4 = vsel %vm6697_vm5, %v884_v36, %v1074_v18  ;;  %v1312_v26 = vpack.c.bf16 %v1184_v44, %v1184_v44  ;;  %v1390_v41 = vmul.f32 %v6610_v17, %v1151_v62 }
 0x23d   : > { %v4022_v13 = vpack.c.bf16 %v3990_v53, %v3990_v53  ;;  %1076 = vst [vmem:[#allocation2 + $0xa8] sm:$0xf] %v1075_v4  ;;  %v893_v45 = vsel %vm6730_vm9, %v885_v6, %v892_v22  ;;  %v1079_v51 = vsel %vm6742_vm10, %v894_v46, %v1078_v48  ;;  %v1391_v1 = vmul.f32 %v6610_v17, %v1354_v39 }
 0x23e   : > { %v4023_v34 = vpack.c.bf16 %v3991_v0, %v3991_v0  ;;  %1077 = vst.msk [vmem:[#allocation2 + $0xac] sm:$0xf] %vm598_vm1, %v893_v45  ;;  %v1437_v11 = vpack.c.bf16 %v1389_v38, %v1389_v38  ;;  %v1476_v49 = vunpack.c.l.bf16 %v1311_v52  ;;  %v1477_v23 = vunpack.c.l.bf16 %v1312_v26 }
 0x23f   : > { %v4188_v37 = vunpack.c.l.bf16 %v4022_v13  ;;  %1080 = vst [vmem:[#allocation2 + $0xb0] sm:$0x1] %v1079_v51  ;;  %v1793_v10 = vunpack.c.l.bf16 %v1773_v56  ;;  %v1438_v27 = vpack.c.bf16 %v1390_v41, %v1390_v41  ;;  %v1439_v47 = vpack.c.bf16 %v1391_v1, %v1391_v1  ;;  %v2473_v51 = vld [vmem:[#allocation2 + $0x80] sm:$0x1] }
 0x240   : > { %v4189_v59 = vunpack.c.l.bf16 %v4023_v34  ;;  %v1517_v18 = vunpack.c.l.bf16 %v1437_v11  ;;  %v1829_v43 = vmul.f32 %v6647_v33, %v1151_v62  ;;  %v1830_v48 = vmul.f32 %v6647_v33, %v1354_v39 }
 0x241   : > { %v4428_v32 = vadd.f32 %v4342_v55, %v4188_v37  ;;  %v1828_v6 = vmul.f32 %v6647_v33, %v1793_v10  ;;  %v1518_v44 = vunpack.c.l.bf16 %v1438_v27  ;;  %v1519_v53 = vunpack.c.l.bf16 %v1439_v47 }
 0x242   : > { %v4429_v36 = vadd.f32 %v4344_v2, %v4189_v59  ;;  %v1632_v0 = vrot.slane %v1517_v18, 1  ;;  %v1877_v22 = vpack.c.bf16 %v1829_v43, %v1829_v43  ;;  %v1878_v26 = vpack.c.bf16 %v1830_v48, %v1830_v48 }
 0x243   : > { %v4460_v46 = vpack.c.bf16 %v4428_v32, %v4428_v32  ;;  %v1876_v52 = vpack.c.bf16 %v1828_v6, %v1828_v6  ;;  %v1633_v38 = vrot.slane %v1518_v44, 1  ;;  %v1635_v56 = vrot.slane %v1519_v53, 1  ;;  %v2910_v44 = vld [vmem:[#allocation2 + $0x78] sm:$0xe] }
 0x244   : > { %v4461_v4 = vpack.c.bf16 %v4429_v36, %v4429_v36  ;;  %v1957_v13 = vunpack.c.l.bf16 %v1877_v22  ;;  %v2289_v62 = vmul.f32 %v7465_v5, %v6783_v63  ;;  %v1958_v45 = vunpack.c.l.bf16 %v1878_v26 }
 0x245   : > { %v4530_v55 = vunpack.c.l.b16 %v4460_v46  ;;  %v1956_v34 = vunpack.c.l.bf16 %v1876_v52  ;;  %v1634_v39 = vsel %vm1586_vm2, %v1632_v0, %v1633_v38  ;;  %v1636_v41 = vsel %vm1586_vm2, %v1633_v38, %v1635_v56 }
 0x246   : > { %v4531_v2 = vunpack.c.l.b16 %v4461_v4  ;;  %v2072_v1 = vrot.slane %v1957_v13, 2  ;;  %v2290_v11 = vmul.f32 %v7469_v42, %v6783_v63  ;;  %v1717_v59 = vadd.f32 %v1634_v39, %v1476_v49 }
 0x247   : > { %v1718_v10 = vadd.f32 %v1636_v41, %v1477_v23  ;;  %v2071_v27 = vrot.slane %v1956_v34, 2  ;;  %v2074_v47 = vrot.slane %v1958_v45, 2  ;;  %v2321_v18 = vpack.c.bf16 %v2289_v62, %v2289_v62 }
 0x248   : > { %v4554_v37 = vpack.c.b16 %v4531_v2, %v4530_v55  ;;  %v2493_v43 = vunpack.c.l.bf16 %v2473_v51  ;;  %v1749_v32 = vpack.c.bf16 %v1717_v59, %v1717_v59  ;;  %v2322_v6 = vpack.c.bf16 %v2290_v11, %v2290_v11 }
 0x249   : > { %v1750_v36 = vpack.c.bf16 %v1718_v10, %v1718_v10  ;;  %v2528_v48 = vmul.f32 %v7465_v5, %v6787_v3  ;;  %v2073_v53 = vsel %vm2025_vm6, %v2071_v27, %v2072_v1  ;;  %v2075_v0 = vsel %vm2025_vm6, %v2072_v1, %v2074_v47  ;;  %v3358_v1 = vld [vmem:[#allocation2 + $0x84] sm:$0xff]  }
 0x24a   : > { %6199 = vmatmul.msk.bf16.gmra.mxu1 %vm4580_vm11, %v4554_v37  ;;  %v2385_v22 = vunpack.c.l.bf16 %v2321_v18  ;;  %v2529_v49 = vmul.f32 %v7469_v42, %v6787_v3  ;;  %v1915_v23 = vunpack.c.l.bf16 %v1749_v32  ;;  %v2530_v4 = vmul.f32 %v6787_v3, %v2493_v43 }
 0x24b   : > { %v1916_v46 = vunpack.c.l.bf16 %v1750_v36  ;;  %v2576_v52 = vpack.c.bf16 %v2528_v48, %v2528_v48  ;;  %v2930_v38 = vunpack.c.l.bf16 %v2910_v44  ;;  %v2966_v56 = vmul.f32 %v7469_v42, %v6750_v25  ;;  %v3610_v48 = vld [vmem:[#allocation2 + $0x8c] sm:$0x1] }
 0x24c   : > { %v2577_v26 = vpack.c.bf16 %v2529_v49, %v2529_v49  ;;  %v2967_v13 = vmul.f32 %v6750_v25, %v2493_v43  ;;  %v2156_v62 = vadd.f32 %v2073_v53, %v1915_v23  ;;  %v2578_v2 = vpack.c.bf16 %v2530_v4, %v2530_v4 }
 0x24d   : > { %v2157_v55 = vadd.f32 %v2075_v0, %v1916_v46  ;;  %v2656_v34 = vunpack.c.l.bf16 %v2576_v52  ;;  %v2965_v51 = vmul.f32 %v6750_v25, %v2930_v38  ;;  %v3014_v39 = vpack.c.bf16 %v2966_v56, %v2966_v56 }
 0x24e   : > { %v2657_v45 = vunpack.c.l.bf16 %v2577_v26  ;;  %v3015_v41 = vpack.c.bf16 %v2967_v13, %v2967_v13  ;;  %v2188_v11 = vpack.c.bf16 %v2156_v62, %v2156_v62  ;;  %v2386_v59 = vunpack.c.l.bf16 %v2322_v6 }
 0x24f   : > { %v2189_v37 = vpack.c.bf16 %v2157_v55, %v2157_v55  ;;  %v2658_v10 = vunpack.c.l.bf16 %v2578_v2  ;;  %v3013_v27 = vpack.c.bf16 %v2965_v51, %v2965_v51  ;;  %v3094_v47 = vunpack.c.l.bf16 %v3014_v39  ;;  %v4048_v2 = vld [vmem:[#allocation2 + $0x84] sm:$0xe] }
 0x250   : > { %v2353_v18 = vunpack.c.l.bf16 %v2188_v11  ;;  %v3095_v36 = vunpack.c.l.bf16 %v3015_v41  ;;  %v3394_v43 = vunpack.c.l.bf16 %v3358_v1  ;;  %v2770_v44 = vrot.slane %v2656_v34, 1 }
 0x251   : > { %v2354_v32 = vunpack.c.l.bf16 %v2189_v37  ;;  %v2771_v53 = vrot.slane %v2657_v45, 1  ;;  %v2773_v0 = vrot.slane %v2658_v10, 1  ;;  %v3093_v46 = vunpack.c.l.bf16 %v3013_v27 }
 0x252   : > { %v2417_v49 = vadd.f32 %v2385_v22, %v2353_v18  ;;  %v3395_v4 = vunpack.c.h.bf16 %v3358_v1  ;;  %v4808_v52 = vunpack.c.l.b16 %v7490_v30  ;;  %v4809_v26 = vunpack.c.l.b16 %v7492_v57 }
 0x253   : > { %v2418_v23 = vadd.f32 %v2386_v59, %v2354_v32  ;;  %v3208_v6 = vrot.slane %v3094_v47, 2  ;;  %v3630_v38 = vunpack.c.l.bf16 %v3610_v48  ;;  %v3210_v62 = vrot.slane %v3095_v36, 2 }
 0x254   : > { %v2449_v56 = vpack.c.bf16 %v2417_v49, %v2417_v49  ;;  %v3665_v55 = vmul.f32 %v6804_v16, %v3394_v43  ;;  %v2772_v34 = vsel %vm1586_vm2, %v2770_v44, %v2771_v53  ;;  %v2774_v45 = vsel %vm1586_vm2, %v2771_v53, %v2773_v0  ;;  %v556_v53 = vpop.f32.mrf.mxu0 }
 0x255   : > { %v2450_v13 = vpack.c.bf16 %v2418_v23, %v2418_v23  ;;  %v3666_v22 = vmul.f32 %v6804_v16, %v3395_v4  ;;  %v3667_v51 = vmul.f32 %v6804_v16, %v3630_v38  ;;  %v3207_v41 = vrot.slane %v3093_v46, 2 }
 0x256   : > { %v2615_v39 = vunpack.c.l.bf16 %v2449_v56  ;;  %v3713_v57 = vpack.c.bf16 %v3665_v55, %v3665_v55  ;;  %v3427_v1 = vmul.f32 %v6802_v14, %v3394_v43  ;;  %v4068_v59 = vunpack.c.l.bf16 %v4048_v2 }
 0x257   : > { %v2616_v30 = vunpack.c.l.bf16 %v2450_v13  ;;  %v3714_v11 = vpack.c.bf16 %v3666_v22, %v3666_v22  ;;  %v3715_v37 = vpack.c.bf16 %v3667_v51, %v3667_v51  ;;  %v3211_v47 = vsel %vm2025_vm6, %v3208_v6, %v3210_v62 }
 0x258   : > { %v2855_v10 = vadd.f32 %v2772_v34, %v2615_v39  ;;  %v3428_v18 = vmul.f32 %v6802_v14, %v3395_v4  ;;  %v3793_v32 = vunpack.c.l.bf16 %v3713_v57  ;;  %v4103_v48 = vmul.f32 %v6793_v9, %v4068_v59 }
 0x259   : > { %v2856_v27 = vadd.f32 %v2774_v45, %v2616_v30  ;;  %v3794_v36 = vunpack.c.l.bf16 %v3714_v11  ;;  %v4104_v44 = vmul.f32 %v6793_v9, %v3395_v4  ;;  %v3795_v23 = vunpack.c.l.bf16 %v3715_v37 }
 0x25a   : > { %v2887_v0 = vpack.c.bf16 %v2855_v10, %v2855_v10  ;;  %v4105_v43 = vmul.f32 %v6793_v9, %v3630_v38  ;;  %v3209_v46 = vsel %vm2025_vm6, %v3207_v41, %v3208_v6  ;;  %v3459_v56 = vpack.c.bf16 %v3427_v1, %v3427_v1 }
 0x25b   : > { %v2888_v49 = vpack.c.bf16 %v2856_v27, %v2856_v27  ;;  %v4151_v13 = vpack.c.bf16 %v4103_v48, %v4103_v48  ;;  %v4152_v55 = vpack.c.bf16 %v4104_v44, %v4104_v44  ;;  %v3460_v34 = vpack.c.bf16 %v3428_v18, %v3428_v18 }
 0x25c   : > { %v3052_v62 = vunpack.c.l.bf16 %v2887_v0  ;;  %v4153_v45 = vpack.c.bf16 %v4105_v43, %v4105_v43  ;;  %v3907_v22 = vrot.slane %v3793_v32, 1  ;;  %v3908_v51 = vrot.slane %v3794_v36, 1 }
 0x25d   : > { %v3053_v2 = vunpack.c.l.bf16 %v2888_v49  ;;  %v4231_v39 = vunpack.c.l.bf16 %v4151_v13  ;;  %v4232_v30 = vunpack.c.l.bf16 %v4152_v55  ;;  %v3910_v11 = vrot.slane %v3795_v23, 1  ;;  %v7572_v13 = vpop.f32.mrf.mxu1 }
 0x25e   : > { %v3292_v4 = vadd.f32 %v3209_v46, %v3052_v62  ;;  %v4233_v59 = vunpack.c.l.bf16 %v4153_v45  ;;  %v3523_v37 = vunpack.c.l.bf16 %v3459_v56  ;;  %v7553_v38 = vpack.c.b16 %v4809_v26, %v4808_v52  ;;  %v558_v26 = vpop.f32.mrf.mxu0 }
 0x25f   : > { %v3293_v57 = vadd.f32 %v3211_v47, %v3053_v2  ;;  %v4346_v10 = vrot.slane %v4232_v30, 2  ;;  %v7555_v6 = vpack.c.bf16 %v556_v53, %v556_v53  ;;  %v4345_v27 = vrot.slane %v4231_v39, 2  ;;  %v1335_v47 = vld [vmem:[#allocation2 + $0x80] sm:$0x1]  ;;  %v1081_v2 = vld [vmem:[#allocation2 + $0xb4] sm:$0xf] }
 0x260   : > { %v3324_v41 = vpack.c.bf16 %v3292_v4, %v3292_v4  ;;  %v1185_v18 = vmul.f32 %v7465_v5, %v6631_v24  ;;  %v3524_v32 = vunpack.c.l.bf16 %v3460_v34  ;;  %v3909_v36 = vsel %vm1586_vm2, %v3907_v22, %v3908_v51  ;;  %5288 = vrot.lane.b32.xlu1 %v7553_v38, %s6495_s10  ;;  %5112 = vrot.lane.b32.xlu2 %v7553_v38, %s6494_s23 }
 0x261   : > { %v3325_v1 = vpack.c.bf16 %v3293_v57, %v3293_v57  ;;  %v4348_v48 = vrot.slane %v4233_v59, 2  ;;  %v896_v52 = vshrl.u32 %v7555_v6, 16  ;;  %v3911_v0 = vsel %vm1586_vm2, %v3908_v51, %v3910_v11 }
 0x262   : > { %v3491_v44 = vunpack.c.l.bf16 %v3324_v41  ;;  %v4347_v49 = vsel %vm2025_vm6, %v4345_v27, %v4346_v10  ;;  %v899_v43 = vshll.u32 %v7555_v6, 16  ;;  %v7568_v46 = vpack.c.bf16 %v558_v26, %v558_v26 }
 0x263   : > { %v3492_v53 = vunpack.c.l.bf16 %v3325_v1  ;;  %v898_v23 = vrot.slane %v896_v52, 7  ;;  %v1186_v56 = vmul.f32 %v7469_v42, %v6631_v24  ;;  %v1313_v34 = vpack.c.bf16 %v1185_v18, %v1185_v18 }
 0x264   : > { %v3555_v55 = vadd.f32 %v3523_v37, %v3491_v44  ;;  %v1355_v45 = vunpack.c.l.bf16 %v1335_v47  ;;  %v4349_v22 = vsel %vm2025_vm6, %v4346_v10, %v4348_v48  ;;  %v904_v30 = vshrl.u32 %v7568_v46, 16 }
 0x265   : > { %v3556_v62 = vadd.f32 %v3524_v32, %v3492_v53  ;;  %v901_v51 = vor.u32 %v899_v43, %v898_v23  ;;  %v902_v39 = vrot.slane %v898_v23, 4  ;;  %v907_v11 = vshll.u32 %v7568_v46, 16  ;;  %v1085_v32 = vld [vmem:[#allocation2 + $0xbc] sm:$0x1]  ;;  %v1774_v23 = vld [vmem:[#allocation2 + $0x78] sm:$0xe] }
 0x266   : > { %v3587_v4 = vpack.c.bf16 %v3555_v55, %v3555_v55  ;;  %v1314_v59 = vpack.c.bf16 %v1186_v56, %v1186_v56  ;;  %v906_v1 = vrot.slane %v904_v30, 7  ;;  %v1392_v37 = vmul.f32 %v7465_v5, %v6610_v17 }
 0x267   : > { %v3588_v57 = vpack.c.bf16 %v3556_v62, %v3556_v62  ;;  %v1082_v41 = vsel %vm6697_vm5, %v901_v51, %v1081_v2  ;;  %v1393_v27 = vmul.f32 %v7469_v42, %v6610_v17  ;;  %v1394_v48 = vmul.f32 %v6610_v17, %v1355_v45 }
 0x268   : > { %v3752_v10 = vunpack.c.l.bf16 %v3587_v4  ;;  %1083 = vst [vmem:[#allocation2 + $0xb4] sm:$0xf] %v1082_v41  ;;  %v1478_v52 = vunpack.c.l.bf16 %v1313_v34  ;;  %v909_v26 = vor.u32 %v907_v11, %v906_v1  ;;  %v911_v47 = vrot.slane %v906_v1, 4  ;;  %v2222_v41 = vld [vmem:[#allocation2 + $0x84] sm:$0xff]   ;;  %v7592_v1 = vpop.f32.mrf.mxu1 }
 0x269   : > { %v3753_v18 = vunpack.c.l.bf16 %v3588_v57  ;;  %v1440_v44 = vpack.c.bf16 %v1392_v37, %v1392_v37  ;;  %v1441_v53 = vpack.c.bf16 %v1393_v27, %v1393_v27  ;;  %v1442_v55 = vpack.c.bf16 %v1394_v48, %v1394_v48 }
 0x26a   : > { %v3992_v43 = vadd.f32 %v3909_v36, %v3752_v10  ;;  %v1479_v62 = vunpack.c.l.bf16 %v1314_v59  ;;  %v910_v5 = vsel %vm6730_vm9, %v902_v39, %v909_v26  ;;  %v1086_v2 = vsel %vm6742_vm10, %v911_v47, %v1085_v32 }
 0x26b   : > { %v3993_v56 = vadd.f32 %v3911_v0, %v3753_v18  ;;  %v1520_v51 = vunpack.c.l.bf16 %v1440_v44  ;;  %v1521_v30 = vunpack.c.l.bf16 %v1441_v53  ;;  %1084 = vst.msk [vmem:[#allocation2 + $0xb8] sm:$0xf] %vm598_vm1, %v910_v5  ;;  %v1522_v34 = vunpack.c.l.bf16 %v1442_v55 }
 0x26c   : > { %v4024_v4 = vpack.c.bf16 %v3992_v43, %v3992_v43  ;;  %v1794_v11 = vunpack.c.l.bf16 %v1774_v23  ;;  %1087 = vst [vmem:[#allocation2 + $0xbc] sm:$0x1] %v1086_v2  ;;  %v1832_v59 = vmul.f32 %v7469_v42, %v6647_v33  ;;  %v1833_v39 = vmul.f32 %v6647_v33, %v1355_v45 }
 0x26d   : > { %v4025_v57 = vpack.c.bf16 %v3993_v56, %v3993_v56  ;;  %v1637_v36 = vrot.slane %v1520_v51, 1  ;;  %v1638_v0 = vrot.slane %v1521_v30, 1  ;;  %v1640_v10 = vrot.slane %v1522_v34, 1 }
 0x26e   : > { %v4190_v37 = vunpack.c.l.bf16 %v4024_v4  ;;  %v1831_v18 = vmul.f32 %v6647_v33, %v1794_v11  ;;  %v1880_v48 = vpack.c.bf16 %v1832_v59, %v1832_v59  ;;  %v1881_v26 = vpack.c.bf16 %v1833_v39, %v1833_v39 }
 0x26f   : > { %v4191_v27 = vunpack.c.l.bf16 %v4025_v57  ;;  %v1639_v32 = vsel %vm1586_vm2, %v1637_v36, %v1638_v0  ;;  %v2258_v47 = vunpack.c.l.bf16 %v2222_v41  ;;  %v1641_v23 = vsel %vm1586_vm2, %v1638_v0, %v1640_v10  ;;  %v2474_v36 = vld [vmem:[#allocation2 + $0x8c] sm:$0x1] }
 0x270   : > { %v4430_v44 = vadd.f32 %v4347_v49, %v4190_v37  ;;  %v1719_v43 = vadd.f32 %v1639_v32, %v1478_v52  ;;  %v1720_v42 = vadd.f32 %v1641_v23, %v1479_v62  ;;  %v1879_v56 = vpack.c.bf16 %v1831_v18, %v1831_v18  ;;  %v2911_v32 = vld [vmem:[#allocation2 + $0x84] sm:$0xe]  ;;  %v7603_v23 = vpop.f32.mrf.mxu1 }
 0x271   : > { %v4431_v53 = vadd.f32 %v4349_v22, %v4191_v27  ;;  %v1960_v45 = vunpack.c.l.bf16 %v1880_v48  ;;  %v1961_v55 = vunpack.c.l.bf16 %v1881_v26  ;;  %v2259_v30 = vunpack.c.h.bf16 %v2222_v41 }
 0x272   : > { %v4462_v5 = vpack.c.bf16 %v4430_v44, %v4430_v44  ;;  %v1751_v51 = vpack.c.bf16 %v1719_v43, %v1719_v43  ;;  %v1752_v4 = vpack.c.bf16 %v1720_v42, %v1720_v42  ;;  %v1959_v57 = vunpack.c.l.bf16 %v1879_v56 }
 0x273   : > { %v4463_v2 = vpack.c.bf16 %v4431_v53, %v4431_v53  ;;  %v2077_v34 = vrot.slane %v1960_v45, 2  ;;  %v2079_v11 = vrot.slane %v1961_v55, 2  ;;  %v2291_v22 = vmul.f32 %v6783_v63, %v2258_v47 }
 0x274   : > { %v4532_v59 = vunpack.c.l.b16 %v4462_v5  ;;  %v1917_v49 = vunpack.c.l.bf16 %v1751_v51  ;;  %v1918_v0 = vunpack.c.l.bf16 %v1752_v4  ;;  %v2076_v52 = vrot.slane %v1959_v57, 2 }
 0x275   : > { %v4533_v39 = vunpack.c.l.b16 %v4463_v2  ;;  %v2080_v62 = vsel %vm2025_vm6, %v2077_v34, %v2079_v11  ;;  %v2292_v37 = vmul.f32 %v6783_v63, %v2259_v30  ;;  %v2323_v10 = vpack.c.bf16 %v2291_v22, %v2291_v22 }
 0x276   : > { %v2494_v18 = vunpack.c.l.bf16 %v2474_v36  ;;  %v2531_v41 = vmul.f32 %v6787_v3, %v2258_v47  ;;  %v2078_v48 = vsel %vm2025_vm6, %v2076_v52, %v2077_v34  ;;  %v2159_v26 = vadd.f32 %v2080_v62, %v1918_v0 }
 0x277   : > { %v4555_v27 = vpack.c.b16 %v4533_v39, %v4532_v59  ;;  %v2324_v44 = vpack.c.bf16 %v2292_v37, %v2292_v37  ;;  %v2532_v53 = vmul.f32 %v6787_v3, %v2259_v30  ;;  %v2158_v43 = vadd.f32 %v2078_v48, %v1917_v49  ;;  %v6369_v49 = vld [vmem:[#allocation2 + $0x90] sm:$0xff]  }
 0x278   : > { %v2387_v42 = vunpack.c.l.bf16 %v2323_v10  ;;  %v2533_v56 = vmul.f32 %v6787_v3, %v2494_v18  ;;  %v2579_v45 = vpack.c.bf16 %v2531_v41, %v2531_v41  ;;  %v2191_v55 = vpack.c.bf16 %v2159_v26, %v2159_v26 }
 0x279   : > { %6200 = vmatmul.msk.bf16.gmra.mxu1 %vm4580_vm11, %v4555_v27  ;;  %v2388_v5 = vunpack.c.l.bf16 %v2324_v44  ;;  %v2580_v2 = vpack.c.bf16 %v2532_v53, %v2532_v53  ;;  %v2931_v47 = vunpack.c.l.bf16 %v2911_v32  ;;  %v2190_v51 = vpack.c.bf16 %v2158_v43, %v2158_v43 }
 0x27a   : > { %v2581_v4 = vpack.c.bf16 %v2533_v56, %v2533_v56  ;;  %v2659_v57 = vunpack.c.l.bf16 %v2579_v45  ;;  %v2969_v34 = vmul.f32 %v6750_v25, %v2259_v30  ;;  %v2356_v11 = vunpack.c.l.bf16 %v2191_v55  ;;  %v3611_v56 = vld [vmem:[#allocation2 + $0x98] sm:$0x1] }
 0x27b   : > { %v2660_v36 = vunpack.c.l.bf16 %v2580_v2  ;;  %v2968_v59 = vmul.f32 %v6750_v25, %v2931_v47  ;;  %v2970_v39 = vmul.f32 %v6750_v25, %v2494_v18  ;;  %v2355_v22 = vunpack.c.l.bf16 %v2190_v51 }
 0x27c   : > { %v2661_v0 = vunpack.c.l.bf16 %v2581_v4  ;;  %v3017_v52 = vpack.c.bf16 %v2969_v34, %v2969_v34  ;;  %v2420_v62 = vadd.f32 %v2388_v5, %v2356_v11  ;;  %v7610_v26 = vunpack.c.l.bf16 %v6369_v49  ;;  %v7615_v4 = vpop.f32.mrf.mxu1 }
 0x27d   : > { %v2776_v37 = vrot.slane %v2660_v36, 1  ;;  %v3016_v27 = vpack.c.bf16 %v2968_v59, %v2968_v59  ;;  %v3018_v10 = vpack.c.bf16 %v2970_v39, %v2970_v39  ;;  %v2419_v41 = vadd.f32 %v2387_v42, %v2355_v22  ;;  %v4049_v36 = vld [vmem:[#allocation2 + $0x90] sm:$0xe] }
 0x27e   : > { %v2778_v32 = vrot.slane %v2661_v0, 1  ;;  %v3097_v48 = vunpack.c.l.bf16 %v3017_v52  ;;  %v2452_v30 = vpack.c.bf16 %v2420_v62, %v2420_v62  ;;  %v2775_v44 = vrot.slane %v2659_v57, 1 }
 0x27f   : > { %v3096_v53 = vunpack.c.l.bf16 %v3016_v27  ;;  %v3098_v43 = vunpack.c.l.bf16 %v3018_v10  ;;  %v2451_v45 = vpack.c.bf16 %v2419_v41, %v2419_v41  ;;  %v7612_v55 = vunpack.c.h.bf16 %v6369_v49 }
 0x280   : > { %v3213_v18 = vrot.slane %v3097_v48, 2  ;;  %v2618_v2 = vunpack.c.l.bf16 %v2452_v30  ;;  %v2779_v5 = vsel %vm1586_vm2, %v2776_v37, %v2778_v32  ;;  %v3429_v34 = vmul.f32 %v7610_v26, %v6802_v14  ;;  %v561_v48 = vpop.f32.mrf.mxu0 }
 0x281   : > { %v3212_v47 = vrot.slane %v3096_v53, 2  ;;  %v3215_v51 = vrot.slane %v3098_v43, 2  ;;  %v2617_v42 = vunpack.c.l.bf16 %v2451_v45  ;;  %v3631_v11 = vunpack.c.l.bf16 %v3611_v56 }
 0x282   : > { %v3668_v57 = vmul.f32 %v7610_v26, %v6804_v16  ;;  %v2777_v59 = vsel %vm1586_vm2, %v2775_v44, %v2776_v37  ;;  %v2858_v39 = vadd.f32 %v2779_v5, %v2618_v2  ;;  %v3430_v49 = vmul.f32 %v7612_v55, %v6802_v14 }
 0x283   : > { %v2857_v22 = vadd.f32 %v2777_v59, %v2617_v42  ;;  %v3214_v0 = vsel %vm2025_vm6, %v3212_v47, %v3213_v18  ;;  %v3669_v52 = vmul.f32 %v7612_v55, %v6804_v16  ;;  %v3670_v62 = vmul.f32 %v6804_v16, %v3631_v11 }
 0x284   : > { %v2890_v27 = vpack.c.bf16 %v2858_v39, %v2858_v39  ;;  %v3216_v10 = vsel %vm2025_vm6, %v3213_v18, %v3215_v51  ;;  %v3716_v41 = vpack.c.bf16 %v3668_v57, %v3668_v57  ;;  %v4069_v32 = vunpack.c.l.bf16 %v4049_v36  ;;  %v7635_v8 = vpop.f32.mrf.mxu1 }
 0x285   : > { %v2889_v30 = vpack.c.bf16 %v2857_v22, %v2857_v22  ;;  %v3461_v37 = vpack.c.bf16 %v3429_v34, %v3429_v34  ;;  %v3717_v44 = vpack.c.bf16 %v3669_v52, %v3669_v52  ;;  %v3718_v53 = vpack.c.bf16 %v3670_v62, %v3670_v62 }
 0x286   : > { %v3055_v43 = vunpack.c.l.bf16 %v2890_v27  ;;  %v3462_v56 = vpack.c.bf16 %v3430_v49, %v3430_v49  ;;  %v4106_v45 = vmul.f32 %v6793_v9, %v4069_v32  ;;  %v4107_v2 = vmul.f32 %v7612_v55, %v6793_v9 }
 0x287   : > { %v3054_v5 = vunpack.c.l.bf16 %v2889_v30  ;;  %v3796_v47 = vunpack.c.l.bf16 %v3716_v41  ;;  %v3797_v42 = vunpack.c.l.bf16 %v3717_v44  ;;  %v4108_v59 = vmul.f32 %v6793_v9, %v3631_v11 }
 0x288   : > { %v3295_v18 = vadd.f32 %v3216_v10, %v3055_v43  ;;  %v3798_v51 = vunpack.c.l.bf16 %v3718_v53  ;;  %v4154_v57 = vpack.c.bf16 %v4106_v45, %v4106_v45  ;;  %v4155_v36 = vpack.c.bf16 %v4107_v2, %v4107_v2  ;;  %v563_v2 = vpop.f32.mrf.mxu0 }
 0x289   : > { %v4810_v34 = vunpack.c.l.b16 %v7555_v6  ;;  %v4811_v39 = vunpack.c.l.b16 %v7568_v46  ;;  %v3294_v22 = vadd.f32 %v3214_v0, %v3054_v5  ;;  %v4156_v49 = vpack.c.bf16 %v4108_v59, %v4108_v59 }
 0x28a   : > { %v3327_v52 = vpack.c.bf16 %v3295_v18, %v3295_v18  ;;  %v3525_v62 = vunpack.c.l.bf16 %v3461_v37  ;;  %v4234_v27 = vunpack.c.l.bf16 %v4154_v57  ;;  %v4235_v32 = vunpack.c.l.bf16 %v4155_v36 }
 0x28b   : > { %v3326_v41 = vpack.c.bf16 %v3294_v22, %v3294_v22  ;;  %v3912_v30 = vrot.slane %v3796_v47, 1  ;;  %v3913_v44 = vrot.slane %v3797_v42, 1  ;;  %v4236_v11 = vunpack.c.l.bf16 %v4156_v49 }
 0x28c   : > { %v3494_v10 = vunpack.c.l.bf16 %v3327_v52  ;;  %v3526_v53 = vunpack.c.l.bf16 %v3462_v56  ;;  %v3915_v43 = vrot.slane %v3798_v51, 1  ;;  %v4351_v45 = vrot.slane %v4235_v32, 2  ;;  %v1118_v51 = vld [vmem:[#allocation2 + $0x84] sm:$0xff]   ;;  %v1088_v32 = vld [vmem:[#allocation2 + $0xc0] sm:$0xf] }
 0x28d   : > { %v3493_v6 = vunpack.c.l.bf16 %v3326_v41  ;;  %v4353_v60 = vrot.slane %v4236_v11, 2  ;;  %v7637_v46 = vpack.c.b16 %v4811_v39, %v4810_v34  ;;  %v7639_v0 = vpack.c.bf16 %v561_v48, %v561_v48  ;;  %v1336_v39 = vld [vmem:[#allocation2 + $0x8c] sm:$0x1] }
 0x28e   : > { %v3558_v37 = vadd.f32 %v3526_v53, %v3494_v10  ;;  %v4350_v5 = vrot.slane %v4234_v27, 2  ;;  %v7641_v59 = vpack.c.bf16 %v563_v2, %v563_v2  ;;  %v3914_v47 = vsel %vm1586_vm2, %v3912_v30, %v3913_v44 }
 0x28f   : > { %v3557_v18 = vadd.f32 %v3525_v62, %v3493_v6  ;;  %5114 = vrot.lane.b32.xlu1 %v7637_v46, %s6494_s23  ;;  %v913_v56 = vshrl.u32 %v7639_v0, 16  ;;  %v916_v42 = vshll.u32 %v7639_v0, 16  ;;  %v3916_v36 = vsel %vm1586_vm2, %v3913_v44, %v3915_v43  ;;  %v1092_v44 = vld [vmem:[#allocation2 + $0xc8] sm:$0x1] }
 0x290   : > { %v3590_v57 = vpack.c.bf16 %v3558_v37, %v3558_v37  ;;  %v4352_v48 = vsel %vm2025_vm6, %v4350_v5, %v4351_v45  ;;  %v921_v34 = vshrl.u32 %v7641_v59, 16  ;;  %v4354_v49 = vsel %vm2025_vm6, %v4351_v45, %v4353_v60  ;;  %v7654_v45 = vpop.f32.mrf.mxu1 }
 0x291   : > { %v3589_v22 = vpack.c.bf16 %v3557_v18, %v3557_v18  ;;  %v915_v52 = vrot.slane %v913_v56, 7  ;;  %v924_v62 = vshll.u32 %v7641_v59, 16  ;;  %v1154_v30 = vunpack.c.l.bf16 %v1118_v51 }
 0x292   : > { %v3755_v27 = vunpack.c.l.bf16 %v3590_v57  ;;  %v923_v41 = vrot.slane %v921_v34, 7  ;;  %v1155_v11 = vunpack.c.h.bf16 %v1118_v51  ;;  %v1356_v43 = vunpack.c.l.bf16 %v1336_v39 }
 0x293   : > { %v3754_v10 = vunpack.c.l.bf16 %v3589_v22  ;;  %v918_v53 = vor.u32 %v916_v42, %v915_v52  ;;  %v919_v2 = vrot.slane %v915_v52, 4  ;;  %v1187_v18 = vmul.f32 %v6631_v24, %v1154_v30 }
 0x294   : > { %v3995_v6 = vadd.f32 %v3916_v36, %v3755_v27  ;;  %v926_v37 = vor.u32 %v924_v62, %v923_v41  ;;  %v928_v5 = vrot.slane %v923_v41, 4  ;;  %v1188_v57 = vmul.f32 %v6631_v24, %v1155_v11 }
 0x295   : > { %v3994_v60 = vadd.f32 %v3914_v47, %v3754_v10  ;;  %v1089_v56 = vsel %vm6697_vm5, %v918_v53, %v1088_v32  ;;  %v1395_v51 = vmul.f32 %v6610_v17, %v1154_v30  ;;  %v1315_v39 = vpack.c.bf16 %v1187_v18, %v1187_v18 }
 0x296   : > { %v4027_v42 = vpack.c.bf16 %v3995_v6, %v3995_v6  ;;  %1090 = vst [vmem:[#allocation2 + $0xc0] sm:$0xf] %v1089_v56  ;;  %v927_v36 = vsel %vm6730_vm9, %v919_v2, %v926_v37  ;;  %v1093_v34 = vsel %vm6742_vm10, %v928_v5, %v1092_v44  ;;  %v1316_v54 = vpack.c.bf16 %v1188_v57, %v1188_v57 }
 0x297   : > { %v4026_v22 = vpack.c.bf16 %v3994_v60, %v3994_v60  ;;  %5290 = vrot.lane.b32.xlu1 %v7637_v46, %s6495_s10  ;;  %1091 = vst.msk [vmem:[#allocation2 + $0xc4] sm:$0xf] %vm598_vm1, %v927_v36  ;;  %v1396_v47 = vmul.f32 %v6610_v17, %v1155_v11  ;;  %v1795_v52 = vunpack.c.l.bf16 %v1775_v20  ;;  %v1397_v27 = vmul.f32 %v6610_v17, %v1356_v43 }
 0x298   : > { %v4193_v62 = vunpack.c.l.bf16 %v4027_v42  ;;  %1094 = vst [vmem:[#allocation2 + $0xc8] sm:$0x1] %v1093_v34  ;;  %v1443_v12 = vpack.c.bf16 %v1395_v51, %v1395_v51  ;;  %v1480_v32 = vunpack.c.l.bf16 %v1315_v39  ;;  %v1481_v30 = vunpack.c.l.bf16 %v1316_v54 }
 0x299   : > { %v4192_v41 = vunpack.c.l.bf16 %v4026_v22  ;;  %v1444_v19 = vpack.c.bf16 %v1396_v47, %v1396_v47  ;;  %v1834_v10 = vmul.f32 %v6647_v33, %v1795_v52  ;;  %v1445_v2 = vpack.c.bf16 %v1397_v27, %v1397_v27  ;;  %v2475_v27 = vld [vmem:[#allocation2 + $0x98] sm:$0x1] }
 0x29a   : > { %v4433_v53 = vadd.f32 %v4354_v49, %v4193_v62  ;;  %v1523_v44 = vunpack.c.l.bf16 %v1443_v12  ;;  %v1835_v6 = vmul.f32 %v6647_v33, %v1155_v11  ;;  %v1836_v20 = vmul.f32 %v6647_v33, %v1356_v43 }
 0x29b   : > { %v4432_v37 = vadd.f32 %v4352_v48, %v4192_v41  ;;  %v1524_v5 = vunpack.c.l.bf16 %v1444_v19  ;;  %v1882_v18 = vpack.c.bf16 %v1834_v10, %v1834_v10  ;;  %v1525_v56 = vunpack.c.l.bf16 %v1445_v2  ;;  %v4653_v48 = vpop.f32.mrf.mxu1 }
 0x29c   : > { %v4465_v60 = vpack.c.bf16 %v4433_v53, %v4433_v53  ;;  %v1642_v57 = vrot.slane %v1523_v44, 1  ;;  %v1883_v51 = vpack.c.bf16 %v1835_v6, %v1835_v6  ;;  %v1884_v34 = vpack.c.bf16 %v1836_v20, %v1836_v20 }
 0x29d   : > { %v4464_v42 = vpack.c.bf16 %v4432_v37, %v4432_v37  ;;  %v1643_v36 = vrot.slane %v1524_v5, 1  ;;  %v1962_v39 = vunpack.c.l.bf16 %v1882_v18  ;;  %v1645_v54 = vrot.slane %v1525_v56, 1 }
 0x29e   : > { %v4535_v22 = vunpack.c.l.b16 %v4465_v60  ;;  %v1963_v49 = vunpack.c.l.bf16 %v1883_v51  ;;  %v2293_v47 = vmul.f32 %v7610_v26, %v6783_v63  ;;  %v1964_v43 = vunpack.c.l.bf16 %v1884_v34  ;;  %v2912_v60 = vld [vmem:[#allocation2 + $0x90] sm:$0xe] }
 0x29f   : > { %v4534_v11 = vunpack.c.l.b16 %v4464_v42  ;;  %v1644_v52 = vsel %vm1586_vm2, %v1642_v57, %v1643_v36  ;;  %v2081_v62 = vrot.slane %v1962_v39, 2  ;;  %v1646_v12 = vsel %vm1586_vm2, %v1643_v36, %v1645_v54 }
 0x2a0   : > { %v1721_v41 = vadd.f32 %v1644_v52, %v1480_v32  ;;  %v2082_v19 = vrot.slane %v1963_v49, 2  ;;  %v2294_v10 = vmul.f32 %v7612_v55, %v6783_v63  ;;  %v1722_v2 = vadd.f32 %v1646_v12, %v1481_v30 }
 0x2a1   : > { %v4556_v53 = vpack.c.b16 %v4535_v22, %v4534_v11  ;;  %v2084_v44 = vrot.slane %v1964_v43, 2  ;;  %v2325_v6 = vpack.c.bf16 %v2293_v47, %v2293_v47  ;;  %v4724_v37 = vpack.c.bf16 %v4653_v48, %v4653_v48 }
 0x2a2   : > { %v1753_v5 = vpack.c.bf16 %v1721_v41, %v1721_v41  ;;  %v2083_v20 = vsel %vm2025_vm6, %v2081_v62, %v2082_v19  ;;  %v2495_v18 = vunpack.c.l.bf16 %v2475_v27  ;;  %v1754_v56 = vpack.c.bf16 %v1722_v2, %v1722_v2  ;;  %v3362_v2 = vld [vmem:[#allocation2 + $0x9c] sm:$0xff]  }
 0x2a3   : > { %6201 = vmatmul.msk.bf16.gmra.mxu1 %vm4580_vm11, %v4556_v53  ;;  %v2085_v57 = vsel %vm2025_vm6, %v2082_v19, %v2084_v44  ;;  %v2326_v32 = vpack.c.bf16 %v2294_v10, %v2294_v10  ;;  %v2534_v51 = vmul.f32 %v7610_v26, %v6787_v3  ;;  %v2389_v36 = vunpack.c.l.bf16 %v2325_v6 }
 0x2a4   : > { %v1919_v42 = vunpack.c.l.bf16 %v1753_v5  ;;  %v2535_v30 = vmul.f32 %v7612_v55, %v6787_v3  ;;  %v2536_v34 = vmul.f32 %v6787_v3, %v2495_v18  ;;  %v1920_v39 = vunpack.c.l.bf16 %v1754_v56 }
 0x2a5   : > { %v2582_v22 = vpack.c.bf16 %v2534_v51, %v2534_v51  ;;  %v2932_v54 = vunpack.c.l.bf16 %v2912_v60  ;;  %v2972_v49 = vmul.f32 %v7612_v55, %v6750_v25  ;;  %v2973_v52 = vmul.f32 %v6750_v25, %v2495_v18 }
 0x2a6   : > { %v2160_v47 = vadd.f32 %v2083_v20, %v1919_v42  ;;  %v2583_v11 = vpack.c.bf16 %v2535_v30, %v2535_v30  ;;  %v2584_v48 = vpack.c.bf16 %v2536_v34, %v2536_v34  ;;  %v2161_v43 = vadd.f32 %v2085_v57, %v1920_v39  ;;  %v3612_v39 = vld [vmem:[#allocation2 + $0xa4] sm:$0x1] }
 0x2a7   : > { %v2662_v62 = vunpack.c.l.bf16 %v2582_v22  ;;  %v2971_v27 = vmul.f32 %v6750_v25, %v2932_v54  ;;  %v3020_v12 = vpack.c.bf16 %v2972_v49, %v2972_v49  ;;  %v3021_v53 = vpack.c.bf16 %v2973_v52, %v2973_v52 }
 0x2a8   : > { %v2192_v41 = vpack.c.bf16 %v2160_v47, %v2160_v47  ;;  %v2663_v19 = vunpack.c.l.bf16 %v2583_v11  ;;  %v2664_v10 = vunpack.c.l.bf16 %v2584_v48  ;;  %v2193_v44 = vpack.c.bf16 %v2161_v43, %v2161_v43 }
 0x2a9   : > { %v2390_v6 = vunpack.c.l.bf16 %v2326_v32  ;;  %v3019_v5 = vpack.c.bf16 %v2971_v27, %v2971_v27  ;;  %v3100_v60 = vunpack.c.l.bf16 %v3020_v12  ;;  %v2780_v20 = vrot.slane %v2662_v62, 1  ;;  %v4050_v12 = vld [vmem:[#allocation2 + $0x9c] sm:$0xe] }
 0x2aa   : > { %v2357_v56 = vunpack.c.l.bf16 %v2192_v41  ;;  %v2781_v51 = vrot.slane %v2663_v19, 1  ;;  %v3101_v42 = vunpack.c.l.bf16 %v3021_v53  ;;  %v2358_v30 = vunpack.c.l.bf16 %v2193_v44 }
 0x2ab   : > { %v2783_v18 = vrot.slane %v2664_v10, 1  ;;  %v3099_v57 = vunpack.c.l.bf16 %v3019_v5  ;;  %v3398_v34 = vunpack.c.l.bf16 %v3362_v2  ;;  %v4812_v22 = vunpack.c.l.b16 %v7639_v0 }
 0x2ac   : > { %v4868_v54 = vunpack.c.l.b16 %v4724_v37  ;;  %v2421_v49 = vadd.f32 %v2389_v36, %v2357_v56  ;;  %v2422_v47 = vadd.f32 %v2390_v6, %v2358_v30  ;;  %v3218_v11 = vrot.slane %v3100_v60, 2 }
 0x2ad   : > { %v3220_v48 = vrot.slane %v3101_v42, 2  ;;  %v3399_v52 = vunpack.c.h.bf16 %v3362_v2  ;;  %v4813_v32 = vunpack.c.l.b16 %v7641_v59  ;;  %v3632_v27 = vunpack.c.l.bf16 %v3612_v39  ;;  %v4655_v39 = vpop.f32.mrf.mxu1 }
 0x2ae   : > { %v2453_v43 = vpack.c.bf16 %v2421_v49, %v2421_v49  ;;  %v3671_v62 = vmul.f32 %v6804_v16, %v3398_v34  ;;  %v2454_v41 = vpack.c.bf16 %v2422_v47, %v2422_v47  ;;  %v2782_v19 = vsel %vm1586_vm2, %v2780_v20, %v2781_v51 }
 0x2af   : > { %v2784_v10 = vsel %vm1586_vm2, %v2781_v51, %v2783_v18  ;;  %v3217_v53 = vrot.slane %v3099_v57, 2  ;;  %v3672_v37 = vmul.f32 %v6804_v16, %v3399_v52  ;;  %v3673_v36 = vmul.f32 %v6804_v16, %v3632_v27 }
 0x2b0   : > { %v2619_v0 = vunpack.c.l.bf16 %v2453_v43  ;;  %v3719_v44 = vpack.c.bf16 %v3671_v62, %v3671_v62  ;;  %v2620_v2 = vunpack.c.l.bf16 %v2454_v41  ;;  %v3221_v59 = vsel %vm2025_vm6, %v3218_v11, %v3220_v48 }
 0x2b1   : > { %v3431_v6 = vmul.f32 %v6802_v14, %v3398_v34  ;;  %v4070_v5 = vunpack.c.l.bf16 %v4050_v12  ;;  %v3432_v56 = vmul.f32 %v6802_v14, %v3399_v52  ;;  %v3720_v42 = vpack.c.bf16 %v3672_v37, %v3672_v37 }
 0x2b2   : > { %v2859_v60 = vadd.f32 %v2782_v19, %v2619_v0  ;;  %v3721_v20 = vpack.c.bf16 %v3673_v36, %v3673_v36  ;;  %v2860_v30 = vadd.f32 %v2784_v10, %v2620_v2  ;;  %v3219_v51 = vsel %vm2025_vm6, %v3217_v53, %v3218_v11 }
 0x2b3   : > { %v4109_v18 = vmul.f32 %v6793_v9, %v4070_v5  ;;  %v4110_v57 = vmul.f32 %v6793_v9, %v3399_v52  ;;  %v3799_v47 = vunpack.c.l.bf16 %v3719_v44  ;;  %v3800_v43 = vunpack.c.l.bf16 %v3720_v42 }
 0x2b4   : > { %v2891_v49 = vpack.c.bf16 %v2859_v60, %v2859_v60  ;;  %v3801_v48 = vunpack.c.l.bf16 %v3721_v20  ;;  %v2892_v62 = vpack.c.bf16 %v2860_v30, %v2860_v30  ;;  %v4111_v34 = vmul.f32 %v6793_v9, %v3632_v27 }
 0x2b5   : > { %v4157_v12 = vpack.c.bf16 %v4109_v18, %v4109_v18  ;;  %v4158_v41 = vpack.c.bf16 %v4110_v57, %v4110_v57  ;;  %v3463_v0 = vpack.c.bf16 %v3431_v6, %v3431_v6  ;;  %v3464_v37 = vpack.c.bf16 %v3432_v56, %v3432_v56 }
 0x2b6   : > { %v3056_v19 = vunpack.c.l.bf16 %v2891_v49  ;;  %v4725_v10 = vpack.c.bf16 %v4655_v39, %v4655_v39  ;;  %v3057_v36 = vunpack.c.l.bf16 %v2892_v62  ;;  %v4159_v11 = vpack.c.bf16 %v4111_v34, %v4111_v34  ;;  %v1337_v49 = vld [vmem:[#allocation2 + $0x98] sm:$0x1] }
 0x2b7   : > { %v4237_v53 = vunpack.c.l.bf16 %v4157_v12  ;;  %v4238_v2 = vunpack.c.l.bf16 %v4158_v41  ;;  %v3917_v52 = vrot.slane %v3799_v47, 1  ;;  %v3918_v58 = vrot.slane %v3800_v43, 1 }
 0x2b8   : > { %v3296_v5 = vadd.f32 %v3219_v51, %v3056_v19  ;;  %v4869_v60 = vunpack.c.l.b16 %v4725_v10  ;;  %v3297_v44 = vadd.f32 %v3221_v59, %v3057_v36  ;;  %v3920_v42 = vrot.slane %v3801_v48, 1 }
 0x2b9   : > { %v4239_v20 = vunpack.c.l.bf16 %v4159_v11  ;;  %v4356_v30 = vrot.slane %v4238_v2, 2  ;;  %v7704_v27 = vpack.c.b16 %v4813_v32, %v4812_v22  ;;  %v1189_v6 = vmul.f32 %v7610_v26, %v6631_v24 }
 0x2ba   : > { %v3328_v35 = vpack.c.bf16 %v3296_v5, %v3296_v5  ;;  %v7706_v18 = vpack.c.b16 %v4869_v60, %v4868_v54  ;;  %v3329_v56 = vpack.c.bf16 %v3297_v44, %v3297_v44  ;;  %v4355_v57 = vrot.slane %v4237_v53, 2 }
 0x2bb   : > { %8474 = vst [vmem:[#allocation9_spill] sm:$0xff] %v7704_v27  ;;  %v4358_v39 = vrot.slane %v4239_v20, 2  ;;  %v1190_v51 = vmul.f32 %v7612_v55, %v6631_v24  ;;  %v3527_v59 = vunpack.c.l.bf16 %v3463_v0  ;;  %v3528_v43 = vunpack.c.l.bf16 %v3464_v37  ;;  %5116 = vrot.lane.b32.xlu2 %v7704_v27, %s6494_s23  ;;  %5292 = vrot.lane.b32.xlu0 %v7704_v27, %s6495_s10 }
 0x2bc   : > { %v3495_v47 = vunpack.c.l.bf16 %v3328_v35  ;;  %v1317_v22 = vpack.c.bf16 %v1189_v6, %v1189_v6  ;;  %v3496_v54 = vunpack.c.l.bf16 %v3329_v56  ;;  %v3919_v32 = vsel %vm1586_vm2, %v3917_v52, %v3918_v58  ;;  %5300 = vrot.lane.b32.xlu1 %v7706_v18, %s6494_s23  ;;  %v1776_v35 = vld [vmem:[#allocation2 + $0x90] sm:$0xe] }
 0x2bd   : > { %v3921_v48 = vsel %vm1586_vm2, %v3918_v58, %v3920_v42  ;;  %v4357_v62 = vsel %vm2025_vm6, %v4355_v57, %v4356_v30  ;;  %v4359_v12 = vsel %vm2025_vm6, %v4356_v30, %v4358_v39  ;;  %v1318_v41 = vpack.c.bf16 %v1190_v51, %v1190_v51 }
 0x2be   : > { %v3559_v34 = vadd.f32 %v3527_v59, %v3495_v47  ;;  %v1357_v19 = vunpack.c.l.bf16 %v1337_v49  ;;  %v3560_v0 = vadd.f32 %v3528_v43, %v3496_v54  ;;  %v1398_v37 = vmul.f32 %v7610_v26, %v6610_v17  ;;  %v2226_v43 = vld [vmem:[#allocation2 + $0x9c] sm:$0xff]  }
 0x2bf   : > { %v1399_v10 = vmul.f32 %v7612_v55, %v6610_v17  ;;  %v1482_v36 = vunpack.c.l.bf16 %v1317_v22  ;;  %v1483_v53 = vunpack.c.l.bf16 %v1318_v41  ;;  %v1796_v2 = vunpack.c.l.bf16 %v1776_v35 }
 0x2c0   : > { %v3591_v58 = vpack.c.bf16 %v3559_v34, %v3559_v34  ;;  %v1400_v11 = vmul.f32 %v6610_v17, %v1357_v19  ;;  %v3592_v5 = vpack.c.bf16 %v3560_v0, %v3560_v0  ;;  %v1446_v52 = vpack.c.bf16 %v1398_v37, %v1398_v37 }
 0x2c1   : > { %v1447_v60 = vpack.c.bf16 %v1399_v10, %v1399_v10  ;;  %v1838_v44 = vmul.f32 %v7612_v55, %v6647_v33  ;;  %v1837_v30 = vmul.f32 %v6647_v33, %v1796_v2  ;;  %v1839_v26 = vmul.f32 %v6647_v33, %v1357_v19 }
 0x2c2   : > { %v3756_v42 = vunpack.c.l.bf16 %v3591_v58  ;;  %v1448_v20 = vpack.c.bf16 %v1400_v11, %v1400_v11  ;;  %v3757_v6 = vunpack.c.l.bf16 %v3592_v5  ;;  %v1526_v56 = vunpack.c.l.bf16 %v1446_v52 }
 0x2c3   : > { %v1527_v57 = vunpack.c.l.bf16 %v1447_v60  ;;  %v1886_v39 = vpack.c.bf16 %v1838_v44, %v1838_v44  ;;  %v1885_v47 = vpack.c.bf16 %v1837_v30, %v1837_v30  ;;  %v1887_v59 = vpack.c.bf16 %v1839_v26, %v1839_v26 }
 0x2c4   : > { %v3996_v51 = vadd.f32 %v3919_v32, %v3756_v42  ;;  %v1528_v49 = vunpack.c.l.bf16 %v1448_v20  ;;  %v3997_v22 = vadd.f32 %v3921_v48, %v3757_v6  ;;  %v1647_v54 = vrot.slane %v1526_v56, 1  ;;  %v2476_v20 = vld [vmem:[#allocation2 + $0xa4] sm:$0x1] }
 0x2c5   : > { %v1648_v35 = vrot.slane %v1527_v57, 1  ;;  %v1966_v34 = vunpack.c.l.bf16 %v1886_v39  ;;  %v1965_v0 = vunpack.c.l.bf16 %v1885_v47  ;;  %v1967_v37 = vunpack.c.l.bf16 %v1887_v59 }
 0x2c6   : > { %v4028_v55 = vpack.c.bf16 %v3996_v51, %v3996_v51  ;;  %v1650_v41 = vrot.slane %v1528_v49, 1  ;;  %v4029_v10 = vpack.c.bf16 %v3997_v22, %v3997_v22  ;;  %v2262_v11 = vunpack.c.l.bf16 %v2226_v43 }
 0x2c7   : > { %v1649_v19 = vsel %vm1586_vm2, %v1647_v54, %v1648_v35  ;;  %v2087_v58 = vrot.slane %v1966_v34, 2  ;;  %v2086_v52 = vrot.slane %v1965_v0, 2  ;;  %v2089_v48 = vrot.slane %v1967_v37, 2 }
 0x2c8   : > { %v4194_v2 = vunpack.c.l.bf16 %v4028_v55  ;;  %v1651_v32 = vsel %vm1586_vm2, %v1648_v35, %v1650_v41  ;;  %v1723_v5 = vadd.f32 %v1649_v19, %v1482_v36  ;;  %v4195_v60 = vunpack.c.l.bf16 %v4029_v10  ;;  %v2913_v35 = vld [vmem:[#allocation2 + $0x9c] sm:$0xe] }
 0x2c9   : > { %v1724_v44 = vadd.f32 %v1651_v32, %v1483_v53  ;;  %v2263_v42 = vunpack.c.h.bf16 %v2226_v43  ;;  %v2088_v6 = vsel %vm2025_vm6, %v2086_v52, %v2087_v58  ;;  %v2295_v56 = vmul.f32 %v6783_v63, %v2262_v11 }
 0x2ca   : > { %v4434_v30 = vadd.f32 %v4357_v62, %v4194_v2  ;;  %v1755_v26 = vpack.c.bf16 %v1723_v5, %v1723_v5  ;;  %v4435_v57 = vadd.f32 %v4359_v12, %v4195_v60  ;;  %v2090_v51 = vsel %vm2025_vm6, %v2087_v58, %v2089_v48 }
 0x2cb   : > { %v1756_v39 = vpack.c.bf16 %v1724_v44, %v1724_v44  ;;  %v2296_v49 = vmul.f32 %v6783_v63, %v2263_v42  ;;  %v2327_v59 = vpack.c.bf16 %v2295_v56, %v2295_v56  ;;  %v2496_v22 = vunpack.c.l.bf16 %v2476_v20 }
 0x2cc   : > { %v4466_v47 = vpack.c.bf16 %v4434_v30, %v4434_v30  ;;  %v1921_v36 = vunpack.c.l.bf16 %v1755_v26  ;;  %v4467_v53 = vpack.c.bf16 %v4435_v57, %v4435_v57  ;;  %v2537_v62 = vmul.f32 %v6787_v3, %v2262_v11 }
 0x2cd   : > { %v1922_v54 = vunpack.c.l.bf16 %v1756_v39  ;;  %v2328_v43 = vpack.c.bf16 %v2296_v49, %v2296_v49  ;;  %v2391_v41 = vunpack.c.l.bf16 %v2327_v59  ;;  %v2538_v12 = vmul.f32 %v6787_v3, %v2263_v42 }
 0x2ce   : > { %v4536_v34 = vunpack.c.l.b16 %v4466_v47  ;;  %v2162_v55 = vadd.f32 %v2088_v6, %v1921_v36  ;;  %v4537_v0 = vunpack.c.l.b16 %v4467_v53  ;;  %v2539_v19 = vmul.f32 %v6787_v3, %v2496_v22  ;;  %v4658_v53 = vpop.f32.mrf.mxu1 }
 0x2cf   : > { %v2163_v37 = vadd.f32 %v2090_v51, %v1922_v54  ;;  %v2392_v10 = vunpack.c.l.bf16 %v2328_v43  ;;  %v2585_v2 = vpack.c.bf16 %v2537_v62, %v2537_v62  ;;  %v2586_v32 = vpack.c.bf16 %v2538_v12, %v2538_v12  ;;  %v6370_v51 = vld [vmem:[#allocation2 + $0xa8] sm:$0xff]   ;;  %v3613_v12 = vld [vmem:[#allocation2 + $0xb0] sm:$0x1] }
 0x2d0   : > { %v2194_v58 = vpack.c.bf16 %v2162_v55, %v2162_v55  ;;  %v2933_v5 = vunpack.c.l.bf16 %v2913_v35  ;;  %v4557_v52 = vpack.c.b16 %v4537_v0, %v4536_v34  ;;  %v2587_v44 = vpack.c.bf16 %v2539_v19, %v2539_v19 }
 0x2d1   : > { %v2195_v60 = vpack.c.bf16 %v2163_v37, %v2163_v37  ;;  %v2975_v11 = vmul.f32 %v6750_v25, %v2263_v42  ;;  %v2665_v20 = vunpack.c.l.bf16 %v2585_v2  ;;  %v2666_v30 = vunpack.c.l.bf16 %v2586_v32 }
 0x2d2   : > { %v2359_v48 = vunpack.c.l.bf16 %v2194_v58  ;;  %v2974_v26 = vmul.f32 %v6750_v25, %v2933_v5  ;;  %6202 = vmatmul.msk.bf16.gmra.mxu1 %vm4580_vm11, %v4557_v52  ;;  %v2667_v56 = vunpack.c.l.bf16 %v2587_v44  ;;  %v2976_v57 = vmul.f32 %v6750_v25, %v2496_v22 }
 0x2d3   : > { %v2360_v6 = vunpack.c.l.bf16 %v2195_v60  ;;  %v3023_v39 = vpack.c.bf16 %v2975_v11, %v2975_v11  ;;  %v2785_v47 = vrot.slane %v2665_v20, 1  ;;  %v2786_v36 = vrot.slane %v2666_v30, 1 }
 0x2d4   : > { %v2423_v49 = vadd.f32 %v2391_v41, %v2359_v48  ;;  %v3022_v59 = vpack.c.bf16 %v2974_v26, %v2974_v26  ;;  %v2788_v42 = vrot.slane %v2667_v56, 1  ;;  %v3024_v43 = vpack.c.bf16 %v2976_v57, %v2976_v57  ;;  %v4051_v48 = vld [vmem:[#allocation2 + $0xa8] sm:$0xe] }
 0x2d5   : > { %v2424_v54 = vadd.f32 %v2392_v10, %v2360_v6  ;;  %v3103_v62 = vunpack.c.l.bf16 %v3023_v39  ;;  %v7744_v55 = vunpack.c.l.bf16 %v6370_v51  ;;  %v2787_v22 = vsel %vm1586_vm2, %v2785_v47, %v2786_v36 }
 0x2d6   : > { %v2455_v35 = vpack.c.bf16 %v2423_v49, %v2423_v49  ;;  %v3102_v34 = vunpack.c.l.bf16 %v3022_v59  ;;  %v3104_v37 = vunpack.c.l.bf16 %v3024_v43  ;;  %v7747_v41 = vunpack.c.h.bf16 %v6370_v51 }
 0x2d7   : > { %v2456_v0 = vpack.c.bf16 %v2424_v54, %v2424_v54  ;;  %v3223_v58 = vrot.slane %v3103_v62, 2  ;;  %v2789_v32 = vsel %vm1586_vm2, %v2786_v36, %v2788_v42  ;;  %v3633_v10 = vunpack.c.l.bf16 %v3613_v12 }
 0x2d8   : > { %v2621_v19 = vunpack.c.l.bf16 %v2455_v35  ;;  %v3674_v5 = vmul.f32 %v7744_v55, %v6804_v16  ;;  %v3222_v60 = vrot.slane %v3102_v34, 2  ;;  %v3225_v44 = vrot.slane %v3104_v37, 2 }
 0x2d9   : > { %v2622_v2 = vunpack.c.l.bf16 %v2456_v0  ;;  %v3433_v11 = vmul.f32 %v7744_v55, %v6802_v14  ;;  %v3434_v30 = vmul.f32 %v7747_v41, %v6802_v14  ;;  %v3675_v26 = vmul.f32 %v7747_v41, %v6804_v16  ;;  %v4660_v0 = vpop.f32.mrf.mxu1 }
 0x2da   : > { %v2861_v52 = vadd.f32 %v2787_v22, %v2621_v19  ;;  %v3676_v6 = vmul.f32 %v6804_v16, %v3633_v10  ;;  %v4726_v56 = vpack.c.bf16 %v4658_v53, %v4658_v53  ;;  %v3224_v39 = vsel %vm2025_vm6, %v3222_v60, %v3223_v58 }
 0x2db   : > { %v2862_v20 = vadd.f32 %v2789_v32, %v2622_v2  ;;  %v3722_v51 = vpack.c.bf16 %v3674_v5, %v3674_v5  ;;  %v3723_v47 = vpack.c.bf16 %v3675_v26, %v3675_v26  ;;  %v4071_v59 = vunpack.c.l.bf16 %v4051_v48 }
 0x2dc   : > { %v2893_v57 = vpack.c.bf16 %v2861_v52, %v2861_v52  ;;  %v3724_v36 = vpack.c.bf16 %v3676_v6, %v3676_v6  ;;  %v3226_v42 = vsel %vm2025_vm6, %v3223_v58, %v3225_v44  ;;  %v3465_v43 = vpack.c.bf16 %v3433_v11, %v3433_v11 }
 0x2dd   : > { %v2894_v49 = vpack.c.bf16 %v2862_v20, %v2862_v20  ;;  %v4113_v62 = vmul.f32 %v7747_v41, %v6793_v9  ;;  %v3466_v34 = vpack.c.bf16 %v3434_v30, %v3434_v30  ;;  %v3802_v12 = vunpack.c.l.bf16 %v3722_v51  ;;  %v1122_v20 = vld [vmem:[#allocation2 + $0x9c] sm:$0xff]  }
 0x2de   : > { %v3058_v54 = vunpack.c.l.bf16 %v2893_v57  ;;  %v4112_v53 = vmul.f32 %v6793_v9, %v4071_v59  ;;  %v3803_v19 = vunpack.c.l.bf16 %v3723_v47  ;;  %v4114_v22 = vmul.f32 %v6793_v9, %v3633_v10 }
 0x2df   : > { %v3059_v35 = vunpack.c.l.bf16 %v2894_v49  ;;  %v4161_v2 = vpack.c.bf16 %v4113_v62, %v4113_v62  ;;  %v4870_v32 = vunpack.c.l.b16 %v4726_v56  ;;  %v3804_v52 = vunpack.c.l.bf16 %v3724_v36 }
 0x2e0   : > { %v3298_v37 = vadd.f32 %v3224_v39, %v3058_v54  ;;  %v4160_v60 = vpack.c.bf16 %v4112_v53, %v4112_v53  ;;  %v3529_v44 = vunpack.c.l.bf16 %v3465_v43  ;;  %v4162_v11 = vpack.c.bf16 %v4114_v22, %v4114_v22 }
 0x2e1   : > { %v3299_v5 = vadd.f32 %v3226_v42, %v3059_v35  ;;  %v4727_v48 = vpack.c.bf16 %v4660_v0, %v4660_v0  ;;  %v3530_v30 = vunpack.c.l.bf16 %v3466_v34  ;;  %v3922_v6 = vrot.slane %v3802_v12, 1  ;;  %v1338_v34 = vld [vmem:[#allocation2 + $0xa4] sm:$0x1] }
 0x2e2   : > { %v3330_v58 = vpack.c.bf16 %v3298_v37, %v3298_v37  ;;  %v4241_v57 = vunpack.c.l.bf16 %v4161_v2  ;;  %v3923_v49 = vrot.slane %v3803_v19, 1  ;;  %v4242_v39 = vunpack.c.l.bf16 %v4162_v11  ;;  %v1777_v11 = vld [vmem:[#allocation2 + $0x9c] sm:$0xe] }
 0x2e3   : > { %v3331_v26 = vpack.c.bf16 %v3299_v5, %v3299_v5  ;;  %v4871_v47 = vunpack.c.l.b16 %v4727_v48  ;;  %v3925_v10 = vrot.slane %v3804_v52, 1  ;;  %v4240_v54 = vunpack.c.l.bf16 %v4160_v60 }
 0x2e4   : > { %v3497_v51 = vunpack.c.l.bf16 %v3330_v58  ;;  %v1158_v56 = vunpack.c.l.bf16 %v1122_v20  ;;  %v1159_v62 = vunpack.c.h.bf16 %v1122_v20  ;;  %v4361_v35 = vrot.slane %v4241_v57, 2 }
 0x2e5   : > { %v3498_v59 = vunpack.c.l.bf16 %v3331_v26  ;;  %v7765_v36 = vpack.c.b16 %v4871_v47, %v4870_v32  ;;  %v4363_v53 = vrot.slane %v4242_v39, 2  ;;  %v3924_v37 = vsel %vm1586_vm2, %v3922_v6, %v3923_v49 }
 0x2e6   : > { %v3561_v42 = vadd.f32 %v3529_v44, %v3497_v51  ;;  %v1191_v0 = vmul.f32 %v6631_v24, %v1158_v56  ;;  %v1192_v19 = vmul.f32 %v6631_v24, %v1159_v62  ;;  %v3926_v2 = vsel %vm1586_vm2, %v3923_v49, %v3925_v10 }
 0x2e7   : > { %v3562_v43 = vadd.f32 %v3530_v30, %v3498_v59  ;;  %5302 = vrot.lane.b32.xlu0 %v7765_v36, %s6494_s23  ;;  %v4360_v32 = vrot.slane %v4240_v54, 2  ;;  %v1358_v58 = vunpack.c.l.bf16 %v1338_v34  ;;  %v1401_v44 = vmul.f32 %v6610_v17, %v1158_v56 }
 0x2e8   : > { %v3593_v12 = vpack.c.bf16 %v3561_v42, %v3561_v42  ;;  %v1319_v5 = vpack.c.bf16 %v1191_v0, %v1191_v0  ;;  %v1320_v60 = vpack.c.bf16 %v1192_v19, %v1192_v19  ;;  %v4364_v26 = vsel %vm2025_vm6, %v4361_v35, %v4363_v53 }
 0x2e9   : > { %v3594_v22 = vpack.c.bf16 %v3562_v43, %v3562_v43  ;;  %v4362_v20 = vsel %vm2025_vm6, %v4360_v32, %v4361_v35  ;;  %v1402_v30 = vmul.f32 %v6610_v17, %v1159_v62  ;;  %v1403_v57 = vmul.f32 %v6610_v17, %v1358_v58 }
 0x2ea   : > { %v3758_v52 = vunpack.c.l.bf16 %v3593_v12  ;;  %v1449_v51 = vpack.c.bf16 %v1401_v44, %v1401_v44  ;;  %v1484_v49 = vunpack.c.l.bf16 %v1319_v5  ;;  %v1485_v59 = vunpack.c.l.bf16 %v1320_v60 }
 0x2eb   : > { %v3759_v48 = vunpack.c.l.bf16 %v3594_v22  ;;  %v1450_v47 = vpack.c.bf16 %v1402_v30, %v1402_v30  ;;  %v1797_v10 = vunpack.c.l.bf16 %v1777_v11  ;;  %v1451_v42 = vpack.c.bf16 %v1403_v57, %v1403_v57 }
 0x2ec   : > { %v3998_v6 = vadd.f32 %v3924_v37, %v3758_v52  ;;  %v1529_v56 = vunpack.c.l.bf16 %v1449_v51  ;;  %v1841_v43 = vmul.f32 %v6647_v33, %v1159_v62  ;;  %v1842_v53 = vmul.f32 %v6647_v33, %v1358_v58 }
 0x2ed   : > { %v3999_v39 = vadd.f32 %v3926_v2, %v3759_v48  ;;  %v1530_v34 = vunpack.c.l.bf16 %v1450_v47  ;;  %v1840_v35 = vmul.f32 %v6647_v33, %v1797_v10  ;;  %v1531_v37 = vunpack.c.l.bf16 %v1451_v42 }
 0x2ee   : > { %v4030_v54 = vpack.c.bf16 %v3998_v6, %v3998_v6  ;;  %v1652_v19 = vrot.slane %v1529_v56, 1  ;;  %v1889_v22 = vpack.c.bf16 %v1841_v43, %v1841_v43  ;;  %v1890_v52 = vpack.c.bf16 %v1842_v53, %v1842_v53 }
 0x2ef   : > { %v4031_v0 = vpack.c.bf16 %v3999_v39, %v3999_v39  ;;  %v1653_v2 = vrot.slane %v1530_v34, 1  ;;  %v1888_v5 = vpack.c.bf16 %v1840_v35, %v1840_v35  ;;  %v1655_v44 = vrot.slane %v1531_v37, 1 }
 0x2f0   : > { %v4196_v12 = vunpack.c.l.bf16 %v4030_v54  ;;  %v1969_v11 = vunpack.c.l.bf16 %v1889_v22  ;;  %v2297_v62 = vmul.f32 %v7744_v55, %v6783_v63  ;;  %v1970_v57 = vunpack.c.l.bf16 %v1890_v52 }
 0x2f1   : > { %v4197_v32 = vunpack.c.l.bf16 %v4031_v0  ;;  %v1654_v30 = vsel %vm1586_vm2, %v1652_v19, %v1653_v2  ;;  %v1968_v6 = vunpack.c.l.bf16 %v1888_v5  ;;  %v1656_v51 = vsel %vm1586_vm2, %v1653_v2, %v1655_v44  ;;  %v2914_v19 = vld [vmem:[#allocation2 + $0xa8] sm:$0xe] }
 0x2f2   : > { %v4436_v60 = vadd.f32 %v4362_v20, %v4196_v12  ;;  %v1725_v39 = vadd.f32 %v1654_v30, %v1484_v49  ;;  %v2092_v47 = vrot.slane %v1969_v11, 2  ;;  %v1726_v54 = vadd.f32 %v1656_v51, %v1485_v59  ;;  %v2477_v20 = vld [vmem:[#allocation2 + $0xb0] sm:$0x1] }
 0x2f3   : > { %v4437_v48 = vadd.f32 %v4364_v26, %v4197_v32  ;;  %v2091_v42 = vrot.slane %v1968_v6, 2  ;;  %v2094_v56 = vrot.slane %v1970_v57, 2  ;;  %v2298_v34 = vmul.f32 %v7747_v41, %v6783_v63 }
 0x2f4   : > { %v4468_v58 = vpack.c.bf16 %v4436_v60, %v4436_v60  ;;  %v1757_v0 = vpack.c.bf16 %v1725_v39, %v1725_v39  ;;  %v2329_v26 = vpack.c.bf16 %v2297_v62, %v2297_v62  ;;  %v1758_v53 = vpack.c.bf16 %v1726_v54, %v1726_v54 }
 0x2f5   : > { %v4469_v10 = vpack.c.bf16 %v4437_v48, %v4437_v48  ;;  %v2093_v12 = vsel %vm2025_vm6, %v2091_v42, %v2092_v47  ;;  %v2095_v37 = vsel %vm2025_vm6, %v2092_v47, %v2094_v56  ;;  %v2330_v22 = vpack.c.bf16 %v2298_v34, %v2298_v34 }
 0x2f6   : > { %v4538_v43 = vunpack.c.l.b16 %v4468_v58  ;;  %v1923_v49 = vunpack.c.l.bf16 %v1757_v0  ;;  %v2393_v32 = vunpack.c.l.bf16 %v2329_v26  ;;  %v2497_v59 = vunpack.c.l.bf16 %v2477_v20 }
 0x2f7   : > { %v4539_v35 = vunpack.c.l.b16 %v4469_v10  ;;  %v1924_v5 = vunpack.c.l.bf16 %v1758_v53  ;;  %v2540_v52 = vmul.f32 %v7744_v55, %v6787_v3  ;;  %v2541_v60 = vmul.f32 %v7747_v41, %v6787_v3  ;;  %v4663_v53 = vpop.f32.mrf.mxu1 }
 0x2f8   : > { %v2164_v44 = vadd.f32 %v2093_v12, %v1923_v49  ;;  %v2394_v11 = vunpack.c.l.bf16 %v2330_v22  ;;  %v2542_v62 = vmul.f32 %v6787_v3, %v2497_v59  ;;  %v2934_v48 = vunpack.c.l.bf16 %v2914_v19 }
 0x2f9   : > { %v4558_v2 = vpack.c.b16 %v4539_v35, %v4538_v43  ;;  %v2165_v30 = vadd.f32 %v2095_v37, %v1924_v5  ;;  %v2588_v6 = vpack.c.bf16 %v2540_v52, %v2540_v52  ;;  %v2589_v57 = vpack.c.bf16 %v2541_v60, %v2541_v60  ;;  %v3366_v35 = vld [vmem:[#allocation2 + $0xb4] sm:$0xff]   ;;  %v3614_v52 = vld [vmem:[#allocation2 + $0xbc] sm:$0x1] }
 0x2fa   : > { %v2978_v58 = vmul.f32 %v7747_v41, %v6750_v25  ;;  %v2196_v51 = vpack.c.bf16 %v2164_v44, %v2164_v44  ;;  %v2590_v39 = vpack.c.bf16 %v2542_v62, %v2542_v62  ;;  %v2977_v47 = vmul.f32 %v6750_v25, %v2934_v48 }
 0x2fb   : > { %6203 = vmatmul.msk.bf16.gmra.mxu1 %vm4580_vm11, %v4558_v2  ;;  %v2979_v10 = vmul.f32 %v6750_v25, %v2497_v59  ;;  %v2197_v54 = vpack.c.bf16 %v2165_v30, %v2165_v30  ;;  %v2668_v42 = vunpack.c.l.bf16 %v2588_v6  ;;  %v2669_v56 = vunpack.c.l.bf16 %v2589_v57 }
 0x2fc   : > { %v3026_v20 = vpack.c.bf16 %v2978_v58, %v2978_v58  ;;  %v2361_v43 = vunpack.c.l.bf16 %v2196_v51  ;;  %v2670_v0 = vunpack.c.l.bf16 %v2590_v39  ;;  %v3025_v34 = vpack.c.bf16 %v2977_v47, %v2977_v47  ;;  %v4052_v39 = vld [vmem:[#allocation2 + $0xb4] sm:$0xe] }
 0x2fd   : > { %v3027_v26 = vpack.c.bf16 %v2979_v10, %v2979_v10  ;;  %v2362_v12 = vunpack.c.l.bf16 %v2197_v54  ;;  %v2790_v37 = vrot.slane %v2668_v42, 1  ;;  %v2791_v19 = vrot.slane %v2669_v56, 1 }
 0x2fe   : > { %v3106_v49 = vunpack.c.l.bf16 %v3026_v20  ;;  %v2425_v22 = vadd.f32 %v2393_v32, %v2361_v43  ;;  %v2793_v2 = vrot.slane %v2670_v0, 1  ;;  %v3105_v5 = vunpack.c.l.bf16 %v3025_v34 }
 0x2ff   : > { %v2426_v60 = vadd.f32 %v2394_v11, %v2362_v12  ;;  %v3107_v59 = vunpack.c.l.bf16 %v3027_v26  ;;  %v3402_v44 = vunpack.c.l.bf16 %v3366_v35  ;;  %v4728_v62 = vpack.c.bf16 %v4663_v53, %v4663_v53 }
 0x300   : > { %v2457_v48 = vpack.c.bf16 %v2425_v22, %v2425_v22  ;;  %v2792_v30 = vsel %vm1586_vm2, %v2790_v37, %v2791_v19  ;;  %v3228_v57 = vrot.slane %v3106_v49, 2  ;;  %v3403_v58 = vunpack.c.h.bf16 %v3366_v35 }
 0x301   : > { %v2458_v6 = vpack.c.bf16 %v2426_v60, %v2426_v60  ;;  %v3634_v51 = vunpack.c.l.bf16 %v3614_v52  ;;  %v2794_v10 = vsel %vm1586_vm2, %v2791_v19, %v2793_v2  ;;  %v3227_v54 = vrot.slane %v3105_v5, 2 }
 0x302   : > { %v2623_v47 = vunpack.c.l.bf16 %v2457_v48  ;;  %v3677_v32 = vmul.f32 %v6804_v16, %v3402_v44  ;;  %v3230_v56 = vrot.slane %v3107_v59, 2  ;;  %v3435_v11 = vmul.f32 %v6802_v14, %v3402_v44  ;;  %v4665_v44 = vpop.f32.mrf.mxu1 }
 0x303   : > { %v2624_v42 = vunpack.c.l.bf16 %v2458_v6  ;;  %v3678_v20 = vmul.f32 %v6804_v16, %v3403_v58  ;;  %v3679_v0 = vmul.f32 %v6804_v16, %v3634_v51  ;;  %v4072_v26 = vunpack.c.l.bf16 %v4052_v39 }
 0x304   : > { %v2863_v43 = vadd.f32 %v2792_v30, %v2623_v47  ;;  %v3725_v34 = vpack.c.bf16 %v3677_v32, %v3677_v32  ;;  %v4872_v35 = vunpack.c.l.b16 %v4728_v62  ;;  %v3229_v12 = vsel %vm2025_vm6, %v3227_v54, %v3228_v57 }
 0x305   : > { %v2864_v53 = vadd.f32 %v2794_v10, %v2624_v42  ;;  %v3726_v37 = vpack.c.bf16 %v3678_v20, %v3678_v20  ;;  %v3436_v49 = vmul.f32 %v6802_v14, %v3403_v58  ;;  %v3727_v22 = vpack.c.bf16 %v3679_v0, %v3679_v0 }
 0x306   : > { %v2895_v19 = vpack.c.bf16 %v2863_v43, %v2863_v43  ;;  %v4115_v2 = vmul.f32 %v6793_v9, %v4072_v26  ;;  %v3467_v52 = vpack.c.bf16 %v3435_v11, %v3435_v11  ;;  %v3805_v60 = vunpack.c.l.bf16 %v3725_v34 }
 0x307   : > { %v2896_v5 = vpack.c.bf16 %v2864_v53, %v2864_v53  ;;  %v4116_v59 = vmul.f32 %v6793_v9, %v3403_v58  ;;  %v3231_v30 = vsel %vm2025_vm6, %v3228_v57, %v3230_v56  ;;  %v3806_v62 = vunpack.c.l.bf16 %v3726_v37 }
 0x308   : > { %v3060_v48 = vunpack.c.l.bf16 %v2895_v19  ;;  %v4117_v6 = vmul.f32 %v6793_v9, %v3634_v51  ;;  %v3807_v47 = vunpack.c.l.bf16 %v3727_v22  ;;  %v4163_v10 = vpack.c.bf16 %v4115_v2, %v4115_v2 }
 0x309   : > { %v3061_v39 = vunpack.c.l.bf16 %v2896_v5  ;;  %v4164_v54 = vpack.c.bf16 %v4116_v59, %v4116_v59  ;;  %v3468_v42 = vpack.c.bf16 %v3436_v49, %v3436_v49  ;;  %v4729_v43 = vpack.c.bf16 %v4665_v44, %v4665_v44  ;;  %v1339_v44 = vld [vmem:[#allocation2 + $0xb0] sm:$0x1] }
 0x30a   : > { %v3300_v32 = vadd.f32 %v3229_v12, %v3060_v48  ;;  %v4165_v20 = vpack.c.bf16 %v4117_v6, %v4117_v6  ;;  %v3531_v11 = vunpack.c.l.bf16 %v3467_v52  ;;  %v3927_v34 = vrot.slane %v3805_v60, 1 }
 0x30b   : > { %v3301_v0 = vadd.f32 %v3231_v30, %v3061_v39  ;;  %v4244_v26 = vunpack.c.l.bf16 %v4164_v54  ;;  %v3928_v53 = vrot.slane %v3806_v62, 1  ;;  %v4873_v61 = vunpack.c.l.b16 %v4729_v43 }
 0x30c   : > { %v3332_v58 = vpack.c.bf16 %v3300_v32, %v3300_v32  ;;  %v4245_v19 = vunpack.c.l.bf16 %v4165_v20  ;;  %v3930_v56 = vrot.slane %v3807_v47, 1  ;;  %v4243_v37 = vunpack.c.l.bf16 %v4163_v10  ;;  %v1778_v32 = vld [vmem:[#allocation2 + $0xa8] sm:$0xe] }
 0x30d   : > { %v3333_v57 = vpack.c.bf16 %v3301_v0, %v3301_v0  ;;  %v1193_v51 = vmul.f32 %v7744_v55, %v6631_v24  ;;  %v3532_v2 = vunpack.c.l.bf16 %v3468_v42  ;;  %v4366_v12 = vrot.slane %v4244_v26, 2 }
 0x30e   : > { %v3499_v22 = vunpack.c.l.bf16 %v3332_v58  ;;  %v7813_v49 = vpack.c.b16 %v4873_v61, %v4872_v35  ;;  %v4368_v59 = vrot.slane %v4245_v19, 2  ;;  %v1194_v52 = vmul.f32 %v7747_v41, %v6631_v24 }
 0x30f   : > { %v3500_v5 = vunpack.c.l.bf16 %v3333_v57  ;;  %v1321_v60 = vpack.c.bf16 %v1193_v51, %v1193_v51  ;;  %v3929_v30 = vsel %vm1586_vm2, %v3927_v34, %v3928_v53  ;;  %v3931_v6 = vsel %vm1586_vm2, %v3928_v53, %v3930_v56 }
 0x310   : > { %v3563_v48 = vadd.f32 %v3531_v11, %v3499_v22  ;;  %5304 = vrot.lane.b32.xlu2 %v7813_v49, %s6494_s23  ;;  %v4365_v39 = vrot.slane %v4243_v37, 2  ;;  %v1322_v47 = vpack.c.bf16 %v1194_v52, %v1194_v52  ;;  %v1359_v35 = vunpack.c.l.bf16 %v1339_v44  ;;  %v2230_v52 = vld [vmem:[#allocation2 + $0xb4] sm:$0xff]  }
 0x311   : > { %v3564_v62 = vadd.f32 %v3532_v2, %v3500_v5  ;;  %v1404_v10 = vmul.f32 %v7744_v55, %v6610_v17  ;;  %v1405_v54 = vmul.f32 %v7747_v41, %v6610_v17  ;;  %v4369_v43 = vsel %vm2025_vm6, %v4366_v12, %v4368_v59 }
 0x312   : > { %v3595_v61 = vpack.c.bf16 %v3563_v48, %v3563_v48  ;;  %v4367_v20 = vsel %vm2025_vm6, %v4365_v39, %v4366_v12  ;;  %v1486_v0 = vunpack.c.l.bf16 %v1321_v60  ;;  %v1406_v34 = vmul.f32 %v6610_v17, %v1359_v35 }
 0x313   : > { %v3596_v42 = vpack.c.bf16 %v3564_v62, %v3564_v62  ;;  %v1452_v26 = vpack.c.bf16 %v1404_v10, %v1404_v10  ;;  %v1453_v58 = vpack.c.bf16 %v1405_v54, %v1405_v54  ;;  %v1487_v19 = vunpack.c.l.bf16 %v1322_v47 }
 0x314   : > { %v3760_v11 = vunpack.c.l.bf16 %v3595_v61  ;;  %v1798_v57 = vunpack.c.l.bf16 %v1778_v32  ;;  %v1844_v55 = vmul.f32 %v7747_v41, %v6647_v33  ;;  %v1454_v37 = vpack.c.bf16 %v1406_v34, %v1406_v34 }
 0x315   : > { %v3761_v53 = vunpack.c.l.bf16 %v3596_v42  ;;  %v1532_v51 = vunpack.c.l.bf16 %v1452_v26  ;;  %v1533_v22 = vunpack.c.l.bf16 %v1453_v58  ;;  %v1845_v12 = vmul.f32 %v6647_v33, %v1359_v35 }
 0x316   : > { %v4000_v56 = vadd.f32 %v3929_v30, %v3760_v11  ;;  %v1843_v5 = vmul.f32 %v6647_v33, %v1798_v57  ;;  %v1892_v59 = vpack.c.bf16 %v1844_v55, %v1844_v55  ;;  %v1534_v44 = vunpack.c.l.bf16 %v1454_v37 }
 0x317   : > { %v4001_v2 = vadd.f32 %v3931_v6, %v3761_v53  ;;  %v1657_v48 = vrot.slane %v1532_v51, 1  ;;  %v1658_v62 = vrot.slane %v1533_v22, 1  ;;  %v1893_v61 = vpack.c.bf16 %v1845_v12, %v1845_v12  ;;  %v2478_v12 = vld [vmem:[#allocation2 + $0xbc] sm:$0x1] }
 0x318   : > { %v4032_v60 = vpack.c.bf16 %v4000_v56, %v4000_v56  ;;  %v1891_v47 = vpack.c.bf16 %v1843_v5, %v1843_v5  ;;  %v1972_v10 = vunpack.c.l.bf16 %v1892_v59  ;;  %v1660_v54 = vrot.slane %v1534_v44, 1 }
 0x319   : > { %v4033_v39 = vpack.c.bf16 %v4001_v2, %v4001_v2  ;;  %v1659_v30 = vsel %vm1586_vm2, %v1657_v48, %v1658_v62  ;;  %v2266_v32 = vunpack.c.l.bf16 %v2230_v52  ;;  %v1973_v34 = vunpack.c.l.bf16 %v1893_v61  ;;  %v2915_v61 = vld [vmem:[#allocation2 + $0xb4] sm:$0xe] }
 0x31a   : > { %v4198_v41 = vunpack.c.l.bf16 %v4032_v60  ;;  %v1727_v42 = vadd.f32 %v1659_v30, %v1486_v0  ;;  %v1971_v11 = vunpack.c.l.bf16 %v1891_v47  ;;  %v1661_v26 = vsel %vm1586_vm2, %v1658_v62, %v1660_v54 }
 0x31b   : > { %v4199_v6 = vunpack.c.l.bf16 %v4033_v39  ;;  %v2097_v58 = vrot.slane %v1972_v10, 2  ;;  %v2267_v53 = vunpack.c.h.bf16 %v2230_v52  ;;  %v1728_v55 = vadd.f32 %v1661_v26, %v1487_v19 }
 0x31c   : > { %v4438_v35 = vadd.f32 %v4367_v20, %v4198_v41  ;;  %v1759_v56 = vpack.c.bf16 %v1727_v42, %v1727_v42  ;;  %v2096_v37 = vrot.slane %v1971_v11, 2  ;;  %v2099_v22 = vrot.slane %v1973_v34, 2 }
 0x31d   : > { %v4439_v57 = vadd.f32 %v4369_v43, %v4199_v6  ;;  %v2299_v2 = vmul.f32 %v6783_v63, %v2266_v32  ;;  %v2300_v5 = vmul.f32 %v6783_v63, %v2267_v53  ;;  %v1760_v0 = vpack.c.bf16 %v1728_v55, %v1728_v55 }
 0x31e   : > { %v4470_v51 = vpack.c.bf16 %v4438_v35, %v4438_v35  ;;  %v1925_v60 = vunpack.c.l.bf16 %v1759_v56  ;;  %v2098_v20 = vsel %vm2025_vm6, %v2096_v37, %v2097_v58  ;;  %v2100_v48 = vsel %vm2025_vm6, %v2097_v58, %v2099_v22 }
 0x31f   : > { %v4471_v59 = vpack.c.bf16 %v4439_v57, %v4439_v57  ;;  %v2331_v52 = vpack.c.bf16 %v2299_v2, %v2299_v2  ;;  %v2332_v43 = vpack.c.bf16 %v2300_v5, %v2300_v5  ;;  %v1926_v62 = vunpack.c.l.bf16 %v1760_v0 }
 0x320   : > { %v4540_v44 = vunpack.c.l.b16 %v4470_v51  ;;  %v2166_v39 = vadd.f32 %v2098_v20, %v1925_v60  ;;  %v2498_v47 = vunpack.c.l.bf16 %v2478_v12  ;;  %v2543_v30 = vmul.f32 %v6787_v3, %v2266_v32  ;;  %v6371_v20 = vld [vmem:[#allocation2 + $0xc0] sm:$0xff]  }
 0x321   : > { %v4541_v19 = vunpack.c.l.b16 %v4471_v59  ;;  %v2395_v10 = vunpack.c.l.bf16 %v2331_v52  ;;  %v2396_v41 = vunpack.c.l.bf16 %v2332_v43  ;;  %v2544_v54 = vmul.f32 %v6787_v3, %v2267_v53 }
 0x322   : > { %v2167_v42 = vadd.f32 %v2100_v48, %v1926_v62  ;;  %v2198_v11 = vpack.c.bf16 %v2166_v39, %v2166_v39  ;;  %v2545_v34 = vmul.f32 %v6787_v3, %v2498_v47  ;;  %v2591_v35 = vpack.c.bf16 %v2543_v30, %v2543_v30 }
 0x323   : > { %v4559_v6 = vpack.c.b16 %v4541_v19, %v4540_v44  ;;  %v2592_v26 = vpack.c.bf16 %v2544_v54, %v2544_v54  ;;  %v2935_v58 = vunpack.c.l.bf16 %v2915_v61  ;;  %v2981_v57 = vmul.f32 %v6750_v25, %v2267_v53  ;;  %v4668_v44 = vpop.f32.mrf.mxu1 }
 0x324   : > { %v2199_v55 = vpack.c.bf16 %v2167_v42, %v2167_v42  ;;  %v2363_v56 = vunpack.c.l.bf16 %v2198_v11  ;;  %v2593_v37 = vpack.c.bf16 %v2545_v34, %v2545_v34  ;;  %v2982_v51 = vmul.f32 %v6750_v25, %v2498_v47  ;;  %v3615_v47 = vld [vmem:[#allocation2 + $0xc8] sm:$0x1] }
 0x325   : > { %6204 = vmatmul.msk.bf16.gmra.mxu1 %vm4580_vm11, %v4559_v6  ;;  %v2671_v32 = vunpack.c.l.bf16 %v2591_v35  ;;  %v2672_v22 = vunpack.c.l.bf16 %v2592_v26  ;;  %v2980_v2 = vmul.f32 %v6750_v25, %v2935_v58  ;;  %v3029_v5 = vpack.c.bf16 %v2981_v57, %v2981_v57 }
 0x326   : > { %v2364_v12 = vunpack.c.l.bf16 %v2199_v55  ;;  %v2427_v59 = vadd.f32 %v2395_v10, %v2363_v56  ;;  %v2673_v0 = vunpack.c.l.bf16 %v2593_v37  ;;  %v3030_v60 = vpack.c.bf16 %v2982_v51, %v2982_v51  ;;  %v4053_v56 = vld [vmem:[#allocation2 + $0xc0] sm:$0xe] }
 0x327   : > { %v2795_v48 = vrot.slane %v2671_v32, 1  ;;  %v2796_v53 = vrot.slane %v2672_v22, 1  ;;  %v3028_v52 = vpack.c.bf16 %v2980_v2, %v2980_v2  ;;  %v3109_v43 = vunpack.c.l.bf16 %v3029_v5 }
 0x328   : > { %v2428_v19 = vadd.f32 %v2396_v41, %v2364_v12  ;;  %v2459_v62 = vpack.c.bf16 %v2427_v59, %v2427_v59  ;;  %v2798_v39 = vrot.slane %v2673_v0, 1  ;;  %v3110_v61 = vunpack.c.l.bf16 %v3030_v60 }
 0x329   : > { %v3108_v30 = vunpack.c.l.bf16 %v3028_v52  ;;  %v7845_v54 = vunpack.c.l.bf16 %v6371_v20  ;;  %v2797_v10 = vsel %vm1586_vm2, %v2795_v48, %v2796_v53  ;;  %v3233_v11 = vrot.slane %v3109_v43, 2 }
 0x32a   : > { %v2460_v6 = vpack.c.bf16 %v2428_v19, %v2428_v19  ;;  %v2625_v42 = vunpack.c.l.bf16 %v2459_v62  ;;  %v3235_v34 = vrot.slane %v3110_v61, 2  ;;  %v7848_v35 = vunpack.c.h.bf16 %v6371_v20 }
 0x32b   : > { %v3635_v26 = vunpack.c.l.bf16 %v3615_v47  ;;  %v2799_v57 = vsel %vm1586_vm2, %v2796_v53, %v2798_v39  ;;  %v3680_v55 = vmul.f32 %v7845_v54, %v6804_v16  ;;  %v3232_v37 = vrot.slane %v3108_v30, 2  ;;  %v4670_v30 = vpop.f32.mrf.mxu1 }
 0x32c   : > { %v2626_v58 = vunpack.c.l.bf16 %v2460_v6  ;;  %v2865_v41 = vadd.f32 %v2797_v10, %v2625_v42  ;;  %v3437_v51 = vmul.f32 %v7845_v54, %v6802_v14  ;;  %v3438_v32 = vmul.f32 %v7848_v35, %v6802_v14 }
 0x32d   : > { %v3681_v22 = vmul.f32 %v7848_v35, %v6804_v16  ;;  %v3682_v12 = vmul.f32 %v6804_v16, %v3635_v26  ;;  %v3728_v59 = vpack.c.bf16 %v3680_v55, %v3680_v55  ;;  %v4730_v0 = vpack.c.bf16 %v4668_v44, %v4668_v44 }
 0x32e   : > { %v2866_v2 = vadd.f32 %v2799_v57, %v2626_v58  ;;  %v2897_v5 = vpack.c.bf16 %v2865_v41, %v2865_v41  ;;  %v3236_v60 = vsel %vm2025_vm6, %v3233_v11, %v3235_v34  ;;  %v4073_v48 = vunpack.c.l.bf16 %v4053_v56 }
 0x32f   : > { %v3729_v20 = vpack.c.bf16 %v3681_v22, %v3681_v22  ;;  %v3234_v43 = vsel %vm2025_vm6, %v3232_v37, %v3233_v11  ;;  %v3730_v19 = vpack.c.bf16 %v3682_v12, %v3682_v12  ;;  %v3469_v62 = vpack.c.bf16 %v3437_v51, %v3437_v51 }
 0x330   : > { %v2898_v53 = vpack.c.bf16 %v2866_v2, %v2866_v2  ;;  %v3062_v52 = vunpack.c.l.bf16 %v2897_v5  ;;  %v3470_v39 = vpack.c.bf16 %v3438_v32, %v3438_v32  ;;  %v4118_v61 = vmul.f32 %v6793_v9, %v4073_v48  ;;  %v1126_v5 = vld [vmem:[#allocation2 + $0xb4] sm:$0xff]  }
 0x331   : > { %v4119_v47 = vmul.f32 %v7848_v35, %v6793_v9  ;;  %v3808_v44 = vunpack.c.l.bf16 %v3728_v59  ;;  %v3809_v10 = vunpack.c.l.bf16 %v3729_v20  ;;  %v3810_v34 = vunpack.c.l.bf16 %v3730_v19 }
 0x332   : > { %v3063_v6 = vunpack.c.l.bf16 %v2898_v53  ;;  %v3302_v42 = vadd.f32 %v3234_v43, %v3062_v52  ;;  %v4120_v58 = vmul.f32 %v6793_v9, %v3635_v26  ;;  %v4166_v57 = vpack.c.bf16 %v4118_v61, %v4118_v61 }
 0x333   : > { %v4167_v41 = vpack.c.bf16 %v4119_v47, %v4119_v47  ;;  %v4874_v55 = vunpack.c.l.b16 %v4730_v0  ;;  %v4731_v37 = vpack.c.bf16 %v4670_v30, %v4670_v30  ;;  %v3533_v51 = vunpack.c.l.bf16 %v3469_v62 }
 0x334   : > { %v3303_v11 = vadd.f32 %v3236_v60, %v3063_v6  ;;  %v3334_v56 = vpack.c.bf16 %v3302_v42, %v3302_v42  ;;  %v3534_v32 = vunpack.c.l.bf16 %v3470_v39  ;;  %v4168_v22 = vpack.c.bf16 %v4120_v58, %v4120_v58  ;;  %v1340_v39 = vld [vmem:[#allocation2 + $0xbc] sm:$0x1] }
 0x335   : > { %v4247_v2 = vunpack.c.l.bf16 %v4167_v41  ;;  %v3932_v53 = vrot.slane %v3808_v44, 1  ;;  %v4875_v52 = vunpack.c.l.b16 %v4731_v37  ;;  %v3933_v59 = vrot.slane %v3809_v10, 1  ;;  %v1779_v37 = vld [vmem:[#allocation2 + $0xb4] sm:$0xe] }
 0x336   : > { %v3335_v12 = vpack.c.bf16 %v3303_v11, %v3303_v11  ;;  %v3501_v48 = vunpack.c.l.bf16 %v3334_v56  ;;  %v3935_v20 = vrot.slane %v3810_v34, 1  ;;  %v4246_v43 = vunpack.c.l.bf16 %v4166_v57 }
 0x337   : > { %v4248_v19 = vunpack.c.l.bf16 %v4168_v22  ;;  %v7866_v47 = vpack.c.b16 %v4875_v52, %v4874_v55  ;;  %v1162_v0 = vunpack.c.l.bf16 %v1126_v5  ;;  %v4371_v60 = vrot.slane %v4247_v2, 2 }
 0x338   : > { %v3502_v26 = vunpack.c.l.bf16 %v3335_v12  ;;  %v3565_v61 = vadd.f32 %v3533_v51, %v3501_v48  ;;  %v1163_v62 = vunpack.c.h.bf16 %v1126_v5  ;;  %v3934_v10 = vsel %vm1586_vm2, %v3932_v53, %v3933_v59 }
 0x339   : > { %v4373_v30 = vrot.slane %v4248_v19, 2  ;;  %5306 = vrot.lane.b32.xlu2 %v7866_v47, %s6494_s23  ;;  %v1195_v44 = vmul.f32 %v6631_v24, %v1162_v0  ;;  %v3936_v34 = vsel %vm1586_vm2, %v3933_v59, %v3935_v20  ;;  %v4370_v58 = vrot.slane %v4246_v43, 2 }
 0x33a   : > { %v3566_v6 = vadd.f32 %v3534_v32, %v3502_v26  ;;  %v3597_v42 = vpack.c.bf16 %v3565_v61, %v3565_v61  ;;  %v1196_v57 = vmul.f32 %v6631_v24, %v1163_v62  ;;  %v1360_v56 = vunpack.c.l.bf16 %v1340_v39 }
 0x33b   : > { %v1323_v11 = vpack.c.bf16 %v1195_v44, %v1195_v44  ;;  %v4372_v51 = vsel %vm2025_vm6, %v4370_v58, %v4371_v60  ;;  %v4374_v32 = vsel %vm2025_vm6, %v4371_v60, %v4373_v30  ;;  %v1407_v2 = vmul.f32 %v6610_v17, %v1162_v0 }
 0x33c   : > { %v3598_v41 = vpack.c.bf16 %v3566_v6, %v3566_v6  ;;  %v3762_v55 = vunpack.c.l.bf16 %v3597_v42  ;;  %v1324_v22 = vpack.c.bf16 %v1196_v57, %v1196_v57  ;;  %v1408_v48 = vmul.f32 %v6610_v17, %v1163_v62 }
 0x33d   : > { %v1409_v53 = vmul.f32 %v6610_v17, %v1360_v56  ;;  %v1455_v52 = vpack.c.bf16 %v1407_v2, %v1407_v2  ;;  %v1488_v24 = vunpack.c.l.bf16 %v1323_v11  ;;  %v1799_v20 = vunpack.c.l.bf16 %v1779_v37 }
 0x33e   : > { %v3763_v5 = vunpack.c.l.bf16 %v3598_v41  ;;  %v4002_v12 = vadd.f32 %v3934_v10, %v3762_v55  ;;  %v1489_v59 = vunpack.c.l.bf16 %v1324_v22  ;;  %v1456_v26 = vpack.c.bf16 %v1408_v48, %v1408_v48 }
 0x33f   : > { %v1457_v61 = vpack.c.bf16 %v1409_v53, %v1409_v53  ;;  %v1535_v39 = vunpack.c.l.bf16 %v1455_v52  ;;  %v1846_v60 = vmul.f32 %v6647_v33, %v1799_v20  ;;  %v1847_v30 = vmul.f32 %v6647_v33, %v1163_v62 }
 0x340   : > { %v4003_v43 = vadd.f32 %v3936_v34, %v3763_v5  ;;  %v4034_v19 = vpack.c.bf16 %v4002_v12, %v4002_v12  ;;  %v1848_v0 = vmul.f32 %v6647_v33, %v1360_v56  ;;  %v1536_v44 = vunpack.c.l.bf16 %v1456_v26 }
 0x341   : > { %v1537_v10 = vunpack.c.l.bf16 %v1457_v61  ;;  %v1662_v17 = vrot.slane %v1535_v39, 1  ;;  %v1894_v58 = vpack.c.bf16 %v1846_v60, %v1846_v60  ;;  %v1895_v57 = vpack.c.bf16 %v1847_v30, %v1847_v30 }
 0x342   : > { %v4035_v6 = vpack.c.bf16 %v4003_v43, %v4003_v43  ;;  %v4200_v42 = vunpack.c.l.bf16 %v4034_v19  ;;  %v1896_v41 = vpack.c.bf16 %v1848_v0, %v1848_v0  ;;  %v1663_v11 = vrot.slane %v1536_v44, 1  ;;  %v2479_v19 = vld [vmem:[#allocation2 + $0xc8] sm:$0x1] }
 0x343   : > { %v1665_v37 = vrot.slane %v1537_v10, 1  ;;  %v1974_v22 = vunpack.c.l.bf16 %v1894_v58  ;;  %v1975_v2 = vunpack.c.l.bf16 %v1895_v57  ;;  %v2301_v62 = vmul.f32 %v7845_v54, %v6783_v63 }
 0x344   : > { %v4201_v55 = vunpack.c.l.bf16 %v4035_v6  ;;  %v4440_v34 = vadd.f32 %v4372_v51, %v4200_v42  ;;  %v1976_v5 = vunpack.c.l.bf16 %v1896_v41  ;;  %v1664_v56 = vsel %vm1586_vm2, %v1662_v17, %v1663_v11 }
 0x345   : > { %v1666_v48 = vsel %vm1586_vm2, %v1663_v11, %v1665_v37  ;;  %v1729_v53 = vadd.f32 %v1664_v56, %v1488_v24  ;;  %v2101_v20 = vrot.slane %v1974_v22, 2  ;;  %v2102_v43 = vrot.slane %v1975_v2, 2 }
 0x346   : > { %v4441_v12 = vadd.f32 %v4374_v32, %v4201_v55  ;;  %v4472_v33 = vpack.c.bf16 %v4440_v34, %v4440_v34  ;;  %v1730_v52 = vadd.f32 %v1666_v48, %v1489_v59  ;;  %v2104_v61 = vrot.slane %v1976_v5, 2  ;;  %v2916_v59 = vld [vmem:[#allocation2 + $0xc0] sm:$0xe] }
 0x347   : > { %v2302_v39 = vmul.f32 %v7848_v35, %v6783_v63  ;;  %v1761_v60 = vpack.c.bf16 %v1729_v53, %v1729_v53  ;;  %v2103_v32 = vsel %vm2025_vm6, %v2101_v20, %v2102_v43  ;;  %v2333_v0 = vpack.c.bf16 %v2301_v62, %v2301_v62 }
 0x348   : > { %v4473_v51 = vpack.c.bf16 %v4441_v12, %v4441_v12  ;;  %v4542_v26 = vunpack.c.l.b16 %v4472_v33  ;;  %v1762_v30 = vpack.c.bf16 %v1730_v52, %v1730_v52  ;;  %v2105_v42 = vsel %vm2025_vm6, %v2102_v43, %v2104_v61  ;;  %v4673_v33 = vpop.f32.mrf.mxu1 }
 0x349   : > { %v2334_v44 = vpack.c.bf16 %v2302_v39, %v2302_v39  ;;  %v2499_v24 = vunpack.c.l.bf16 %v2479_v19  ;;  %v1927_v10 = vunpack.c.l.bf16 %v1761_v60  ;;  %v2397_v58 = vunpack.c.l.bf16 %v2333_v0 }
 0x34a   : > { %v4543_v6 = vunpack.c.l.b16 %v4473_v51  ;;  %v1928_v17 = vunpack.c.l.bf16 %v1762_v30  ;;  %v2546_v57 = vmul.f32 %v7845_v54, %v6787_v3  ;;  %v2547_v63 = vmul.f32 %v7848_v35, %v6787_v3  ;;  %v3370_v30 = vld [vmem:[#allocation2 + $0xcc] sm:$0xff]  }
 0x34b   : > { %v2398_v55 = vunpack.c.l.bf16 %v2334_v44  ;;  %v2548_v34 = vmul.f32 %v6787_v3, %v2499_v24  ;;  %v2168_v11 = vadd.f32 %v2103_v32, %v1927_v10  ;;  %v2936_v2 = vunpack.c.l.bf16 %v2916_v59 }
 0x34c   : > { %v4560_v41 = vpack.c.b16 %v4543_v6, %v4542_v26  ;;  %v2169_v37 = vadd.f32 %v2105_v42, %v1928_v17  ;;  %v2594_v22 = vpack.c.bf16 %v2546_v57, %v2546_v57  ;;  %v2595_v5 = vpack.c.bf16 %v2547_v63, %v2547_v63  ;;  %v3616_v42 = vld [vmem:[#allocation2 + $0xd4] sm:$0x1] }
 0x34d   : > { %v2596_v62 = vpack.c.bf16 %v2548_v34, %v2548_v34  ;;  %v2984_v12 = vmul.f32 %v7848_v35, %v6750_v25  ;;  %v2985_v54 = vmul.f32 %v6750_v25, %v2499_v24  ;;  %v2200_v56 = vpack.c.bf16 %v2168_v11, %v2168_v11 }
 0x34e   : > { %6205 = vmatmul.msk.bf16.gmra.mxu1 %vm4580_vm11, %v4560_v41  ;;  %v2201_v48 = vpack.c.bf16 %v2169_v37, %v2169_v37  ;;  %v2674_v53 = vunpack.c.l.bf16 %v2594_v22  ;;  %v2983_v52 = vmul.f32 %v6750_v25, %v2936_v2  ;;  %v2675_v3 = vunpack.c.l.bf16 %v2595_v5  ;;  %v4054_v22 = vld [vmem:[#allocation2 + $0xcc] sm:$0xe] }
 0x34f   : > { %v2676_v20 = vunpack.c.l.bf16 %v2596_v62  ;;  %v3032_v43 = vpack.c.bf16 %v2984_v12, %v2984_v12  ;;  %v3033_v19 = vpack.c.bf16 %v2985_v54, %v2985_v54  ;;  %v2365_v51 = vunpack.c.l.bf16 %v2200_v56 }
 0x350   : > { %v2366_v26 = vunpack.c.l.bf16 %v2201_v48  ;;  %v2800_v61 = vrot.slane %v2674_v53, 1  ;;  %v2801_v39 = vrot.slane %v2675_v3, 1  ;;  %v3031_v60 = vpack.c.bf16 %v2983_v52, %v2983_v52  ;;  %v4675_v48 = vpop.f32.mrf.mxu1 }
 0x351   : > { %v2429_v32 = vadd.f32 %v2397_v58, %v2365_v51  ;;  %v3112_v0 = vunpack.c.l.bf16 %v3032_v43  ;;  %v3113_v6 = vunpack.c.l.bf16 %v3033_v19  ;;  %v2803_v44 = vrot.slane %v2676_v20, 1 }
 0x352   : > { %v2430_v35 = vadd.f32 %v2398_v55, %v2366_v26  ;;  %v3406_v10 = vunpack.c.l.bf16 %v3370_v30  ;;  %v3407_v25 = vunpack.c.h.bf16 %v3370_v30  ;;  %v2802_v17 = vsel %vm1586_vm2, %v2800_v61, %v2801_v39 }
 0x353   : > { %v2461_v24 = vpack.c.bf16 %v2429_v32, %v2429_v32  ;;  %v3111_v57 = vunpack.c.l.bf16 %v3031_v60  ;;  %v3636_v41 = vunpack.c.l.bf16 %v3616_v42  ;;  %v3238_v11 = vrot.slane %v3112_v0, 2 }
 0x354   : > { %v2462_v59 = vpack.c.bf16 %v2430_v35, %v2430_v35  ;;  %v3240_v37 = vrot.slane %v3113_v6, 2  ;;  %v2804_v58 = vsel %vm1586_vm2, %v2801_v39, %v2803_v44  ;;  %v3683_v55 = vmul.f32 %v6804_v16, %v3406_v10 }
 0x355   : > { %v2627_v63 = vunpack.c.l.bf16 %v2461_v24  ;;  %v3684_v2 = vmul.f32 %v6804_v16, %v3407_v25  ;;  %v3685_v5 = vmul.f32 %v6804_v16, %v3636_v41  ;;  %v3439_v54 = vmul.f32 %v6802_v14, %v3406_v10 }
 0x356   : > { %v2628_v34 = vunpack.c.l.bf16 %v2462_v59  ;;  %v3440_v56 = vmul.f32 %v6802_v14, %v3407_v25  ;;  %v3237_v53 = vrot.slane %v3111_v57, 2  ;;  %v4074_v52 = vunpack.c.l.bf16 %v4054_v22 }
 0x357   : > { %v2867_v62 = vadd.f32 %v2802_v17, %v2627_v63  ;;  %v4732_v3 = vpack.c.bf16 %v4673_v33, %v4673_v33  ;;  %v3241_v19 = vsel %vm2025_vm6, %v3238_v11, %v3240_v37  ;;  %v3731_v26 = vpack.c.bf16 %v3683_v55, %v3683_v55 }
 0x358   : > { %v2868_v12 = vadd.f32 %v2804_v58, %v2628_v34  ;;  %v3239_v51 = vsel %vm2025_vm6, %v3237_v53, %v3238_v11  ;;  %v3732_v61 = vpack.c.bf16 %v3684_v2, %v3684_v2  ;;  %v3733_v39 = vpack.c.bf16 %v3685_v5, %v3685_v5  ;;  %v4678_v37 = vpop.f32.mrf.mxu1 }
 0x359   : > { %v2899_v20 = vpack.c.bf16 %v2867_v62, %v2867_v62  ;;  %v3471_v30 = vpack.c.bf16 %v3439_v54, %v3439_v54  ;;  %v3472_v32 = vpack.c.bf16 %v3440_v56, %v3440_v56  ;;  %v4121_v35 = vmul.f32 %v6793_v9, %v4074_v52 }
 0x35a   : > { %v2900_v43 = vpack.c.bf16 %v2868_v12, %v2868_v12  ;;  %v4122_v14 = vmul.f32 %v6793_v9, %v3407_v25  ;;  %v4123_v0 = vmul.f32 %v6793_v9, %v3636_v41  ;;  %v4733_v33 = vpack.c.bf16 %v4675_v48, %v4675_v48 }
 0x35b   : > { %v3064_v16 = vunpack.c.l.bf16 %v2899_v20  ;;  %v4876_v6 = vunpack.c.l.b16 %v4732_v3  ;;  %v3811_v24 = vunpack.c.l.bf16 %v3731_v26  ;;  %v3812_v59 = vunpack.c.l.bf16 %v3732_v61 }
 0x35c   : > { %v3065_v60 = vunpack.c.l.bf16 %v2900_v43  ;;  %v3813_v10 = vunpack.c.l.bf16 %v3733_v39  ;;  %v4877_v17 = vunpack.c.l.b16 %v4733_v33  ;;  %v3535_v34 = vunpack.c.l.bf16 %v3471_v30 }
 0x35d   : > { %v3304_v42 = vadd.f32 %v3239_v51, %v3064_v16  ;;  %v3536_v11 = vunpack.c.l.bf16 %v3472_v32  ;;  %v4169_v22 = vpack.c.bf16 %v4121_v35, %v4121_v35  ;;  %v4170_v58 = vpack.c.bf16 %v4122_v14, %v4122_v14 }
 0x35e   : > { %v3305_v44 = vadd.f32 %v3241_v19, %v3065_v60  ;;  %v4171_v55 = vpack.c.bf16 %v4123_v0, %v4123_v0  ;;  %v7912_v2 = vpack.c.b16 %v4877_v17, %v4876_v6  ;;  %v3937_v41 = vrot.slane %v3811_v24, 1 }
 0x35f   : > { %v3336_v57 = vpack.c.bf16 %v3304_v42, %v3304_v42  ;;  %v3938_v5 = vrot.slane %v3812_v59, 1  ;;  %v3940_v62 = vrot.slane %v3813_v10, 1  ;;  %v4249_v56 = vunpack.c.l.bf16 %v4169_v22 }
 0x360   : > { %v3337_v63 = vpack.c.bf16 %v3305_v44, %v3305_v44  ;;  %5308 = vrot.lane.b32.xlu1 %v7912_v2, %s6494_s23  ;;  %v4250_v48 = vunpack.c.l.bf16 %v4170_v58  ;;  %v4251_v53 = vunpack.c.l.bf16 %v4171_v55  ;;  %v4734_v19 = vpack.c.bf16 %v4678_v37, %v4678_v37  ;;  %v4680_v61 = vpop.f32.mrf.mxu1 }
 0x361   : > { %v3503_v25 = vunpack.c.l.bf16 %v3336_v57  ;;  %v3939_v20 = vsel %vm1586_vm2, %v3937_v41, %v3938_v5  ;;  %v3941_v43 = vsel %vm1586_vm2, %v3938_v5, %v3940_v62  ;;  %v4375_v39 = vrot.slane %v4249_v56, 2 }
 0x362   : > { %v3504_v9 = vunpack.c.l.bf16 %v3337_v63  ;;  %v4376_v16 = vrot.slane %v4250_v48, 2  ;;  %v4378_v60 = vrot.slane %v4251_v53, 2  ;;  %v4735_v30 = vpack.c.bf16 %v4680_v61, %v4680_v61 }
 0x363   : > { %v3567_v12 = vadd.f32 %v3535_v34, %v3503_v25  ;;  %v4878_v14 = vunpack.c.l.b16 %v4734_v19 }
 0x364   : > { %v3568_v54 = vadd.f32 %v3536_v11, %v3504_v9  ;;  %v4879_v0 = vunpack.c.l.b16 %v4735_v30  ;;  %v4377_v42 = vsel %vm2025_vm6, %v4375_v39, %v4376_v16  ;;  %v4379_v44 = vsel %vm2025_vm6, %v4376_v16, %v4378_v60  ;;  %v7935_v39 = vpop.permute.xlu0 %5086 }
 0x365   : > { %v3599_v52 = vpack.c.bf16 %v3567_v12, %v3567_v12  ;;  %v7925_v12 = vpop.permute.xlu1 %5088 }
 0x366   : > { %v3600_v3 = vpack.c.bf16 %v3568_v54, %v3568_v54  ;;  %v7920_v24 = vpack.c.b16 %v4879_v0, %v4878_v14 }
 0x367   : > { %v3764_v51 = vunpack.c.l.bf16 %v3599_v52 }
 0x368   : > { %v3765_v26 = vunpack.c.l.bf16 %v3600_v3  ;;  %v4683_v63 = vpop.f32.mrf.mxu1 }
 0x369   : > { %v4004_v32 = vadd.f32 %v3939_v20, %v3764_v51  ;;  %v4736_v55 = vpack.c.bf16 %v4683_v63, %v4683_v63 }
 0x36a   : > { %v4005_v35 = vadd.f32 %v3941_v43, %v3765_v26 }
 0x36b   : > { %v4036_v33 = vpack.c.bf16 %v4004_v32, %v4004_v32  ;;  %v4880_v41 = vunpack.c.l.b16 %v4736_v55 }
 0x36c   : > { %v4037_v6 = vpack.c.bf16 %v4005_v35, %v4005_v35  ;;  %v7937_v35 = vpop.permute.xlu2 %5090 }
 0x36d   : > { %v4202_v59 = vunpack.c.l.bf16 %v4036_v33  ;;  %v7927_v56 = vpop.permute.xlu1 %5270  ;;  %v7945_v33 = vpop.permute.xlu0 %5266 }
 0x36e   : > { %v4203_v10 = vunpack.c.l.bf16 %v4037_v6 }
 0x36f   : > { %v4442_v17 = vadd.f32 %v4377_v42, %v4202_v59 }
 0x370   : > { %v4443_v57 = vadd.f32 %v4379_v44, %v4203_v10  ;;  %v4685_v25 = vpop.f32.mrf.mxu1 }
 0x371   : > { %v4474_v34 = vpack.c.bf16 %v4442_v17, %v4442_v17  ;;  %v4737_v9 = vpack.c.bf16 %v4685_v25, %v4685_v25 }
 0x372   : > { %v4475_v11 = vpack.c.bf16 %v4443_v57, %v4443_v57 }
 0x373   : > { %v4544_v37 = vunpack.c.l.b16 %v4474_v34  ;;  %v4881_v5 = vunpack.c.l.b16 %v4737_v9 }
 0x374   : > { %v4545_v22 = vunpack.c.l.b16 %v4475_v11  ;;  %v7947_v42 = vpop.permute.xlu2 %5268 }
 0x375   : > { %v7923_v62 = vpack.c.b16 %v4881_v5, %v4880_v41  ;;  %v7931_v19 = vpop.permute.xlu1 %5096  ;;  %v7951_v10 = vpop.permute.xlu0 %5092 }
 0x376   : > { %v4561_v58 = vpack.c.b16 %v4545_v22, %v4544_v37 }
 0x378   : > { %6206 = vmatmul.msk.bf16.gmra.mxu1 %vm4580_vm11, %v4561_v58  ;;  %v4688_v54 = vpop.f32.mrf.mxu1 }
 0x379   : > { %v4738_v48 = vpack.c.bf16 %v4688_v54, %v4688_v54 }
 0x37b   : > { %v4882_v3 = vunpack.c.l.b16 %v4738_v48 }
 0x37c   : > { %v7953_v11 = vpop.permute.xlu2 %5094 }
 0x37d   : > { %v7933_v26 = vpop.permute.xlu1 %5100  ;;  %v5273_v58 = vpop.permute.xlu0 %5272 }
 0x380   : > { %v4690_v53 = vpop.f32.mrf.mxu1 }
 0x381   : > { %v4739_v52 = vpack.c.bf16 %v4690_v53, %v4690_v53 }
 0x383   : > { %v4883_v20 = vunpack.c.l.b16 %v4739_v52 }
 0x384   : > { %v5277_v25 = vpop.permute.xlu2 %5276 }
 0x385   : > { %v7929_v43 = vpack.c.b16 %v4883_v20, %v4882_v3  ;;  %v7941_v0 = vpop.permute.xlu1 %5104  ;;  %v7965_v5 = vpop.permute.xlu0 %5098  ;;  %v4719_v20 = vpack.c.bf16 %v7592_v1, %v7592_v1 }
 0x388   : > { %v4693_v51 = vpop.f32.mrf.mxu1 }
 0x389   : > { %v4740_v61 = vpack.c.bf16 %v4693_v51, %v4693_v51 }
 0x38b   : > { %v4884_v30 = vunpack.c.l.b16 %v4740_v61 }
 0x38c   : > { %v7967_v3 = vpop.permute.xlu2 %5106 }
 0x38d   : > { %v7949_v44 = vpop.permute.xlu1 %5282 }
 0x390   : > { %v4695_v16 = vpop.f32.mrf.mxu1 }
 0x391   : > { %v4741_v60 = vpack.c.bf16 %v4695_v16, %v4695_v16  ;;  %v4718_v16 = vpack.c.bf16 %v7572_v13, %v7572_v13 }
 0x393   : > { %v4885_v32 = vunpack.c.l.b16 %v4741_v60  ;;  %v4863_v60 = vunpack.c.l.b16 %v4719_v20 }
 0x395   : > { %v7939_v14 = vpack.c.b16 %v4885_v32, %v4884_v30  ;;  %v7957_v22 = vpop.permute.xlu1 %5108  ;;  %v5275_v30 = vpop.permute.xlu0 %5274  ;;  %v4862_v32 = vunpack.c.l.b16 %v4718_v16 }
 0x397   : > { %5316 = vrot.lane.b32.xlu2 %v7939_v14, %s6494_s23 }
 0x398   : > { %v4698_v6 = vpop.f32.mrf.mxu1 }
 0x399   : > { %v4742_v59 = vpack.c.bf16 %v4698_v6, %v4698_v6  ;;  %v7981_v6 = vpop.permute.xlu2 %5286 }
 0x39b   : > { %v4886_v63 = vunpack.c.l.b16 %v4742_v59  ;;  %v7983_v59 = vpack.c.b16 %v4863_v60, %v4862_v32 }
 0x39d   : > { %v7961_v9 = vpop.permute.xlu1 %5288 }
 0x3a0   : > { %v4700_v17 = vpop.f32.mrf.mxu1 }
 0x3a1   : > { %v4743_v57 = vpack.c.bf16 %v4700_v17, %v4700_v17  ;;  %v5103_v17 = vpop.permute.xlu0 %5102 }
 0x3a3   : > { %v4887_v34 = vunpack.c.l.b16 %v4743_v57  ;;  %v7989_v57 = vpop.permute.xlu2 %5112 }
 0x3a5   : > { %v7955_v37 = vpack.c.b16 %v4887_v34, %v4886_v63  ;;  %v7973_v61 = vpop.permute.xlu1 %5114 }
 0x3a7   : > { %5318 = vrot.lane.b32.xlu1 %v7955_v37, %s6494_s23 }
 0x3a8   : > { %v4703_v55 = vpop.f32.mrf.mxu1 }
 0x3a9   : > { %v4744_v41 = vpack.c.bf16 %v4703_v55, %v4703_v55  ;;  %v7991_v55 = vpop.permute.xlu0 %5284 }
 0x3ab   : > { %v4888_v53 = vunpack.c.l.b16 %v4744_v41 }
 0x3ad   : > { %v7987_v1 = vpop.permute.xlu1 %5290 }
 0x3af   : > { %5264 = vrot.lane.b32.xlu1 %v6818_v40, %s6495_s10 }
 0x3b0   : > { %v4705_v54 = vpop.f32.mrf.mxu1 }
 0x3b1   : > { %v4745_v48 = vpack.c.bf16 %v4705_v54, %v4705_v54  ;;  %v8000_v32 = vpop.permute.xlu0 %5110 }
 0x3b3   : > { %v4889_v52 = vunpack.c.l.b16 %v4745_v48  ;;  %v7993_v48 = vpop.permute.xlu2 %5116 }
 0x3b5   : > { %v7971_v51 = vpack.c.b16 %v4889_v52, %v4888_v53  ;;  %v5301_v63 = vpop.permute.xlu1 %5300 }
 0x3b7   : > { %5312 = vrot.lane.b32.xlu1 %v7923_v62, %s6494_s23  ;;  %5320 = vrot.lane.b32.xlu0 %v7971_v51, %s6494_s23 }
 0x3bb   : > { %v5305_v29 = vpop.permute.xlu2 %5304 }
 0x3bf   : > { %5294 = vrot.lane.b32.xlu1 %v7983_v59, %s6494_s23 }
 0x3cb   : > { %v4708_v13 = vpop.f32.mrf.mxu1 }
 0x3cc   : > { %v4746_v34 = vpack.c.bf16 %v4708_v13, %v4708_v13 }
 0x3ce   : > { %v4890_v53 = vunpack.c.l.b16 %v4746_v34  ;;  %v4720_v34 = vpack.c.bf16 %v7603_v23, %v7603_v23 }
 0x3d2   : > { %v5309_v16 = vpop.permute.xlu1 %5308 }
 0x3d3   : > { %v4710_v41 = vpop.f32.mrf.mxu1  ;;  %v5349_v60 = vsel %vm428_vm0, %v5277_v25, %v5309_v16  ;;  %v5307_v25 = vpop.permute.xlu2 %5306 }
 0x3d4   : > { %v4747_v54 = vpack.c.bf16 %v4710_v41, %v4710_v41  ;;  %v5390_v13 = vsel %vm5374_vm12, %v5349_v60, 1065369472  ;;  %v4721_v41 = vpack.c.bf16 %v7615_v4, %v7615_v4  ;;  %v5346_v16 = vsel %vm428_vm0, %v5275_v30, %v5307_v25 }
 0x3d5   : > { %5440 = vmatpush.bf16.msra.mxu2 %v5390_v13  ;;  %v5388_v60 = vsel %vm5374_vm12, %v5346_v16, 1065369472  ;;  %v5343_v4 = vsel %vm428_vm0, %v5273_v58, %v5305_v29  ;;  %v5337_v30 = vsel %vm428_vm0, %v7947_v42, %v5301_v63  ;;  %v4722_v42 = vpack.c.bf16 %v7635_v8, %v7635_v8 }
 0x3d6   : > { %v4891_v52 = vunpack.c.l.b16 %v4747_v54  ;;  %v8009_v54 = vpop.permute.xlu0 %5292  ;;  %v5386_v13 = vsel %vm5374_vm12, %v5343_v4, 1065369472  ;;  %v5382_v29 = vsel %vm5374_vm12, %v5337_v30, 1065369472 }
 0x3d8   : > { %v7995_v20 = vpack.c.b16 %v4891_v52, %v4890_v53  ;;  %v4865_v53 = vunpack.c.l.b16 %v4721_v41  ;;  %v4864_v52 = vunpack.c.l.b16 %v4720_v34 }
 0x3d9   : > { %5441 = vmatpush.bf16.msra.mxu2 %v5388_v60 }
 0x3da   : > { %5322 = vrot.lane.b32.xlu0 %v7995_v20, %s6494_s23  ;;  %v8012_v27 = vpack.c.b16 %v4865_v53, %v4864_v52 }
 0x3dd   : > { %5442 = vmatpush.bf16.msra.mxu2 %v5386_v13  ;;  %v5152_v13 = vsel %vm428_vm0, %v5103_v17, %v7920_v24  ;;  %v5124_v17 = vsel %vm428_vm0, %v7925_v12, %v8012_v27  ;;  %v5160_v12 = vsel %vm428_vm0, %v7967_v3, %v7929_v43  ;;  %v5164_v3 = vsel %vm428_vm0, %v7957_v22, %v7939_v14 }
 0x3de   : > { %v5303_v23 = vpop.permute.xlu0 %5302 }
 0x3df   : > { %v5340_v41 = vsel %vm428_vm0, %v7927_v56, %v5303_v23  ;;  %v4723_v56 = vpack.c.bf16 %v7654_v45, %v7654_v45  ;;  %v5120_v23 = vsel %vm428_vm0, %v7935_v39, %v7983_v59  ;;  %v5198_v45 = vunpack.c.l.bf16 %v5152_v13 }
 0x3e0   : > { %v5384_v34 = vsel %vm5374_vm12, %v5340_v41, 1065369472  ;;  %v4866_v41 = vunpack.c.l.b16 %v4722_v42  ;;  %v5183_v30 = vunpack.c.h.bf16 %v5120_v23  ;;  %v5156_v39 = vsel %vm428_vm0, %v7941_v0, %v7923_v62 }
 0x3e1   : > { %5443 = vmatpush.bf16.msra.mxu2 %v5384_v34  ;;  %v4867_v63 = vunpack.c.l.b16 %v4723_v56  ;;  %v5182_v34 = vunpack.c.l.bf16 %v5120_v23  ;;  %v5200_v56 = vunpack.c.l.bf16 %v5156_v39  ;;  %v5201_v42 = vunpack.c.h.bf16 %v5156_v39 }
 0x3e2   : > { %5314 = vrot.lane.b32.xlu0 %v7929_v43, %s6494_s23  ;;  %v5185_v23 = vunpack.c.h.bf16 %v5124_v17 }
 0x3e3   : > { %v5214_v8 = vmax.f32 %v5182_v34, 0.0 }
 0x3e5   : > { %5444 = vmatpush.bf16.msra.mxu2 %v5382_v29  ;;  %v5199_v29 = vunpack.c.h.bf16 %v5152_v13  ;;  %v5232_v13 = vmax.f32 %v5200_v56, 0.0 }
 0x3ea   : > { %5296 = vrot.lane.b32.xlu0 %v8012_v27, %s6494_s23 }
 0x3f2   : > { %5278 = vrot.lane.b32.xlu0 %v7214_v28, %s6495_s10 }
 0x3f5   : > { %v4713_v58 = vpop.f32.mrf.mxu1 }
 0x3f6   : > { %v4748_v53 = vpack.c.bf16 %v4713_v58, %v4713_v58  ;;  %v8040_v58 = vpack.c.b16 %v4867_v63, %v4866_v41  ;;  %v5184_v63 = vunpack.c.l.bf16 %v5124_v17  ;;  %v5233_v41 = vmax.f32 %v5201_v42, 0.0 }
 0x3f8   : > { %v4892_v16 = vunpack.c.l.b16 %v4748_v53  ;;  %v5215_v53 = vmax.f32 %v5183_v30, 0.0  ;;  %v5216_v34 = vmax.f32 %v5184_v63, 0.0  ;;  %v5217_v30 = vmax.f32 %v5185_v23, 0.0 }
 0x3f9   : > { %v5128_v0 = vsel %vm428_vm0, %v7937_v35, %v8040_v58  ;;  %v5132_v63 = vsel %vm428_vm0, %v7951_v10, %v7706_v18  ;;  %v5168_v10 = vsel %vm428_vm0, %v8000_v32, %v7955_v37  ;;  %v5172_v32 = vsel %vm428_vm0, %v7989_v57, %v7971_v51 }
 0x3fa   : > { %v5188_v35 = vunpack.c.l.bf16 %v5132_v63  ;;  %v5189_v23 = vunpack.c.h.bf16 %v5132_v63 }
 0x3fd   : > { %v4715_v25 = vpop.f32.mrf.mxu1 }
 0x3fe   : > { %v4749_v52 = vpack.c.bf16 %v4715_v25, %v4715_v25  ;;  %v5230_v25 = vmax.f32 %v5198_v45, 0.0  ;;  %v5247_v45 = vpack.c.bf16 %v5217_v30, %v5216_v34 }
 0x400   : > { %v4893_v60 = vunpack.c.l.b16 %v4749_v52  ;;  %v5231_v52 = vmax.f32 %v5199_v29, 0.0  ;;  %v5255_v29 = vpack.c.bf16 %v5233_v41, %v5232_v13  ;;  %v5204_v13 = vunpack.c.l.bf16 %v5164_v3 }
 0x401   : > { %v5205_v41 = vunpack.c.h.bf16 %v5164_v3 }
 0x402   : > { %v8029_v4 = vpack.c.b16 %v4893_v60, %v4892_v16  ;;  %v5246_v16 = vpack.c.bf16 %v5215_v53, %v5214_v8  ;;  %v5254_v60 = vpack.c.bf16 %v5231_v52, %v5230_v25  ;;  %v5202_v8 = vunpack.c.l.bf16 %v5160_v12 }
 0x403   : > { %v5203_v53 = vunpack.c.h.bf16 %v5160_v12  ;;  %v5186_v25 = vunpack.c.l.bf16 %v5128_v0  ;;  %v5187_v52 = vunpack.c.h.bf16 %v5128_v0  ;;  %v5236_v34 = vmax.f32 %v5204_v13, 0.0 }
 0x404   : > { %5324 = vrot.lane.b32.xlu2 %v8029_v4, %s6494_s23  ;;  %v5237_v30 = vmax.f32 %v5205_v41, 0.0 }
 0x405   : > { %v5218_v39 = vmax.f32 %v5186_v25, 0.0  ;;  %v5219_v17 = vmax.f32 %v5187_v52, 0.0  ;;  %v5206_v52 = vunpack.c.l.bf16 %v5168_v10 }
 0x406   : > { %v5257_v0 = vpack.c.bf16 %v5237_v30, %v5236_v34  ;;  %v5208_v34 = vunpack.c.l.bf16 %v5172_v32  ;;  %v5209_v30 = vunpack.c.h.bf16 %v5172_v32 }
 0x407   : > { %v5248_v56 = vpack.c.bf16 %v5219_v17, %v5218_v39  ;;  %v5238_v17 = vmax.f32 %v5206_v52, 0.0 }
 0x40c   : > { %5298 = vrot.lane.b32.xlu2 %v8040_v58, %s6494_s23 }
 0x414   : > { %6394 = vxpose.binary.xlu0.c.b16.start [1/16] (narrow) %v5254_v60, %v5246_v16, 32  ;;  %v5234_v16 = vmax.f32 %v5202_v8, 0.0  ;;  %v5235_v60 = vmax.f32 %v5203_v53, 0.0  ;;  %v5136_v8 = vsel %vm428_vm0, %v7953_v11, %v7765_v36  ;;  %v5140_v11 = vsel %vm428_vm0, %v7931_v19, %v7813_v49 }
 0x415   : > { %5280 = vrot.lane.b32.xlu2 %v7277_v7, %s6495_s10  ;;  %v5190_v53 = vunpack.c.l.bf16 %v5136_v8  ;;  %v5191_v25 = vunpack.c.h.bf16 %v5136_v8  ;;  %v5192_v13 = vunpack.c.l.bf16 %v5140_v11  ;;  %v5193_v41 = vunpack.c.h.bf16 %v5140_v11 }
 0x416   : > { %v5256_v42 = vpack.c.bf16 %v5235_v60, %v5234_v16  ;;  %v5207_v16 = vunpack.c.h.bf16 %v5168_v10  ;;  %v5241_v8 = vmax.f32 %v5209_v30, 0.0 }
 0x417   : > { %v5222_v60 = vmax.f32 %v5190_v53, 0.0  ;;  %v5223_v39 = vmax.f32 %v5191_v25, 0.0 }
 0x419   : > { %v5250_v63 = vpack.c.bf16 %v5223_v39, %v5222_v60 }
 0x41d   : > { %5262 = vrot.lane.b32.xlu2 %v6736_v15, %s6495_s10 }
 0x424   : > { %6395 = vxpose.binary.xlu0.c.b16.cont [2/16] (narrow) %v5255_v29, %v5247_v45, 32  ;;  %v5220_v45 = vmax.f32 %v5188_v35, 0.0  ;;  %v5221_v29 = vmax.f32 %v5189_v23, 0.0  ;;  %v5317_v35 = vpop.permute.xlu2 %5316  ;;  %v5319_v23 = vpop.permute.xlu1 %5318 }
 0x425   : > { %5310 = vrot.lane.b32.xlu2 %v7920_v24, %s6494_s23 }
 0x426   : > { %v5249_v12 = vpack.c.bf16 %v5221_v29, %v5220_v45  ;;  %v5224_v29 = vmax.f32 %v5192_v13, 0.0 }
 0x429   : > { %v5321_v22 = vpop.permute.xlu0 %5320 }
 0x434   : > { %6396 = vxpose.binary.xlu0.c.b16.cont [3/16] (narrow) %v5256_v42, %v5248_v56, 32  ;;  %v5239_v56 = vmax.f32 %v5207_v16, 0.0  ;;  %v5265_v16 = vpop.permute.xlu1 %5264 }
 0x436   : > { %v5258_v3 = vpack.c.bf16 %v5239_v56, %v5238_v17  ;;  %v5144_v17 = vsel %vm428_vm0, %v7965_v5, %v7866_v47 }
 0x437   : > { %v5195_v5 = vunpack.c.h.bf16 %v5144_v17 }
 0x439   : > { %v5227_v30 = vmax.f32 %v5195_v5, 0.0 }
 0x444   : > { %6397 = vxpose.binary.xlu0.c.b16.cont [4/16] (narrow) %v5257_v0, %v5249_v12, 32  ;;  %v5225_v12 = vmax.f32 %v5193_v41, 0.0  ;;  %v5240_v0 = vmax.f32 %v5208_v34, 0.0  ;;  %v5313_v34 = vpop.permute.xlu1 %5312 }
 0x446   : > { %v5251_v25 = vpack.c.bf16 %v5225_v12, %v5224_v29  ;;  %v5259_v52 = vpack.c.bf16 %v5241_v8, %v5240_v0  ;;  %v5361_v0 = vsel %vm428_vm0, %v7991_v55, %v5317_v35  ;;  %v5148_v55 = vsel %vm428_vm0, %v7933_v26, %v7912_v2 }
 0x447   : > { %v5180_v35 = vsel %vm428_vm0, %v7993_v48, %v8029_v4 }
 0x44c   : > { %v5323_v42 = vpop.permute.xlu0 %5322 }
 0x44d   : > { %v5370_v19 = vsel %vm428_vm0, %v7987_v1, %v5323_v42  ;;  %v5176_v1 = vsel %vm428_vm0, %v7973_v61, %v7995_v20 }
 0x44e   : > { %v5404_v60 = vsel %vm5374_vm12, %v5370_v19, 1065369472  ;;  %v5210_v13 = vunpack.c.l.bf16 %v5176_v1  ;;  %v5211_v41 = vunpack.c.h.bf16 %v5176_v1 }
 0x450   : > { %v5242_v29 = vmax.f32 %v5210_v13, 0.0  ;;  %v5243_v12 = vmax.f32 %v5211_v41, 0.0 }
 0x454   : > { %6398 = vxpose.binary.xlu0.c.b16.cont [5/16] (narrow) %v5258_v3, %v5250_v63, 32  ;;  %v5315_v45 = vpop.permute.xlu0 %5314  ;;  %v5194_v3 = vunpack.c.l.bf16 %v5144_v17  ;;  %v5212_v17 = vunpack.c.l.bf16 %v5180_v35 }
 0x45c   : > { %v5297_v39 = vpop.permute.xlu0 %5296 }
 0x45d   : > { %v5331_v63 = vsel %vm428_vm0, %v5265_v16, %v5297_v39  ;;  %v5197_v39 = vunpack.c.h.bf16 %v5148_v55 }
 0x45e   : > { %v5325_v10 = vpop.permute.xlu2 %5324  ;;  %v5378_v61 = vsel %vm5374_vm12, %v5331_v63, 1065369472 }
 0x45f   : > { %v5373_v53 = vsel %vm428_vm0, %v8009_v54, %v5325_v10  ;;  %v5367_v54 = vsel %vm428_vm0, %v7961_v9, %v5321_v22  ;;  %v5364_v9 = vsel %vm428_vm0, %v7981_v6, %v5319_v23  ;;  %v5226_v22 = vmax.f32 %v5194_v3, 0.0 }
 0x460   : > { %v5406_v57 = vsel %vm5374_vm12, %v5373_v53, 1065369472  ;;  %v5402_v32 = vsel %vm5374_vm12, %v5367_v54, 1065369472  ;;  %v5398_v10 = vsel %vm5374_vm12, %v5361_v0, 1065369472  ;;  %v5358_v6 = vsel %vm428_vm0, %v7949_v44, %v5315_v45 }
 0x461   : > { %5459 = vmatpush.bf16.msra.mxu3 %v5406_v57  ;;  %v5252_v23 = vpack.c.bf16 %v5227_v30, %v5226_v22  ;;  %v5260_v53 = vpack.c.bf16 %v5243_v12, %v5242_v29  ;;  %v5396_v19 = vsel %vm5374_vm12, %v5358_v6, 1065369472  ;;  %v5213_v54 = vunpack.c.h.bf16 %v5180_v35 }
 0x462   : > { %v8475_v22 = vmov 0  }
 0x463   : > { %v5245_v63 = vmax.f32 %v5213_v54, 0.0 }
 0x464   : > { %6399 = vxpose.binary.xlu0.c.b16.cont [6/16] (narrow) %v5259_v52, %v5251_v25, 32  ;;  %v5295_v25 = vpop.permute.xlu1 %5294  ;;  %v5279_v1 = vpop.permute.xlu0 %5278 }
 0x465   : > { %5460 = vmatpush.bf16.msra.mxu3 %v5404_v60  ;;  %v5196_v60 = vunpack.c.l.bf16 %v5148_v55  ;;  %v5478_v55 = vld [vmem:[%s8451_s7] sm:$0xff] }
 0x466   : > { %v5299_v56 = vpop.permute.xlu2 %5298 }
 0x467   : > { %v5334_v42 = vsel %vm428_vm0, %v7945_v33, %v5299_v56  ;;  %v5400_v33 = vsel %vm5374_vm12, %v5364_v9, 1065369472  ;;  %v5228_v26 = vmax.f32 %v5196_v60, 0.0  ;;  %v5229_v56 = vmax.f32 %v5197_v39, 0.0 }
 0x468   : > { %v5380_v11 = vsel %vm5374_vm12, %v5334_v42, 1065369472  ;;  %v5244_v42 = vmax.f32 %v5212_v17, 0.0 }
 0x469   : > { %5445 = vmatpush.bf16.msra.mxu2 %v5380_v11  ;;  %5461 = vmatpush.bf16.msra.mxu3 %v5402_v32  ;;  %v5253_v32 = vpack.c.bf16 %v5229_v56, %v5228_v26 }
 0x46a   : > { %v5261_v5 = vpack.c.bf16 %v5245_v63, %v5244_v42 }
 0x46d   : > { %5462 = vmatpush.bf16.msra.mxu3 %v5400_v33  ;;  %5446 = vmatpush.bf16.msra.mxu2 %v5378_v61 }
 0x46f   : > { %v5281_v8 = vpop.permute.xlu2 %5280 }
 0x470   : > { %v5355_v57 = vsel %vm428_vm0, %v5281_v8, %v5313_v34  ;;  %v6496_v34 = vmov 32  }
 0x471   : > { %5463 = vmatpush.bf16.msra.mxu3 %v5398_v10  ;;  %v5394_v16 = vsel %vm5374_vm12, %v5355_v57, 1065369472  ;;  %6406 = vset.pattern.permute.xlu1 %v6496_v34 }
 0x472   : > { %6407 = vset.pattern.permute.xlu2 %v6496_v34 }
 0x474   : > { %6400 = vxpose.binary.xlu0.c.b16.cont [7/16] (narrow) %v5260_v53, %v5252_v23, 32 }
 0x475   : > { %5464 = vmatpush.bf16.msra.mxu3 %v5396_v19 }
 0x477   : > { %v5263_v52 = vpop.permute.xlu2 %5262 }
 0x478   : > { %v5328_v44 = vsel %vm428_vm0, %v5263_v52, %v5295_v25 }
 0x479   : > { %v5376_v45 = vsel %vm5374_vm12, %v5328_v44, 1065369472  ;;  %5465 = vmatpush.bf16.msra.mxu3 %v5394_v16 }
 0x47a   : > { %5447 = vmatpush.bf16.msra.mxu2 %v5376_v45 }
 0x47f   : > { %v5311_v48 = vpop.permute.xlu2 %5310 }
 0x480   : > { %v5352_v3 = vsel %vm428_vm0, %v5279_v1, %v5311_v48 }
 0x481   : > { %v5392_v11 = vsel %vm5374_vm12, %v5352_v3, 1065369472 }
 0x482   : > { %5466 = vmatpush.bf16.msra.mxu3 %v5392_v11 }
 0x484   : > { %6401 = vxpose.binary.xlu0.c.b16.end [8/16] (narrow) %v5261_v5, %v5253_v32, 32 }
 0x4c0   : > { %v6402_v13 = vpop.trf.xlu0 }
 0x4c1   : > { %5448 = vmatmul.bf16.vlgmr.msra.gmra.mxu2 %v6402_v13 }
 0x4c8   : > { %v6403_v41 = vpop.trf.xlu0 }
 0x4c9   : > { %5467 = vmatmul.bf16.vlgmr.msra.gmra.mxu3 %v6403_v41 }
 0x4d0   : > { %v6404_v9 = vpop.trf.xlu0 }
 0x4d1   : > { %5453 = vmatmul.bf16.gmra.mxu2 %v6404_v9 }
 0x4d8   : > { %v6405_v61 = vpop.trf.xlu0 }
 0x4d9   : > { %5472 = vmatmul.bf16.gmra.mxu3 %v6405_v61 }
 0x4eb   : > { %6420 = vset.pattern.permute.xlu0 %v8475_v22 }
 0x544   : > { %v5449_v33 = vpop.f32.mrf.mxu2 }
 0x54c   : > { %v5468_v30 = vpop.f32.mrf.mxu3  ;;  %v5451_v29 = vpop.f32.mrf.mxu2 }
 0x54d   : > { %v5469_v53 = vadd.f32 %v5468_v30, %v5449_v33 }
 0x54f   : > { %v5482_v35 = vmul.f32 %v5478_v55, %v5469_v53 }
 0x554   : > { %v5470_v12 = vpop.f32.mrf.mxu3  ;;  %v5454_v0 = vpop.f32.mrf.mxu2 }
 0x555   : > { %v5471_v57 = vadd.f32 %v5470_v12, %v5451_v29 }
 0x55c   : > { %v5473_v8 = vpop.f32.mrf.mxu3  ;;  %v5456_v6 = vpop.f32.mrf.mxu2 }
 0x55d   : > { %v5474_v10 = vadd.f32 %v5473_v8, %v5454_v0 }
 0x55f   : > { %5498 = vperm.xlu1 %6406, %v5474_v10  }
 0x564   : > { %v5475_v23 = vpop.f32.mrf.mxu3 }
 0x565   : > { %v5476_v19 = vadd.f32 %v5475_v23, %v5456_v6 }
 0x567   : > { %5503 = vperm.xlu2 %6407, %v5476_v19   ;;  %5488 = vperm.xlu1 %6406, %v5469_v53  }
 0x56f   : > { %5493 = vperm.xlu2 %6407, %v5471_v57   ;;  %6419 = vset.pattern.permute.xlu1 %v8475_v22 }
 0x577   : > { %4910 = vrot.lane.b32.xlu2 %v7983_v59, %s6497_s11  ;;  %v5481_v59 = vld [vmem:[%s8451_s7 + $0x18] sm:$0xff] }
 0x578   : > { %6418 = vset.pattern.permute.xlu2 %v8475_v22 }
 0x57f   : > { %4912 = vrot.lane.b32.xlu2 %v8012_v27, %s6497_s11  ;;  %v5485_v27 = vmul.f32 %v5481_v59, %v5476_v19 }
 0x587   : > { %4916 = vrot.lane.b32.xlu2 %v7706_v18, %s6497_s11  ;;  %v5479_v18 = vld [vmem:[%s8451_s7 + $0x8] sm:$0xff] }
 0x58f   : > { %4920 = vrot.lane.b32.xlu2 %v7813_v49, %s6497_s11  ;;  %v5483_v49 = vmul.f32 %v5479_v18, %v5471_v57 }
 0x597   : > { %4934 = vrot.lane.b32.xlu2 %v7955_v37, %s6497_s11 }
 0x59f   : > { %4936 = vrot.lane.b32.xlu2 %v7971_v51, %s6497_s11  ;;  %v5480_v51 = vld [vmem:[%s8451_s7 + $0x10] sm:$0xff] }
 0x5a7   : > { %4938 = vrot.lane.b32.xlu2 %v7995_v20, %s6497_s11 }
 0x5af   : > { %4940 = vrot.lane.b32.xlu2 %v8029_v4, %s6497_s11 }
 0x5b7   : > { %4932 = vrot.lane.b32.xlu2 %v7939_v14, %s6497_s11 }
 0x5c1   : > { %v5504_v37 = vpop.permute.xlu2 %5503 }
 0x5c2   : > { %v5509_v52 = vmul.f32 %v5504_v37, %v5481_v59 }
 0x5c9   : > { %v5494_v16 = vpop.permute.xlu2 %5493 }
 0x5ca   : > { %v5507_v20 = vmul.f32 %v5494_v16, %v5479_v18 }
 0x5d1   : > { %v5499_v25 = vpop.permute.xlu1 %5498  ;;  %v4911_v14 = vpop.permute.xlu2 %4910 }
 0x5d2   : > { %v5508_v44 = vmul.f32 %v5499_v25, %v5480_v51 }
 0x5d4   : > { %v6408_v45 = vpack.i.bf16 %v5509_v52, %v5508_v44 }
 0x5d6   : > { %6409 = vrot.lane.b32.xlu1 %v6408_v45, %s6498_s20 }
 0x5d9   : > { %v5489_v60 = vpop.permute.xlu1 %5488  ;;  %v4913_v4 = vpop.permute.xlu2 %4912 }
 0x5da   : > { %v5506_v39 = vmul.f32 %v5489_v60, %v5478_v55  ;;  %v4948_v12 = vsel %vm428_vm0, %v6818_v40, %v4913_v4 }
 0x5db   : > { %v5008_v8 = vunpack.c.l.bf16 %v4948_v12 }
 0x5dc   : > { %v6413_v17 = vpack.i.bf16 %v5507_v20, %v5506_v39 }
 0x5dd   : > { %v5040_v53 = vmax.f32 %v5008_v8, 0.0 }
 0x5de   : > { %6414 = vrot.lane.b32.xlu1 %v6413_v17, %s6498_s20 }
 0x5e6   : > { %4914 = vrot.lane.b32.xlu1 %v8040_v58, %s6497_s11  ;;  %v8168_v58 = vpop.permute.xlu2 %4916 }
 0x5ee   : > { %4918 = vrot.lane.b32.xlu1 %v7765_v36, %s6497_s11  ;;  %v8170_v36 = vpop.permute.xlu2 %4920 }
 0x5f6   : > { %4922 = vrot.lane.b32.xlu1 %v7866_v47, %s6497_s11  ;;  %v5484_v47 = vmul.f32 %v5480_v51, %v5474_v10  ;;  %v4935_v1 = vpop.permute.xlu2 %4934  ;;  %v5009_v10 = vunpack.c.h.bf16 %v4948_v12 }
 0x5f8   : > { %v5041_v19 = vmax.f32 %v5009_v10, 0.0 }
 0x5fe   : > { %4924 = vrot.lane.b32.xlu1 %v7912_v2, %s6497_s11  ;;  %v4937_v29 = vpop.permute.xlu2 %4936 }
 0x5ff   : > { %v4996_v0 = vsel %vm428_vm0, %v7553_v38, %v4937_v29 }
 0x600   : > { %v5032_v6 = vunpack.c.l.bf16 %v4996_v0  ;;  %v5033_v23 = vunpack.c.h.bf16 %v4996_v0 }
 0x602   : > { %v5064_v57 = vmax.f32 %v5032_v6, 0.0  ;;  %v5065_v55 = vmax.f32 %v5033_v23, 0.0 }
 0x604   : > { %v5083_v59 = vpack.c.bf16 %v5065_v55, %v5064_v57 }
 0x606   : > { %4926 = vrot.lane.b32.xlu1 %v7920_v24, %s6497_s11  ;;  %v4944_v24 = vsel %vm428_vm0, %v6736_v15, %v4911_v14 }
 0x607   : > { %v5006_v63 = vunpack.c.l.bf16 %v4944_v24  ;;  %v5007_v48 = vunpack.c.h.bf16 %v4944_v24 }
 0x609   : > { %v5038_v41 = vmax.f32 %v5006_v63, 0.0  ;;  %v5039_v9 = vmax.f32 %v5007_v48, 0.0 }
 0x60e   : > { %4928 = vrot.lane.b32.xlu1 %v7923_v62, %s6497_s11 }
 0x616   : > { %4930 = vrot.lane.b32.xlu1 %v7929_v43, %s6497_s11  ;;  %v4992_v43 = vsel %vm428_vm0, %v7488_v31, %v4935_v1  ;;  %v5070_v31 = vpack.c.bf16 %v5039_v9, %v5038_v41  ;;  %s6232_s11 = sshll.u32 %s8484_s28, 5 }
 0x617   : > { %v5030_v3 = vunpack.c.l.bf16 %v4992_v43  ;;  %v5031_v11 = vunpack.c.h.bf16 %v4992_v43  ;;  %s305_s14 = scalar_lea.vmem %s8452_s8, %s6232_s11 }
 0x619   : > { %v5062_v15 = vmax.f32 %v5030_v3, 0.0  ;;  %v5063_v61 = vmax.f32 %v5031_v11, 0.0 }
 0x61b   : > { %v5082_v30 = vpack.c.bf16 %v5063_v61, %v5062_v15 }
 0x648   : > { %v6410_v54 = vpop.permute.xlu1 %6409 }
 0x649   : > { %v6412_v26 = vunpack.i.h.bf16 %v6410_v54  ;;  %v6411_v2 = vunpack.i.l.bf16 %v6410_v54 }
 0x64b   : > { %v5528_v56 = vsel %vm5374_vm12, %v5484_v47, %v6411_v2  ;;  %v5529_v62 = vsel %vm5374_vm12, %v5485_v27, %v6412_v26  ;;  %v4939_v27 = vpop.permute.xlu2 %4938 }
 0x64c   : > { %v5531_v42 = vpack.c.bf16 %v5529_v62, %v5528_v56  ;;  %v5000_v40 = vsel %vm428_vm0, %v7637_v46, %v4939_v27  ;;  %v4956_v46 = vsel %vm428_vm0, %v6898_v50, %v8168_v58 }
 0x64d   : > { %v5035_v37 = vunpack.c.h.bf16 %v5000_v40  ;;  %v5012_v14 = vunpack.c.l.bf16 %v4956_v46  ;;  %v5013_v4 = vunpack.c.h.bf16 %v4956_v46  ;;  %v8481_v46 = vld [vmem:[#allocation7_spill] sm:$0xff] }
 0x64e   : > { %5586 = vmatpush.bf16.msrb.mxu2 %v5531_v42  ;;  %6372 = vmatpush.bf16.msrb.mxu3 %v5531_v42  ;;  %v8477_v42 = vld [vmem:[#allocation3_spill] sm:$0xff] }
 0x64f   : > { %v5067_v44 = vmax.f32 %v5035_v37, 0.0  ;;  %v5044_v1 = vmax.f32 %v5012_v14, 0.0  ;;  %v5045_v26 = vmax.f32 %v5013_v4, 0.0 }
 0x650   : > { %v6415_v32 = vpop.permute.xlu1 %6414 }
 0x651   : > { %v6417_v5 = vunpack.i.h.bf16 %v6415_v32  ;;  %v6416_v13 = vunpack.i.l.bf16 %v6415_v32  ;;  %v5073_v56 = vpack.c.bf16 %v5045_v26, %v5044_v1  ;;  %v8478_v32 = vld [vmem:[#allocation4_spill] sm:$0xff] }
 0x653   : > { %v5526_v22 = vsel %vm5374_vm12, %v5482_v35, %v6416_v13  ;;  %v5527_v34 = vsel %vm5374_vm12, %v5483_v49, %v6417_v5  ;;  %v5071_v35 = vpack.c.bf16 %v5041_v19, %v5040_v53  ;;  %v5034_v49 = vunpack.c.l.bf16 %v5000_v40  ;;  %v4941_v39 = vpop.permute.xlu2 %4940 }
 0x654   : > { %v5530_v33 = vpack.c.bf16 %v5527_v34, %v5526_v22  ;;  %v4964_v5 = vsel %vm428_vm0, %v8478_v32, %v8170_v36  ;;  %v8479_v34 = vld [vmem:[#allocation5_spill] sm:$0xff]  ;;  %v8480_v36 = vld [vmem:[#allocation6_spill] sm:$0xff] }
 0x655   : > { %v5066_v52 = vmax.f32 %v5034_v49, 0.0  ;;  %v5016_v13 = vunpack.c.l.bf16 %v4964_v5  ;;  %v5017_v41 = vunpack.c.h.bf16 %v4964_v5 }
 0x656   : > { %5587 = vmatpush.bf16.msrb.mxu2 %v5530_v33  ;;  %6373 = vmatpush.bf16.msrb.mxu3 %v5530_v33 }
 0x657   : > { %v5084_v20 = vpack.c.bf16 %v5067_v44, %v5066_v52  ;;  %v5048_v9 = vmax.f32 %v5016_v13, 0.0  ;;  %v5049_v15 = vmax.f32 %v5017_v41, 0.0 }
 0x658   : > { %v4915_v18 = vpop.permute.xlu1 %4914 }
 0x659   : > { %6207 = vmatmul.msk.bf16.vlgmr.msrb.gmra.mxu2 %vm5374_vm12, %v5070_v31  ;;  %6219 = vmatmul.msk.bf16.vlgmr.msrb.gmra.mxu3 %vm5374_vm12, %v5082_v30  ;;  %v4952_v38 = vsel %vm428_vm0, %v6865_v21, %v4915_v18  ;;  %v8476_v21 = vld [vmem:[#allocation9_spill] sm:$0xff]  ;;  %v5075_v61 = vpack.c.bf16 %v5049_v15, %v5048_v9 }
 0x65a   : > { %v5010_v51 = vunpack.c.l.bf16 %v4952_v38  ;;  %v5011_v25 = vunpack.c.h.bf16 %v4952_v38  ;;  %v5004_v17 = vsel %vm428_vm0, %v8476_v21, %v4941_v39 }
 0x65b   : > { %v5036_v54 = vunpack.c.l.bf16 %v5004_v17  ;;  %v5037_v47 = vunpack.c.h.bf16 %v5004_v17 }
 0x65c   : > { %v5042_v45 = vmax.f32 %v5010_v51, 0.0  ;;  %v5043_v16 = vmax.f32 %v5011_v25, 0.0 }
 0x65d   : > { %v5068_v2 = vmax.f32 %v5036_v54, 0.0  ;;  %v5069_v24 = vmax.f32 %v5037_v47, 0.0 }
 0x65e   : > { %v5072_v60 = vpack.c.bf16 %v5043_v16, %v5042_v45 }
 0x65f   : > { %v5085_v62 = vpack.c.bf16 %v5069_v24, %v5068_v2  ;;  %v4933_v24 = vpop.permute.xlu2 %4932 }
 0x660   : > { %v4919_v43 = vpop.permute.xlu1 %4918 }
 0x661   : > { %v4960_v50 = vsel %vm428_vm0, %v8477_v42, %v4919_v43 }
 0x662   : > { %v5014_v58 = vunpack.c.l.bf16 %v4960_v50  ;;  %v5015_v63 = vunpack.c.h.bf16 %v4960_v50 }
 0x664   : > { %v5046_v48 = vmax.f32 %v5014_v58, 0.0  ;;  %v5047_v3 = vmax.f32 %v5015_v63, 0.0 }
 0x666   : > { %v5074_v11 = vpack.c.bf16 %v5047_v3, %v5046_v48 }
 0x668   : > { %v4923_v22 = vpop.permute.xlu1 %4922 }
 0x669   : > { %6208 = vmatmul.msk.bf16.gmra.mxu2 %vm5374_vm12, %v5071_v35  ;;  %6220 = vmatmul.msk.bf16.gmra.mxu3 %vm5374_vm12, %v5083_v59  ;;  %v4968_v33 = vsel %vm428_vm0, %v8479_v34, %v4923_v22 }
 0x66a   : > { %v5018_v31 = vunpack.c.l.bf16 %v4968_v33  ;;  %v5019_v30 = vunpack.c.h.bf16 %v4968_v33 }
 0x66c   : > { %v5050_v29 = vmax.f32 %v5018_v31, 0.0  ;;  %v5051_v12 = vmax.f32 %v5019_v30, 0.0 }
 0x66e   : > { %v5076_v0 = vpack.c.bf16 %v5051_v12, %v5050_v29 }
 0x670   : > { %v4925_v8 = vpop.permute.xlu1 %4924 }
 0x671   : > { %v4972_v10 = vsel %vm428_vm0, %v8480_v36, %v4925_v8 }
 0x672   : > { %v5020_v6 = vunpack.c.l.bf16 %v4972_v10  ;;  %v5021_v23 = vunpack.c.h.bf16 %v4972_v10 }
 0x674   : > { %v5052_v53 = vmax.f32 %v5020_v6, 0.0  ;;  %v5053_v19 = vmax.f32 %v5021_v23, 0.0 }
 0x676   : > { %v5077_v57 = vpack.c.bf16 %v5053_v19, %v5052_v53 }
 0x678   : > { %v4927_v55 = vpop.permute.xlu1 %4926 }
 0x679   : > { %6209 = vmatmul.msk.bf16.gmra.mxu2 %vm5374_vm12, %v5072_v60  ;;  %6221 = vmatmul.msk.bf16.gmra.mxu3 %vm5374_vm12, %v5084_v20  ;;  %v4976_v35 = vsel %vm428_vm0, %v7214_v28, %v4927_v55 }
 0x67a   : > { %v5022_v59 = vunpack.c.l.bf16 %v4976_v35  ;;  %v5023_v27 = vunpack.c.h.bf16 %v4976_v35 }
 0x67c   : > { %v5054_v18 = vmax.f32 %v5022_v59, 0.0  ;;  %v5055_v40 = vmax.f32 %v5023_v27, 0.0 }
 0x67e   : > { %v5078_v38 = vpack.c.bf16 %v5055_v40, %v5054_v18 }
 0x680   : > { %v4929_v49 = vpop.permute.xlu1 %4928 }
 0x681   : > { %v4980_v37 = vsel %vm428_vm0, %v7277_v7, %v4929_v49 }
 0x682   : > { %v5024_v52 = vunpack.c.l.bf16 %v4980_v37  ;;  %v5025_v44 = vunpack.c.h.bf16 %v4980_v37 }
 0x684   : > { %v5056_v45 = vmax.f32 %v5024_v52, 0.0  ;;  %v5057_v16 = vmax.f32 %v5025_v44, 0.0 }
 0x686   : > { %v5079_v20 = vpack.c.bf16 %v5057_v16, %v5056_v45 }
 0x688   : > { %v4931_v39 = vpop.permute.xlu1 %4930 }
 0x689   : > { %6210 = vmatmul.msk.bf16.gmra.mxu2 %vm5374_vm12, %v5073_v56  ;;  %6222 = vmatmul.msk.bf16.gmra.mxu3 %vm5374_vm12, %v5085_v62  ;;  %v4984_v21 = vsel %vm428_vm0, %v8481_v46, %v4931_v39  ;;  %v8482_v56 = vld [vmem:[#allocation8_spill] sm:$0xff] }
 0x68a   : > { %v5026_v14 = vunpack.c.l.bf16 %v4984_v21  ;;  %v5027_v4 = vunpack.c.h.bf16 %v4984_v21  ;;  %v4988_v62 = vsel %vm428_vm0, %v8482_v56, %v4933_v24 }
 0x68b   : > { %v5028_v63 = vunpack.c.l.bf16 %v4988_v62  ;;  %v5029_v48 = vunpack.c.h.bf16 %v4988_v62 }
 0x68c   : > { %v5058_v54 = vmax.f32 %v5026_v14, 0.0  ;;  %v5059_v47 = vmax.f32 %v5027_v4, 0.0 }
 0x68d   : > { %v5060_v3 = vmax.f32 %v5028_v63, 0.0 }
 0x68e   : > { %v5080_v2 = vpack.c.bf16 %v5059_v47, %v5058_v54 }
 0x699   : > { %6211 = vmatmul.msk.bf16.gmra.mxu2 %vm5374_vm12, %v5074_v11  ;;  %v5061_v11 = vmax.f32 %v5029_v48, 0.0 }
 0x69b   : > { %v5081_v15 = vpack.c.bf16 %v5061_v11, %v5060_v3 }
 0x6a9   : > { %6212 = vmatmul.msk.bf16.gmra.mxu2 %vm5374_vm12, %v5075_v61 }
 0x6b9   : > { %6213 = vmatmul.msk.bf16.gmra.mxu2 %vm5374_vm12, %v5076_v0 }
 0x6c9   : > { %6214 = vmatmul.msk.bf16.gmra.mxu2 %vm5374_vm12, %v5077_v57 }
 0x6d9   : > { %6215 = vmatmul.msk.bf16.gmra.mxu2 %vm5374_vm12, %v5078_v38 }
 0x6dc   : > { %v8219_v51 = vpop.f32.mrf.mxu2  ;;  %v8221_v25 = vpop.f32.mrf.mxu3 }
 0x6dd   : > { %v5693_v48 = vadd.f32 1e-15, %v8221_v25 }
 0x6e4   : > { %v8223_v28 = vpop.f32.mrf.mxu2  ;;  %v8225_v60 = vpop.f32.mrf.mxu3 }
 0x6e5   : > { %v5694_v56 = vadd.f32 1e-15, %v8225_v60 }
 0x6e9   : > { %6216 = vmatmul.msk.bf16.gmra.mxu2 %vm5374_vm12, %v5079_v20 }
 0x6ec   : > { %v8230_v7 = vpop.f32.mrf.mxu2  ;;  %v8232_v17 = vpop.f32.mrf.mxu3 }
 0x6ed   : > { %v5695_v39 = vadd.f32 1e-15, %v8232_v17 }
 0x6f4   : > { %v8234_v1 = vpop.f32.mrf.mxu2  ;;  %v8236_v26 = vpop.f32.mrf.mxu3 }
 0x6f5   : > { %v5696_v62 = vadd.f32 1e-15, %v8236_v26  ;;  %v5672_v3 = vadd.f32 1e-15, %v8234_v1 }
 0x6f9   : > { %6217 = vmatmul.msk.bf16.gmra.mxu2 %vm5374_vm12, %v5080_v2 }
 0x6fc   : > { %v8241_v43 = vpop.f32.mrf.mxu2  ;;  %v8243_v42 = vpop.f32.mrf.mxu3 }
 0x6fd   : > { %v5673_v50 = vadd.f32 1e-15, %v8241_v43  ;;  %v5697_v58 = vadd.f32 1e-15, %v8243_v42 }
 0x6ff   : > { %6421 = vrcp.f32 %v5673_v50 }
 0x700   : > { %6423 = vrcp.f32 %v5697_v58 }
 0x704   : > { %v8247_v32 = vpop.f32.mrf.mxu2  ;;  %v8249_v5 = vpop.f32.mrf.mxu3 }
 0x705   : > { %v6422_v13 = vpop.eup %6421  ;;  %v5698_v41 = vadd.f32 1e-15, %v8249_v5  ;;  %v5674_v4 = vadd.f32 1e-15, %v8247_v32 }
 0x706   : > { %v6424_v9 = vpop.eup %6423  ;;  %5773 = vrot.lane.b32.xlu0 %v6422_v13, %s6495_s10 }
 0x707   : > { %5821 = vrot.lane.b32.xlu1 %v6424_v9, %s6495_s10  ;;  %6425 = vrcp.f32 %v5698_v41  ;;  %v5670_v9 = vadd.f32 1e-15, %v8223_v28 }
 0x709   : > { %6218 = vmatmul.msk.bf16.gmra.mxu2 %vm5374_vm12, %v5081_v15  ;;  %v5671_v15 = vadd.f32 1e-15, %v8230_v7 }
 0x70c   : > { %v8255_v61 = vpop.f32.mrf.mxu2  ;;  %v8257_v22 = vpop.f32.mrf.mxu3 }
 0x70d   : > { %v5699_v34 = vadd.f32 1e-15, %v8257_v22  ;;  %v6426_v33 = vpop.eup %6425  ;;  %v5675_v31 = vadd.f32 1e-15, %v8255_v61 }
 0x70e   : > { %5823 = vrot.lane.b32.xlu2 %v6426_v33, %s6495_s10 }
 0x70f   : > { %6427 = vrcp.f32 %v5699_v34 }
 0x710   : > { %6429 = vrcp.f32 %v5675_v31 }
 0x714   : > { %v8262_v30 = vpop.f32.mrf.mxu2  ;;  %v8264_v29 = vpop.f32.mrf.mxu3 }
 0x715   : > { %v5700_v12 = vadd.f32 1e-15, %v8264_v29  ;;  %v6428_v0 = vpop.eup %6427  ;;  %v5676_v54 = vadd.f32 1e-15, %v8262_v30 }
 0x716   : > { %5825 = vrot.lane.b32.xlu1 %v6428_v0, %s6495_s10  ;;  %v6430_v36 = vpop.eup %6429 }
 0x717   : > { %6431 = vrcp.f32 %v5700_v12 }
 0x71c   : > { %v8268_v8 = vpop.f32.mrf.mxu2 }
 0x71d   : > { %v5677_v10 = vadd.f32 1e-15, %v8268_v8  ;;  %v6432_v6 = vpop.eup %6431 }
 0x71e   : > { %5827 = vrot.lane.b32.xlu2 %v6432_v6, %s6495_s10  ;;  %5777 = vrot.lane.b32.xlu1 %v6430_v36, %s6495_s10  ;;  %v5669_v6 = vadd.f32 1e-15, %v8219_v51 }
 0x71f   : > { %6433 = vrcp.f32 %v5677_v10 }
 0x724   : > { %v8273_v23 = vpop.f32.mrf.mxu2 }
 0x725   : > { %v6434_v53 = vpop.eup %6433  ;;  %v5678_v19 = vadd.f32 1e-15, %v8273_v23 }
 0x726   : > { %5781 = vrot.lane.b32.xlu1 %v6434_v53, %s6495_s10 }
 0x727   : > { %6435 = vrcp.f32 %v5678_v19 }
 0x72c   : > { %v8277_v57 = vpop.f32.mrf.mxu2 }
 0x72d   : > { %v6436_v55 = vpop.eup %6435  ;;  %v5679_v35 = vadd.f32 1e-15, %v8277_v57 }
 0x72e   : > { %5783 = vrot.lane.b32.xlu2 %v6436_v55, %s6495_s10 }
 0x72f   : > { %6437 = vrcp.f32 %v5679_v35 }
 0x734   : > { %v8281_v59 = vpop.f32.mrf.mxu2 }
 0x735   : > { %v6438_v27 = vpop.eup %6437  ;;  %v5680_v18 = vadd.f32 1e-15, %v8281_v59 }
 0x736   : > { %5785 = vrot.lane.b32.xlu1 %v6438_v27, %s6495_s10 }
 0x737   : > { %6439 = vrcp.f32 %v5680_v18 }
 0x73c   : > { %v8285_v40 = vpop.f32.mrf.mxu2 }
 0x73d   : > { %v6440_v38 = vpop.eup %6439  ;;  %v5681_v49 = vadd.f32 1e-15, %v8285_v40 }
 0x73e   : > { %5787 = vrot.lane.b32.xlu2 %v6440_v38, %s6495_s10 }
 0x73f   : > { %6441 = vrcp.f32 %v5681_v49 }
 0x744   : > { %v8289_v37 = vpop.f32.mrf.mxu2 }
 0x745   : > { %v6442_v52 = vpop.eup %6441  ;;  %v5682_v44 = vadd.f32 1e-15, %v8289_v37 }
 0x746   : > { %5789 = vrot.lane.b32.xlu1 %v6442_v52, %s6495_s10 }
 0x747   : > { %6443 = vrcp.f32 %v5682_v44 }
 0x74c   : > { %v8293_v45 = vpop.f32.mrf.mxu2 }
 0x74d   : > { %v6444_v16 = vpop.eup %6443  ;;  %v5683_v20 = vadd.f32 1e-15, %v8293_v45 }
 0x74e   : > { %5791 = vrot.lane.b32.xlu2 %v6444_v16, %s6495_s10 }
 0x74f   : > { %6445 = vrcp.f32 %v5683_v20 }
 0x750   : > { %6447 = vrcp.f32 %v5695_v39 }
 0x754   : > { %v8298_v46 = vpop.f32.mrf.mxu2 }
 0x755   : > { %v6446_v21 = vpop.eup %6445  ;;  %v5684_v14 = vadd.f32 1e-15, %v8298_v46 }
 0x756   : > { %5793 = vrot.lane.b32.xlu1 %v6446_v21, %s6495_s10  ;;  %v6448_v47 = vpop.eup %6447 }
 0x757   : > { %6449 = vrcp.f32 %v5684_v14 }
 0x758   : > { %6451 = vrcp.f32 %v5674_v4 }
 0x759   : > { %6453 = vrcp.f32 %v5676_v54 }
 0x75a   : > { %6455 = vrcp.f32 %v5694_v56 }
 0x75b   : > { %6457 = vrcp.f32 %v5696_v62 }
 0x75c   : > { %v8304_v2 = vpop.f32.mrf.mxu2  ;;  %6459 = vrcp.f32 %v5693_v48 }
 0x75d   : > { %v6450_v24 = vpop.eup %6449  ;;  %6461 = vrcp.f32 %v5672_v3 }
 0x75e   : > { %5817 = vrot.lane.b32.xlu1 %v6448_v47, %s6495_s10  ;;  %5795 = vrot.lane.b32.xlu2 %v6450_v24, %s6495_s10  ;;  %v6452_v50 = vpop.eup %6451  ;;  %6463 = vrcp.f32 %v5670_v9  ;;  %v5685_v47 = vadd.f32 1e-15, %v8304_v2 }
 0x75f   : > { %v6454_v63 = vpop.eup %6453  ;;  %6465 = vrcp.f32 %v5671_v15 }
 0x760   : > { %v6456_v11 = vpop.eup %6455  ;;  %6467 = vrcp.f32 %v5669_v6 }
 0x761   : > { %v6458_v41 = vpop.eup %6457 }
 0x762   : > { %v6460_v34 = vpop.eup %6459 }
 0x763   : > { %v6462_v31 = vpop.eup %6461 }
 0x764   : > { %v8310_v58 = vpop.f32.mrf.mxu2  ;;  %v6464_v53 = vpop.eup %6463 }
 0x765   : > { %v6466_v35 = vpop.eup %6465 }
 0x766   : > { %5775 = vrot.lane.b32.xlu1 %v6452_v50, %s6495_s10  ;;  %5779 = vrot.lane.b32.xlu2 %v6454_v63, %s6495_s10  ;;  %v5686_v63 = vadd.f32 1e-15, %v8310_v58 }
 0x768   : > { %v5824_v12 = vpop.permute.xlu2 %5823 }
 0x769   : > { %v8327_v36 = vmul.f32 %v5824_v12, %v8249_v5  ;;  %v6468_v5 = vpop.eup %6467 }
 0x76c   : > { %v8316_v13 = vpop.f32.mrf.mxu2 }
 0x76e   : > { %5815 = vrot.lane.b32.xlu1 %v6456_v11, %s6495_s10  ;;  %5819 = vrot.lane.b32.xlu2 %v6458_v41, %s6495_s10 }
 0x774   : > { %v8322_v33 = vpop.f32.mrf.mxu2 }
 0x775   : > { %v5688_v24 = vadd.f32 1e-15, %v8322_v33 }
 0x776   : > { %5771 = vrot.lane.b32.xlu1 %v6462_v31, %s6495_s10  ;;  %5813 = vrot.lane.b32.xlu2 %v6460_v34, %s6495_s10 }
 0x779   : > { %v5822_v0 = vpop.permute.xlu1 %5821 }
 0x77a   : > { %v8330_v10 = vmul.f32 %v5822_v0, %v8243_v42  ;;  %v5828_v42 = vpop.permute.xlu2 %5827 }
 0x77b   : > { %v8343_v38 = vmul.f32 %v5828_v42, %v8264_v29 }
 0x77c   : > { %v5909_v19 = vpack.c.bf16 %v8327_v36, %v8330_v10  ;;  %v8335_v55 = vpop.f32.mrf.mxu2 }
 0x77d   : > { %v5689_v20 = vadd.f32 1e-15, %v8335_v55 }
 0x77e   : > { %5767 = vrot.lane.b32.xlu1 %v6464_v53, %s6495_s10  ;;  %5769 = vrot.lane.b32.xlu2 %v6466_v35, %s6495_s10 }
 0x784   : > { %v8339_v27 = vpop.f32.mrf.mxu2 }
 0x785   : > { %v5690_v29 = vadd.f32 1e-15, %v8339_v27 }
 0x786   : > { %5765 = vrot.lane.b32.xlu2 %v6468_v5, %s6495_s10 }
 0x788   : > { %v5826_v18 = vpop.permute.xlu1 %5825  ;;  %v5784_v11 = vpop.permute.xlu2 %5783 }
 0x789   : > { %v8346_v49 = vmul.f32 %v5826_v18, %v8257_v22  ;;  %v5687_v22 = vadd.f32 1e-15, %v8316_v13 }
 0x78b   : > { %v5910_v52 = vpack.c.bf16 %v8343_v38, %v8346_v49 }
 0x78c   : > { %v8350_v44 = vpop.f32.mrf.mxu2 }
 0x78d   : > { %v5691_v16 = vadd.f32 1e-15, %v8350_v44 }
 0x78f   : > { %6469 = vrcp.f32 %v5691_v16 }
 0x790   : > { %6471 = vrcp.f32 %v5689_v20  ;;  %v5778_v50 = vpop.permute.xlu1 %5777 }
 0x794   : > { %v8354_v39 = vpop.f32.mrf.mxu2 }
 0x795   : > { %v6470_v21 = vpop.eup %6469  ;;  %v5692_v14 = vadd.f32 1e-15, %v8354_v39 }
 0x796   : > { %5809 = vrot.lane.b32.xlu2 %v6470_v21, %s6495_s10  ;;  %v6472_v4 = vpop.eup %6471 }
 0x797   : > { %6473 = vrcp.f32 %v5692_v14 }
 0x798   : > { %6475 = vrcp.f32 %v5687_v22  ;;  %v5782_v41 = vpop.permute.xlu1 %5781  ;;  %v5788_v15 = vpop.permute.xlu2 %5787 }
 0x799   : > { %6477 = vrcp.f32 %v5690_v29 }
 0x79a   : > { %6479 = vrcp.f32 %v5685_v47 }
 0x79b   : > { %6481 = vrcp.f32 %v5688_v24 }
 0x79c   : > { %6483 = vrcp.f32 %v5686_v63  ;;  %v5867_v63 = vmul.f32 %v5778_v50, %v8255_v61 }
 0x79d   : > { %v6474_v54 = vpop.eup %6473 }
 0x79e   : > { %5805 = vrot.lane.b32.xlu2 %v6472_v4, %s6495_s10  ;;  %5811 = vrot.lane.b32.xlu1 %v6474_v54, %s6495_s10  ;;  %v6476_v56 = vpop.eup %6475  ;;  %v5869_v54 = vmul.f32 %v5782_v41, %v8268_v8 }
 0x79f   : > { %v6478_v62 = vpop.eup %6477 }
 0x7a0   : > { %v6480_v48 = vpop.eup %6479 }
 0x7a1   : > { %v6482_v3 = vpop.eup %6481 }
 0x7a2   : > { %v6484_v9 = vpop.eup %6483 }
 0x7a6   : > { %5801 = vrot.lane.b32.xlu2 %v6476_v56, %s6495_s10  ;;  %5807 = vrot.lane.b32.xlu1 %v6478_v62, %s6495_s10 }
 0x7a8   : > { %v5786_v34 = vpop.permute.xlu1 %5785  ;;  %v5792_v31 = vpop.permute.xlu2 %5791 }
 0x7a9   : > { %v5874_v16 = vmul.f32 %v5792_v31, %v8289_v37  ;;  %v5871_v22 = vmul.f32 %v5786_v34, %v8277_v57  ;;  %v5870_v37 = vmul.f32 %v5784_v11, %v8273_v23 }
 0x7ab   : > { %v5899_v24 = vpack.c.bf16 %v5870_v37, %v5869_v54 }
 0x7ad   : > { %v5932_v57 = vsel %vm5374_vm12, %v5899_v24, 0 }
 0x7ae   : > { %5797 = vrot.lane.b32.xlu2 %v6480_v48, %s6495_s10  ;;  %5803 = vrot.lane.b32.xlu1 %v6482_v3, %s6495_s10  ;;  %v5774_v3 = vpop.permute.xlu0 %5773 }
 0x7b6   : > { %5799 = vrot.lane.b32.xlu1 %v6484_v9, %s6495_s10  ;;  %v5865_v9 = vmul.f32 %v5774_v3, %v8241_v43 }
 0x7b8   : > { %v5790_v12 = vpop.permute.xlu1 %5789  ;;  %v5796_v0 = vpop.permute.xlu2 %5795 }
 0x7b9   : > { %v5876_v53 = vmul.f32 %v5796_v0, %v8298_v46  ;;  %v5873_v42 = vmul.f32 %v5790_v12, %v8285_v40  ;;  %v5872_v46 = vmul.f32 %v5788_v15, %v8281_v59 }
 0x7bb   : > { %v5901_v20 = vpack.c.bf16 %v5874_v16, %v5873_v42  ;;  %v5900_v4 = vpack.c.bf16 %v5872_v46, %v5871_v22 }
 0x7bd   : > { %v5938_v29 = vsel %vm5374_vm12, %v5901_v20, 0  ;;  %v5935_v40 = vsel %vm5374_vm12, %v5900_v4, 0 }
 0x7c0   : > { %v5780_v14 = vpop.permute.xlu2 %5779 }
 0x7c1   : > { %v5868_v56 = vmul.f32 %v5780_v14, %v8262_v30  ;;  %v5995_v14 = vld [vmem:[%s8449_s5] sm:$0xff] }
 0x7c2   : > { %5999 = vperm.xlu2 %6418, %v5995_v14  }
 0x7c3   : > { %v5898_v48 = vpack.c.bf16 %v5868_v56, %v5867_v63 }
 0x7c5   : > { %v5929_v41 = vsel %vm5374_vm12, %v5898_v48, 0 }
 0x7c8   : > { %v5794_v6 = vpop.permute.xlu1 %5793  ;;  %v5820_v47 = vpop.permute.xlu2 %5819 }
 0x7c9   : > { %v5875_v35 = vmul.f32 %v5794_v6, %v8293_v45 }
 0x7cb   : > { %v5902_v5 = vpack.c.bf16 %v5876_v53, %v5875_v35  ;;  %v5888_v35 = vmul.f32 %v5820_v47, %v8236_v26  ;;  %v5996_v26 = vld [vmem:[%s8449_s5 + $0x8] sm:$0xff] }
 0x7cc   : > { %6004 = vperm.xlu1 %6419, %v5996_v26  }
 0x7cd   : > { %v5941_v18 = vsel %vm5374_vm12, %v5902_v5, 0 }
 0x7ce   : > { %5967 = vmatpush.bf16.xpose.msra.mxu3 %v5941_v18 }
 0x7d0   : > { %v5818_v21 = vpop.permute.xlu1 %5817  ;;  %v5814_v59 = vpop.permute.xlu2 %5813 }
 0x7d1   : > { %v5885_v36 = vmul.f32 %v5814_v59, %v8221_v25 }
 0x7d6   : > { %5968 = vmatpush.bf16.xpose.msra.mxu3 %v5938_v29 }
 0x7d8   : > { %v5776_v45 = vpop.permute.xlu1 %5775  ;;  %v5770_v15 = vpop.permute.xlu2 %5769 }
 0x7d9   : > { %v5866_v8 = vmul.f32 %v5776_v45, %v8247_v32  ;;  %v5863_v61 = vmul.f32 %v5770_v15, %v8230_v7  ;;  %v5887_v7 = vmul.f32 %v5818_v21, %v8232_v17 }
 0x7db   : > { %v5897_v11 = vpack.c.bf16 %v5866_v8, %v5865_v9  ;;  %v5908_v38 = vpack.c.bf16 %v5888_v35, %v5887_v7 }
 0x7dd   : > { %v5926_v34 = vsel %vm5374_vm12, %v5897_v11, 0  ;;  %v5959_v17 = vsel %vm5374_vm12, %v5908_v38, 0 }
 0x7de   : > { %5969 = vmatpush.bf16.xpose.msra.mxu3 %v5935_v40 }
 0x7e0   : > { %v5816_v62 = vpop.permute.xlu1 %5815  ;;  %v5766_v12 = vpop.permute.xlu2 %5765 }
 0x7e1   : > { %v5861_v43 = vmul.f32 %v5766_v12, %v8219_v51  ;;  %v6253_v51 = vld [vmem:[%s8448_s4] sm:$0xff] }
 0x7e6   : > { %5970 = vmatpush.bf16.xpose.msra.mxu3 %v5932_v57 }
 0x7e8   : > { %v5772_v23 = vpop.permute.xlu1 %5771 }
 0x7e9   : > { %v5864_v30 = vmul.f32 %v5772_v23, %v8234_v1  ;;  %v5965_v1 = vsel %vm5374_vm12, %v5910_v52, 0  ;;  %v5886_v52 = vmul.f32 %v5816_v62, %v8225_v60 }
 0x7eb   : > { %v5896_v50 = vpack.c.bf16 %v5864_v30, %v5863_v61  ;;  %v5907_v10 = vpack.c.bf16 %v5886_v52, %v5885_v36 }
 0x7ed   : > { %v5923_v0 = vsel %vm5374_vm12, %v5896_v50, 0  ;;  %v5956_v42 = vsel %vm5374_vm12, %v5907_v10, 0 }
 0x7ee   : > { %5971 = vmatpush.bf16.xpose.msra.mxu3 %v5929_v41 }
 0x7f0   : > { %v5768_v31 = vpop.permute.xlu1 %5767  ;;  %v5810_v5 = vpop.permute.xlu2 %5809 }
 0x7f1   : > { %v5862_v32 = vmul.f32 %v5768_v31, %v8223_v28  ;;  %v5962_v28 = vsel %vm5374_vm12, %v5909_v19, 0  ;;  %v5883_v16 = vmul.f32 %v5810_v5, %v8350_v44 }
 0x7f3   : > { %v5895_v6 = vpack.c.bf16 %v5862_v32, %v5861_v43 }
 0x7f5   : > { %v5920_v53 = vsel %vm5374_vm12, %v5895_v6, 0 }
 0x7f6   : > { %5972 = vmatpush.bf16.xpose.msra.mxu3 %v5926_v34 }
 0x7f8   : > { %v5806_v60 = vpop.permute.xlu2 %5805 }
 0x7f9   : > { %v5881_v22 = vmul.f32 %v5806_v60, %v8335_v55 }
 0x7fe   : > { %5973 = vmatpush.bf16.xpose.msra.mxu3 %v5923_v0 }
 0x800   : > { %v5802_v46 = vpop.permute.xlu2 %5801 }
 0x801   : > { %v5879_v54 = vmul.f32 %v5802_v46, %v8316_v13 }
 0x806   : > { %5974 = vmatpush.bf16.xpose.msra.mxu3 %v5920_v53 }
 0x808   : > { %v5798_v55 = vpop.permute.xlu2 %5797 }
 0x809   : > { %v5877_v56 = vmul.f32 %v5798_v55, %v8304_v2 }
 0x80d   : > { %6227 = vmatmul.msk.bf16.vlgmr.msra.gmra.mxu3 %vm5374_vm12, %v6253_v51 }
 0x80e   : > { %5981 = vmatpush.bf16.xpose.msrb.mxu3 %v5965_v1 }
 0x810   : > { %v5812_v49 = vpop.permute.xlu1 %5811 }
 0x811   : > { %v5884_v19 = vmul.f32 %v5812_v49, %v8354_v39  ;;  %v6012_v39 = vld [vmem:[%s8450_s6 + $0x8] sm:$0xff] }
 0x812   : > { %6020 = vperm.xlu1 %6419, %v6012_v39  }
 0x813   : > { %v5906_v20 = vpack.c.bf16 %v5884_v19, %v5883_v16 }
 0x815   : > { %v5953_v25 = vsel %vm5374_vm12, %v5906_v20, 0 }
 0x816   : > { %5982 = vmatpush.bf16.xpose.msrb.mxu3 %v5962_v28 }
 0x818   : > { %v5808_v18 = vpop.permute.xlu1 %5807 }
 0x819   : > { %v5882_v21 = vmul.f32 %v5808_v18, %v8339_v27  ;;  %v6011_v27 = vld [vmem:[%s8450_s6] sm:$0xff] }
 0x81a   : > { %6015 = vperm.xlu2 %6418, %v6011_v27  }
 0x81b   : > { %v5905_v29 = vpack.c.bf16 %v5882_v21, %v5881_v22 }
 0x81c   : > { %v6000_v62 = vpop.permute.xlu2 %5999 }
 0x81d   : > { %v5950_v45 = vsel %vm5374_vm12, %v5905_v29, 0 }
 0x81e   : > { %5983 = vmatpush.bf16.xpose.msrb.mxu3 %v5959_v17 }
 0x820   : > { %v5804_v44 = vpop.permute.xlu1 %5803 }
 0x821   : > { %v5880_v4 = vmul.f32 %v5804_v44, %v8322_v33 }
 0x823   : > { %v5904_v40 = vpack.c.bf16 %v5880_v4, %v5879_v54 }
 0x825   : > { %v5947_v24 = vsel %vm5374_vm12, %v5904_v40, 0 }
 0x826   : > { %5984 = vmatpush.bf16.xpose.msrb.mxu3 %v5956_v42 }
 0x828   : > { %v5800_v47 = vpop.permute.xlu1 %5799 }
 0x829   : > { %v5878_v37 = vmul.f32 %v5800_v47, %v8310_v58 }
 0x82b   : > { %v5903_v57 = vpack.c.bf16 %v5878_v37, %v5877_v56 }
 0x82d   : > { %v5944_v33 = vsel %vm5374_vm12, %v5903_v57, 0 }
 0x82e   : > { %5985 = vmatpush.bf16.xpose.msrb.mxu3 %v5953_v25 }
 0x836   : > { %5986 = vmatpush.bf16.xpose.msrb.mxu3 %v5950_v45 }
 0x83e   : > { %5987 = vmatpush.bf16.xpose.msrb.mxu3 %v5947_v24  ;;  %v6005_v63 = vpop.permute.xlu1 %6004 }
 0x846   : > { %5988 = vmatpush.bf16.xpose.msrb.mxu3 %v5944_v33 }
 0x84d   : > { %6228 = vmatmul.msk.bf16.vlgmr.msrb.gmra.mxu3 %vm5374_vm12, %v6253_v51 }
 0x874   : > { %v6016_v59 = vpop.permute.xlu2 %6015 }
 0x884   : > { %v6021_v2 = vpop.permute.xlu1 %6020 }
 0x890   : > { %v5976_v13 = vpop.f32.mrf.mxu3 }
 0x891   : > { %v6007_v48 = vmul.f32 %v6000_v62, %v5976_v13 }
 0x893   : > { %v6023_v58 = vadd.f32 %v6016_v59, %v6007_v48 }
 0x895   : > { %6027 = vst [vmem:[%s305_s14] sm:$0xff] %v6023_v58 }
 0x898   : > { %v5978_v3 = vpop.f32.mrf.mxu3 }
 0x899   : > { %v6009_v8 = vmul.f32 %v6005_v63, %v5978_v3 }
 0x89b   : > { %v6025_v41 = vadd.f32 %v6021_v2, %v6009_v8 }
 0x89d   : > { %6029 = vst [vmem:[%s305_s14 + $0x10] sm:$0xff] %v6025_v41 }
 0x8d0   : > { %v5990_v9 = vpop.f32.mrf.mxu3 }
 0x8d1   : > { %v6008_v23 = vmul.f32 %v6000_v62, %v5990_v9 }
 0x8d3   : > { %v6024_v11 = vadd.f32 %v6016_v59, %v6008_v23 }
 0x8d5   : > { %6028 = vst [vmem:[%s305_s14 + $0x8] sm:$0xff] %v6024_v11 }
 0x8d8   : > { %v5992_v15 = vpop.f32.mrf.mxu3 }
 0x8d9   : > { %v6010_v30 = vmul.f32 %v6005_v63, %v5992_v15 }
 0x8db   : > { %v6026_v34 = vadd.f32 %v6021_v2, %v6010_v30 }
 0x8dd   : > { %6030 = vst [vmem:[%s305_s14 + $0x18] sm:$0xff] %v6026_v34 }
 0x8de PF: > { %s18_s27 = sadd.s32 1, %s6491_s27  }
 0x8df   : > { %p15_p4 = scmp.ge.s32.totalorder %s18_s27, 4  }
 0x8e1   :  { %17 = sbr.rel (!%p15_p4) target bundleno = 1 (0x1), region = 84 }

</bundles_post_ra>
